<compile_context>
chip_gen: v5e
topology: v5e:2x2
jax: 0.10.0
libtpu: 0.0.40
codegen_flags: <defaults>
</compile_context>

<pallas_src>
import functools

import jax
import jax.numpy as jnp
from jax import lax
from jax.experimental import pallas as pl
from jax.experimental.pallas import tpu as pltpu


# Polyphase tap selection for ConvTranspose2d(k=4, s=2, p=1):
#   out row 2p   = x[p-1]*w[ky=3] + x[p]  *w[ky=1]
#   out row 2p+1 = x[p]  *w[ky=2] + x[p+1]*w[ky=0]
# (identical along columns).  _TAPS[r][d] = kernel index for window offset d.
_TAPS = ((3, 1), (2, 0))


def _fused_phase_weights(w_iohw):
    """PyTorch ConvTranspose2d weight (Cin, Cout, 4, 4) -> (9*Cin, 4*Cout).

    Row blocks are the 9 taps of the union 3x3 window over the zero-padded
    input (tap t = 3*ey + ex, Cin-minor); column blocks are the 4 output
    phases (phase = 2*ry + rx, Cout-minor).  Each phase only touches 4 of the
    9 taps; the other blocks are zero so ONE matmul yields all four phases.
    """
    cin, cout = w_iohw.shape[0], w_iohw.shape[1]
    wf = jnp.zeros((9, cin, 4, cout), w_iohw.dtype)
    for ry in range(2):
        for rx in range(2):
            phase = 2 * ry + rx
            for dy in range(2):
                for dx in range(2):
                    t = 3 * (ry + dy) + (rx + dx)
                    wf = wf.at[t, :, phase, :].set(
                        w_iohw[:, :, _TAPS[ry][dy], _TAPS[rx][dx]])
    return wf.reshape(9 * cin, 4 * cout)


def _deconv_fused_kernel(H, W, Cin, Cout, relu_before, relu_after):
    HW = H * W

    def kernel(x_ref, w_ref, b_ref, o_ref, xp_ref):
        # x_ref : (1, H, W, Cin)      bf16   input tile (one batch element)
        # w_ref : (9*Cin, 4*Cout)     bf16   fused polyphase weights
        # b_ref : (1, 4*Cout)         f32    phase-tiled bias
        # o_ref : (1, H*W, 4*Cout)    bf16   phase-major, lane-dense output
        # xp_ref: (H+2, W+2, Cin)     bf16   VMEM scratch (zero-padded input)
        x = x_ref[0]
        if relu_before:
            x = jnp.maximum(x, 0)
        x = x.astype(xp_ref.dtype)

        # Zero only the 1-pixel border strips; the interior is overwritten.
        zrow = jnp.zeros((1, W + 2, Cin), xp_ref.dtype)
        zcol = jnp.zeros((H + 2, 1, Cin), xp_ref.dtype)
        xp_ref[0:1, :, :] = zrow
        xp_ref[H + 1:H + 2, :, :] = zrow
        xp_ref[:, 0:1, :] = zcol
        xp_ref[:, W + 1:W + 2, :] = zcol
        xp_ref[1:H + 1, 1:W + 1, :] = x

        # im2col over the union 3x3 window: 9 shifted views (tap-major,
        # Cin-minor) -> one (HW, 9*Cin) operand.
        cols = []
        for ey in range(3):
            for ex in range(3):
                sl = xp_ref[ey:ey + H, ex:ex + W, :]        # (H, W, Cin)
                cols.append(sl.reshape(HW, Cin))
        patches = jnp.concatenate(cols, axis=-1)            # (HW, 9*Cin)

        # Single fused MXU matmul produces all 4 phases (f32 accumulation).
        acc = jnp.dot(patches, w_ref[...],
                      preferred_element_type=jnp.float32)   # (HW, 4*Cout)
        acc = acc + b_ref[...]
        if relu_after:
            acc = jnp.maximum(acc, 0.0)
        o_ref[0] = acc.astype(o_ref.dtype)                  # lane-dense bf16

    return kernel


def upsample_forward(x_nchw, weight, bias, *, activate_before='none',
                     activate_after='none', upsample_type='deconv'):
    """Forward pass of UpSample on NCHW input; returns NCHW output."""
    if upsample_type != 'deconv':
        # TODO(synk): 'bilinear'/'nearest' paths (F.interpolate + 3x3 Conv2d)
        # are not lowered; only the default 'deconv' path is implemented.
        raise NotImplementedError(upsample_type)
    assert activate_before in ('none', 'relu')
    assert activate_after in ('none', 'relu')

    N, Cin, H, W = x_nchw.shape
    Cout = weight.shape[1]
    out_dtype = x_nchw.dtype

    # NCHW -> NHWC (channels on the 128-lane axis), bf16 MXU operands.
    x = jnp.transpose(x_nchw, (0, 2, 3, 1)).astype(jnp.bfloat16)
    w_fused = _fused_phase_weights(weight).astype(jnp.bfloat16)  # (9Cin,4Cout)
    b4 = jnp.tile(bias.astype(jnp.float32), 4).reshape(1, 4 * Cout)

    kernel = _deconv_fused_kernel(H, W, Cin, Cout,
                                  activate_before == 'relu',
                                  activate_after == 'relu')

    out = pl.pallas_call(
        kernel,
        out_shape=jax.ShapeDtypeStruct((N, H * W, 4 * Cout), jnp.bfloat16),
        grid=(N,),
        in_specs=[
            pl.BlockSpec((1, H, W, Cin), lambda n: (n, 0, 0, 0)),
            pl.BlockSpec((9 * Cin, 4 * Cout), lambda n: (0, 0)),
            pl.BlockSpec((1, 4 * Cout), lambda n: (0, 0)),
        ],
        out_specs=pl.BlockSpec((1, H * W, 4 * Cout), lambda n: (n, 0, 0)),
        scratch_shapes=[pltpu.VMEM((H + 2, W + 2, Cin), jnp.bfloat16)],
        compiler_params=pltpu.CompilerParams(
            dimension_semantics=("parallel",)),
    )(x, w_fused, b4)

    # (n, p*W+q, (2*ry+rx)*Cout + c) -> NCHW (n, c, 2p+ry, 2q+rx): the phase
    # interleave is one bf16 transpose + reshape, cast back to input dtype.
    out = out.reshape(N, H, W, 2, 2, Cout)
    y = jnp.transpose(out, (0, 5, 1, 3, 2, 4)).reshape(N, Cout, 2 * H, 2 * W)
    return y.astype(out_dtype)


if __name__ == "__main__":
    # Shapes consistent with UpSample usage inside PatchConvDecoder2
    # (e.g. the 128 -> 64 channel up layer): batch=2, Cin=128, 16x16 -> 32x32.
    N, CIN, COUT, H, W = 2, 128, 64, 16, 16

    key = jax.random.PRNGKey(0)
    kx, kw, kb = jax.random.split(key, 3)
    x = jax.random.normal(kx, (N, CIN, H, W), jnp.float32)
    # PyTorch ConvTranspose2d weight layout: (in_channels, out_channels, kH, kW)
    weight = 0.05 * jax.random.normal(kw, (CIN, COUT, 4, 4), jnp.float32)
    bias = 0.05 * jax.random.normal(kb, (COUT,), jnp.float32)

    fwd = jax.jit(functools.partial(upsample_forward,
                                    activate_before='none',
                                    activate_after='none',
                                    upsample_type='deconv'))
    y = fwd(x, weight, bias)
    jax.block_until_ready(y)

    assert y.shape == (N, COUT, 2 * H, 2 * W), y.shape
    assert bool(jnp.all(jnp.isfinite(y)))

    # Reference: ConvTranspose2d(k=4, s=2, p=1) == lhs-dilated conv with the
    # spatially-flipped kernel (pure XLA, f32).
    y_ref = lax.conv_general_dilated(
        x, jnp.flip(weight, (2, 3)),
        window_strides=(1, 1), padding=((2, 2), (2, 2)),
        lhs_dilation=(2, 2),
        dimension_numbers=('NCHW', 'IOHW', 'NCHW'))
    y_ref = y_ref + bias[None, :, None, None]
    # bf16 MXU operands + bf16 output store (f32 accumulation) -> loose abs tol.
    err = float(jnp.max(jnp.abs(y.astype(jnp.float32) - y_ref)))
    assert err < 1e-1, f"max abs err vs reference: {err}"

    print("KERNEL_OK")
</pallas_src>

<mosaic_0001>
module attributes {stable_mosaic.version = 11 : i64} {
  func.func @kernel(%arg0: i32, %arg1: memref<1x16x16x128xbf16, #tpu.memory_space<vmem>>, %arg2: memref<1152x256xbf16, #tpu.memory_space<vmem>>, %arg3: memref<1x256xf32, #tpu.memory_space<vmem>>, %arg4: memref<1x256x256xbf16, #tpu.memory_space<vmem>>, %arg5: memref<18x18x128xbf16, #tpu.memory_space<vmem>>) attributes {dimension_semantics = [#tpu.dimension_semantics<parallel>], iteration_bounds = array<i64: 2>, scalar_prefetch = 0 : i64, scratch_operands = 1 : i64, tpu.core_type = #tpu.core_type<tc>, window_params = [{transform_indices = @transform_0, window_bounds = array<i64: 1, 16, 16, 128>}, {pipeline_mode = #tpu.pipeline_mode<synchronous>, transform_indices = @transform_1, window_bounds = array<i64: 1152, 256>}, {pipeline_mode = #tpu.pipeline_mode<synchronous>, transform_indices = @transform_2, window_bounds = array<i64: 1, 256>}, {transform_indices = @transform_3, window_bounds = array<i64: 1, 256, 256>}]} {
    %c0 = arith.constant 0 : index
    %c0_0 = arith.constant 0 : index
    %c0_1 = arith.constant 0 : index
    %c0_2 = arith.constant 0 : index
    %0 = vector.load %arg1[%c0, %c0_0, %c0_1, %c0_2] : memref<1x16x16x128xbf16, #tpu.memory_space<vmem>>, vector<1x16x16x128xbf16>
    %1 = vector.shape_cast %0 : vector<1x16x16x128xbf16> to vector<16x16x128xbf16>
    %cst = arith.constant 0.000000e+00 : bf16
    %2 = vector.broadcast %cst : bf16 to vector<1x18x128xbf16>
    %cst_3 = arith.constant 0.000000e+00 : bf16
    %3 = vector.broadcast %cst_3 : bf16 to vector<18x1x128xbf16>
    %c0_4 = arith.constant 0 : index
    %c0_5 = arith.constant 0 : index
    %c0_6 = arith.constant 0 : index
    %4 = vector.load %arg5[%c0_4, %c0_5, %c0_6] : memref<18x18x128xbf16, #tpu.memory_space<vmem>>, vector<1x18x128xbf16>
    tpu.vector_store %arg5[%c0_4, %c0_5, %c0_6], %2 {strides = array<i32>} : memref<18x18x128xbf16, #tpu.memory_space<vmem>>, vector<1x18x128xbf16>,
    %c17 = arith.constant 17 : index
    %c0_7 = arith.constant 0 : index
    %c0_8 = arith.constant 0 : index
    %5 = vector.load %arg5[%c17, %c0_7, %c0_8] : memref<18x18x128xbf16, #tpu.memory_space<vmem>>, vector<1x18x128xbf16>
    tpu.vector_store %arg5[%c17, %c0_7, %c0_8], %2 {strides = array<i32>} : memref<18x18x128xbf16, #tpu.memory_space<vmem>>, vector<1x18x128xbf16>,
    %c0_9 = arith.constant 0 : index
    %c0_10 = arith.constant 0 : index
    %c0_11 = arith.constant 0 : index
    %6 = vector.load %arg5[%c0_9, %c0_10, %c0_11] : memref<18x18x128xbf16, #tpu.memory_space<vmem>>, vector<18x1x128xbf16>
    tpu.vector_store %arg5[%c0_9, %c0_10, %c0_11], %3 {strides = array<i32>} : memref<18x18x128xbf16, #tpu.memory_space<vmem>>, vector<18x1x128xbf16>,
    %c0_12 = arith.constant 0 : index
    %c17_13 = arith.constant 17 : index
    %c0_14 = arith.constant 0 : index
    %7 = vector.load %arg5[%c0_12, %c17_13, %c0_14] : memref<18x18x128xbf16, #tpu.memory_space<vmem>>, vector<18x1x128xbf16>
    tpu.vector_store %arg5[%c0_12, %c17_13, %c0_14], %3 {strides = array<i32>} : memref<18x18x128xbf16, #tpu.memory_space<vmem>>, vector<18x1x128xbf16>,
    %c1 = arith.constant 1 : index
    %c1_15 = arith.constant 1 : index
    %c0_16 = arith.constant 0 : index
    %8 = vector.load %arg5[%c1, %c1_15, %c0_16] : memref<18x18x128xbf16, #tpu.memory_space<vmem>>, vector<16x16x128xbf16>
    tpu.vector_store %arg5[%c1, %c1_15, %c0_16], %1 {strides = array<i32>} : memref<18x18x128xbf16, #tpu.memory_space<vmem>>, vector<16x16x128xbf16>,
    %c0_17 = arith.constant 0 : index
    %c0_18 = arith.constant 0 : index
    %c0_19 = arith.constant 0 : index
    %9 = vector.load %arg5[%c0_17, %c0_18, %c0_19] : memref<18x18x128xbf16, #tpu.memory_space<vmem>>, vector<16x16x128xbf16>
    %10 = vector.shape_cast %9 : vector<16x16x128xbf16> to vector<256x128xbf16>
    %c0_20 = arith.constant 0 : index
    %c1_21 = arith.constant 1 : index
    %c0_22 = arith.constant 0 : index
    %11 = vector.load %arg5[%c0_20, %c1_21, %c0_22] : memref<18x18x128xbf16, #tpu.memory_space<vmem>>, vector<16x16x128xbf16>
    %12 = vector.shape_cast %11 : vector<16x16x128xbf16> to vector<256x128xbf16>
    %c0_23 = arith.constant 0 : index
    %c2 = arith.constant 2 : index
    %c0_24 = arith.constant 0 : index
    %13 = vector.load %arg5[%c0_23, %c2, %c0_24] : memref<18x18x128xbf16, #tpu.memory_space<vmem>>, vector<16x16x128xbf16>
    %14 = vector.shape_cast %13 : vector<16x16x128xbf16> to vector<256x128xbf16>
    %c1_25 = arith.constant 1 : index
    %c0_26 = arith.constant 0 : index
    %c0_27 = arith.constant 0 : index
    %15 = vector.load %arg5[%c1_25, %c0_26, %c0_27] : memref<18x18x128xbf16, #tpu.memory_space<vmem>>, vector<16x16x128xbf16>
    %16 = vector.shape_cast %15 : vector<16x16x128xbf16> to vector<256x128xbf16>
    %c1_28 = arith.constant 1 : index
    %c1_29 = arith.constant 1 : index
    %c0_30 = arith.constant 0 : index
    %17 = vector.load %arg5[%c1_28, %c1_29, %c0_30] : memref<18x18x128xbf16, #tpu.memory_space<vmem>>, vector<16x16x128xbf16>
    %18 = vector.shape_cast %17 : vector<16x16x128xbf16> to vector<256x128xbf16>
    %c1_31 = arith.constant 1 : index
    %c2_32 = arith.constant 2 : index
    %c0_33 = arith.constant 0 : index
    %19 = vector.load %arg5[%c1_31, %c2_32, %c0_33] : memref<18x18x128xbf16, #tpu.memory_space<vmem>>, vector<16x16x128xbf16>
    %20 = vector.shape_cast %19 : vector<16x16x128xbf16> to vector<256x128xbf16>
    %c2_34 = arith.constant 2 : index
    %c0_35 = arith.constant 0 : index
    %c0_36 = arith.constant 0 : index
    %21 = vector.load %arg5[%c2_34, %c0_35, %c0_36] : memref<18x18x128xbf16, #tpu.memory_space<vmem>>, vector<16x16x128xbf16>
    %22 = vector.shape_cast %21 : vector<16x16x128xbf16> to vector<256x128xbf16>
    %c2_37 = arith.constant 2 : index
    %c1_38 = arith.constant 1 : index
    %c0_39 = arith.constant 0 : index
    %23 = vector.load %arg5[%c2_37, %c1_38, %c0_39] : memref<18x18x128xbf16, #tpu.memory_space<vmem>>, vector<16x16x128xbf16>
    %24 = vector.shape_cast %23 : vector<16x16x128xbf16> to vector<256x128xbf16>
    %c2_40 = arith.constant 2 : index
    %c2_41 = arith.constant 2 : index
    %c0_42 = arith.constant 0 : index
    %25 = vector.load %arg5[%c2_40, %c2_41, %c0_42] : memref<18x18x128xbf16, #tpu.memory_space<vmem>>, vector<16x16x128xbf16>
    %26 = vector.shape_cast %25 : vector<16x16x128xbf16> to vector<256x128xbf16>
    %27 = tpu.concatenate %10, %12, %14, %16, %18, %20, %22, %24, %26 in 1 : vector<256x128xbf16>, vector<256x128xbf16>, vector<256x128xbf16>, vector<256x128xbf16>, vector<256x128xbf16>, vector<256x128xbf16>, vector<256x128xbf16>, vector<256x128xbf16>, vector<256x128xbf16> -> vector<256x1152xbf16>
    %c0_43 = arith.constant 0 : index
    %c0_44 = arith.constant 0 : index
    %28 = vector.load %arg2[%c0_43, %c0_44] : memref<1152x256xbf16, #tpu.memory_space<vmem>>, vector<1152x256xbf16>
    %cst_45 = arith.constant dense<0.000000e+00> : vector<256x256xf32>
    %29 = tpu.matmul %27, %28, %cst_45 {dimension_numbers = #tpu.dot_dimension_numbers<[1], [0], [0], [1], [0, 0, 1, 1], [], []>} : vector<256x1152xbf16>, vector<1152x256xbf16>, vector<256x256xf32> -> vector<256x256xf32>
    %c0_46 = arith.constant 0 : index
    %c0_47 = arith.constant 0 : index
    %30 = vector.load %arg3[%c0_46, %c0_47] : memref<1x256xf32, #tpu.memory_space<vmem>>, vector<1x256xf32>
    %31 = vector.broadcast %30 : vector<1x256xf32> to vector<256x256xf32>
    %32 = arith.addf %29, %31 : vector<256x256xf32>
    %33 = arith.truncf %32 : vector<256x256xf32> to vector<256x256xbf16>
    %c0_48 = arith.constant 0 : index
    %c0_49 = arith.constant 0 : index
    %c0_50 = arith.constant 0 : index
    %34 = vector.load %arg4[%c0_48, %c0_49, %c0_50] : memref<1x256x256xbf16, #tpu.memory_space<vmem>>, vector<1x256x256xbf16>
    %35 = vector.shape_cast %34 : vector<1x256x256xbf16> to vector<256x256xbf16>
    %36 = vector.shape_cast %33 : vector<256x256xbf16> to vector<1x256x256xbf16>
    tpu.vector_store %arg4[%c0_48, %c0_49, %c0_50], %36 {strides = array<i32>} : memref<1x256x256xbf16, #tpu.memory_space<vmem>>, vector<1x256x256xbf16>,
    return
  }
  func.func @transform_0(%arg0: i32) -> (i32, i32, i32, i32) {
    %c0_i32 = arith.constant 0 : i32
    %c0_i32_0 = arith.constant 0 : i32
    %c0_i32_1 = arith.constant 0 : i32
    %c0_i32_2 = arith.constant 0 : i32
    return %arg0, %c0_i32, %c0_i32_0, %c0_i32_1 : i32, i32, i32, i32
  }
  func.func @transform_1(%arg0: i32) -> (i32, i32) {
    %c0_i32 = arith.constant 0 : i32
    %c0_i32_0 = arith.constant 0 : i32
    %c0_i32_1 = arith.constant 0 : i32
    return %c0_i32, %c0_i32_0 : i32, i32
  }
  func.func @transform_2(%arg0: i32) -> (i32, i32) {
    %c0_i32 = arith.constant 0 : i32
    %c0_i32_0 = arith.constant 0 : i32
    %c0_i32_1 = arith.constant 0 : i32
    return %c0_i32, %c0_i32_0 : i32, i32
  }
  func.func @transform_3(%arg0: i32) -> (i32, i32, i32) {
    %c0_i32 = arith.constant 0 : i32
    %c0_i32_0 = arith.constant 0 : i32
    %c0_i32_1 = arith.constant 0 : i32
    return %arg0, %c0_i32, %c0_i32_0 : i32, i32, i32
  }
}

</mosaic_0001>

<bundles_post_ra>
// kernel: tile.9
= control target key start
LH: loop header
LB: loop body
LE: loop exit
PB: predicated region body
PF: predicated region fallthrough
CT: control target
= control target key end

     0   :  { %s6_s8 = smov 3  ;;  %vm8_vm0 = vcmask 523264   ;;  %s31_s9 = smov 64   ;;  %vm15_vm1 = vcmask 1048064   ;;  %s51_s0 = inlined_call_operand.vmem [shape: f32[4,64], index: 0, kind: input, shape index: {}]   ;;  %s52_s1 = inlined_call_operand.vmem [shape: f32[1,256], index: 1, kind: output, shape index: {}]  }
   0x1   :  { %v4_v0 = vld [vmem:[%s51_s0] sm:$0xf]  ;;  %s11_s0 = smov 3 }
   0x2   :  { %5 = vst [vmem:[#allocation1] sm:$0xf] %v4_v0 }
   0x9   :  { %v12_v1 = vld [vmem:[#allocation1 + $0x1] ss:$2 sm:%s11_s0]   ;;  %v7_v2 = vld [vmem:[#allocation1] ss:$2 sm:%s6_s8]  }
   0xa   :  { %13 = vrot.lane.b32.xlu0 %v12_v1, %s31_s9  ;;  %9 = vst.msk [vmem:[#allocation0] ss:$8 sm:$0x3] %vm8_vm0, %v7_v2  }
  0x7c   :  { %v14_v3 = vpop.permute.xlu0 %13  }
  0x7d   :  { %16 = vst.msk [vmem:[#allocation0] ss:$8 sm:$0x3] %vm15_vm1, %v14_v3  }
  0x84   :  { %v19_v4 = vld [vmem:[#allocation0] sm:$0x1]  ;;  %v24_v5 = vld [vmem:[#allocation0 + $0x8] sm:$0x1] }
  0x85   :  { %22 = vst [vmem:[%s52_s1] sm:$0x1] %v19_v4 }
  0x86   :  { %29 = vst [vmem:[%s52_s1 + $0x1] sm:$0x1] %v24_v5 }

// kernel: tile.8
= control target key start
LH: loop header
LB: loop body
LE: loop exit
PB: predicated region body
PF: predicated region fallthrough
CT: control target
= control target key end

     0   :  { %2 = vsyncpa [#allocation1], 0  ;;  %s48_s8 = smov [#allocation0]   ;;  %s65_s0 = inlined_call_operand.hbm [shape: f32[64], index: 0, kind: input, shape index: {}]   ;;  %s66_s1 = inlined_call_operand.vmem [shape: f32[4,64], index: 1, kind: output, shape index: {}]  }
   0x1   :  { %s8_s0 = sshll.u32 %s65_s0, 4  ;;  %s10_s9 = sshll.u32 %s48_s8, 4  ;;  %s9_s0 = int_to_ptr.hbm [resolvable:$true] %s8_s0  ;;  %s11_s9 = int_to_ptr.vmem [resolvable:$true] %s10_s9 }
   0x2   :  { %13 = dma.hbm_to_vmem [thread:$0]  %s9_s0, 16, %s11_s9, [#allocation1]  }
   0x3   :  { %46 = dma.done.wait [#allocation1], 16  }
   0x4   :  { %47 = vsyncadd [#allocation1], 4294967280  ;;  %v18_v0 = vld [vmem:[#allocation0] ss:$0 sm:$0xff] }
   0x5   :  { %19 = vst [vmem:[%s66_s1] sm:$0xf] %v18_v0 }
   0x6   :  { %20 = vsyncpa [#allocation1], 1 }

// kernel: upsample_forward.1
= control target key start
LH: loop header
LB: loop body
LE: loop exit
PB: predicated region body
PF: predicated region fallthrough
CT: control target
= control target key end

     0   :  { %s6959_s12 = smov 0   ;;  %s9852_s0 = inlined_call_operand.vmem [shape: bf16[2,16,16,128], index: 0, kind: input, shape index: {}]   ;;  %s9853_s1 = inlined_call_operand.vmem [shape: bf16[1152,256], index: 1, kind: input, shape index: {}]   ;;  %s9854_s2 = inlined_call_operand.vmem [shape: f32[1,256], index: 2, kind: input, shape index: {}]   ;;  %s9855_s3 = inlined_call_operand.vmem [shape: bf16[2,256,256], index: 3, kind: output, shape index: {}]  }
   0x1 LB: > { %s5807_s13 = sadd.s32 4294967295, %s6936_s12   ;;  %p5811_p0 = scmp.ge.s32.totalorder %s6936_s12, 1  ;;  %s6936_s12 = sphi %s6959_s12, %s13_s12  }
   0x2   : > { %p137_p1 = scmp.lt.s32.totalorder %s6936_s12, 3 }
   0x4   : > { %p138_p2 = pnand %p5811_p0, %p137_p1 }
   0x6   : > { %141 = sbr.rel (%p138_p2) target bundleno = 1371 (0x55b), region = 32 }
   0xb   : > { %v6114_v0 = vld [vmem:[%s9853_s1 + $0x70] sm:$0xf]  ;;  %v6699_v1 = vld [vmem:[%s9853_s1 + $0x74] sm:$0xf0]  ;;  %v6106_v5 = vld [vmem:[%s9853_s1 + $0x60] sm:$0xf] }
   0xc   : > { %v6178_v2 = vld [vmem:[%s9853_s1 + $0xf0] sm:$0xf]  ;;  %v6115_v3 = vor.u32 %v6699_v1, %v6114_v0  ;;  %v6715_v4 = vld [vmem:[%s9853_s1 + $0xf4] sm:$0xf0]  ;;  %v6697_v6 = vld [vmem:[%s9853_s1 + $0x64] sm:$0xf0] }
   0xd   : > { %v6179_v7 = vor.u32 %v6715_v4, %v6178_v2  ;;  %v6170_v8 = vld [vmem:[%s9853_s1 + $0xe0] sm:$0xf]  ;;  %v6713_v9 = vld [vmem:[%s9853_s1 + $0xe4] sm:$0xf0]  ;;  %v6107_v10 = vor.u32 %v6697_v6, %v6106_v5  ;;  %v6098_v12 = vld [vmem:[%s9853_s1 + $0x50] sm:$0xf] }
   0xe   : > { %6828 = vmatpush.bf16.msra.mxu2 %v6115_v3  ;;  %4086 = vmatpush.bf16.msra.mxu0 %v6115_v3  ;;  %v6171_v11 = vor.u32 %v6713_v9, %v6170_v8  ;;  %v6695_v13 = vld [vmem:[%s9853_s1 + $0x54] sm:$0xf0]  ;;  %v6162_v14 = vld [vmem:[%s9853_s1 + $0xd0] sm:$0xf]  ;;  %v6090_v18 = vld [vmem:[%s9853_s1 + $0x40] sm:$0xf] }
   0xf   : > { %6836 = vmatpush.bf16.msra.mxu3 %v6179_v7  ;;  %4175 = vmatpush.bf16.msra.mxu1 %v6179_v7  ;;  %v6711_v15 = vld [vmem:[%s9853_s1 + $0xd4] sm:$0xf0]  ;;  %v6099_v16 = vor.u32 %v6695_v13, %v6098_v12  ;;  %v6693_v19 = vld [vmem:[%s9853_s1 + $0x44] sm:$0xf0]  ;;  %v6154_v20 = vld [vmem:[%s9853_s1 + $0xc0] sm:$0xf] }
  0x10   : > { %v6163_v17 = vor.u32 %v6711_v15, %v6162_v14  ;;  %v6709_v21 = vld [vmem:[%s9853_s1 + $0xc4] sm:$0xf0]  ;;  %v6082_v22 = vld [vmem:[%s9853_s1 + $0x30] sm:$0xf]  ;;  %p161_p3 = scmp.lt.s32.totalorder %s5807_s13, 1  ;;  %vm211_vm0 = vcmask 1040384   ;;  %v6091_v23 = vor.u32 %v6693_v19, %v6090_v18 }
  0x11   : > { %vm212_vm1 = vsmask.f32 256  ;;  %v238_v24 = vld [vmem:[#allocation2 + $0x60] sm:$0x1]  ;;  %vm268_vm2 = vsmask.f32 7938  ;;  %v6155_v25 = vor.u32 %v6709_v21, %v6154_v20 }
  0x12   : > { %6829 = vmatpush.bf16.msra.mxu2 %v6107_v10  ;;  %4087 = vmatpush.bf16.msra.mxu0 %v6107_v10  ;;  %v6691_v26 = vld [vmem:[%s9853_s1 + $0x34] sm:$0xf0]  ;;  %v6146_v27 = vld [vmem:[%s9853_s1 + $0xb0] sm:$0xf]  ;;  %s10235_s13 = smov (!%p161_p3, %s5807_s13), 1  ;;  %vm7032_vm3 = vmand %vm211_vm0, %vm212_vm1  ;;  %vm647_vm6 = vcmask 1043456  }
  0x13   : > { %6837 = vmatpush.bf16.msra.mxu3 %v6171_v11  ;;  %4176 = vmatpush.bf16.msra.mxu1 %v6171_v11  ;;  %v6707_v29 = vld [vmem:[%s9853_s1 + $0xb4] sm:$0xf0]  ;;  %v239_v30 = vsel %vm7032_vm3, 0, %v238_v24  ;;  %vm7043_vm4 = vmand %vm211_vm0, %vm268_vm2  ;;  %v294_v32 = vld [vmem:[#allocation2 + $0x68] sm:$0x1]  ;;  %s6634_s6 = sshll.u32 %s10235_s13, 7  ;;  %v6083_v36 = vor.u32 %v6691_v26, %v6082_v22 }
  0x14   : > { %v6074_v33 = vld [vmem:[%s9853_s1 + $0x20] sm:$0xf]  ;;  %v6689_v34 = vld [vmem:[%s9853_s1 + $0x24] sm:$0xf0]  ;;  %240 = vst [vmem:[#allocation2 + $0x60] sm:$0x1] %v239_v30  ;;  %s7065_s15 = scalar_lea.vmem %s9852_s0, %s6634_s6  ;;  %v6147_v39 = vor.u32 %v6707_v29, %v6146_v27  ;;  %vm7095_vm8 = vmand %vm647_vm6, %vm268_vm2 }
  0x15   : > { %v295_v35 = vsel %vm7043_vm4, 0, %v294_v32  ;;  %v6138_v37 = vld [vmem:[%s9853_s1 + $0xa0] sm:$0xf]  ;;  %v6705_v38 = vld [vmem:[%s9853_s1 + $0xa4] sm:$0xf0]  ;;  %v6938_v42 = vmov 0   ;;  %v6075_v49 = vor.u32 %v6689_v34, %v6074_v33 }
  0x16   : > { %6830 = vmatpush.bf16.msra.mxu2 %v6099_v16  ;;  %4088 = vmatpush.bf16.msra.mxu0 %v6099_v16  ;;  %vm324_vm5 = vsmask.f32 4368  ;;  %296 = vst [vmem:[#allocation2 + $0x68] sm:$0x1] %v295_v35  ;;  %v186_v40 = vld [vmem:[%s7065_s15 + $0x38] sm:$0xf]  ;;  %v6139_v55 = vor.u32 %v6705_v38, %v6138_v37 }
  0x17   : > { %6838 = vmatpush.bf16.msra.mxu3 %v6163_v17  ;;  %4177 = vmatpush.bf16.msra.mxu1 %v6163_v17  ;;  %v187_v41 = vld [vmem:[%s7065_s15 + $0x3c] sm:$0xf]  ;;  %204 = vst [vmem:[#allocation2] sm:$0xf] %v6938_v42  ;;  %v446_v43 = vshrl.u32 %v186_v40, 16  ;;  %v449_v44 = vshll.u32 %v186_v40, 16  ;;  %vm7083_vm7 = vmor %vm212_vm1, %vm324_vm5 }
  0x18   : > { %v454_v45 = vshrl.u32 %v187_v41, 16  ;;  %v457_v46 = vshll.u32 %v187_v41, 16  ;;  %205 = vst [vmem:[#allocation2 + $0x4] sm:$0xf] %v6938_v42  ;;  %v6066_v47 = vld [vmem:[%s9853_s1 + $0x10] sm:$0xf] }
  0x19   : > { %v6687_v48 = vld [vmem:[%s9853_s1 + $0x14] sm:$0xf0]  ;;  %206 = vst [vmem:[#allocation2 + $0x8] sm:$0x1] %v6938_v42  ;;  %v6130_v50 = vld [vmem:[%s9853_s1 + $0x90] sm:$0xf] }
  0x1a   : > { %6831 = vmatpush.bf16.msra.mxu2 %v6091_v23  ;;  %4089 = vmatpush.bf16.msra.mxu0 %v6091_v23  ;;  %v6703_v51 = vld [vmem:[%s9853_s1 + $0x94] sm:$0xf0]  ;;  %v448_v53 = vrot.slane %v446_v43, 7  ;;  %v456_v54 = vrot.slane %v454_v45, 7  ;;  %208 = vst [vmem:[#allocation2 + $0xcc] sm:$0xf] %v6938_v42  ;;  %v6067_v0 = vor.u32 %v6687_v48, %v6066_v47 }
  0x1b   : > { %6839 = vmatpush.bf16.msra.mxu3 %v6155_v25  ;;  %4178 = vmatpush.bf16.msra.mxu1 %v6155_v25  ;;  %v6058_v56 = vld [vmem:[%s9853_s1] sm:$0xf]  ;;  %v6685_v57 = vld [vmem:[%s9853_s1 + $0x4] sm:$0xf0]  ;;  %209 = vst [vmem:[#allocation2 + $0xd0] sm:$0xf] %v6938_v42  ;;  %v6131_v14 = vor.u32 %v6703_v51, %v6130_v50 }
  0x1c   : > { %v451_v59 = vor.u32 %v449_v44, %v448_v53  ;;  %v452_v60 = vrot.slane %v448_v53, 4  ;;  %v459_v61 = vor.u32 %v457_v46, %v456_v54  ;;  %v461_v62 = vrot.slane %v456_v54, 4  ;;  %v698_v63 = vld [vmem:[#allocation2 + $0x60] sm:$0xf]  ;;  %210 = vst [vmem:[#allocation2 + $0xd4] sm:$0x1] %v6938_v42 }
  0x1d   : > { %v702_v1 = vld [vmem:[#allocation2 + $0x68] sm:$0x1]  ;;  %v7100_v2 = vld [vmem:[%s7065_s15 + $0x40] sm:$0xf]  ;;  %v189_v3 = vld [vmem:[%s7065_s15 + $0x44] sm:$0xf]  ;;  %v6059_v19 = vor.u32 %v6685_v57, %v6058_v56 }
  0x1e   : > { %6832 = vmatpush.bf16.msra.mxu2 %v6083_v36  ;;  %4090 = vmatpush.bf16.msra.mxu0 %v6083_v36  ;;  %v6122_v4 = vld [vmem:[%s9853_s1 + $0x80] sm:$0xf]  ;;  %v6701_v5 = vld [vmem:[%s9853_s1 + $0x84] sm:$0xf0]  ;;  %v460_v6 = vsel %vm7083_vm7, %v452_v60, %v459_v61  ;;  %v699_v7 = vsel %vm7095_vm8, %v451_v59, %v698_v63  ;;  %v7116_v8 = vld [vmem:[%s9853_s1 + $0x170] sm:$0xf]  ;;  %v703_v10 = vsel %vm7032_vm3, %v461_v62, %v702_v1 }
  0x1f   : > { %6840 = vmatpush.bf16.msra.mxu3 %v6147_v39  ;;  %4179 = vmatpush.bf16.msra.mxu1 %v6147_v39  ;;  %v7121_v9 = vld [vmem:[%s9853_s1 + $0x174] sm:$0xf0]  ;;  %v214_v11 = vld [vmem:[#allocation2] sm:$0x1]  ;;  %v241_v12 = vld [vmem:[#allocation2 + $0x6c] sm:$0x1]  ;;  %v6123_v37 = vor.u32 %v6701_v5, %v6122_v4 }
  0x20   : > { %v463_v13 = vshrl.u32 %v7100_v2, 16  ;;  %700 = vst [vmem:[#allocation2 + $0x60] sm:$0xf] %v699_v7  ;;  %v215_v15 = vsel %vm7032_vm3, 0, %v214_v11  ;;  %v7131_v16 = vld [vmem:[%s9853_s1 + $0x1f0] sm:$0xf]  ;;  %v6243_v38 = vor.u32 %v7121_v9, %v7116_v8 }
  0x21   : > { %v7136_v17 = vld [vmem:[%s9853_s1 + $0x1f4] sm:$0xf0]  ;;  %v762_v18 = vld [vmem:[#allocation2 + $0x4] sm:$0xf]  ;;  %701 = vst [vmem:[#allocation2 + $0x64] sm:$0xf] %v460_v6 }
  0x22   : > { %6833 = vmatpush.bf16.msra.mxu2 %v6075_v49  ;;  %4091 = vmatpush.bf16.msra.mxu0 %v6075_v49  ;;  %v270_v20 = vld [vmem:[#allocation2 + $0x8] sm:$0x1]  ;;  %v822_v21 = vshll.u32 %v762_v18, 16  ;;  %v826_v22 = vshrl.u32 %v762_v18, 16  ;;  %v7141_v23 = vld [vmem:[%s9853_s1 + $0x270] sm:$0xf]  ;;  %v6307_v42 = vor.u32 %v7136_v17, %v7131_v16 }
  0x23   : > { %6841 = vmatpush.bf16.msra.mxu3 %v6139_v55  ;;  %4180 = vmatpush.bf16.msra.mxu1 %v6139_v55  ;;  %v7146_v24 = vld [vmem:[%s9853_s1 + $0x274] sm:$0xf0]  ;;  %704 = vst [vmem:[#allocation2 + $0x68] sm:$0x1] %v703_v10  ;;  %vm809_vm9 = vsmask.f32 3328 }
  0x24   : > { %vm810_vm10 = vsmask.f32 7440  ;;  %v271_v25 = vsel %vm7043_vm4, 0, %v270_v20  ;;  %v7153_v26 = vld [vmem:[%s9853_s1 + $0x2f0] sm:$0xf]  ;;  %v242_v29 = vsel %vm7032_vm3, 0, %v241_v12  ;;  %v6371_v46 = vor.u32 %v7146_v24, %v7141_v23 }
  0x25   : > { %v7158_v27 = vld [vmem:[%s9853_s1 + $0x2f4] sm:$0xf0]  ;;  %v465_v30 = vrot.slane %v463_v13, 7  ;;  %v471_v32 = vshrl.u32 %v189_v3, 16  ;;  %216 = vst [vmem:[#allocation2] sm:$0x1] %v215_v15  ;;  %vm7198_vm11 = vmor %vm809_vm9, %vm810_vm10 }
  0x26   : > { %6834 = vmatpush.bf16.msra.mxu2 %v6067_v0  ;;  %4092 = vmatpush.bf16.msra.mxu0 %v6067_v0  ;;  %v7162_v33 = vrot.slane %v822_v21, 5  ;;  %v828_v34 = vrot.slane %v826_v22, 4  ;;  %v466_v35 = vshll.u32 %v7100_v2, 16  ;;  %v474_v36 = vshll.u32 %v189_v3, 16  ;;  %272 = vst [vmem:[#allocation2 + $0x8] sm:$0x1] %v271_v25 }
  0x27   : > { %6842 = vmatpush.bf16.msra.mxu3 %v6131_v14  ;;  %4181 = vmatpush.bf16.msra.mxu1 %v6131_v14  ;;  %v469_v39 = vrot.slane %v465_v30, 4  ;;  %v7167_v40 = vrot.slane %v471_v32, 7  ;;  %v6234_v41 = vld [vmem:[%s9853_s1 + $0x160] sm:$0xf]  ;;  %243 = vst [vmem:[#allocation2 + $0x6c] sm:$0x1] %v242_v29  ;;  %v6435_v54 = vor.u32 %v7158_v27, %v7153_v26 }
  0x28   : > { %v829_v43 = vor.u32 %v828_v34, %v7162_v33  ;;  %v6729_v44 = vld [vmem:[%s9853_s1 + $0x164] sm:$0xf0]  ;;  %v297_v45 = vld [vmem:[#allocation2 + $0x74] sm:$0x1]  ;;  %v7185_v50 = vld [vmem:[%s7065_s15] sm:$0xf]  ;;  %v468_v3 = vor.u32 %v466_v35, %v465_v30 }
  0x29   : > { %v476_v47 = vor.u32 %v474_v36, %v7167_v40  ;;  %v478_v48 = vrot.slane %v7167_v40, 4  ;;  %v298_v49 = vsel %vm7043_vm4, 0, %v297_v45  ;;  %v777_v51 = vld [vmem:[#allocation2 + $0x60] sm:$0xf]  ;;  %v6235_v55 = vor.u32 %v6729_v44, %v6234_v41  ;;  %v778_v59 = vld [vmem:[#allocation2 + $0x64] sm:$0xf] }
  0x2a   : > { %6835 = vmatpush.bf16.msra.mxu2 %v6059_v19  ;;  %4093 = vmatpush.bf16.msra.mxu0 %v6059_v19  ;;  %v7187_v53 = vrot.slane %v829_v43, 4  ;;  %299 = vst [vmem:[#allocation2 + $0x74] sm:$0x1] %v298_v49  ;;  %v327_v56 = vshrl.u32 %v7185_v50, 16  ;;  %v6644_v57 = vld [vmem:[#allocation2 + $0x60] sm:$0xff]  ;;  %v1005_v60 = vshrl.u32 %v777_v51, 16 }
  0x2b   : > { %6843 = vmatpush.bf16.msra.mxu3 %v6123_v37  ;;  %v1008_v61 = vshll.u32 %v777_v51, 16  ;;  %v477_v62 = vsel %vm7083_vm7, %v469_v39, %v476_v47  ;;  %v330_v63 = vshll.u32 %v7185_v50, 16  ;;  %4182 = vmatpush.bf16.msra.mxu1 %v6123_v37  ;;  %v801_v0 = vld [vmem:[#allocation2 + $0x68] sm:$0x1]  ;;  %v1014_v1 = vshll.u32 %v778_v59, 16  ;;  %s6635_s6 = sshll.u32 %s10235_s13, 8 }
  0x2c   : > { %v1018_v2 = vshrl.u32 %v778_v59, 16  ;;  %708 = vst [vmem:[#allocation2 + $0x70] sm:$0xf] %v477_v62  ;;  %v1007_v4 = vrot.slane %v1005_v60, 4  ;;  %v1024_v6 = vshll.u32 %v801_v0, 16  ;;  %v6636_v7 = vld [vmem:[#allocation2] sm:$0xff]  ;;  %s9732_s9 = scalar_lea.vmem %s9855_s3, %s6635_s6 }
  0x2d   : > { %4134 = vmatmul.bf16.vlgmr.msra.gmra.mxu2 %v6644_v57  ;;  %v1010_v5 = vrot.slane %v1008_v61, 5  ;;  %v761_v8 = vld [vmem:[#allocation2] sm:$0xf]  ;;  %v1016_v9 = vrot.slane %v1014_v1, 5  ;;  %v793_v11 = vld [vmem:[#allocation2 + $0x8] sm:$0x1]  ;;  %4094 = vmatmul.bf16.vlgmr.msra.gmra.mxu0 %v6636_v7 }
  0x2e   : > { %4264 = vmatpush.bf16.msrb.mxu2 %v6243_v38  ;;  %4442 = vmatpush.bf16.msrb.mxu0 %v6371_v46  ;;  %v1020_v10 = vrot.slane %v1018_v2, 4  ;;  %v813_v12 = vshrl.u32 %v761_v8, 16  ;;  %v816_v13 = vshll.u32 %v761_v8, 16  ;;  %v173_v14 = vld [vmem:[%s7065_s15 + $0x4] sm:$0xf]  ;;  %v1026_v16 = vrot.slane %v1024_v6, 5 }
  0x2f   : > { %4353 = vmatpush.bf16.msrb.mxu3 %v6307_v42  ;;  %4531 = vmatpush.bf16.msrb.mxu1 %v6435_v54  ;;  %v1011_v15 = vor.u32 %v1010_v5, %v1007_v4  ;;  %v832_v17 = vshll.u32 %v793_v11, 16  ;;  %v705_v18 = vld [vmem:[#allocation2 + $0x6c] sm:$0xf]  ;;  %v6298_v25 = vld [vmem:[%s9853_s1 + $0x1e0] sm:$0xf]  ;;  %v329_v41 = vrot.slane %v327_v56, 7 }
  0x30   : > { %v217_v19 = vld [vmem:[#allocation2 + $0xc] sm:$0x1]  ;;  %v1021_v21 = vor.u32 %v1020_v10, %v1016_v9  ;;  %v815_v22 = vrot.slane %v813_v12, 4  ;;  %v818_v23 = vrot.slane %v816_v13, 5  ;;  %v706_v24 = vsel %vm7095_vm8, %v468_v3, %v705_v18  ;;  %v6745_v26 = vld [vmem:[%s9853_s1 + $0x1e4] sm:$0xf0] }
  0x31   : > { %v1012_v27 = vrot.slane %v1011_v15, 4  ;;  %v834_v29 = vrot.slane %v832_v17, 5  ;;  %707 = vst [vmem:[#allocation2 + $0x6c] sm:$0xf] %v706_v24  ;;  %v709_v30 = vld [vmem:[#allocation2 + $0x74] sm:$0x1]  ;;  %v6299_v32 = vor.u32 %v6745_v26, %v6298_v25 }
  0x32   : > { %4265 = vmatpush.bf16.msrb.mxu2 %v6235_v55  ;;  %v1022_v34 = vrot.slane %v1021_v21, 4  ;;  %v819_v35 = vor.u32 %v818_v23, %v815_v22  ;;  %v710_v36 = vsel %vm7032_vm3, %v478_v48, %v709_v30  ;;  %v218_v37 = vsel %vm7032_vm3, 0, %v217_v19  ;;  %v273_v43 = vld [vmem:[#allocation2 + $0x14] sm:$0x1]  ;;  %v6362_v48 = vld [vmem:[%s9853_s1 + $0x260] sm:$0xf] }
  0x33   : > { %v1017_v38 = vsel %vm7198_vm11, %v1012_v27, %v1016_v9  ;;  %v835_v39 = vsel %vm7198_vm11, %v7187_v53, %v834_v29  ;;  %711 = vst [vmem:[#allocation2 + $0x74] sm:$0x1] %v710_v36  ;;  %v780_v40 = vld [vmem:[#allocation2 + $0x70] sm:$0xf]  ;;  %v335_v42 = vshrl.u32 %v173_v14, 16  ;;  %4354 = vmatpush.bf16.msrb.mxu3 %v6299_v32  ;;  %v332_v53 = vor.u32 %v330_v63, %v329_v41 }
  0x34   : > { %v1027_v44 = vsel %vm7198_vm11, %v1022_v34, %v1026_v16  ;;  %v2688_v45 = vunpack.c.l.b16 %v1017_v38  ;;  %v820_v46 = vrot.slane %v819_v35, 4  ;;  %v2673_v47 = vunpack.c.l.b16 %v835_v39  ;;  %219 = vst [vmem:[#allocation2 + $0xc] sm:$0x1] %v218_v37  ;;  %v6761_v54 = vld [vmem:[%s9853_s1 + $0x264] sm:$0xf0] }
  0x35   : > { %v2689_v49 = vunpack.c.l.b16 %v1027_v44  ;;  %v1038_v50 = vshll.u32 %v780_v40, 16  ;;  %v1042_v51 = vshrl.u32 %v780_v40, 16  ;;  %v6426_v55 = vld [vmem:[%s9853_s1 + $0x2e0] sm:$0xf]  ;;  %v7231_v56 = vld [vmem:[%s7065_s15 + $0x48] sm:$0xf]  ;;  %v6363_v9 = vor.u32 %v6761_v54, %v6362_v48 }
  0x36   : > { %v825_v57 = vsel %vm7198_vm11, %v820_v46, %v7162_v33  ;;  %v333_v59 = vrot.slane %v329_v41, 4  ;;  %v7236_v60 = vrot.slane %v335_v42, 7  ;;  %v338_v61 = vshll.u32 %v173_v14, 16  ;;  %v6777_v62 = vld [vmem:[%s9853_s1 + $0x2e4] sm:$0xf0] }
  0x37   : > { %v7241_v63 = vpack.c.b16 %v2689_v49, %v2688_v45  ;;  %v2672_v0 = vunpack.c.l.b16 %v825_v57  ;;  %v7243_v1 = vrot.slane %v1038_v50, 5  ;;  %v1044_v2 = vrot.slane %v1042_v51, 4  ;;  %v191_v3 = vld [vmem:[%s7065_s15 + $0x4c] sm:$0xf]  ;;  %v244_v4 = vld [vmem:[#allocation2 + $0x78] sm:$0x1]  ;;  %4443 = vmatpush.bf16.msrb.mxu0 %v6363_v9 }
  0x38   : > { %v6645_v5 = vld [vmem:[#allocation2 + $0x6c] sm:$0xff]  ;;  %v340_v33 = vor.u32 %v338_v61, %v7236_v60  ;;  %v342_v7 = vrot.slane %v7236_v60, 4  ;;  %v274_v8 = vsel %vm7043_vm4, 0, %v273_v43  ;;  %v6427_v17 = vor.u32 %v6777_v62, %v6426_v55  ;;  %v6727_v21 = vld [vmem:[%s9853_s1 + $0x154] sm:$0xf0] }
  0x39   : > { %9958 = vst [vmem:[#allocation3_spill] sm:$0xff] %v7241_v63  ;;  %v779_v6 = vld [vmem:[#allocation2 + $0x6c] sm:$0xf]  ;;  %4223 = vmatmul.bf16.vlgmr.msra.gmra.mxu3 %v7241_v63  ;;  %v7251_v10 = vpack.c.b16 %v2673_v47, %v2672_v0  ;;  %v1045_v13 = vor.u32 %v1044_v2, %v7243_v1  ;;  %v6226_v14 = vld [vmem:[%s9853_s1 + $0x150] sm:$0xf]  ;;  %v245_v18 = vsel %vm7032_vm3, 0, %v244_v4 }
  0x3a   : > { %v1029_v11 = vshrl.u32 %v779_v6, 16  ;;  %v1032_v12 = vshll.u32 %v779_v6, 16  ;;  %275 = vst [vmem:[#allocation2 + $0x14] sm:$0x1] %v274_v8  ;;  %v802_v15 = vld [vmem:[#allocation2 + $0x74] sm:$0x1]  ;;  %v341_v16 = vsel %vm7083_vm7, %v333_v59, %v340_v33  ;;  %4532 = vmatpush.bf16.msrb.mxu1 %v6427_v17  ;;  %v6227_v37 = vor.u32 %v6727_v21, %v6226_v14 }
  0x3b   : > { %9959 = vst [vmem:[#allocation4_spill] sm:$0xff] %v7251_v10  ;;  %v480_v19 = vshrl.u32 %v7231_v56, 16  ;;  %4183 = vmatmul.bf16.vlgmr.msra.gmra.mxu1 %v7251_v10  ;;  %v1046_v24 = vrot.slane %v1045_v13, 4  ;;  %v1048_v25 = vshll.u32 %v802_v15, 16  ;;  %v649_v26 = vld [vmem:[#allocation2 + $0xc] sm:$0xf] }
  0x3c   : > { %v1031_v22 = vrot.slane %v1029_v11, 4  ;;  %v1034_v23 = vrot.slane %v1032_v12, 5  ;;  %v650_v27 = vsel %vm7095_vm8, %v332_v53, %v649_v26  ;;  %652 = vst [vmem:[#allocation2 + $0x10] sm:$0xf] %v341_v16  ;;  %v483_v30 = vshll.u32 %v7231_v56, 16  ;;  %4266 = vmatpush.bf16.msrb.mxu2 %v6227_v37 }
  0x3d   : > { %v482_v29 = vrot.slane %v480_v19, 7  ;;  %v488_v32 = vshrl.u32 %v191_v3, 16  ;;  %4139 = vmatmul.bf16.gmra.mxu2 %v6645_v5  ;;  %v1050_v35 = vrot.slane %v1048_v25, 5  ;;  %651 = vst [vmem:[#allocation2 + $0xc] sm:$0xf] %v650_v27  ;;  %v491_v36 = vshll.u32 %v191_v3, 16 }
  0x3e   : > { %v1035_v34 = vor.u32 %v1034_v23, %v1031_v22  ;;  %v300_v38 = vld [vmem:[#allocation2 + $0x80] sm:$0x1]  ;;  %246 = vst [vmem:[#allocation2 + $0x78] sm:$0x1] %v245_v18  ;;  %v174_v44 = vld [vmem:[%s7065_s15 + $0x8] sm:$0xf] }
  0x3f   : > { %v486_v39 = vrot.slane %v482_v29, 4  ;;  %v490_v40 = vrot.slane %v488_v32, 7  ;;  %v301_v41 = vsel %vm7043_vm4, 0, %v300_v38  ;;  %v1051_v43 = vsel %vm7198_vm11, %v1046_v24, %v1050_v35  ;;  %v175_v49 = vld [vmem:[%s7065_s15 + $0xc] sm:$0xf] }
  0x40   : > { %v1036_v42 = vrot.slane %v1035_v34, 4  ;;  %302 = vst [vmem:[#allocation2 + $0x80] sm:$0x1] %v301_v41  ;;  %v2691_v45 = vunpack.c.l.b16 %v1051_v43  ;;  %v485_v47 = vor.u32 %v483_v30, %v482_v29  ;;  %v344_v50 = vshrl.u32 %v174_v44, 16  ;;  %v220_v55 = vld [vmem:[#allocation2 + $0x18] sm:$0x1] }
  0x41   : > { %v653_v46 = vld [vmem:[#allocation2 + $0x14] sm:$0x1]  ;;  %v493_v48 = vor.u32 %v491_v36, %v490_v40  ;;  %v495_v54 = vrot.slane %v490_v40, 4  ;;  %v352_v56 = vshrl.u32 %v175_v49, 16  ;;  %v6290_v57 = vld [vmem:[%s9853_s1 + $0x1d0] sm:$0xf] }
  0x42   : > { %v1041_v51 = vsel %vm7198_vm11, %v1036_v42, %v7243_v1  ;;  %v654_v53 = vsel %vm7032_vm3, %v342_v7, %v653_v46  ;;  %v221_v61 = vsel %vm7032_vm3, 0, %v220_v55  ;;  %v346_v62 = vrot.slane %v344_v50, 7  ;;  %v6743_v0 = vld [vmem:[%s9853_s1 + $0x1d4] sm:$0xf0]  ;;  %v276_v26 = vld [vmem:[#allocation2 + $0x20] sm:$0x1] }
  0x43   : > { %v2690_v59 = vunpack.c.l.b16 %v1041_v51  ;;  %655 = vst [vmem:[#allocation2 + $0x14] sm:$0x1] %v654_v53  ;;  %v494_v60 = vsel %vm7083_vm7, %v486_v39, %v493_v48  ;;  %v764_v1 = vld [vmem:[#allocation2 + $0x10] sm:$0xf]  ;;  %v7290_v2 = vrot.slane %v352_v56, 7  ;;  %v355_v3 = vshll.u32 %v175_v49, 16 }
  0x44   : > { %715 = vst [vmem:[#allocation2 + $0x7c] sm:$0xf] %v494_v60  ;;  %v6291_v4 = vor.u32 %v6743_v0, %v6290_v57  ;;  %v6637_v5 = vld [vmem:[#allocation2 + $0xc] sm:$0xff]  ;;  %v846_v33 = vshll.u32 %v764_v1, 16  ;;  %v850_v7 = vshrl.u32 %v764_v1, 16  ;;  %v347_v8 = vshll.u32 %v174_v44, 16 }
  0x45   : > { %v763_v6 = vld [vmem:[#allocation2 + $0xc] sm:$0xf]  ;;  %v7292_v9 = vpack.c.b16 %v2691_v45, %v2690_v59  ;;  %v712_v13 = vld [vmem:[#allocation2 + $0x78] sm:$0xf]  ;;  %222 = vst [vmem:[#allocation2 + $0x18] sm:$0x1] %v221_v61  ;;  %v357_v14 = vor.u32 %v355_v3, %v7290_v2  ;;  %4099 = vmatmul.bf16.gmra.mxu0 %v6637_v5 }
  0x46   : > { %v837_v11 = vshrl.u32 %v763_v6, 16  ;;  %v840_v12 = vshll.u32 %v763_v6, 16  ;;  %4355 = vmatpush.bf16.msrb.mxu3 %v6291_v4  ;;  %v848_v15 = vrot.slane %v846_v33, 5  ;;  %v852_v16 = vrot.slane %v850_v7, 4  ;;  %v6354_v27 = vld [vmem:[%s9853_s1 + $0x250] sm:$0xf] }
  0x47   : > { %9960 = vst [vmem:[#allocation5_spill] sm:$0xff] %v7292_v9  ;;  %v713_v17 = vsel %vm7095_vm8, %v485_v47, %v712_v13  ;;  %v716_v18 = vld [vmem:[#allocation2 + $0x80] sm:$0x1]  ;;  %v350_v19 = vrot.slane %v346_v62, 4  ;;  %v349_v32 = vor.u32 %v347_v8, %v346_v62  ;;  %v277_v34 = vsel %vm7043_vm4, 0, %v276_v26 }
  0x48   : > { %v839_v21 = vrot.slane %v837_v11, 4  ;;  %v842_v22 = vrot.slane %v840_v12, 5  ;;  %714 = vst [vmem:[#allocation2 + $0x78] sm:$0xf] %v713_v17  ;;  %v717_v23 = vsel %vm7032_vm3, %v495_v54, %v716_v18  ;;  %v853_v24 = vor.u32 %v852_v16, %v848_v15  ;;  %v6759_v41 = vld [vmem:[%s9853_s1 + $0x254] sm:$0xf0] }
  0x49   : > { %718 = vst [vmem:[#allocation2 + $0x80] sm:$0x1] %v717_v23  ;;  %v358_v25 = vsel %vm7083_vm7, %v350_v19, %v357_v14  ;;  %4228 = vmatmul.bf16.gmra.mxu3 %v7292_v9  ;;  %v359_v43 = vrot.slane %v7290_v2, 4  ;;  %v6355_v45 = vor.u32 %v6759_v41, %v6354_v27  ;;  %v6418_v46 = vld [vmem:[%s9853_s1 + $0x2d0] sm:$0xf]  ;;  %vm1260_vm12 = vcmask 1042432  }
  0x4a   : > { %v794_v29 = vld [vmem:[#allocation2 + $0x14] sm:$0x1]  ;;  %v843_v30 = vor.u32 %v842_v22, %v839_v21  ;;  %659 = vst [vmem:[#allocation2 + $0x1c] sm:$0xf] %v358_v25  ;;  %v854_v35 = vrot.slane %v853_v24, 4  ;;  %vm1261_vm13 = vcmask 1046532  }
  0x4b   : > { %v856_v36 = vshll.u32 %v794_v29, 16  ;;  %v782_v37 = vld [vmem:[#allocation2 + $0x7c] sm:$0xf]  ;;  %278 = vst [vmem:[#allocation2 + $0x20] sm:$0x1] %v277_v34  ;;  %4444 = vmatpush.bf16.msrb.mxu0 %v6355_v45  ;;  %vm7682_vm14 = vmor %vm1260_vm12, %vm1261_vm13 }
  0x4c   : > { %v844_v38 = vrot.slane %v843_v30, 4  ;;  %v1062_v39 = vshll.u32 %v782_v37, 16  ;;  %v1066_v40 = vshrl.u32 %v782_v37, 16  ;;  %v656_v44 = vld [vmem:[#allocation2 + $0x18] sm:$0xf] }
  0x4d   : > { %v858_v42 = vrot.slane %v856_v36, 5  ;;  %v657_v50 = vsel %vm7095_vm8, %v349_v32, %v656_v44  ;;  %v6775_v51 = vld [vmem:[%s9853_s1 + $0x2d4] sm:$0xf0]  ;;  %v192_v53 = vld [vmem:[%s7065_s15 + $0x50] sm:$0xf] }
  0x4e   : > { %v849_v47 = vsel %vm7198_vm11, %v844_v38, %v848_v15  ;;  %v1064_v48 = vrot.slane %v1062_v39, 5  ;;  %v1068_v49 = vrot.slane %v1066_v40, 4  ;;  %658 = vst [vmem:[#allocation2 + $0x18] sm:$0xf] %v657_v50  ;;  %v6419_v59 = vor.u32 %v6775_v51, %v6418_v46  ;;  %v193_v3 = vld [vmem:[%s7065_s15 + $0x54] sm:$0xf] }
  0x4f   : > { %v859_v54 = vsel %vm7198_vm11, %v854_v35, %v858_v42  ;;  %v2674_v55 = vunpack.c.l.b16 %v849_v47  ;;  %v6646_v56 = vld [vmem:[#allocation2 + $0x78] sm:$0xff]  ;;  %v497_v60 = vshrl.u32 %v192_v53, 16  ;;  %v247_v6 = vld [vmem:[#allocation2 + $0x84] sm:$0x1]  ;;  %v500_v21 = vshll.u32 %v192_v53, 16 }
  0x50   : > { %v781_v57 = vld [vmem:[#allocation2 + $0x78] sm:$0xf]  ;;  %v2675_v61 = vunpack.c.l.b16 %v859_v54  ;;  %v803_v62 = vld [vmem:[#allocation2 + $0x80] sm:$0x1]  ;;  %v1069_v2 = vor.u32 %v1068_v49, %v1064_v48  ;;  %4144 = vmatmul.bf16.gmra.mxu2 %v6646_v56  ;;  %4533 = vmatpush.bf16.msrb.mxu1 %v6419_v59  ;;  %v248_v19 = vsel %vm7032_vm3, 0, %v247_v6  ;;  %v505_v26 = vshrl.u32 %v193_v3, 16 }
  0x51   : > { %v1053_v0 = vshrl.u32 %v781_v57, 16  ;;  %v1056_v1 = vshll.u32 %v781_v57, 16  ;;  %v1072_v4 = vshll.u32 %v803_v62, 16  ;;  %v766_v5 = vld [vmem:[#allocation2 + $0x1c] sm:$0xf]  ;;  %v499_v33 = vrot.slane %v497_v60, 7 }
  0x52   : > { %v7325_v7 = vpack.c.b16 %v2675_v61, %v2674_v55  ;;  %v1070_v12 = vrot.slane %v1069_v2, 4  ;;  %v660_v13 = vld [vmem:[#allocation2 + $0x20] sm:$0x1]  ;;  %v870_v16 = vshll.u32 %v766_v5, 16  ;;  %v874_v17 = vshrl.u32 %v766_v5, 16 }
  0x53   : > { %v1055_v8 = vrot.slane %v1053_v0, 4  ;;  %v1058_v11 = vrot.slane %v1056_v1, 5  ;;  %v1074_v14 = vrot.slane %v1072_v4, 5  ;;  %v661_v15 = vsel %vm7032_vm3, %v359_v43, %v660_v13  ;;  %v6218_v22 = vld [vmem:[%s9853_s1 + $0x140] sm:$0xf] }
  0x54   : > { %9961 = vst [vmem:[#allocation6_spill] sm:$0xff] %v7325_v7  ;;  %4188 = vmatmul.bf16.gmra.mxu1 %v7325_v7  ;;  %v872_v24 = vrot.slane %v870_v16, 5  ;;  %v876_v25 = vrot.slane %v874_v17, 4  ;;  %v508_v34 = vshll.u32 %v193_v3, 16  ;;  %v7337_v38 = vrot.slane %v505_v26, 7 }
  0x55   : > { %v1059_v18 = vor.u32 %v1058_v11, %v1055_v8  ;;  %662 = vst [vmem:[#allocation2 + $0x20] sm:$0x1] %v661_v15  ;;  %v1075_v23 = vsel %vm7198_vm11, %v1070_v12, %v1074_v14  ;;  %v6638_v30 = vld [vmem:[#allocation2 + $0x18] sm:$0xff]  ;;  %v6725_v39 = vld [vmem:[%s9853_s1 + $0x144] sm:$0xf0]  ;;  %v503_v41 = vrot.slane %v499_v33, 4  ;;  %v502_v49 = vor.u32 %v500_v21, %v499_v33 }
  0x56   : > { %249 = vst [vmem:[#allocation2 + $0x84] sm:$0x1] %v248_v19  ;;  %v2693_v29 = vunpack.c.l.b16 %v1075_v23  ;;  %v765_v32 = vld [vmem:[#allocation2 + $0x18] sm:$0xf]  ;;  %v877_v37 = vor.u32 %v876_v25, %v872_v24  ;;  %4104 = vmatmul.bf16.gmra.mxu0 %v6638_v30  ;;  %v6219_v42 = vor.u32 %v6725_v39, %v6218_v22  ;;  %v303_v43 = vld [vmem:[#allocation2 + $0x8c] sm:$0x1]  ;;  %v510_v54 = vor.u32 %v508_v34, %v7337_v38 }
  0x57   : > { %v1060_v27 = vrot.slane %v1059_v18, 4  ;;  %v861_v35 = vshrl.u32 %v765_v32, 16  ;;  %v864_v36 = vshll.u32 %v765_v32, 16  ;;  %v176_v44 = vld [vmem:[%s7065_s15 + $0x10] sm:$0xf]  ;;  %v304_v55 = vsel %vm7043_vm4, 0, %v303_v43 }
  0x58   : > { %v177_v50 = vld [vmem:[%s7065_s15 + $0x14] sm:$0xf]  ;;  %v223_v51 = vld [vmem:[#allocation2 + $0x24] sm:$0x1]  ;;  %v878_v53 = vrot.slane %v877_v37, 4  ;;  %4267 = vmatpush.bf16.msrb.mxu2 %v6219_v42  ;;  %v361_v61 = vshrl.u32 %v176_v44, 16  ;;  %v511_v1 = vsel %vm7083_vm7, %v503_v41, %v510_v54 }
  0x59   : > { %v1065_v40 = vsel %vm7198_vm11, %v1060_v27, %v1064_v48  ;;  %v863_v46 = vrot.slane %v861_v35, 4  ;;  %v866_v47 = vrot.slane %v864_v36, 5  ;;  %v224_v48 = vsel %vm7032_vm3, 0, %v223_v51  ;;  %v6282_v56 = vld [vmem:[%s9853_s1 + $0x1c0] sm:$0xf] }
  0x5a   : > { %v2692_v45 = vunpack.c.l.b16 %v1065_v40  ;;  %305 = vst [vmem:[#allocation2 + $0x8c] sm:$0x1] %v304_v55  ;;  %v364_v62 = vshll.u32 %v176_v44, 16  ;;  %v369_v3 = vshrl.u32 %v177_v50, 16  ;;  %v363_v6 = vrot.slane %v361_v61, 7 }
  0x5b   : > { %v867_v60 = vor.u32 %v866_v47, %v863_v46  ;;  %225 = vst [vmem:[#allocation2 + $0x24] sm:$0x1] %v224_v48  ;;  %v372_v33 = vshll.u32 %v177_v50, 16  ;;  %v6741_v12 = vld [vmem:[%s9853_s1 + $0x1c4] sm:$0xf0]  ;;  %v512_v14 = vrot.slane %v7337_v38, 4 }
  0x5c   : > { %v7354_v57 = vpack.c.b16 %v2693_v29, %v2692_v45  ;;  %v795_v59 = vld [vmem:[#allocation2 + $0x20] sm:$0x1]  ;;  %722 = vst [vmem:[#allocation2 + $0x88] sm:$0xf] %v511_v1  ;;  %v7361_v11 = vrot.slane %v369_v3, 7  ;;  %v367_v15 = vrot.slane %v363_v6, 4  ;;  %v6283_v16 = vor.u32 %v6741_v12, %v6282_v56 }
  0x5d   : > { %v880_v0 = vshll.u32 %v795_v59, 16  ;;  %v719_v2 = vld [vmem:[#allocation2 + $0x84] sm:$0xf]  ;;  %v868_v4 = vrot.slane %v867_v60, 4  ;;  %v279_v17 = vld [vmem:[#allocation2 + $0x2c] sm:$0x1]  ;;  %v366_v22 = vor.u32 %v364_v62, %v363_v6 }
  0x5e   : > { %9962 = vst [vmem:[#allocation7_spill] sm:$0xff] %v7354_v57  ;;  %4233 = vmatmul.bf16.gmra.mxu3 %v7354_v57  ;;  %v720_v5 = vsel %vm7095_vm8, %v502_v49, %v719_v2  ;;  %v6346_v18 = vld [vmem:[%s9853_s1 + $0x240] sm:$0xf]  ;;  %v374_v23 = vor.u32 %v372_v33, %v7361_v11  ;;  %v280_v27 = vsel %vm7043_vm4, 0, %v279_v17  ;;  %v6773_v30 = vld [vmem:[%s9853_s1 + $0x2c4] sm:$0xf0] }
  0x5f   : > { %v882_v8 = vrot.slane %v880_v0, 5  ;;  %721 = vst [vmem:[#allocation2 + $0x84] sm:$0xf] %v720_v5  ;;  %v873_v13 = vsel %vm7198_vm11, %v868_v4, %v872_v24  ;;  %v6757_v24 = vld [vmem:[%s9853_s1 + $0x244] sm:$0xf0]  ;;  %4356 = vmatpush.bf16.msrb.mxu3 %v6283_v16  ;;  %v376_v51 = vrot.slane %v7361_v11, 4 }
  0x60   : > { %v2676_v21 = vunpack.c.l.b16 %v873_v13  ;;  %v6410_v25 = vld [vmem:[%s9853_s1 + $0x2c0] sm:$0xf]  ;;  %v6347_v29 = vor.u32 %v6757_v24, %v6346_v18  ;;  %v194_v32 = vld [vmem:[%s7065_s15 + $0x58] sm:$0xf]  ;;  %v375_v35 = vsel %vm7083_vm7, %v367_v15, %v374_v23  ;;  %281 = vst [vmem:[#allocation2 + $0x2c] sm:$0x1] %v280_v27 }
  0x61   : > { %v883_v19 = vsel %vm7198_vm11, %v878_v53, %v882_v8  ;;  %v723_v34 = vld [vmem:[#allocation2 + $0x8c] sm:$0x1]  ;;  %v6411_v36 = vor.u32 %v6773_v30, %v6410_v25  ;;  %v195_v37 = vld [vmem:[%s7065_s15 + $0x5c] sm:$0xf]  ;;  %666 = vst [vmem:[#allocation2 + $0x28] sm:$0xf] %v375_v35 }
  0x62   : > { %v2677_v26 = vunpack.c.l.b16 %v883_v19  ;;  %v724_v39 = vsel %vm7032_vm3, %v512_v14, %v723_v34  ;;  %v663_v40 = vld [vmem:[#allocation2 + $0x24] sm:$0xf]  ;;  %4445 = vmatpush.bf16.msrb.mxu0 %v6347_v29  ;;  %v250_v41 = vld [vmem:[#allocation2 + $0x90] sm:$0x1]  ;;  %v514_v45 = vshrl.u32 %v194_v32, 16  ;;  %v522_v48 = vshrl.u32 %v195_v37, 16 }
  0x63   : > { %725 = vst [vmem:[#allocation2 + $0x8c] sm:$0x1] %v724_v39  ;;  %v784_v42 = vld [vmem:[#allocation2 + $0x88] sm:$0xf]  ;;  %v664_v43 = vsel %vm7095_vm8, %v366_v22, %v663_v40  ;;  %4534 = vmatpush.bf16.msrb.mxu1 %v6411_v36  ;;  %v251_v44 = vsel %vm7032_vm3, 0, %v250_v41  ;;  %v517_v60 = vshll.u32 %v194_v32, 16 }
  0x64   : > { %v7390_v38 = vpack.c.b16 %v2677_v26, %v2676_v21  ;;  %v1086_v49 = vshll.u32 %v784_v42, 16  ;;  %v1090_v50 = vshrl.u32 %v784_v42, 16  ;;  %665 = vst [vmem:[#allocation2 + $0x24] sm:$0xf] %v664_v43  ;;  %v516_v55 = vrot.slane %v514_v45, 7 }
  0x65   : > { %252 = vst [vmem:[#allocation2 + $0x90] sm:$0x1] %v251_v44  ;;  %v525_v61 = vshll.u32 %v195_v37, 16  ;;  %v6210_v1 = vld [vmem:[%s9853_s1 + $0x130] sm:$0xf]  ;;  %v7403_v5 = vrot.slane %v522_v48, 7 }
  0x66   : > { %9963 = vst [vmem:[#allocation8_spill] sm:$0xff] %v7390_v38  ;;  %4193 = vmatmul.bf16.gmra.mxu1 %v7390_v38  ;;  %v6647_v46 = vld [vmem:[#allocation2 + $0x84] sm:$0xff]  ;;  %v1088_v56 = vrot.slane %v1086_v49, 5  ;;  %v1092_v59 = vrot.slane %v1090_v50, 4  ;;  %v520_v4 = vrot.slane %v516_v55, 4  ;;  %v519_v17 = vor.u32 %v517_v60, %v516_v55 }
  0x67   : > { %v783_v47 = vld [vmem:[#allocation2 + $0x84] sm:$0xf]  ;;  %4149 = vmatmul.bf16.gmra.mxu2 %v6647_v46  ;;  %v667_v3 = vld [vmem:[#allocation2 + $0x2c] sm:$0x1]  ;;  %v6723_v6 = vld [vmem:[%s9853_s1 + $0x134] sm:$0xf0]  ;;  %v527_v18 = vor.u32 %v525_v61, %v7403_v5 }
  0x68   : > { %v1077_v53 = vshrl.u32 %v783_v47, 16  ;;  %v1080_v54 = vshll.u32 %v783_v47, 16  ;;  %v1093_v2 = vor.u32 %v1092_v59, %v1088_v56  ;;  %v668_v8 = vsel %vm7032_vm3, %v376_v51, %v667_v3  ;;  %v768_v11 = vld [vmem:[#allocation2 + $0x28] sm:$0xf]  ;;  %v306_v13 = vld [vmem:[#allocation2 + $0x98] sm:$0x1] }
  0x69   : > { %v6211_v12 = vor.u32 %v6723_v6, %v6210_v1  ;;  %v178_v14 = vld [vmem:[%s7065_s15 + $0x18] sm:$0xf]  ;;  %669 = vst [vmem:[#allocation2 + $0x2c] sm:$0x1] %v668_v8  ;;  %v894_v16 = vshll.u32 %v768_v11, 16  ;;  %v898_v23 = vshrl.u32 %v768_v11, 16  ;;  %v528_v27 = vsel %vm7083_vm7, %v520_v4, %v527_v18 }
  0x6a   : > { %v1079_v62 = vrot.slane %v1077_v53, 4  ;;  %v1082_v0 = vrot.slane %v1080_v54, 5  ;;  %v804_v15 = vld [vmem:[#allocation2 + $0x8c] sm:$0x1]  ;;  %v1094_v21 = vrot.slane %v1093_v2, 4  ;;  %v307_v29 = vsel %vm7043_vm4, 0, %v306_v13 }
  0x6b   : > { %v1096_v22 = vshll.u32 %v804_v15, 16  ;;  %4268 = vmatpush.bf16.msrb.mxu2 %v6211_v12  ;;  %v6639_v24 = vld [vmem:[#allocation2 + $0x24] sm:$0xff]  ;;  %v896_v26 = vrot.slane %v894_v16, 5  ;;  %v179_v30 = vld [vmem:[%s7065_s15 + $0x1c] sm:$0xf]  ;;  %v378_v32 = vshrl.u32 %v178_v14, 16 }
  0x6c   : > { %v1083_v33 = vor.u32 %v1082_v0, %v1079_v62  ;;  %v767_v25 = vld [vmem:[#allocation2 + $0x24] sm:$0xf]  ;;  %v726_v39 = vld [vmem:[#allocation2 + $0x90] sm:$0xf]  ;;  %4109 = vmatmul.bf16.gmra.mxu0 %v6639_v24  ;;  %v900_v41 = vrot.slane %v898_v23, 4  ;;  %v381_v53 = vshll.u32 %v178_v14, 16 }
  0x6d   : > { %v1098_v35 = vrot.slane %v1096_v22, 5  ;;  %v885_v36 = vshrl.u32 %v767_v25, 16  ;;  %v888_v37 = vshll.u32 %v767_v25, 16  ;;  %v727_v42 = vsel %vm7095_vm8, %v519_v17, %v726_v39  ;;  %729 = vst [vmem:[#allocation2 + $0x94] sm:$0xf] %v528_v27 }
  0x6e   : > { %v1084_v19 = vrot.slane %v1083_v33, 4  ;;  %v226_v43 = vld [vmem:[#allocation2 + $0x30] sm:$0x1]  ;;  %v380_v44 = vrot.slane %v378_v32, 7  ;;  %728 = vst [vmem:[#allocation2 + $0x90] sm:$0xf] %v727_v42  ;;  %v901_v51 = vor.u32 %v900_v41, %v896_v26 }
  0x6f   : > { %v1099_v45 = vsel %vm7198_vm11, %v1094_v21, %v1098_v35  ;;  %v887_v46 = vrot.slane %v885_v36, 4  ;;  %v890_v47 = vrot.slane %v888_v37, 5  ;;  %v227_v49 = vsel %vm7032_vm3, 0, %v226_v43  ;;  %308 = vst [vmem:[#allocation2 + $0x98] sm:$0x1] %v307_v29 }
  0x70   : > { %v1089_v34 = vsel %vm7198_vm11, %v1084_v19, %v1088_v56  ;;  %v2695_v50 = vunpack.c.l.b16 %v1099_v45  ;;  %v384_v54 = vrot.slane %v380_v44, 4  ;;  %v6274_v55 = vld [vmem:[%s9853_s1 + $0x1b0] sm:$0xf]  ;;  %v796_v48 = vld [vmem:[#allocation2 + $0x2c] sm:$0x1]  ;;  %v386_v59 = vshrl.u32 %v179_v30, 16 }
  0x71   : > { %v2694_v40 = vunpack.c.l.b16 %v1089_v34  ;;  %v891_v56 = vor.u32 %v890_v47, %v887_v46  ;;  %228 = vst [vmem:[#allocation2 + $0x30] sm:$0x1] %v227_v49  ;;  %v389_v60 = vshll.u32 %v179_v30, 16  ;;  %v902_v62 = vrot.slane %v901_v51, 4  ;;  %v6739_v1 = vld [vmem:[%s9853_s1 + $0x1b4] sm:$0xf0] }
  0x72   : > { %v904_v0 = vshll.u32 %v796_v48, 16  ;;  %v282_v2 = vld [vmem:[#allocation2 + $0x38] sm:$0x1]  ;;  %v388_v4 = vrot.slane %v386_v59, 7  ;;  %v6275_v6 = vor.u32 %v6739_v1, %v6274_v55  ;;  %v6338_v8 = vld [vmem:[%s9853_s1 + $0x230] sm:$0xf]  ;;  %v383_v13 = vor.u32 %v381_v53, %v380_v44 }
  0x73   : > { %v7428_v61 = vpack.c.b16 %v2695_v50, %v2694_v40  ;;  %v892_v3 = vrot.slane %v891_v56, 4  ;;  %v283_v33 = vsel %vm7043_vm4, 0, %v282_v2  ;;  %v529_v12 = vrot.slane %v7403_v5, 4  ;;  %v6755_v14 = vld [vmem:[%s9853_s1 + $0x234] sm:$0xf0] }
  0x74   : > { %v906_v11 = vrot.slane %v904_v0, 5  ;;  %284 = vst [vmem:[#allocation2 + $0x38] sm:$0x1] %v283_v33  ;;  %v786_v16 = vld [vmem:[#allocation2 + $0x94] sm:$0xf]  ;;  %v391_v17 = vor.u32 %v389_v60, %v388_v4  ;;  %v393_v18 = vrot.slane %v388_v4, 4  ;;  %4357 = vmatpush.bf16.msrb.mxu3 %v6275_v6  ;;  %v6339_v19 = vor.u32 %v6755_v14, %v6338_v8 }
  0x75   : > { %9964 = vst [vmem:[#allocation9_spill] sm:$0xff] %v7428_v61  ;;  %4238 = vmatmul.bf16.gmra.mxu3 %v7428_v61  ;;  %v897_v15 = vsel %vm7198_vm11, %v892_v3, %v896_v26  ;;  %v6402_v21 = vld [vmem:[%s9853_s1 + $0x2b0] sm:$0xf]  ;;  %v1110_v25 = vshll.u32 %v786_v16, 16  ;;  %v1114_v27 = vshrl.u32 %v786_v16, 16 }
  0x76   : > { %v907_v5 = vsel %vm7198_vm11, %v902_v62, %v906_v11  ;;  %v2678_v22 = vunpack.c.l.b16 %v897_v15  ;;  %v6648_v23 = vld [vmem:[#allocation2 + $0x90] sm:$0xff]  ;;  %v730_v30 = vld [vmem:[#allocation2 + $0x98] sm:$0x1]  ;;  %v392_v34 = vsel %vm7083_vm7, %v384_v54, %v391_v17  ;;  %4446 = vmatpush.bf16.msrb.mxu0 %v6339_v19  ;;  %v196_v46 = vld [vmem:[%s7065_s15 + $0x60] sm:$0xf] }
  0x77   : > { %v785_v24 = vld [vmem:[#allocation2 + $0x90] sm:$0xf]  ;;  %v2679_v29 = vunpack.c.l.b16 %v907_v5  ;;  %v6771_v35 = vld [vmem:[%s9853_s1 + $0x2b4] sm:$0xf0]  ;;  %4154 = vmatmul.bf16.gmra.mxu2 %v6648_v23  ;;  %v731_v36 = vsel %vm7032_vm3, %v529_v12, %v730_v30  ;;  %v1112_v37 = vrot.slane %v1110_v25, 5  ;;  %v1116_v39 = vrot.slane %v1114_v27, 4 }
  0x78   : > { %v1101_v26 = vshrl.u32 %v785_v24, 16  ;;  %v1104_v32 = vshll.u32 %v785_v24, 16  ;;  %v670_v40 = vld [vmem:[#allocation2 + $0x30] sm:$0xf]  ;;  %673 = vst [vmem:[#allocation2 + $0x34] sm:$0xf] %v392_v34  ;;  %v6403_v41 = vor.u32 %v6771_v35, %v6402_v21 }
  0x79   : > { %v7457_v42 = vpack.c.b16 %v2679_v29, %v2678_v22  ;;  %732 = vst [vmem:[#allocation2 + $0x98] sm:$0x1] %v731_v36  ;;  %v671_v45 = vsel %vm7095_vm8, %v383_v13, %v670_v40  ;;  %v197_v47 = vld [vmem:[%s7065_s15 + $0x64] sm:$0xf]  ;;  %v253_v49 = vld [vmem:[#allocation2 + $0x9c] sm:$0x1]  ;;  %v1117_v51 = vor.u32 %v1116_v39, %v1112_v37 }
  0x7a   : > { %v1103_v43 = vrot.slane %v1101_v26, 4  ;;  %v1106_v44 = vrot.slane %v1104_v32, 5  ;;  %672 = vst [vmem:[#allocation2 + $0x30] sm:$0xf] %v671_v45  ;;  %4535 = vmatpush.bf16.msrb.mxu1 %v6403_v41  ;;  %v254_v54 = vsel %vm7032_vm3, 0, %v253_v49  ;;  %v531_v55 = vshrl.u32 %v196_v46, 16 }
  0x7b   : > { %9965 = vst [vmem:[#allocation10_spill] sm:$0xff] %v7457_v42  ;;  %4198 = vmatmul.bf16.gmra.mxu1 %v7457_v42  ;;  %v674_v53 = vld [vmem:[#allocation2 + $0x38] sm:$0x1]  ;;  %v534_v56 = vshll.u32 %v196_v46, 16  ;;  %v539_v59 = vshrl.u32 %v197_v47, 16  ;;  %v542_v60 = vshll.u32 %v197_v47, 16 }
  0x7c   : > { %v1107_v50 = vor.u32 %v1106_v44, %v1103_v43  ;;  %v675_v48 = vsel %vm7032_vm3, %v393_v18, %v674_v53  ;;  %255 = vst [vmem:[#allocation2 + $0x9c] sm:$0x1] %v254_v54  ;;  %v533_v0 = vrot.slane %v531_v55, 7  ;;  %v6202_v1 = vld [vmem:[%s9853_s1 + $0x120] sm:$0xf]  ;;  %v1118_v33 = vrot.slane %v1117_v51, 4 }
  0x7d   : > { %676 = vst [vmem:[#allocation2 + $0x38] sm:$0x1] %v675_v48  ;;  %v7471_v2 = vrot.slane %v539_v59, 7  ;;  %v6721_v3 = vld [vmem:[%s9853_s1 + $0x124] sm:$0xf0]  ;;  %v6893_v31 = vld [vmem:[#allocation2 + $0x90] sm:$0xff] }
  0x7e   : > { %v1108_v62 = vrot.slane %v1107_v50, 4  ;;  %v309_v4 = vld [vmem:[#allocation2 + $0xa4] sm:$0x1]  ;;  %v537_v11 = vrot.slane %v533_v0, 4  ;;  %v6203_v12 = vor.u32 %v6721_v3, %v6202_v1  ;;  %v536_v16 = vor.u32 %v534_v56, %v533_v0  ;;  %v180_v18 = vld [vmem:[%s7065_s15 + $0x20] sm:$0xf] }
  0x7f   : > { %v770_v8 = vld [vmem:[#allocation2 + $0x34] sm:$0xf]  ;;  %v544_v17 = vor.u32 %v542_v60, %v7471_v2  ;;  %v546_v22 = vrot.slane %v7471_v2, 4  ;;  %v310_v23 = vsel %vm7043_vm4, 0, %v309_v4  ;;  %v181_v30 = vld [vmem:[%s7065_s15 + $0x24] sm:$0xf] }
  0x80   : > { %v1113_v6 = vsel %vm7198_vm11, %v1108_v62, %v1112_v37  ;;  %v805_v13 = vld [vmem:[#allocation2 + $0x98] sm:$0x1]  ;;  %v918_v14 = vshll.u32 %v770_v8, 16  ;;  %v922_v15 = vshrl.u32 %v770_v8, 16  ;;  %4269 = vmatpush.bf16.msrb.mxu2 %v6203_v12  ;;  %311 = vst [vmem:[#allocation2 + $0xa4] sm:$0x1] %v310_v23 }
  0x81   : > { %v1120_v19 = vshll.u32 %v805_v13, 16  ;;  %v6640_v21 = vld [vmem:[#allocation2 + $0x30] sm:$0xff]  ;;  %v2696_v32 = vunpack.c.l.b16 %v1113_v6  ;;  %v545_v34 = vsel %vm7083_vm7, %v537_v11, %v544_v17  ;;  %v229_v36 = vld [vmem:[#allocation2 + $0x3c] sm:$0x1]  ;;  %v395_v37 = vshrl.u32 %v180_v18, 16 }
  0x82   : > { %v769_v5 = vld [vmem:[#allocation2 + $0x30] sm:$0xf]  ;;  %v920_v27 = vrot.slane %v918_v14, 5  ;;  %v924_v29 = vrot.slane %v922_v15, 4  ;;  %4114 = vmatmul.bf16.gmra.mxu0 %v6640_v21  ;;  %736 = vst [vmem:[#allocation2 + $0xa0] sm:$0xf] %v545_v34 }
  0x83   : > { %v909_v24 = vshrl.u32 %v769_v5, 16  ;;  %v912_v25 = vshll.u32 %v769_v5, 16  ;;  %v1122_v26 = vrot.slane %v1120_v19, 5  ;;  %v733_v35 = vld [vmem:[#allocation2 + $0x9c] sm:$0xf]  ;;  %v230_v47 = vsel %vm7032_vm3, 0, %v229_v36 }
  0x84   : > { %v797_v39 = vld [vmem:[#allocation2 + $0x38] sm:$0x1]  ;;  %v925_v43 = vor.u32 %v924_v29, %v920_v27  ;;  %v734_v44 = vsel %vm7095_vm8, %v536_v16, %v733_v35  ;;  %v397_v49 = vrot.slane %v395_v37, 7  ;;  %231 = vst [vmem:[#allocation2 + $0x3c] sm:$0x1] %v230_v47  ;;  %v398_v54 = vshll.u32 %v180_v18, 16 }
  0x85   : > { %v911_v40 = vrot.slane %v909_v24, 4  ;;  %v914_v41 = vrot.slane %v912_v25, 5  ;;  %v1123_v45 = vsel %vm7198_vm11, %v1118_v33, %v1122_v26  ;;  %v928_v46 = vshll.u32 %v797_v39, 16  ;;  %735 = vst [vmem:[#allocation2 + $0x9c] sm:$0xf] %v734_v44 }
  0x86   : > { %v2697_v50 = vunpack.c.l.b16 %v1123_v45  ;;  %v926_v53 = vrot.slane %v925_v43, 4  ;;  %v6266_v55 = vld [vmem:[%s9853_s1 + $0x1a0] sm:$0xf]  ;;  %v403_v56 = vshrl.u32 %v181_v30, 16  ;;  %v406_v59 = vshll.u32 %v181_v30, 16 }
  0x87   : > { %v915_v51 = vor.u32 %v914_v41, %v911_v40  ;;  %v930_v48 = vrot.slane %v928_v46, 5  ;;  %v6737_v60 = vld [vmem:[%s9853_s1 + $0x1a4] sm:$0xf0]  ;;  %v401_v1 = vrot.slane %v397_v49, 4  ;;  %v285_v3 = vld [vmem:[#allocation2 + $0x44] sm:$0x1]  ;;  %v400_v8 = vor.u32 %v398_v54, %v397_v49 }
  0x88   : > { %v7498_v62 = vpack.c.b16 %v2697_v50, %v2696_v32  ;;  %v6267_v2 = vor.u32 %v6737_v60, %v6266_v55  ;;  %v6330_v4 = vld [vmem:[%s9853_s1 + $0x220] sm:$0xf]  ;;  %v737_v33 = vld [vmem:[#allocation2 + $0xa4] sm:$0x1]  ;;  %v405_v11 = vrot.slane %v403_v56, 7  ;;  %v286_v12 = vsel %vm7043_vm4, 0, %v285_v3 }
  0x89   : > { %v916_v0 = vrot.slane %v915_v51, 4  ;;  %v931_v6 = vsel %vm7198_vm11, %v926_v53, %v930_v48  ;;  %v6753_v13 = vld [vmem:[%s9853_s1 + $0x224] sm:$0xf0]  ;;  %v738_v16 = vsel %vm7032_vm3, %v546_v22, %v737_v33  ;;  %287 = vst [vmem:[#allocation2 + $0x44] sm:$0x1] %v286_v12 }
  0x8a   : > { %9966 = vst [vmem:[#allocation11_spill] sm:$0xff] %v7498_v62  ;;  %4243 = vmatmul.bf16.gmra.mxu3 %v7498_v62  ;;  %v2681_v15 = vunpack.c.l.b16 %v931_v6  ;;  %v6331_v17 = vor.u32 %v6753_v13, %v6330_v4  ;;  %v6394_v18 = vld [vmem:[%s9853_s1 + $0x2a0] sm:$0xf]  ;;  %v6769_v19 = vld [vmem:[%s9853_s1 + $0x2a4] sm:$0xf0]  ;;  %v408_v23 = vor.u32 %v406_v59, %v405_v11  ;;  %v410_v30 = vrot.slane %v405_v11, 4 }
  0x8b   : > { %v921_v14 = vsel %vm7198_vm11, %v916_v0, %v920_v27  ;;  %739 = vst [vmem:[#allocation2 + $0xa4] sm:$0x1] %v738_v16  ;;  %v788_v5 = vld [vmem:[#allocation2 + $0xa0] sm:$0xf]  ;;  %4358 = vmatpush.bf16.msrb.mxu3 %v6267_v2  ;;  %v6395_v24 = vor.u32 %v6769_v19, %v6394_v18  ;;  %v677_v36 = vld [vmem:[#allocation2 + $0x3c] sm:$0xf] }
  0x8c   : > { %v2680_v21 = vunpack.c.l.b16 %v921_v14  ;;  %v6649_v25 = vld [vmem:[#allocation2 + $0x9c] sm:$0xff]  ;;  %v1134_v22 = vshll.u32 %v788_v5, 16  ;;  %v1138_v29 = vshrl.u32 %v788_v5, 16  ;;  %4447 = vmatpush.bf16.msrb.mxu0 %v6331_v17  ;;  %v409_v35 = vsel %vm7083_vm7, %v401_v1, %v408_v23  ;;  %v198_v37 = vld [vmem:[%s7065_s15 + $0x68] sm:$0xf] }
  0x8d   : > { %v787_v27 = vld [vmem:[#allocation2 + $0x9c] sm:$0xf]  ;;  %4536 = vmatpush.bf16.msrb.mxu1 %v6395_v24  ;;  %4159 = vmatmul.bf16.gmra.mxu2 %v6649_v25  ;;  %v678_v41 = vsel %vm7095_vm8, %v400_v8, %v677_v36  ;;  %680 = vst [vmem:[#allocation2 + $0x40] sm:$0xf] %v409_v35  ;;  %v199_v43 = vld [vmem:[%s7065_s15 + $0x6c] sm:$0xf] }
  0x8e   : > { %v7521_v26 = vpack.c.b16 %v2681_v15, %v2680_v21  ;;  %v1125_v32 = vshrl.u32 %v787_v27, 16  ;;  %v1128_v34 = vshll.u32 %v787_v27, 16  ;;  %v1136_v39 = vrot.slane %v1134_v22, 5  ;;  %679 = vst [vmem:[#allocation2 + $0x3c] sm:$0xf] %v678_v41 }
  0x8f   : > { %v1140_v40 = vrot.slane %v1138_v29, 4  ;;  %v256_v46 = vld [vmem:[#allocation2 + $0xa8] sm:$0x1]  ;;  %v548_v50 = vshrl.u32 %v198_v37, 16  ;;  %v551_v51 = vshll.u32 %v198_v37, 16  ;;  %v556_v48 = vshrl.u32 %v199_v43, 16 }
  0x90   : > { %9967 = vst [vmem:[#allocation12_spill] sm:$0xff] %v7521_v26  ;;  %4203 = vmatmul.bf16.gmra.mxu1 %v7521_v26  ;;  %v1127_v44 = vrot.slane %v1125_v32, 4  ;;  %v1130_v45 = vrot.slane %v1128_v34, 5  ;;  %v257_v49 = vsel %vm7032_vm3, 0, %v256_v46  ;;  %v6194_v53 = vld [vmem:[%s9853_s1 + $0x110] sm:$0xf] }
  0x91   : > { %v1141_v47 = vor.u32 %v1140_v40, %v1136_v39  ;;  %v681_v55 = vld [vmem:[#allocation2 + $0x44] sm:$0x1]  ;;  %258 = vst [vmem:[#allocation2 + $0xa8] sm:$0x1] %v257_v49  ;;  %v559_v56 = vshll.u32 %v199_v43, 16  ;;  %v550_v1 = vrot.slane %v548_v50, 7 }
  0x92   : > { %v1131_v54 = vor.u32 %v1130_v45, %v1127_v44  ;;  %v806_v59 = vld [vmem:[#allocation2 + $0xa4] sm:$0x1]  ;;  %v682_v0 = vsel %vm7032_vm3, %v410_v30, %v681_v55  ;;  %v6719_v2 = vld [vmem:[%s9853_s1 + $0x114] sm:$0xf0]  ;;  %v7540_v6 = vrot.slane %v556_v48, 7 }
  0x93   : > { %v1142_v60 = vrot.slane %v1141_v47, 4  ;;  %v1144_v4 = vshll.u32 %v806_v59, 16  ;;  %683 = vst [vmem:[#allocation2 + $0x44] sm:$0x1] %v682_v0  ;;  %v6195_v33 = vor.u32 %v6719_v2, %v6194_v53  ;;  %v553_v8 = vor.u32 %v551_v51, %v550_v1  ;;  %v312_v12 = vld [vmem:[#allocation2 + $0xb0] sm:$0x1] }
  0x94   : > { %v1132_v3 = vrot.slane %v1131_v54, 4  ;;  %v554_v11 = vrot.slane %v550_v1, 4  ;;  %v772_v15 = vld [vmem:[#allocation2 + $0x40] sm:$0xf]  ;;  %v561_v16 = vor.u32 %v559_v56, %v7540_v6  ;;  %v563_v17 = vrot.slane %v7540_v6, 4 }
  0x95   : > { %v1146_v14 = vrot.slane %v1144_v4, 5  ;;  %4270 = vmatpush.bf16.msrb.mxu2 %v6195_v33  ;;  %v182_v18 = vld [vmem:[%s7065_s15 + $0x28] sm:$0xf]  ;;  %v6641_v21 = vld [vmem:[#allocation2 + $0x3c] sm:$0xff]  ;;  %v942_v23 = vshll.u32 %v772_v15, 16  ;;  %v946_v24 = vshrl.u32 %v772_v15, 16 }
  0x96   : > { %v1137_v13 = vsel %vm7198_vm11, %v1132_v3, %v1136_v39  ;;  %v771_v5 = vld [vmem:[#allocation2 + $0x3c] sm:$0xf]  ;;  %v313_v25 = vsel %vm7043_vm4, 0, %v312_v12  ;;  %v183_v27 = vld [vmem:[%s7065_s15 + $0x2c] sm:$0xf]  ;;  %v562_v32 = vsel %vm7083_vm7, %v554_v11, %v561_v16  ;;  %4119 = vmatmul.bf16.gmra.mxu0 %v6641_v21  ;;  %v412_v50 = vshrl.u32 %v182_v18, 16 }
  0x97   : > { %v2698_v19 = vunpack.c.l.b16 %v1137_v13  ;;  %v1147_v22 = vsel %vm7198_vm11, %v1142_v60, %v1146_v14  ;;  %v933_v29 = vshrl.u32 %v771_v5, 16  ;;  %v936_v30 = vshll.u32 %v771_v5, 16  ;;  %314 = vst [vmem:[#allocation2 + $0xb0] sm:$0x1] %v313_v25  ;;  %v232_v34 = vld [vmem:[#allocation2 + $0x48] sm:$0x1] }
  0x98   : > { %v2699_v35 = vunpack.c.l.b16 %v1147_v22  ;;  %v944_v36 = vrot.slane %v942_v23, 5  ;;  %v948_v37 = vrot.slane %v946_v24, 4  ;;  %v740_v39 = vld [vmem:[#allocation2 + $0xa8] sm:$0xf]  ;;  %743 = vst [vmem:[#allocation2 + $0xac] sm:$0xf] %v562_v32 }
  0x99   : > { %v935_v40 = vrot.slane %v933_v29, 4  ;;  %v938_v41 = vrot.slane %v936_v30, 5  ;;  %v741_v43 = vsel %vm7095_vm8, %v553_v8, %v740_v39  ;;  %v233_v44 = vsel %vm7032_vm3, 0, %v232_v34  ;;  %v6258_v45 = vld [vmem:[%s9853_s1 + $0x190] sm:$0xf] }
  0x9a   : > { %v7561_v46 = vpack.c.b16 %v2699_v35, %v2698_v19  ;;  %v798_v47 = vld [vmem:[#allocation2 + $0x44] sm:$0x1]  ;;  %v949_v49 = vor.u32 %v948_v37, %v944_v36  ;;  %742 = vst [vmem:[#allocation2 + $0xa8] sm:$0xf] %v741_v43  ;;  %v415_v51 = vshll.u32 %v182_v18, 16  ;;  %v420_v55 = vshrl.u32 %v183_v27, 16 }
  0x9b   : > { %v939_v53 = vor.u32 %v938_v41, %v935_v40  ;;  %v952_v54 = vshll.u32 %v798_v47, 16  ;;  %234 = vst [vmem:[#allocation2 + $0x48] sm:$0x1] %v233_v44  ;;  %v423_v48 = vshll.u32 %v183_v27, 16  ;;  %v414_v59 = vrot.slane %v412_v50, 7 }
  0x9c   : > { %9968 = vst [vmem:[#allocation13_spill] sm:$0xff] %v7561_v46  ;;  %4248 = vmatmul.bf16.gmra.mxu3 %v7561_v46  ;;  %v950_v56 = vrot.slane %v949_v49, 4  ;;  %v6735_v60 = vld [vmem:[%s9853_s1 + $0x194] sm:$0xf0]  ;;  %v288_v0 = vld [vmem:[#allocation2 + $0x50] sm:$0x1] }
  0x9d   : > { %v940_v1 = vrot.slane %v939_v53, 4  ;;  %v954_v2 = vrot.slane %v952_v54, 5  ;;  %v7567_v3 = vrot.slane %v420_v55, 7  ;;  %v6259_v4 = vor.u32 %v6735_v60, %v6258_v45  ;;  %v6322_v6 = vld [vmem:[%s9853_s1 + $0x210] sm:$0xf] }
  0x9e   : > { %v744_v33 = vld [vmem:[#allocation2 + $0xb0] sm:$0x1]  ;;  %v417_v8 = vor.u32 %v415_v51, %v414_v59  ;;  %v418_v11 = vrot.slane %v414_v59, 4  ;;  %v289_v12 = vsel %vm7043_vm4, 0, %v288_v0  ;;  %v6751_v13 = vld [vmem:[%s9853_s1 + $0x214] sm:$0xf0] }
  0x9f   : > { %v945_v14 = vsel %vm7198_vm11, %v940_v1, %v944_v36  ;;  %v955_v15 = vsel %vm7198_vm11, %v950_v56, %v954_v2  ;;  %v745_v16 = vsel %vm7032_vm3, %v563_v17, %v744_v33  ;;  %v790_v18 = vld [vmem:[#allocation2 + $0xac] sm:$0xf]  ;;  %v425_v19 = vor.u32 %v423_v48, %v7567_v3  ;;  %4359 = vmatpush.bf16.msrb.mxu3 %v6259_v4  ;;  %v6386_v21 = vld [vmem:[%s9853_s1 + $0x290] sm:$0xf]  ;;  %v6767_v5 = vld [vmem:[%s9853_s1 + $0x294] sm:$0xf0] }
  0xa0   : > { %v2682_v23 = vunpack.c.l.b16 %v945_v14  ;;  %v2683_v24 = vunpack.c.l.b16 %v955_v15  ;;  %746 = vst [vmem:[#allocation2 + $0xb0] sm:$0x1] %v745_v16  ;;  %v1158_v25 = vshll.u32 %v790_v18, 16  ;;  %v1162_v27 = vshrl.u32 %v790_v18, 16  ;;  %v200_v22 = vld [vmem:[%s7065_s15 + $0x70] sm:$0xf] }
  0xa1   : > { %v6650_v29 = vld [vmem:[#allocation2 + $0xa8] sm:$0xff]  ;;  %v426_v30 = vsel %vm7083_vm7, %v418_v11, %v425_v19  ;;  %v427_v32 = vrot.slane %v7567_v3, 4  ;;  %290 = vst [vmem:[#allocation2 + $0x50] sm:$0x1] %v289_v12  ;;  %v6323_v34 = vor.u32 %v6751_v13, %v6322_v6  ;;  %v6387_v35 = vor.u32 %v6767_v5, %v6386_v21  ;;  %v201_v45 = vld [vmem:[%s7065_s15 + $0x74] sm:$0xf] }
  0xa2   : > { %v789_v17 = vld [vmem:[#allocation2 + $0xa8] sm:$0xf]  ;;  %v7594_v36 = vpack.c.b16 %v2683_v24, %v2682_v23  ;;  %v1160_v40 = vrot.slane %v1158_v25, 5  ;;  %4164 = vmatmul.bf16.gmra.mxu2 %v6650_v29  ;;  %v1164_v43 = vrot.slane %v1162_v27, 4  ;;  %687 = vst [vmem:[#allocation2 + $0x4c] sm:$0xf] %v426_v30 }
  0xa3   : > { %v1149_v37 = vshrl.u32 %v789_v17, 16  ;;  %v1152_v39 = vshll.u32 %v789_v17, 16  ;;  %v684_v41 = vld [vmem:[#allocation2 + $0x48] sm:$0xf]  ;;  %4448 = vmatpush.bf16.msrb.mxu0 %v6323_v34  ;;  %v565_v47 = vshrl.u32 %v200_v22, 16  ;;  %4537 = vmatpush.bf16.msrb.mxu1 %v6387_v35  ;;  %v568_v48 = vshll.u32 %v200_v22, 16 }
  0xa4   : > { %9969 = vst [vmem:[#allocation14_spill] sm:$0xff] %v7594_v36  ;;  %v685_v44 = vsel %vm7095_vm8, %v417_v8, %v684_v41  ;;  %4208 = vmatmul.bf16.gmra.mxu1 %v7594_v36  ;;  %v259_v51 = vld [vmem:[#allocation2 + $0xb4] sm:$0x1]  ;;  %v1165_v53 = vor.u32 %v1164_v43, %v1160_v40  ;;  %v6186_v56 = vld [vmem:[%s9853_s1 + $0x100] sm:$0xf]  ;;  %v573_v60 = vshrl.u32 %v201_v45, 16 }
  0xa5   : > { %v1151_v49 = vrot.slane %v1149_v37, 4  ;;  %v1154_v50 = vrot.slane %v1152_v39, 5  ;;  %686 = vst [vmem:[#allocation2 + $0x48] sm:$0xf] %v685_v44  ;;  %v260_v54 = vsel %vm7032_vm3, 0, %v259_v51  ;;  %v567_v55 = vrot.slane %v565_v47, 7 }
  0xa6   : > { %261 = vst [vmem:[#allocation2 + $0xb4] sm:$0x1] %v260_v54  ;;  %v576_v0 = vshll.u32 %v201_v45, 16  ;;  %v6717_v1 = vld [vmem:[%s9853_s1 + $0x104] sm:$0xf0]  ;;  %v1166_v3 = vrot.slane %v1165_v53, 4 }
  0xa7   : > { %v1155_v59 = vor.u32 %v1154_v50, %v1151_v49  ;;  %v807_v2 = vld [vmem:[#allocation2 + $0xb0] sm:$0x1]  ;;  %v571_v4 = vrot.slane %v567_v55, 4  ;;  %v6187_v6 = vor.u32 %v6717_v1, %v6186_v56  ;;  %v315_v33 = vld [vmem:[#allocation2 + $0xbc] sm:$0x1]  ;;  %v575_v13 = vrot.slane %v573_v60, 7 }
  0xa8   : > { %v1168_v11 = vshll.u32 %v807_v2, 16  ;;  %v688_v12 = vld [vmem:[#allocation2 + $0x50] sm:$0x1]  ;;  %v316_v14 = vsel %vm7043_vm4, 0, %v315_v33  ;;  %v570_v16 = vor.u32 %v568_v48, %v567_v55  ;;  %v185_v30 = vld [vmem:[%s7065_s15 + $0x34] sm:$0xf] }
  0xa9   : > { %v1156_v8 = vrot.slane %v1155_v59, 4  ;;  %v689_v15 = vsel %vm7032_vm3, %v427_v32, %v688_v12  ;;  %4271 = vmatpush.bf16.msrb.mxu2 %v6187_v6  ;;  %317 = vst [vmem:[#allocation2 + $0xbc] sm:$0x1] %v316_v14  ;;  %v184_v18 = vld [vmem:[%s7065_s15 + $0x30] sm:$0xf]  ;;  %v578_v23 = vor.u32 %v576_v0, %v575_v13  ;;  %v580_v24 = vrot.slane %v575_v13, 4 }
  0xaa   : > { %v1170_v21 = vrot.slane %v1168_v11, 5  ;;  %690 = vst [vmem:[#allocation2 + $0x50] sm:$0x1] %v689_v15  ;;  %v7615_v5 = vld [vmem:[#allocation2 + $0x4c] sm:$0xf]  ;;  %v429_v32 = vshrl.u32 %v184_v18, 16 }
  0xab   : > { %v1161_v19 = vsel %vm7198_vm11, %v1156_v8, %v1160_v40  ;;  %v966_v29 = vshll.u32 %v7615_v5, 16  ;;  %v970_v17 = vshrl.u32 %v7615_v5, 16  ;;  %v579_v39 = vsel %vm7083_vm7, %v571_v4, %v578_v23  ;;  %v235_v40 = vld [vmem:[#allocation2 + $0x54] sm:$0x1]  ;;  %v6250_v41 = vld [vmem:[%s9853_s1 + $0x180] sm:$0xf] }
  0xac   : > { %v2700_v25 = vunpack.c.l.b16 %v1161_v19  ;;  %v6642_v27 = vld [vmem:[#allocation2 + $0x48] sm:$0xff]  ;;  %v1171_v34 = vsel %vm7198_vm11, %v1166_v3, %v1170_v21  ;;  %750 = vst [vmem:[#allocation2 + $0xb8] sm:$0xf] %v579_v39  ;;  %v236_v53 = vsel %vm7032_vm3, 0, %v235_v40  ;;  %v431_v56 = vrot.slane %v429_v32, 7 }
  0xad   : > { %v773_v22 = vld [vmem:[#allocation2 + $0x48] sm:$0xf]  ;;  %v2701_v43 = vunpack.c.l.b16 %v1171_v34  ;;  %4124 = vmatmul.bf16.gmra.mxu0 %v6642_v27  ;;  %v968_v44 = vrot.slane %v966_v29, 5  ;;  %v972_v45 = vrot.slane %v970_v17, 4  ;;  %v747_v47 = vld [vmem:[#allocation2 + $0xb4] sm:$0xf]  ;;  %v4095_v17 = vpop.f32.mrf.mxu0 }
  0xae   : > { %v957_v35 = vshrl.u32 %v773_v22, 16  ;;  %v960_v37 = vshll.u32 %v773_v22, 16  ;;  %v748_v51 = vsel %vm7095_vm8, %v570_v16, %v747_v47  ;;  %v6733_v54 = vld [vmem:[%s9853_s1 + $0x184] sm:$0xf0]  ;;  %v432_v59 = vshll.u32 %v184_v18, 16 }
  0xaf   : > { %v7634_v55 = vpack.c.b16 %v2701_v43, %v2700_v25  ;;  %v973_v48 = vor.u32 %v972_v45, %v968_v44  ;;  %749 = vst [vmem:[#allocation2 + $0xb4] sm:$0xf] %v748_v51  ;;  %v291_v60 = vld [vmem:[#allocation2 + $0x5c] sm:$0x1]  ;;  %v437_v2 = vshrl.u32 %v185_v30, 16  ;;  %v440_v3 = vshll.u32 %v185_v30, 16 }
  0xb0   : > { %v959_v49 = vrot.slane %v957_v35, 4  ;;  %v962_v50 = vrot.slane %v960_v37, 5  ;;  %v751_v1 = vld [vmem:[#allocation2 + $0xbc] sm:$0x1]  ;;  %237 = vst [vmem:[#allocation2 + $0x54] sm:$0x1] %v236_v53  ;;  %v6251_v4 = vor.u32 %v6733_v54, %v6250_v41  ;;  %v434_v18 = vor.u32 %v432_v59, %v431_v56  ;;  %v4135_v30 = vpop.f32.mrf.mxu2 }
  0xb1   : > { %9970 = vst [vmem:[#allocation15_spill] sm:$0xff] %v7634_v55  ;;  %4253 = vmatmul.bf16.gmra.mxu3 %v7634_v55  ;;  %v7637_v6 = vld [vmem:[#allocation2 + $0x50] sm:$0x1]  ;;  %v974_v33 = vrot.slane %v973_v48, 4  ;;  %v752_v8 = vsel %vm7032_vm3, %v580_v24, %v751_v1  ;;  %v435_v11 = vrot.slane %v431_v56, 4  ;;  %v439_v15 = vrot.slane %v437_v2, 7 }
  0xb2   : > { %v963_v0 = vor.u32 %v962_v50, %v959_v49  ;;  %v6314_v12 = vld [vmem:[%s9853_s1 + $0x200] sm:$0xf]  ;;  %v976_v14 = vshll.u32 %v7637_v6, 16  ;;  %753 = vst [vmem:[#allocation2 + $0xbc] sm:$0x1] %v752_v8  ;;  %4360 = vmatpush.bf16.msrb.mxu3 %v6251_v4  ;;  %v292_v16 = vsel %vm7043_vm4, 0, %v291_v60 }
  0xb3   : > { %293 = vst [vmem:[#allocation2 + $0x5c] sm:$0x1] %v292_v16  ;;  %v6749_v19 = vld [vmem:[%s9853_s1 + $0x204] sm:$0xf0]  ;;  %v6378_v21 = vld [vmem:[%s9853_s1 + $0x280] sm:$0xf]  ;;  %v442_v27 = vor.u32 %v440_v3, %v439_v15 }
  0xb4   : > { %v964_v13 = vrot.slane %v963_v0, 4  ;;  %v978_v24 = vrot.slane %v976_v14, 5  ;;  %v792_v25 = vld [vmem:[#allocation2 + $0xb8] sm:$0xf]  ;;  %v444_v22 = vrot.slane %v439_v15, 4  ;;  %v6315_v37 = vor.u32 %v6749_v19, %v6314_v12 }
  0xb5   : > { %v6765_v29 = vld [vmem:[%s9853_s1 + $0x284] sm:$0xf0]  ;;  %v1182_v34 = vshll.u32 %v792_v25, 16  ;;  %v1186_v35 = vshrl.u32 %v792_v25, 16  ;;  %v3360_v39 = vld [vmem:[%s9854_s2] sm:$0x3]  ;;  %v443_v45 = vsel %vm7083_vm7, %v435_v11, %v442_v27 }
  0xb6   : > { %v969_v23 = vsel %vm7198_vm11, %v964_v13, %v968_v44  ;;  %v1196_v40 = vld [vmem:[#allocation2] sm:$0xe]  ;;  %v979_v41 = vsel %vm7198_vm11, %v974_v33, %v978_v24  ;;  %v6651_v43 = vld [vmem:[#allocation2 + $0xb4] sm:$0xff]  ;;  %v6379_v47 = vor.u32 %v6765_v29, %v6378_v21  ;;  %v7665_v49 = vperm.slane %v3360_v39, 0  ;;  %v6498_v50 = vld [vmem:[%s9853_s1 + $0x370] sm:$0xf]  ;;  %4449 = vmatpush.bf16.msrb.mxu0 %v6315_v37 }
  0xb7   : > { %v2684_v32 = vunpack.c.l.b16 %v969_v23  ;;  %v791_v44 = vld [vmem:[#allocation2 + $0xb4] sm:$0xf]  ;;  %v2685_v51 = vunpack.c.l.b16 %v979_v41  ;;  %v1184_v48 = vrot.slane %v1182_v34, 5  ;;  %4169 = vmatmul.bf16.gmra.mxu2 %v6651_v43  ;;  %v1188_v59 = vrot.slane %v1186_v35, 4  ;;  %694 = vst [vmem:[#allocation2 + $0x58] sm:$0xf] %v443_v45 }
  0xb8   : > { %v1173_v53 = vshrl.u32 %v791_v44, 16  ;;  %v1176_v54 = vshll.u32 %v791_v44, 16  ;;  %v691_v56 = vld [vmem:[#allocation2 + $0x54] sm:$0xf]  ;;  %4538 = vmatpush.bf16.msrb.mxu1 %v6379_v47  ;;  %v4096_v0 = vadd.f32 %v4095_v17, %v7665_v49  ;;  %v6795_v1 = vld [vmem:[%s9853_s1 + $0x374] sm:$0xf0]  ;;  %v4184_v25 = vpop.f32.mrf.mxu1 }
  0xb9   : > { %v692_v60 = vsel %vm7095_vm8, %v434_v18, %v691_v56  ;;  %v7676_v2 = vpack.c.b16 %v2685_v51, %v2684_v32  ;;  %v808_v3 = vld [vmem:[#allocation2 + $0xbc] sm:$0x1]  ;;  %v6499_v8 = vor.u32 %v6795_v1, %v6498_v50  ;;  %v1189_v11 = vor.u32 %v1188_v59, %v1184_v48  ;;  %v6853_v19 = vld [vmem:[#allocation2 + $0x4] sm:$0xf]  ;;  %v6854_v23 = vld [vmem:[#allocation2 + $0x8] sm:$0x1]  ;;  %v7696_v50 = vpop.f32.mrf.mxu0  ;;  %v7698_v51 = vpop.f32.mrf.mxu2 }
  0xba   : > { %v1175_v4 = vrot.slane %v1173_v53, 4  ;;  %v1178_v33 = vrot.slane %v1176_v54, 5  ;;  %693 = vst [vmem:[#allocation2 + $0x54] sm:$0xf] %v692_v60  ;;  %v1192_v12 = vshll.u32 %v808_v3, 16  ;;  %v5816_v14 = vrot.slane %v1196_v40, 9 }
  0xbb   : > { %9971 = vst [vmem:[#allocation16_spill] sm:$0xff] %v7676_v2  ;;  %v695_v13 = vld [vmem:[#allocation2 + $0x5c] sm:$0x1]  ;;  %4213 = vmatmul.bf16.gmra.mxu1 %v7676_v2  ;;  %v1265_v21 = vrot.slane %v6853_v19, 5  ;;  %v1268_v24 = vrot.slane %v6854_v23, 5  ;;  %4620 = vmatpush.bf16.msra.mxu2 %v6499_v8  ;;  %v1190_v17 = vrot.slane %v1189_v11, 4  ;;  %v7688_v34 = vadd.f32 %v4184_v25, %v4096_v0 }
  0xbc   : > { %v1179_v15 = vor.u32 %v1178_v33, %v1175_v4  ;;  %v696_v16 = vsel %vm7032_vm3, %v444_v22, %v695_v13  ;;  %v1375_v27 = vld [vmem:[#allocation2 + $0xc] sm:$0xf]  ;;  %v7686_v29 = vld [vmem:[#allocation2 + $0x10] sm:$0xf]  ;;  %v1194_v32 = vrot.slane %v1192_v12, 5  ;;  %v4136_v22 = vadd.f32 %v4135_v30, %v7665_v49  ;;  %v4224_v35 = vpop.f32.mrf.mxu3  ;;  %9974 = vst [vmem:[#allocation17_spill] sm:$0xff] %v7698_v51 }
  0xbd   : > { %697 = vst [vmem:[#allocation2 + $0x5c] sm:$0x1] %v696_v16  ;;  %v1266_v39 = vsel %vm7682_vm14, %v5816_v14, %v1265_v21  ;;  %v1267_v40 = vrot.slane %v1265_v21, 4  ;;  %v1424_v41 = vshrl.u32 %v1375_v27, 16  ;;  %v1427_v45 = vshll.u32 %v1375_v27, 16 }
  0xbe   : > { %v1180_v37 = vrot.slane %v1179_v15, 4  ;;  %v1195_v43 = vsel %vm7198_vm11, %v1190_v17, %v1194_v32  ;;  %v2736_v44 = vunpack.c.l.b16 %v1266_v39  ;;  %v1433_v47 = vshll.u32 %v7686_v29, 16  ;;  %v7702_v54 = vld [vmem:[#allocation2 + $0x58] sm:$0xf]  ;;  %v7706_v59 = vld [vmem:[#allocation2 + $0x14] sm:$0x1] }
  0xbf   : > { %v2703_v53 = vunpack.c.l.b16 %v1195_v43  ;;  %v1269_v56 = vsel %vm7682_vm14, %v1267_v40, %v1268_v24  ;;  %v1426_v60 = vrot.slane %v1424_v41, 4  ;;  %v6562_v0 = vld [vmem:[%s9853_s1 + $0x3f0] sm:$0xf]  ;;  %v990_v33 = vshll.u32 %v7702_v54, 16  ;;  %v6811_v15 = vld [vmem:[%s9853_s1 + $0x3f4] sm:$0xf0] }
  0xc0   : > { %v1185_v30 = vsel %vm7198_vm11, %v1180_v37, %v1184_v48  ;;  %v994_v48 = vshrl.u32 %v7702_v54, 16  ;;  %v2737_v8 = vunpack.c.l.b16 %v1269_v56  ;;  %v1429_v13 = vrot.slane %v1427_v45, 5  ;;  %v7873_v26 = vld [vmem:[#allocation2 + $0x38] sm:$0x1]  ;;  %v7963_v10 = vld [vmem:[#allocation2 + $0x4c] sm:$0xf] }
  0xc1   : > { %v2702_v1 = vunpack.c.l.b16 %v1185_v30  ;;  %v6643_v3 = vld [vmem:[#allocation2 + $0x54] sm:$0xff]  ;;  %v1435_v14 = vrot.slane %v1433_v47, 5  ;;  %v992_v19 = vrot.slane %v990_v33, 5  ;;  %v1437_v32 = vshrl.u32 %v7686_v29, 16  ;;  %v6500_v20 = vld [vmem:[%s9853_s1 + $0x378] sm:$0xf0] }
  0xc2   : > { %v775_v4 = vld [vmem:[#allocation2 + $0x54] sm:$0xf]  ;;  %4129 = vmatmul.bf16.gmra.mxu0 %v6643_v3  ;;  %v996_v21 = vrot.slane %v994_v48, 4  ;;  %v7718_v23 = vpack.c.b16 %v2737_v8, %v2736_v44  ;;  %v1430_v17 = vor.u32 %v1429_v13, %v1426_v60  ;;  %v1443_v40 = vshll.u32 %v7706_v59, 16  ;;  %v7730_v3 = vpop.f32.mrf.mxu1 }
  0xc3   : > { %v981_v11 = vshrl.u32 %v775_v4, 16  ;;  %v984_v12 = vshll.u32 %v775_v4, 16  ;;  %v7716_v16 = vpack.c.b16 %v2703_v53, %v2702_v1  ;;  %v6563_v41 = vor.u32 %v6811_v15, %v6562_v0  ;;  %v1807_v1 = vld [vmem:[#allocation2 + $0xc] sm:$0xe]  ;;  %v7732_v4 = vpop.f32.mrf.mxu2  ;;  %v6698_v13 = vld [vmem:[%s9853_s1 + $0x74] sm:$0xf] }
  0xc4   : > { %9976 = vst [vmem:[#allocation19_spill] sm:$0xff] %v7718_v23  ;;  %v7720_v24 = vld [vmem:[#allocation2 + $0x5c] sm:$0x1]  ;;  %v997_v37 = vor.u32 %v996_v21, %v992_v19  ;;  %v7726_v43 = vpop.f32.mrf.mxu3  ;;  %v1431_v44 = vrot.slane %v1430_v17, 4  ;;  %v1439_v47 = vrot.slane %v1437_v32, 4  ;;  %v7728_v30 = vadd.f32 %v4224_v35, %v4136_v22  ;;  %v4100_v35 = vpop.f32.mrf.mxu0 }
  0xc5   : > { %9975 = vst [vmem:[#allocation18_spill] sm:$0xff] %v7716_v16  ;;  %v983_v25 = vrot.slane %v981_v11, 4  ;;  %v986_v27 = vrot.slane %v984_v12, 5  ;;  %4258 = vmatmul.bf16.gmra.mxu3 %v7716_v16  ;;  %v1000_v39 = vshll.u32 %v7720_v24, 16  ;;  %v1445_v60 = vrot.slane %v1443_v40, 5 }
  0xc6   : > { %9977 = vst [vmem:[#allocation20_spill] sm:$0xff] %v7726_v43  ;;  %v998_v53 = vrot.slane %v997_v37, 4  ;;  %4709 = vmatpush.bf16.msra.mxu3 %v6563_v41  ;;  %v1436_v0 = vsel %vm7198_vm11, %v1431_v44, %v1435_v14  ;;  %v1440_v48 = vor.u32 %v1439_v47, %v1435_v14  ;;  %v1873_v8 = vrot.slane %v7686_v29, 5  ;;  %v6626_v22 = vld [vmem:[%s9853_s1 + $0x470] sm:$0xf] }
  0xc7   : > { %v987_v45 = vor.u32 %v986_v27, %v983_v25  ;;  %v1002_v56 = vrot.slane %v1000_v39, 5  ;;  %4272 = vmatmul.bf16.vlgmr.msrb.gmra.mxu2 %v7718_v23  ;;  %v6827_v12 = vld [vmem:[%s9853_s1 + $0x474] sm:$0xf0]  ;;  %v6116_v29 = vld [vmem:[%s9853_s1 + $0x78] sm:$0xf0]  ;;  %v5832_v25 = vrot.slane %v1807_v1, 9  ;;  %v2880_v17 = vunpack.c.l.b16 %v1436_v0 }
  0xc8   : > { %v1441_v21 = vrot.slane %v1440_v48, 4  ;;  %v1876_v32 = vrot.slane %v7706_v59, 5  ;;  %v1197_v37 = vld [vmem:[#allocation2 + $0xc] sm:$0xe]  ;;  %v1875_v40 = vrot.slane %v1873_v8, 4  ;;  %v6627_v41 = vor.u32 %v6827_v12, %v6626_v22 }
  0xc9   : > { %v988_v33 = vrot.slane %v987_v45, 4  ;;  %v1003_v11 = vsel %vm7198_vm11, %v998_v53, %v1002_v56  ;;  %v6119_v45 = vor.u32 %v6698_v13, %v6116_v29  ;;  %v1377_v44 = vld [vmem:[#allocation2 + $0x18] sm:$0xf]  ;;  %v7759_v56 = vld [vmem:[#allocation2 + $0x1c] sm:$0xf]  ;;  %v1874_v1 = vsel %vm7682_vm14, %v5832_v25, %v1873_v8  ;;  %v6652_v25 = vld [vmem:[#allocation2 + $0xc] sm:$0xff] }
  0xca   : > { %v2687_v15 = vunpack.c.l.b16 %v1003_v11  ;;  %v1446_v39 = vsel %vm7198_vm11, %v1441_v21, %v1445_v60  ;;  %4798 = vmatpush.bf16.msra.mxu0 %v6627_v41  ;;  %v4101_v59 = vadd.f32 %v4100_v35, %v7665_v49  ;;  %v6855_v0 = vld [vmem:[#allocation2 + $0x10] sm:$0xf]  ;;  %v6856_v22 = vld [vmem:[#allocation2 + $0x14] sm:$0x1]  ;;  %v7767_v12 = vld [vmem:[#allocation2 + $0x20] sm:$0x1]  ;;  %v1877_v8 = vsel %vm7682_vm14, %v1875_v40, %v1876_v32 }
  0xcb   : > { %v993_v14 = vsel %vm7198_vm11, %v988_v33, %v992_v19  ;;  %v2881_v53 = vunpack.c.l.b16 %v1446_v39  ;;  %4887 = vmatpush.bf16.msra.mxu1 %v6119_v45  ;;  %v5817_v33 = vrot.slane %v1197_v37, 9  ;;  %v1272_v60 = vrot.slane %v6855_v0, 5  ;;  %v1198_v16 = vld [vmem:[#allocation2 + $0x18] sm:$0xe] }
  0xcc   : > { %v2686_v27 = vunpack.c.l.b16 %v993_v14  ;;  %v4229_v19 = vpop.f32.mrf.mxu3  ;;  %v1275_v11 = vrot.slane %v6856_v22, 5  ;;  %v1448_v13 = vshrl.u32 %v1377_v44, 16  ;;  %v1451_v29 = vshll.u32 %v1377_v44, 16  ;;  %v7769_v14 = vpop.f32.mrf.mxu2 }
  0xcd   : > { %v7765_v48 = vpack.c.b16 %v2881_v53, %v2880_v17  ;;  %9980 = vst [vmem:[#allocation23_spill] sm:$0xff] %v7769_v14  ;;  %v1273_v35 = vsel %vm7682_vm14, %v5817_v33, %v1272_v60  ;;  %v1457_v21 = vshll.u32 %v7759_v56, 16  ;;  %v1461_v41 = vshrl.u32 %v7759_v56, 16  ;;  %v7782_v40 = vpop.f32.mrf.mxu0 }
  0xce   : > { %v7757_v47 = vpack.c.b16 %v2687_v15, %v2686_v27  ;;  %v1274_v15 = vrot.slane %v1272_v60, 4  ;;  %v2738_v27 = vunpack.c.l.b16 %v1273_v35  ;;  %v1450_v37 = vrot.slane %v1448_v13, 4 }
  0xcf   : > { %9979 = vst [vmem:[#allocation22_spill] sm:$0xff] %v7765_v48  ;;  %v1453_v39 = vrot.slane %v1451_v29, 5  ;;  %v1459_v53 = vrot.slane %v1457_v21, 5  ;;  %v1467_v32 = vshll.u32 %v7767_v12, 16  ;;  %v1463_v60 = vrot.slane %v1461_v41, 4 }
  0xd0   : > { %9978 = vst [vmem:[#allocation21_spill] sm:$0xff] %v7757_v47  ;;  %4218 = vmatmul.bf16.gmra.mxu1 %v7757_v47  ;;  %v1276_v45 = vsel %vm7682_vm14, %v1274_v15, %v1275_v11  ;;  %v4141_v22 = vadd.f32 %v7732_v4, %v7665_v49  ;;  %v2944_v15 = vunpack.c.l.b16 %v1874_v1  ;;  %v2945_v21 = vunpack.c.l.b16 %v1877_v8  ;;  %v6793_v4 = vld [vmem:[%s9853_s1 + $0x364] sm:$0xf0]  ;;  %v1808_v8 = vld [vmem:[#allocation2 + $0x18] sm:$0xe] }
  0xd1   : > { %v4189_v17 = vpop.f32.mrf.mxu1  ;;  %v2739_v33 = vunpack.c.l.b16 %v1276_v45  ;;  %v1454_v0 = vor.u32 %v1453_v39, %v1450_v37  ;;  %v1469_v13 = vrot.slane %v1467_v32, 5  ;;  %v6490_v37 = vld [vmem:[%s9853_s1 + $0x360] sm:$0xf]  ;;  %v5818_v45 = vrot.slane %v1198_v16, 9  ;;  %v6857_v32 = vld [vmem:[#allocation2 + $0x1c] sm:$0xf] }
  0xd2   : > { %v7779_v44 = vadd.f32 %v4189_v17, %v4101_v59  ;;  %4450 = vmatmul.bf16.vlgmr.msrb.gmra.mxu0 %v7765_v48  ;;  %v1464_v59 = vor.u32 %v1463_v60, %v1459_v53  ;;  %v7789_v35 = vadd.f32 %v4229_v19, %v4141_v22  ;;  %v7808_v60 = vpack.c.b16 %v2945_v21, %v2944_v15  ;;  %v6858_v22 = vld [vmem:[#allocation2 + $0x20] sm:$0x1]  ;;  %v6809_v16 = vld [vmem:[%s9853_s1 + $0x3e4] sm:$0xf0] }
  0xd3   : > { %v7787_v29 = vpack.c.b16 %v2739_v33, %v2738_v27  ;;  %v1455_v11 = vrot.slane %v1454_v0, 4  ;;  %v1279_v33 = vrot.slane %v6857_v32, 5  ;;  %v7806_v0 = vld [vmem:[#allocation2 + $0x28] sm:$0xf]  ;;  %v6491_v55 = vor.u32 %v6793_v4, %v6490_v37  ;;  %v7817_v32 = vld [vmem:[#allocation2 + $0x2c] sm:$0x1] }
  0xd4   : > { %9982 = vst [vmem:[#allocation25_spill] sm:$0xff] %v7789_v35  ;;  %v7791_v17 = vpop.f32.mrf.mxu3  ;;  %v1465_v39 = vrot.slane %v1464_v59, 4  ;;  %v4145_v19 = vpop.f32.mrf.mxu2  ;;  %v1282_v59 = vrot.slane %v6858_v22, 5  ;;  %v1880_v15 = vrot.slane %v7759_v56, 5  ;;  %v1481_v4 = vshll.u32 %v7806_v0, 16 }
  0xd5   : > { %4361 = vmatmul.bf16.vlgmr.msrb.gmra.mxu3 %v6652_v25  ;;  %9981 = vst [vmem:[#allocation24_spill] sm:$0xff] %v7787_v29  ;;  %v1379_v25 = vld [vmem:[#allocation2 + $0x24] sm:$0xf]  ;;  %v1460_v27 = vsel %vm7198_vm11, %v1455_v11, %v1459_v53  ;;  %v1281_v62 = vrot.slane %v1279_v33, 4  ;;  %v4105_v21 = vpop.f32.mrf.mxu0  ;;  %4621 = vmatpush.bf16.msra.mxu2 %v6491_v55  ;;  %v1485_v22 = vshrl.u32 %v7806_v0, 16  ;;  %v4146_v55 = vadd.f32 %v4145_v19, %v7665_v49 }
  0xd6   : > { %9983 = vst [vmem:[#allocation26_spill] sm:$0xff] %v7791_v17  ;;  %v1470_v1 = vsel %vm7198_vm11, %v1465_v39, %v1469_v13  ;;  %v1472_v53 = vshrl.u32 %v1379_v25, 16  ;;  %v2882_v11 = vunpack.c.l.b16 %v1460_v27  ;;  %v1475_v61 = vshll.u32 %v1379_v25, 16  ;;  %v6554_v13 = vld [vmem:[%s9853_s1 + $0x3e0] sm:$0xf] }
  0xd7   : > { %4277 = vmatmul.bf16.gmra.mxu2 %v7787_v29  ;;  %9984 = vst [vmem:[#allocation27_spill] sm:$0xff] %v7808_v60  ;;  %v2883_v46 = vunpack.c.l.b16 %v1470_v1  ;;  %v5833_v39 = vrot.slane %v1808_v8, 9  ;;  %v4106_v25 = vadd.f32 %v4105_v21, %v7665_v49  ;;  %v1280_v27 = vsel %vm7682_vm14, %v5818_v45, %v1279_v33  ;;  %v6825_v19 = vld [vmem:[%s9853_s1 + $0x464] sm:$0xf0] }
  0xd8   : > { %v1474_v37 = vrot.slane %v1472_v53, 4  ;;  %v1477_v1 = vrot.slane %v1475_v61, 5  ;;  %v1283_v8 = vsel %vm7682_vm14, %v1281_v62, %v1282_v59  ;;  %v1483_v57 = vrot.slane %v1481_v4, 5  ;;  %v6618_v61 = vld [vmem:[%s9853_s1 + $0x460] sm:$0xf] }
  0xd9   : > { %v7804_v41 = vpop.f32.mrf.mxu1  ;;  %v6555_v56 = vor.u32 %v6809_v16, %v6554_v13  ;;  %v7828_v53 = vpack.c.b16 %v2883_v46, %v2882_v11  ;;  %v1487_v63 = vrot.slane %v1485_v22, 4  ;;  %v1491_v21 = vshll.u32 %v7817_v32, 16  ;;  %v6696_v46 = vld [vmem:[%s9853_s1 + $0x64] sm:$0xf]  ;;  %v6653_v11 = vld [vmem:[#allocation2 + $0x18] sm:$0xff] }
  0xda   : > { %v1478_v9 = vor.u32 %v1477_v1, %v1474_v37  ;;  %v1882_v45 = vrot.slane %v1880_v15, 4  ;;  %v1883_v33 = vrot.slane %v7767_v12, 5  ;;  %v2740_v62 = vunpack.c.l.b16 %v1280_v27  ;;  %v6108_v12 = vld [vmem:[%s9853_s1 + $0x68] sm:$0xf0] }
  0xdb   : > { %9985 = vst [vmem:[#allocation28_spill] sm:$0xff] %v7828_v53  ;;  %4710 = vmatpush.bf16.msra.mxu3 %v6555_v56  ;;  %v2741_v13 = vunpack.c.l.b16 %v1283_v8  ;;  %v1488_v16 = vor.u32 %v1487_v63, %v1483_v57  ;;  %v6619_v4 = vor.u32 %v6825_v19, %v6618_v61  ;;  %v6111_v22 = vor.u32 %v6696_v46, %v6108_v12  ;;  %v1381_v61 = vld [vmem:[#allocation2 + $0x30] sm:$0xf]  ;;  %v6860_v12 = vld [vmem:[#allocation2 + $0x2c] sm:$0x1] }
  0xdc   : > { %v7846_v1 = vpop.f32.mrf.mxu2  ;;  %v1493_v2 = vrot.slane %v1491_v21, 5  ;;  %v1881_v63 = vsel %vm7682_vm14, %v5833_v39, %v1880_v15  ;;  %v1884_v8 = vsel %vm7682_vm14, %v1882_v45, %v1883_v33  ;;  %v1199_v45 = vld [vmem:[#allocation2 + $0x24] sm:$0xe]  ;;  %v1496_v33 = vshrl.u32 %v1381_v61, 16 }
  0xdd   : > { %9987 = vst [vmem:[#allocation30_spill] sm:$0xff] %v7846_v1  ;;  %v1489_v47 = vrot.slane %v1488_v16, 4  ;;  %4799 = vmatpush.bf16.msra.mxu0 %v6619_v4  ;;  %4888 = vmatpush.bf16.msra.mxu1 %v6111_v22  ;;  %v7859_v19 = vpop.f32.mrf.mxu0  ;;  %v2946_v46 = vunpack.c.l.b16 %v1881_v63  ;;  %v2947_v21 = vunpack.c.l.b16 %v1884_v8  ;;  %v5819_v16 = vrot.slane %v1199_v45, 9 }
  0xdf   : > { %v1494_v15 = vsel %vm7198_vm11, %v1489_v47, %v1493_v2  ;;  %v7868_v22 = vpack.c.b16 %v2947_v21, %v2946_v46  ;;  %v1809_v2 = vld [vmem:[#allocation2 + $0x24] sm:$0xe]  ;;  %v1498_v47 = vrot.slane %v1496_v33, 4  ;;  %v6482_v33 = vld [vmem:[%s9853_s1 + $0x350] sm:$0xf] }
  0xe0   : > { %4539 = vmatmul.bf16.vlgmr.msrb.gmra.mxu1 %v7808_v60  ;;  %v1479_v60 = vrot.slane %v1478_v9, 4  ;;  %v5834_v21 = vrot.slane %v1809_v2, 9  ;;  %v1383_v2 = vld [vmem:[#allocation2 + $0x3c] sm:$0xf] }
  0xe1   : > { %v4234_v59 = vpop.f32.mrf.mxu3  ;;  %9989 = vst [vmem:[#allocation32_spill] sm:$0xff] %v7868_v22 }
  0xe2   : > { %v7841_v37 = vadd.f32 %v4234_v59, %v4146_v55  ;;  %4455 = vmatmul.bf16.gmra.mxu0 %v7828_v53  ;;  %v7855_v55 = vpack.c.b16 %v2741_v13, %v2740_v62  ;;  %v7857_v59 = vld [vmem:[#allocation2 + $0x34] sm:$0xf]  ;;  %v1484_v39 = vsel %vm7198_vm11, %v1479_v60, %v1483_v57  ;;  %v2885_v57 = vunpack.c.l.b16 %v1494_v15 }
  0xe3   : > { %v4194_v27 = vpop.f32.mrf.mxu1  ;;  %v1505_v62 = vshll.u32 %v7857_v59, 16  ;;  %v1509_v13 = vshrl.u32 %v7857_v59, 16  ;;  %v2884_v63 = vunpack.c.l.b16 %v1484_v39  ;;  %v1887_v60 = vrot.slane %v7806_v0, 5 }
  0xe4   : > { %9986 = vst [vmem:[#allocation29_spill] sm:$0xff] %v7841_v37  ;;  %v7849_v56 = vadd.f32 %v4194_v27, %v4106_v25  ;;  %v6859_v25 = vld [vmem:[#allocation2 + $0x28] sm:$0xf]  ;;  %v1289_v27 = vrot.slane %v6860_v12, 5  ;;  %v1890_v39 = vrot.slane %v7817_v32, 5 }
  0xe5   : > { %4366 = vmatmul.bf16.gmra.mxu3 %v6653_v11  ;;  %9988 = vst [vmem:[#allocation31_spill] sm:$0xff] %v7855_v55  ;;  %v1286_v9 = vrot.slane %v6859_v25, 5  ;;  %v1499_v11 = vshll.u32 %v1381_v61, 16  ;;  %v7871_v61 = vrot.slane %v1505_v62, 5  ;;  %v1511_v25 = vrot.slane %v1509_v13, 4  ;;  %v6654_v12 = vld [vmem:[#allocation2 + $0x24] sm:$0xff] }
  0xe6   : > { %v7882_v0 = vpack.c.b16 %v2885_v57, %v2884_v63  ;;  %v1888_v57 = vsel %vm7682_vm14, %v5834_v21, %v1887_v60  ;;  %v6807_v21 = vld [vmem:[%s9853_s1 + $0x3d4] sm:$0xf0] }
  0xe7   : > { %4282 = vmatmul.bf16.gmra.mxu2 %v7855_v55  ;;  %v1288_v4 = vrot.slane %v1286_v9, 4  ;;  %v1501_v8 = vrot.slane %v1499_v11, 5  ;;  %v1287_v45 = vsel %vm7682_vm14, %v5819_v16, %v1286_v9  ;;  %v1889_v11 = vrot.slane %v1887_v60, 4  ;;  %v6546_v60 = vld [vmem:[%s9853_s1 + $0x3d0] sm:$0xf] }
  0xe8   : > { %9991 = vst [vmem:[#allocation34_spill] sm:$0xff] %v7882_v0  ;;  %v1512_v9 = vor.u32 %v1511_v25, %v7871_v61  ;;  %v1515_v16 = vshll.u32 %v7873_v26, 16 }
  0xe9   : > { %v7875_v42 = vpop.f32.mrf.mxu3  ;;  %v1290_v46 = vsel %vm7682_vm14, %v1288_v4, %v1289_v27  ;;  %v4110_v62 = vpop.f32.mrf.mxu0  ;;  %v1502_v13 = vor.u32 %v1501_v8, %v1498_v47  ;;  %v6791_v4 = vld [vmem:[%s9853_s1 + $0x354] sm:$0xf0]  ;;  %v2742_v27 = vunpack.c.l.b16 %v1287_v45  ;;  %v1891_v47 = vsel %vm7682_vm14, %v1889_v11, %v1890_v39  ;;  %v6861_v11 = vld [vmem:[#allocation2 + $0x34] sm:$0xf] }
  0xea   : > { %v4150_v36 = vpop.f32.mrf.mxu2  ;;  %9990 = vst [vmem:[#allocation33_spill] sm:$0xff] %v7875_v42  ;;  %v2743_v32 = vunpack.c.l.b16 %v1290_v46  ;;  %v6483_v63 = vor.u32 %v6791_v4, %v6482_v33  ;;  %v1513_v25 = vrot.slane %v1512_v9, 4  ;;  %v4111_v55 = vadd.f32 %v4110_v62, %v7665_v49  ;;  %v7904_v46 = vld [vmem:[#allocation2 + $0x40] sm:$0xf]  ;;  %v1200_v33 = vld [vmem:[#allocation2 + $0x30] sm:$0xe] }
  0xeb   : > { %v7885_v15 = vpop.f32.mrf.mxu1  ;;  %v1503_v8 = vrot.slane %v1502_v13, 4  ;;  %v4151_v45 = vadd.f32 %v4150_v36, %v7665_v49  ;;  %v1293_v13 = vrot.slane %v6861_v11, 5  ;;  %v1520_v62 = vshrl.u32 %v1383_v2, 16 }
  0xec   : > { %4622 = vmatpush.bf16.msra.mxu2 %v6483_v63  ;;  %v7901_v53 = vpack.c.b16 %v2743_v32, %v2742_v27  ;;  %v1523_v9 = vshll.u32 %v1383_v2, 16  ;;  %v2948_v4 = vunpack.c.l.b16 %v1888_v57  ;;  %v2949_v36 = vunpack.c.l.b16 %v1891_v47  ;;  %v1810_v57 = vld [vmem:[#allocation2 + $0x30] sm:$0xe] }
  0xed   : > { %v1529_v63 = vshll.u32 %v7904_v46, 16  ;;  %v1894_v47 = vrot.slane %v7857_v59, 5  ;;  %v1522_v38 = vrot.slane %v1520_v62, 4  ;;  %v5835_v7 = vrot.slane %v1810_v57, 9 }
  0xee   : > { %9992 = vst [vmem:[#allocation35_spill] sm:$0xff] %v7901_v53  ;;  %v1525_v29 = vrot.slane %v1523_v9, 5  ;;  %v7929_v48 = vpack.c.b16 %v2949_v36, %v2948_v4  ;;  %v1897_v59 = vrot.slane %v7873_v26, 5  ;;  %v6823_v26 = vld [vmem:[%s9853_s1 + $0x454] sm:$0xf0] }
  0xef   : > { %v1896_v23 = vrot.slane %v1894_v47, 4  ;;  %v1895_v4 = vsel %vm7682_vm14, %v5835_v7, %v1894_v47  ;;  %v1385_v47 = vld [vmem:[#allocation2 + $0x48] sm:$0xf] }
  0xf0   : > { %4544 = vmatmul.bf16.gmra.mxu1 %v7868_v22  ;;  %v1517_v22 = vrot.slane %v1515_v16, 5  ;;  %v6547_v16 = vor.u32 %v6807_v21, %v6546_v60  ;;  %v5820_v60 = vrot.slane %v1200_v33, 9  ;;  %v6862_v21 = vld [vmem:[#allocation2 + $0x38] sm:$0x1]  ;;  %9995 = vst [vmem:[#allocation38_spill] sm:$0xff] %v7929_v48  ;;  %v1526_v62 = vor.u32 %v1525_v29, %v1522_v38 }
  0xf1   : > { %v7932_v33 = vld [vmem:[#allocation2 + $0x44] sm:$0x1] }
  0xf2   : > { %4460 = vmatmul.bf16.gmra.mxu0 %v7882_v0  ;;  %v7912_v39 = vpop.f32.mrf.mxu2  ;;  %v1518_v27 = vsel %vm7198_vm11, %v1513_v25, %v1517_v22  ;;  %v1533_v0 = vshrl.u32 %v7904_v46, 16  ;;  %4711 = vmatpush.bf16.msra.mxu3 %v6547_v16  ;;  %v7927_v22 = vpop.f32.mrf.mxu0  ;;  %v1295_v25 = vrot.slane %v1293_v13, 4  ;;  %v1539_v29 = vshll.u32 %v7932_v33, 16 }
  0xf3   : > { %9993 = vst [vmem:[#allocation36_spill] sm:$0xff] %v7912_v39 }
  0xf5   : > { %4371 = vmatmul.bf16.gmra.mxu3 %v6654_v12  ;;  %v1508_v12 = vsel %vm7198_vm11, %v1503_v8, %v7871_v61  ;;  %v1296_v61 = vrot.slane %v6862_v21, 5 }
  0xf6   : > { %v2886_v16 = vunpack.c.l.b16 %v1508_v12  ;;  %v6100_v12 = vld [vmem:[%s9853_s1 + $0x58] sm:$0xf0] }
  0xf7   : > { %4287 = vmatmul.bf16.gmra.mxu2 %v7901_v53  ;;  %v2887_v53 = vunpack.c.l.b16 %v1518_v27  ;;  %v6655_v27 = vld [vmem:[#allocation2 + $0x30] sm:$0xff] }
  0xf8   : > { %v4239_v32 = vpop.f32.mrf.mxu3  ;;  %v4199_v11 = vpop.f32.mrf.mxu1 }
  0xf9   : > { %v7922_v2 = vadd.f32 %v4239_v32, %v4151_v45  ;;  %v7925_v8 = vadd.f32 %v4199_v11, %v4111_v55  ;;  %v1531_v45 = vrot.slane %v1529_v63, 5  ;;  %v1535_v32 = vrot.slane %v1533_v0, 4  ;;  %v6610_v0 = vld [vmem:[%s9853_s1 + $0x450] sm:$0xf] }
  0xfa   : > { %v1294_v55 = vsel %vm7682_vm14, %v5820_v60, %v1293_v13  ;;  %v1297_v11 = vsel %vm7682_vm14, %v1295_v25, %v1296_v61  ;;  %v7939_v9 = vpack.c.b16 %v2887_v53, %v2886_v16  ;;  %v6694_v13 = vld [vmem:[%s9853_s1 + $0x54] sm:$0xf]  ;;  %v4155_v53 = vpop.f32.mrf.mxu2  ;;  %v6611_v36 = vor.u32 %v6823_v26, %v6610_v0 }
  0xfb   : > { %9994 = vst [vmem:[#allocation37_spill] sm:$0xff] %v7922_v2  ;;  %v1536_v38 = vor.u32 %v1535_v32, %v1531_v45  ;;  %v1898_v63 = vsel %vm7682_vm14, %v1896_v23, %v1897_v59  ;;  %v2744_v57 = vunpack.c.l.b16 %v1294_v55  ;;  %v2745_v60 = vunpack.c.l.b16 %v1297_v11  ;;  %v1201_v55 = vld [vmem:[#allocation2 + $0x3c] sm:$0xe]  ;;  %v6863_v11 = vld [vmem:[#allocation2 + $0x40] sm:$0xf] }
  0xfc   : > { %9996 = vst [vmem:[#allocation39_spill] sm:$0xff] %v7939_v9  ;;  %v6103_v21 = vor.u32 %v6694_v13, %v6100_v12  ;;  %v1527_v61 = vrot.slane %v1526_v62, 4  ;;  %4800 = vmatpush.bf16.msra.mxu0 %v6611_v36  ;;  %v2950_v25 = vunpack.c.l.b16 %v1895_v4  ;;  %v2951_v16 = vunpack.c.l.b16 %v1898_v63 }
  0xfd   : > { %v1537_v26 = vrot.slane %v1536_v38, 4  ;;  %v7965_v23 = vpack.c.b16 %v2745_v60, %v2744_v57  ;;  %v1300_v62 = vrot.slane %v6863_v11, 5  ;;  %v1544_v13 = vshrl.u32 %v1385_v47, 16  ;;  %v6864_v57 = vld [vmem:[#allocation2 + $0x44] sm:$0x1] }
  0xfe   : > { %4889 = vmatpush.bf16.msra.mxu1 %v6103_v21  ;;  %v1532_v59 = vsel %vm7198_vm11, %v1527_v61, %v1531_v45  ;;  %v1547_v36 = vshll.u32 %v1385_v47, 16  ;;  %v1553_v4 = vshll.u32 %v7963_v10, 16  ;;  %v1557_v12 = vshrl.u32 %v7963_v10, 16  ;;  %v1811_v61 = vld [vmem:[#allocation2 + $0x3c] sm:$0xe] }
  0xff   : > { %v4115_v0 = vpop.f32.mrf.mxu0  ;;  %9998 = vst [vmem:[#allocation41_spill] sm:$0xff] %v7965_v23  ;;  %v7971_v63 = vpack.c.b16 %v2951_v16, %v2950_v25  ;;  %v5821_v45 = vrot.slane %v1201_v55, 9  ;;  %v1303_v60 = vrot.slane %v6864_v57, 5  ;;  %v1302_v11 = vrot.slane %v1300_v62, 4 }
 0x100   : > { %4549 = vmatmul.bf16.gmra.mxu1 %v7929_v48  ;;  %v7959_v7 = vpop.f32.mrf.mxu1  ;;  %v7961_v32 = vpop.f32.mrf.mxu3  ;;  %v1541_v48 = vrot.slane %v1539_v29, 5  ;;  %v2888_v29 = vunpack.c.l.b16 %v1532_v59  ;;  %v4116_v21 = vadd.f32 %v4115_v0, %v7665_v49  ;;  %v1549_v25 = vrot.slane %v1547_v36, 5 }
 0x101   : > { %9997 = vst [vmem:[#allocation40_spill] sm:$0xff] %v7961_v32  ;;  %v4156_v32 = vadd.f32 %v4155_v53, %v7665_v49  ;;  %v1904_v57 = vrot.slane %v7932_v33, 5  ;;  %v1304_v53 = vsel %vm7682_vm14, %v1302_v11, %v1303_v60 }
 0x102   : > { %4465 = vmatmul.bf16.gmra.mxu0 %v7939_v9  ;;  %9999 = vst [vmem:[#allocation42_spill] sm:$0xff] %v7971_v63  ;;  %v1542_v38 = vsel %vm7198_vm11, %v1537_v26, %v1541_v48  ;;  %v7978_v47 = vpop.f32.mrf.mxu2  ;;  %v1546_v9 = vrot.slane %v1544_v13, 4  ;;  %v1555_v48 = vrot.slane %v1553_v4, 5  ;;  %v1559_v26 = vrot.slane %v1557_v12, 4 }
 0x103   : > { %10000 = vst [vmem:[#allocation43_spill] sm:$0xff] %v7978_v47  ;;  %v2889_v16 = vunpack.c.l.b16 %v1542_v38  ;;  %v1301_v13 = vsel %vm7682_vm14, %v5821_v45, %v1300_v62  ;;  %v6789_v62 = vld [vmem:[%s9853_s1 + $0x344] sm:$0xf0]  ;;  %v6656_v45 = vld [vmem:[#allocation2 + $0x3c] sm:$0xff] }
 0x104   : > { %v1550_v36 = vor.u32 %v1549_v25, %v1546_v9  ;;  %v1560_v38 = vor.u32 %v1559_v26, %v1555_v48  ;;  %v2746_v60 = vunpack.c.l.b16 %v1301_v13  ;;  %v2747_v9 = vunpack.c.l.b16 %v1304_v53  ;;  %v1387_v26 = vld [vmem:[#allocation2 + $0x54] sm:$0xf] }
 0x105   : > { %4376 = vmatmul.bf16.gmra.mxu3 %v6655_v27  ;;  %v1901_v27 = vrot.slane %v7904_v46, 5  ;;  %v5836_v46 = vrot.slane %v1811_v61, 9  ;;  %v7993_v4 = vpack.c.b16 %v2889_v16, %v2888_v29 }
 0x106   : > { %v1551_v11 = vrot.slane %v1550_v36, 4  ;;  %v1561_v25 = vrot.slane %v1560_v38, 4  ;;  %v1571_v38 = vshll.u32 %v1387_v26, 16 }
 0x107   : > { %4292 = vmatmul.bf16.gmra.mxu2 %v7965_v23  ;;  %v7981_v23 = vld [vmem:[#allocation2 + $0x50] sm:$0x1]  ;;  %v1903_v55 = vrot.slane %v1901_v27, 4  ;;  %v7986_v2 = vpop.f32.mrf.mxu0  ;;  %10001 = vst [vmem:[#allocation44_spill] sm:$0xff] %v7993_v4  ;;  %v1902_v29 = vsel %vm7682_vm14, %v5836_v46, %v1901_v27  ;;  %v1202_v46 = vld [vmem:[#allocation2 + $0x48] sm:$0xe] }
 0x108   : > { %v1563_v33 = vshll.u32 %v7981_v23, 16  ;;  %v2952_v13 = vunpack.c.l.b16 %v1902_v29  ;;  %v1556_v27 = vsel %vm7198_vm11, %v1551_v11, %v1555_v48  ;;  %v5822_v48 = vrot.slane %v1202_v46, 9 }
 0x109   : > { %v1310_v29 = vrot.slane %v7637_v6, 5  ;;  %v1908_v6 = vrot.slane %v7963_v10, 5 }
 0x10a   : > { %v1565_v16 = vrot.slane %v1563_v33, 5 }
 0x10c   : > { %v1566_v36 = vsel %vm7198_vm11, %v1561_v25, %v1565_v16 }
 0x10d   : > { %v4204_v59 = vpop.f32.mrf.mxu1  ;;  %v4244_v0 = vpop.f32.mrf.mxu3  ;;  %v2891_v11 = vunpack.c.l.b16 %v1566_v36  ;;  %v1812_v36 = vld [vmem:[#allocation2 + $0x48] sm:$0xe] }
 0x10e   : > { %v7984_v39 = vadd.f32 %v4204_v59, %v4116_v21  ;;  %v7995_v12 = vadd.f32 %v4244_v0, %v4156_v32  ;;  %v6474_v21 = vld [vmem:[%s9853_s1 + $0x340] sm:$0xf]  ;;  %v1905_v32 = vsel %vm7682_vm14, %v1903_v55, %v1904_v57  ;;  %v8009_v0 = vld [vmem:[#allocation2 + $0x58] sm:$0xf]  ;;  %v1307_v55 = vrot.slane %v7615_v5, 5 }
 0x10f   : > { %v6475_v61 = vor.u32 %v6789_v62, %v6474_v21  ;;  %v2953_v53 = vunpack.c.l.b16 %v1905_v32  ;;  %v8011_v21 = vpack.c.b16 %v2747_v9, %v2746_v60  ;;  %v1568_v57 = vshrl.u32 %v1387_v26, 16  ;;  %v8028_v5 = vld [vmem:[#allocation2 + $0x5c] sm:$0x1]  ;;  %v6538_v26 = vld [vmem:[%s9853_s1 + $0x3c0] sm:$0xf] }
 0x110   : > { %4554 = vmatmul.bf16.gmra.mxu1 %v7971_v63  ;;  %10002 = vst [vmem:[#allocation45_spill] sm:$0xff] %v7995_v12  ;;  %v4160_v59 = vpop.f32.mrf.mxu2  ;;  %v1577_v33 = vshll.u32 %v8009_v0, 16  ;;  %v2890_v32 = vunpack.c.l.b16 %v1556_v27  ;;  %v1309_v25 = vrot.slane %v1307_v55, 4  ;;  %v6657_v12 = vld [vmem:[#allocation2 + $0x48] sm:$0xff] }
 0x111   : > { %4623 = vmatpush.bf16.msra.mxu2 %v6475_v61  ;;  %10003 = vst [vmem:[#allocation46_spill] sm:$0xff] %v8011_v21  ;;  %v8024_v9 = vpack.c.b16 %v2953_v53, %v2952_v13  ;;  %v1570_v16 = vrot.slane %v1568_v57, 4  ;;  %v6805_v13 = vld [vmem:[%s9853_s1 + $0x3c4] sm:$0xf0]  ;;  %v1573_v53 = vrot.slane %v1571_v38, 5  ;;  %v4161_v27 = vadd.f32 %v4160_v59, %v7665_v49 }
 0x112   : > { %4470 = vmatmul.bf16.gmra.mxu0 %v7993_v4  ;;  %v8036_v63 = vrot.slane %v1577_v33, 5  ;;  %v1587_v57 = vshll.u32 %v8028_v5, 16  ;;  %v1311_v47 = vsel %vm7682_vm14, %v1309_v25, %v1310_v29  ;;  %v8047_v33 = vpack.c.b16 %v2891_v11, %v2890_v32  ;;  %v6821_v32 = vld [vmem:[%s9853_s1 + $0x444] sm:$0xf0] }
 0x113   : > { %v4120_v60 = vpop.f32.mrf.mxu0  ;;  %10005 = vst [vmem:[#allocation48_spill] sm:$0xff] %v8024_v9  ;;  %v1574_v10 = vor.u32 %v1573_v53, %v1570_v16  ;;  %v6092_v53 = vld [vmem:[%s9853_s1 + $0x48] sm:$0xf0] }
 0x114   : > { %v4121_v38 = vadd.f32 %v4120_v60, %v7665_v49  ;;  %10006 = vst [vmem:[#allocation49_spill] sm:$0xff] %v8047_v33  ;;  %v1589_v29 = vrot.slane %v1587_v57, 5  ;;  %v6602_v60 = vld [vmem:[%s9853_s1 + $0x440] sm:$0xf] }
 0x115   : > { %4381 = vmatmul.bf16.gmra.mxu3 %v6656_v45  ;;  %v8013_v62 = vpop.f32.mrf.mxu3  ;;  %v1581_v45 = vshrl.u32 %v8009_v0, 16  ;;  %v8022_v61 = vpop.f32.mrf.mxu1  ;;  %v6603_v16 = vor.u32 %v6821_v32, %v6602_v60 }
 0x116   : > { %10004 = vst [vmem:[#allocation47_spill] sm:$0xff] %v8013_v62  ;;  %v1308_v62 = vsel %vm7682_vm14, %v5822_v48, %v1307_v55  ;;  %v2749_v48 = vunpack.c.l.b16 %v1311_v47  ;;  %v1575_v47 = vrot.slane %v1574_v10, 4  ;;  %v1389_v10 = vld [vmem:[#allocation2 + $0x60] sm:$0xf] }
 0x117   : > { %4297 = vmatmul.bf16.gmra.mxu2 %v8011_v21  ;;  %v1583_v46 = vrot.slane %v1581_v45, 4  ;;  %v6539_v21 = vor.u32 %v6805_v13, %v6538_v26  ;;  %v5837_v26 = vrot.slane %v1812_v36, 9  ;;  %v1910_v13 = vrot.slane %v1908_v6, 4  ;;  %4801 = vmatpush.bf16.msra.mxu0 %v6603_v16 }
 0x118   : > { %v4162_v4 = vpop.f32.mrf.mxu2  ;;  %v2748_v55 = vunpack.c.l.b16 %v1308_v62  ;;  %v1915_v16 = vrot.slane %v8009_v0, 5 }
 0x119   : > { %4712 = vmatpush.bf16.msra.mxu3 %v6539_v21  ;;  %v1584_v59 = vor.u32 %v1583_v46, %v8036_v63  ;;  %v1911_v21 = vrot.slane %v7981_v23, 5  ;;  %v6692_v23 = vld [vmem:[%s9853_s1 + $0x44] sm:$0xf]  ;;  %v1909_v46 = vsel %vm7682_vm14, %v5837_v26, %v1908_v6  ;;  %v4163_v57 = vadd.f32 %v4162_v4, %v7665_v49  ;;  %v1203_v26 = vld [vmem:[#allocation2 + $0x54] sm:$0xe] }
 0x11a   : > { %v6095_v36 = vor.u32 %v6692_v23, %v6092_v53  ;;  %v1580_v6 = vsel %vm7198_vm11, %v1575_v47, %v8036_v63  ;;  %v5823_v63 = vrot.slane %v1203_v26, 9 }
 0x11b   : > { %v1585_v62 = vrot.slane %v1584_v59, 4  ;;  %v8077_v59 = vld [vmem:[#allocation2 + $0x64] sm:$0xf]  ;;  %v2892_v53 = vunpack.c.l.b16 %v1580_v6 }
 0x11c   : > { %4890 = vmatpush.bf16.msra.mxu1 %v6095_v36  ;;  %v1601_v32 = vshll.u32 %v8077_v59, 16  ;;  %v1605_v23 = vshrl.u32 %v8077_v59, 16 }
 0x11e   : > { %v1607_v1 = vrot.slane %v1605_v23, 4 }
 0x11f   : > { %v4249_v45 = vpop.f32.mrf.mxu3 }
 0x120   : > { %4559 = vmatmul.bf16.gmra.mxu1 %v8024_v9  ;;  %v8051_v42 = vadd.f32 %v4249_v45, %v4161_v27  ;;  %v8053_v9 = vpop.f32.mrf.mxu0  ;;  %v1912_v27 = vsel %vm7682_vm14, %v1910_v13, %v1911_v21  ;;  %v1314_v45 = vrot.slane %v7702_v54, 5  ;;  %v1813_v21 = vld [vmem:[#allocation2 + $0x54] sm:$0xe] }
 0x121   : > { %v4209_v25 = vpop.f32.mrf.mxu1  ;;  %v2955_v60 = vunpack.c.l.b16 %v1912_v27  ;;  %v5838_v27 = vrot.slane %v1813_v21, 9  ;;  %v6658_v21 = vld [vmem:[#allocation2 + $0x54] sm:$0xff]  ;;  %v4123_v52 = vadd.f32 %v8053_v9, %v7665_v49 }
 0x122   : > { %10007 = vst [vmem:[#allocation50_spill] sm:$0xff] %v8051_v42  ;;  %v8064_v11 = vadd.f32 %v4209_v25, %v4121_v38  ;;  %4475 = vmatmul.bf16.gmra.mxu0 %v8047_v33  ;;  %v8075_v38 = vpack.c.b16 %v2749_v48, %v2748_v55  ;;  %v2954_v25 = vunpack.c.l.b16 %v1909_v46  ;;  %v1592_v55 = vshrl.u32 %v1389_v10, 16 }
 0x123   : > { %v1595_v48 = vshll.u32 %v1389_v10, 16  ;;  %v1316_v47 = vrot.slane %v1314_v45, 4  ;;  %v1603_v42 = vrot.slane %v1601_v32, 5  ;;  %v1315_v0 = vsel %vm7682_vm14, %v5823_v63, %v1314_v45  ;;  %v1391_v63 = vld [vmem:[#allocation2 + $0x6c] sm:$0xf] }
 0x124   : > { %10008 = vst [vmem:[#allocation51_spill] sm:$0xff] %v8075_v38  ;;  %v1594_v10 = vrot.slane %v1592_v55, 4  ;;  %v1916_v6 = vsel %vm7682_vm14, %v5838_v27, %v1915_v16  ;;  %v2750_v55 = vunpack.c.l.b16 %v1315_v0 }
 0x125   : > { %4386 = vmatmul.bf16.gmra.mxu3 %v6657_v12  ;;  %v1590_v12 = vsel %vm7198_vm11, %v1585_v62, %v1589_v29  ;;  %v4165_v13 = vpop.f32.mrf.mxu2  ;;  %v1317_v29 = vrot.slane %v7720_v24, 5  ;;  %v8092_v62 = vpack.c.b16 %v2955_v60, %v2954_v25  ;;  %v1597_v33 = vrot.slane %v1595_v48, 5 }
 0x126   : > { %v2893_v46 = vunpack.c.l.b16 %v1590_v12  ;;  %v1608_v26 = vor.u32 %v1607_v1, %v1603_v42  ;;  %v4166_v32 = vadd.f32 %v4165_v13, %v7665_v49  ;;  %v8113_v1 = vld [vmem:[#allocation2 + $0x70] sm:$0xf]  ;;  %v6787_v13 = vld [vmem:[%s9853_s1 + $0x334] sm:$0xf0] }
 0x127   : > { %v4251_v4 = vpop.f32.mrf.mxu3  ;;  %4302 = vmatmul.bf16.gmra.mxu2 %v8075_v38  ;;  %10010 = vst [vmem:[#allocation53_spill] sm:$0xff] %v8092_v62  ;;  %v8095_v38 = vld [vmem:[#allocation2 + $0x68] sm:$0x1]  ;;  %v1318_v24 = vsel %vm7682_vm14, %v1316_v47, %v1317_v29  ;;  %v1598_v12 = vor.u32 %v1597_v33, %v1594_v10  ;;  %v2956_v47 = vunpack.c.l.b16 %v1916_v6  ;;  %v6466_v10 = vld [vmem:[%s9853_s1 + $0x330] sm:$0xf] }
 0x128   : > { %v8087_v54 = vadd.f32 %v4251_v4, %v4163_v57  ;;  %v1917_v57 = vrot.slane %v1915_v16, 4  ;;  %v1918_v4 = vrot.slane %v8028_v5, 5  ;;  %v8104_v60 = vpack.c.b16 %v2893_v46, %v2892_v53 }
 0x129   : > { %v8102_v25 = vpop.f32.mrf.mxu1  ;;  %v1611_v5 = vshll.u32 %v8095_v38, 16  ;;  %v2751_v48 = vunpack.c.l.b16 %v1318_v24  ;;  %v1599_v53 = vrot.slane %v1598_v12, 4  ;;  %v1609_v16 = vrot.slane %v1608_v26, 4  ;;  %v1814_v12 = vld [vmem:[#allocation2 + $0x60] sm:$0xe] }
 0x12a   : > { %10009 = vst [vmem:[#allocation52_spill] sm:$0xff] %v8087_v54  ;;  %v4125_v36 = vpop.f32.mrf.mxu0  ;;  %v1919_v45 = vsel %vm7682_vm14, %v1917_v57, %v1918_v4  ;;  %v1616_v57 = vshrl.u32 %v1391_v63, 16  ;;  %v1619_v4 = vshll.u32 %v1391_v63, 16  ;;  %v6865_v26 = vld [vmem:[#allocation2 + $0x64] sm:$0xf] }
 0x12b   : > { %10011 = vst [vmem:[#allocation54_spill] sm:$0xff] %v8104_v60  ;;  %v2957_v29 = vunpack.c.l.b16 %v1919_v45  ;;  %v1613_v33 = vrot.slane %v1611_v5, 5  ;;  %v8115_v27 = vpack.c.b16 %v2751_v48, %v2750_v55  ;;  %v4126_v0 = vadd.f32 %v4125_v36, %v7665_v49  ;;  %v1204_v45 = vld [vmem:[#allocation2 + $0x60] sm:$0xe]  ;;  %v6866_v54 = vld [vmem:[#allocation2 + $0x68] sm:$0x1] }
 0x12c   : > { %v1321_v5 = vrot.slane %v6865_v26, 5  ;;  %v1625_v55 = vshll.u32 %v8113_v1, 16  ;;  %v1629_v48 = vshrl.u32 %v8113_v1, 16  ;;  %v1621_v26 = vrot.slane %v1619_v4, 5 }
 0x12d   : > { %v4167_v23 = vpop.f32.mrf.mxu2  ;;  %10012 = vst [vmem:[#allocation55_spill] sm:$0xff] %v8115_v27  ;;  %v1614_v36 = vsel %vm7198_vm11, %v1609_v16, %v1613_v33 }
 0x12e   : > { %v2895_v37 = vunpack.c.l.b16 %v1614_v36  ;;  %v8139_v16 = vrot.slane %v1625_v55, 5 }
 0x130   : > { %4564 = vmatmul.bf16.gmra.mxu1 %v8092_v62  ;;  %v8128_v62 = vpack.c.b16 %v2957_v29, %v2956_v47  ;;  %v5824_v47 = vrot.slane %v1204_v45, 9  ;;  %v1323_v29 = vrot.slane %v1321_v5, 4 }
 0x132   : > { %4480 = vmatmul.bf16.gmra.mxu0 %v8104_v60  ;;  %v4127_v6 = vpop.f32.mrf.mxu0  ;;  %10014 = vst [vmem:[#allocation57_spill] sm:$0xff] %v8128_v62  ;;  %v1604_v60 = vsel %vm7198_vm11, %v1599_v53, %v1603_v42  ;;  %v1324_v42 = vrot.slane %v6866_v54, 5  ;;  %v1322_v55 = vsel %vm7682_vm14, %v5824_v47, %v1321_v5 }
 0x133   : > { %v2894_v53 = vunpack.c.l.b16 %v1604_v60  ;;  %v4128_v4 = vadd.f32 %v4127_v6, %v7665_v49  ;;  %v1925_v60 = vrot.slane %v8095_v38, 5 }
 0x134   : > { %v4254_v46 = vpop.f32.mrf.mxu3 }
 0x135   : > { %4391 = vmatmul.bf16.gmra.mxu3 %v6658_v21  ;;  %v8124_v24 = vadd.f32 %v4254_v46, %v4166_v32  ;;  %v6467_v21 = vor.u32 %v6787_v13, %v6466_v10  ;;  %v1922_v32 = vrot.slane %v8077_v59, 5  ;;  %v4168_v46 = vadd.f32 %v4167_v23, %v7665_v49  ;;  %v6530_v23 = vld [vmem:[%s9853_s1 + $0x3b0] sm:$0xf] }
 0x136   : > { %v5839_v10 = vrot.slane %v1814_v12, 9  ;;  %v1618_v13 = vrot.slane %v1616_v57, 4  ;;  %v1631_v59 = vrot.slane %v1629_v48, 4  ;;  %v6803_v57 = vld [vmem:[%s9853_s1 + $0x3b4] sm:$0xf0]  ;;  %v1325_v48 = vsel %vm7682_vm14, %v1323_v29, %v1324_v42 }
 0x137   : > { %10013 = vst [vmem:[#allocation56_spill] sm:$0xff] %v8124_v24  ;;  %4624 = vmatpush.bf16.msra.mxu2 %v6467_v21  ;;  %v8141_v21 = vld [vmem:[#allocation2 + $0x74] sm:$0x1]  ;;  %v1924_v54 = vrot.slane %v1922_v32, 4  ;;  %v6531_v12 = vor.u32 %v6803_v57, %v6530_v23  ;;  %v1393_v23 = vld [vmem:[#allocation2 + $0x78] sm:$0xf] }
 0x138   : > { %v4214_v63 = vpop.f32.mrf.mxu1  ;;  %4307 = vmatmul.bf16.gmra.mxu2 %v8115_v27  ;;  %v1622_v36 = vor.u32 %v1621_v26, %v1618_v13  ;;  %v1632_v6 = vor.u32 %v1631_v59, %v8139_v16  ;;  %v1635_v27 = vshll.u32 %v8141_v21, 16  ;;  %v6659_v57 = vld [vmem:[#allocation2 + $0x60] sm:$0xff]  ;;  %v1923_v13 = vsel %vm7682_vm14, %v5839_v10, %v1922_v32  ;;  %v6690_v32 = vld [vmem:[%s9853_s1 + $0x34] sm:$0xf] }
 0x139   : > { %v8137_v24 = vadd.f32 %v4214_v63, %v4126_v0  ;;  %v8158_v63 = vpack.c.b16 %v2895_v37, %v2894_v53  ;;  %4713 = vmatpush.bf16.msra.mxu3 %v6531_v12  ;;  %v1926_v37 = vsel %vm7682_vm14, %v1924_v54, %v1925_v60  ;;  %v1640_v42 = vshrl.u32 %v1393_v23, 16  ;;  %v6594_v12 = vld [vmem:[%s9853_s1 + $0x430] sm:$0xf]  ;;  %v6084_v60 = vld [vmem:[%s9853_s1 + $0x38] sm:$0xf0] }
 0x13a   : > { %v4170_v33 = vpop.f32.mrf.mxu2  ;;  %v1623_v26 = vrot.slane %v1622_v36, 4  ;;  %v1633_v47 = vrot.slane %v1632_v6, 4  ;;  %v1637_v29 = vrot.slane %v1635_v27, 5  ;;  %v1643_v53 = vshll.u32 %v1393_v23, 16  ;;  %v6867_v23 = vld [vmem:[#allocation2 + $0x70] sm:$0xf] }
 0x13b   : > { %10016 = vst [vmem:[#allocation59_spill] sm:$0xff] %v8158_v63  ;;  %v4171_v10 = vadd.f32 %v4170_v33, %v7665_v49  ;;  %v2959_v36 = vunpack.c.l.b16 %v1926_v37  ;;  %v6087_v6 = vor.u32 %v6690_v32, %v6084_v60 }
 0x13c   : > { %v4256_v0 = vpop.f32.mrf.mxu3  ;;  %v1638_v33 = vsel %vm7198_vm11, %v1633_v47, %v1637_v29  ;;  %v1645_v37 = vrot.slane %v1643_v53, 5  ;;  %v6868_v29 = vld [vmem:[#allocation2 + $0x74] sm:$0x1]  ;;  %v1932_v53 = vrot.slane %v8141_v21, 5 }
 0x13d   : > { %v8151_v45 = vadd.f32 %v4256_v0, %v4168_v46  ;;  %v2752_v0 = vunpack.c.l.b16 %v1322_v55  ;;  %v8184_v55 = vld [vmem:[#allocation2 + $0x7c] sm:$0xf]  ;;  %4891 = vmatpush.bf16.msra.mxu1 %v6087_v6  ;;  %v2897_v6 = vunpack.c.l.b16 %v1638_v33 }
 0x13e   : > { %v1649_v32 = vshll.u32 %v8184_v55, 16  ;;  %v1653_v60 = vshrl.u32 %v8184_v55, 16 }
 0x13f   : > { %10015 = vst [vmem:[#allocation58_spill] sm:$0xff] %v8151_v45  ;;  %v4130_v38 = vpop.f32.mrf.mxu0  ;;  %v2753_v45 = vunpack.c.l.b16 %v1325_v48  ;;  %v2958_v48 = vunpack.c.l.b16 %v1923_v13  ;;  %v1642_v13 = vrot.slane %v1640_v42, 4 }
 0x140   : > { %4569 = vmatmul.bf16.gmra.mxu1 %v8128_v62  ;;  %v4216_v46 = vpop.f32.mrf.mxu1  ;;  %v1815_v62 = vld [vmem:[#allocation2 + $0x6c] sm:$0xe] }
 0x141   : > { %v8162_v5 = vadd.f32 %v4216_v46, %v4128_v4  ;;  %v6819_v4 = vld [vmem:[%s9853_s1 + $0x434] sm:$0xf0]  ;;  %v8179_v54 = vpack.c.b16 %v2753_v45, %v2752_v0  ;;  %v1328_v46 = vrot.slane %v6867_v23, 5  ;;  %v1929_v45 = vrot.slane %v8113_v1, 5  ;;  %v1205_v0 = vld [vmem:[#allocation2 + $0x6c] sm:$0xe] }
 0x142   : > { %4485 = vmatmul.bf16.gmra.mxu0 %v8158_v63  ;;  %v4172_v59 = vpop.f32.mrf.mxu2  ;;  %v6595_v27 = vor.u32 %v6819_v4, %v6594_v12  ;;  %v4131_v23 = vadd.f32 %v4130_v38, %v7665_v49  ;;  %v5825_v1 = vrot.slane %v1205_v0, 9  ;;  %v5840_v42 = vrot.slane %v1815_v62, 9  ;;  %v8205_v0 = vld [vmem:[#allocation2 + $0x80] sm:$0x1] }
 0x143   : > { %10017 = vst [vmem:[#allocation60_spill] sm:$0xff] %v8179_v54  ;;  %v1330_v47 = vrot.slane %v1328_v46, 4  ;;  %v1931_v35 = vrot.slane %v1929_v45, 4  ;;  %v1646_v43 = vor.u32 %v1645_v37, %v1642_v13  ;;  %v1651_v38 = vrot.slane %v1649_v32, 5 }
 0x144   : > { %4802 = vmatpush.bf16.msra.mxu0 %v6595_v27  ;;  %v1331_v27 = vrot.slane %v6868_v29, 5  ;;  %v1659_v37 = vshll.u32 %v8205_v0, 16 }
 0x145   : > { %4396 = vmatmul.bf16.gmra.mxu3 %v6659_v57  ;;  %v1628_v57 = vsel %vm7198_vm11, %v1623_v26, %v8139_v16  ;;  %v8198_v26 = vpack.c.b16 %v2959_v36, %v2958_v48  ;;  %v4173_v48 = vadd.f32 %v4172_v59, %v7665_v49 }
 0x146   : > { %v2896_v63 = vunpack.c.l.b16 %v1628_v57  ;;  %v1329_v57 = vsel %vm7682_vm14, %v5825_v1, %v1328_v46  ;;  %v1332_v62 = vsel %vm7682_vm14, %v1330_v47, %v1331_v27  ;;  %v1395_v1 = vld [vmem:[#allocation2 + $0x84] sm:$0xf] }
 0x147   : > { %v4132_v4 = vpop.f32.mrf.mxu0  ;;  %10019 = vst [vmem:[#allocation62_spill] sm:$0xff] %v8198_v26 }
 0x148   : > { %v4259_v12 = vpop.f32.mrf.mxu3  ;;  %4312 = vmatmul.bf16.gmra.mxu2 %v8179_v54  ;;  %v8212_v21 = vpack.c.b16 %v2897_v6, %v2896_v63  ;;  %v4133_v46 = vadd.f32 %v4132_v4, %v7665_v49  ;;  %v2755_v63 = vunpack.c.l.b16 %v1332_v62  ;;  %v6458_v4 = vld [vmem:[%s9853_s1 + $0x320] sm:$0xf]  ;;  %v6785_v62 = vld [vmem:[%s9853_s1 + $0x324] sm:$0xf0] }
 0x149   : > { %v8195_v16 = vadd.f32 %v4259_v12, %v4171_v10  ;;  %v1655_v10 = vrot.slane %v1653_v60, 4  ;;  %v6660_v60 = vld [vmem:[#allocation2 + $0x6c] sm:$0xff] }
 0x14a   : > { %v4273_v14 = vpop.f32.mrf.mxu2  ;;  %10020 = vst [vmem:[#allocation63_spill] sm:$0xff] %v8212_v21 }
 0x14b   : > { %10018 = vst [vmem:[#allocation61_spill] sm:$0xff] %v8195_v16  ;;  %v4274_v36 = vadd.f32 %v4273_v14, %v7688_v34  ;;  %v1933_v34 = vsel %vm7682_vm14, %v1931_v35, %v1932_v53  ;;  %v1647_v14 = vrot.slane %v1646_v43, 4  ;;  %v1656_v59 = vor.u32 %v1655_v10, %v1651_v38  ;;  %v8229_v53 = vld [vmem:[#allocation2 + $0x88] sm:$0xf] }
 0x14c   : > { %v2961_v29 = vunpack.c.l.b16 %v1933_v34 }
 0x14d   : > { %v4219_v17 = vpop.f32.mrf.mxu1  ;;  %v1657_v6 = vrot.slane %v1656_v59, 4  ;;  %v6459_v59 = vor.u32 %v6785_v62, %v6458_v4 }
 0x14e   : > { %v8201_v12 = vadd.f32 %v4219_v17, %v4131_v23  ;;  %v1930_v17 = vsel %vm7682_vm14, %v5840_v42, %v1929_v45  ;;  %v2754_v23 = vunpack.c.l.b16 %v1329_v57  ;;  %v4098_v45 = vadd.f32 %v7696_v50, %v7665_v49  ;;  %v1816_v57 = vld [vmem:[#allocation2 + $0x78] sm:$0xe] }
 0x14f   : > { %v4451_v13 = vpop.f32.mrf.mxu0  ;;  %v2960_v43 = vunpack.c.l.b16 %v1930_v17  ;;  %v1661_v42 = vrot.slane %v1659_v37, 5  ;;  %v1664_v17 = vshrl.u32 %v1395_v1, 16  ;;  %v1667_v37 = vshll.u32 %v1395_v1, 16  ;;  %4625 = vmatpush.bf16.msra.mxu2 %v6459_v59  ;;  %v6522_v59 = vld [vmem:[%s9853_s1 + $0x3a0] sm:$0xf] }
 0x150   : > { %4574 = vmatmul.bf16.gmra.mxu1 %v8198_v26  ;;  %v4261_v33 = vpop.f32.mrf.mxu3  ;;  %v8233_v50 = vpack.c.b16 %v2755_v63, %v2754_v23  ;;  %v4187_v47 = vadd.f32 %v7730_v3, %v4098_v45  ;;  %v1677_v23 = vshrl.u32 %v8229_v53, 16  ;;  %v10024_v3 = vrot.slane %v8184_v55, 5 }
 0x151   : > { %v8220_v32 = vadd.f32 %v4261_v33, %v4173_v48  ;;  %v1652_v48 = vsel %vm7198_vm11, %v1647_v14, %v1651_v38  ;;  %v6869_v33 = vld [vmem:[#allocation2 + $0x7c] sm:$0xf]  ;;  %v1662_v14 = vsel %vm7198_vm11, %v1657_v6, %v1661_v42  ;;  %v1939_v45 = vrot.slane %v8205_v0, 5  ;;  %v6801_v0 = vld [vmem:[%s9853_s1 + $0x3a4] sm:$0xf0] }
 0x152   : > { %4490 = vmatmul.bf16.gmra.mxu0 %v8212_v21  ;;  %v4275_v27 = vpop.f32.mrf.mxu2  ;;  %10022 = vst [vmem:[#allocation65_spill] sm:$0xff] %v8233_v50  ;;  %v1335_v34 = vrot.slane %v6869_v33, 5  ;;  %v2898_v26 = vunpack.c.l.b16 %v1652_v48  ;;  %v5841_v21 = vrot.slane %v1816_v57, 9  ;;  %v1938_v1 = vrot.slane %v10024_v3, 4  ;;  %v8253_v57 = vld [vmem:[#allocation2 + $0x8c] sm:$0x1] }
 0x153   : > { %10021 = vst [vmem:[#allocation64_spill] sm:$0xff] %v8220_v32  ;;  %v1666_v4 = vrot.slane %v1664_v17, 4  ;;  %v1669_v32 = vrot.slane %v1667_v37, 5  ;;  %v2899_v51 = vunpack.c.l.b16 %v1662_v14  ;;  %v1679_v42 = vrot.slane %v1677_v23, 4 }
 0x154   : > { %v1337_v54 = vrot.slane %v1335_v34, 4  ;;  %v4276_v17 = vadd.f32 %v4275_v27, %v4187_v47  ;;  %v1683_v47 = vshll.u32 %v8253_v57, 16  ;;  %v4103_v55 = vadd.f32 %v7782_v40, %v7665_v49 }
 0x155   : > { %v4221_v35 = vpop.f32.mrf.mxu1  ;;  %4401 = vmatmul.bf16.gmra.mxu3 %v6660_v60  ;;  %v1673_v60 = vshll.u32 %v8229_v53, 16  ;;  %v8269_v14 = vpack.c.b16 %v2899_v51, %v2898_v26 }
 0x156   : > { %v8231_v10 = vadd.f32 %v4221_v35, %v4133_v46  ;;  %v1206_v46 = vld [vmem:[#allocation2 + $0x78] sm:$0xe]  ;;  %v8243_v35 = vpack.c.b16 %v2961_v29, %v2960_v43  ;;  %v6870_v43 = vld [vmem:[#allocation2 + $0x80] sm:$0x1] }
 0x157   : > { %v4453_v38 = vpop.f32.mrf.mxu0  ;;  %v5826_v62 = vrot.slane %v1206_v46, 9  ;;  %v1338_v29 = vrot.slane %v6870_v43, 5  ;;  %v8251_v6 = vrot.slane %v1673_v60, 5  ;;  %10025 = vst [vmem:[#allocation67_spill] sm:$0xff] %v8269_v14 }
 0x158   : > { %v4362_v63 = vpop.f32.mrf.mxu3  ;;  %10023 = vst [vmem:[#allocation66_spill] sm:$0xff] %v8243_v35  ;;  %4317 = vmatmul.bf16.gmra.mxu2 %v8233_v50 }
 0x159   : > { %v4363_v33 = vadd.f32 %v4362_v63, %v4274_v36  ;;  %v1336_v60 = vsel %vm7682_vm14, %v5826_v62, %v1335_v34  ;;  %v1339_v23 = vsel %vm7682_vm14, %v1337_v54, %v1338_v29  ;;  %v1670_v63 = vor.u32 %v1669_v32, %v1666_v4  ;;  %v6661_v62 = vld [vmem:[#allocation2 + $0x78] sm:$0xff]  ;;  %v1397_v4 = vld [vmem:[#allocation2 + $0x90] sm:$0xf] }
 0x15a   : > { %v4278_v36 = vpop.f32.mrf.mxu2  ;;  %v1940_v54 = vsel %vm7682_vm14, %v1938_v1, %v1939_v45  ;;  %v2756_v32 = vunpack.c.l.b16 %v1336_v60  ;;  %v2757_v51 = vunpack.c.l.b16 %v1339_v23  ;;  %v6586_v1 = vld [vmem:[%s9853_s1 + $0x420] sm:$0xf]  ;;  %v6688_v45 = vld [vmem:[%s9853_s1 + $0x24] sm:$0xf]  ;;  %v1688_v60 = vshrl.u32 %v1397_v4, 16 }
 0x15b   : > { %v4452_v16 = vadd.f32 %v4451_v13, %v4363_v33  ;;  %v4279_v37 = vadd.f32 %v4278_v36, %v7779_v44  ;;  %v6523_v13 = vor.u32 %v6801_v0, %v6522_v59  ;;  %v1680_v33 = vor.u32 %v1679_v42, %v8251_v6 }
 0x15c   : > { %v1671_v26 = vrot.slane %v1670_v63, 4  ;;  %v1685_v42 = vrot.slane %v1683_v47, 5  ;;  %v2963_v59 = vunpack.c.l.b16 %v1940_v54  ;;  %v4192_v54 = vadd.f32 %v7804_v41, %v4103_v55 }
 0x15d   : > { %v4540_v48 = vpop.f32.mrf.mxu1  ;;  %4714 = vmatpush.bf16.msra.mxu3 %v6523_v13  ;;  %v1681_v29 = vrot.slane %v1680_v33, 4  ;;  %v6076_v13 = vld [vmem:[%s9853_s1 + $0x28] sm:$0xf0]  ;;  %v6871_v33 = vld [vmem:[#allocation2 + $0x88] sm:$0xf] }
 0x15e   : > { %v8262_v46 = vadd.f32 %v4540_v48, %v4452_v16  ;;  %v10026_v16 = vmov %v10024_v3  ;;  %v8280_v48 = vld [vmem:[#allocation2 + $0x94] sm:$0xf]  ;;  %v1676_v23 = vsel %vm7198_vm11, %v1671_v26, %v8251_v6  ;;  %v6079_v63 = vor.u32 %v6688_v45, %v6076_v13  ;;  %v6872_v13 = vld [vmem:[#allocation2 + $0x8c] sm:$0x1] }
 0x15f   : > { %v4456_v27 = vpop.f32.mrf.mxu0  ;;  %v1937_v34 = vsel %vm7682_vm14, %v5841_v21, %v10026_v16  ;;  %v1342_v47 = vrot.slane %v6871_v33, 5  ;;  %v1207_v16 = vld [vmem:[#allocation2 + $0x84] sm:$0xe]  ;;  %v1686_v6 = vsel %vm7198_vm11, %v1681_v29, %v1685_v42  ;;  %v1943_v45 = vrot.slane %v8229_v53, 5 }
 0x160   : > { %4579 = vmatmul.bf16.gmra.mxu1 %v8243_v35  ;;  %v4364_v44 = vpop.f32.mrf.mxu3  ;;  %v2962_v36 = vunpack.c.l.b16 %v1937_v34  ;;  %v1697_v34 = vshll.u32 %v8280_v48, 16  ;;  %v1345_v41 = vrot.slane %v6872_v13, 5  ;;  %v4108_v13 = vadd.f32 %v7859_v19, %v7665_v49 }
 0x161   : > { %v4365_v3 = vadd.f32 %v4364_v44, %v4276_v17  ;;  %v8293_v17 = vpack.c.b16 %v2757_v51, %v2756_v32  ;;  %v1691_v44 = vshll.u32 %v1397_v4, 16  ;;  %4892 = vmatpush.bf16.msra.mxu1 %v6079_v63  ;;  %v2900_v4 = vunpack.c.l.b16 %v1676_v23  ;;  %v8313_v63 = vld [vmem:[#allocation2 + $0x98] sm:$0x1] }
 0x162   : > { %4495 = vmatmul.bf16.gmra.mxu0 %v8269_v14  ;;  %v4280_v0 = vpop.f32.mrf.mxu2  ;;  %v8306_v51 = vpack.c.b16 %v2963_v59, %v2962_v36  ;;  %v2901_v59 = vunpack.c.l.b16 %v1686_v6  ;;  %v1699_v33 = vrot.slane %v1697_v34, 5  ;;  %v6662_v6 = vld [vmem:[#allocation2 + $0x84] sm:$0xff] }
 0x163   : > { %v4454_v43 = vadd.f32 %v4453_v38, %v4365_v3  ;;  %v6817_v38 = vld [vmem:[%s9853_s1 + $0x424] sm:$0xf0]  ;;  %10027 = vst [vmem:[#allocation68_spill] sm:$0xff] %v8293_v17  ;;  %v1701_v3 = vshrl.u32 %v8280_v48, 16  ;;  %v1693_v55 = vrot.slane %v1691_v44, 5  ;;  %v4281_v23 = vadd.f32 %v4280_v0, %v4192_v54 }
 0x164   : > { %v6587_v40 = vor.u32 %v6817_v38, %v6586_v1  ;;  %10028 = vst [vmem:[#allocation69_spill] sm:$0xff] %v8306_v51  ;;  %v1817_v38 = vld [vmem:[#allocation2 + $0x84] sm:$0xe] }
 0x165   : > { %v4542_v21 = vpop.f32.mrf.mxu1  ;;  %4406 = vmatmul.bf16.gmra.mxu3 %v6661_v62  ;;  %v1703_v35 = vrot.slane %v1701_v3, 4  ;;  %v5842_v42 = vrot.slane %v1817_v38, 9  ;;  %v8323_v3 = vpack.c.b16 %v2901_v59, %v2900_v4  ;;  %v6450_v59 = vld [vmem:[%s9853_s1 + $0x310] sm:$0xf] }
 0x166   : > { %4803 = vmatpush.bf16.msra.mxu0 %v6587_v40  ;;  %v8303_v62 = vadd.f32 %v4542_v21, %v4454_v43  ;;  %v1690_v40 = vrot.slane %v1688_v60, 4  ;;  %v5827_v43 = vrot.slane %v1207_v16, 9  ;;  %v1344_v21 = vrot.slane %v1342_v47, 4 }
 0x167   : > { %v4458_v1 = vpop.f32.mrf.mxu0  ;;  %v1945_v60 = vrot.slane %v1943_v45, 4  ;;  %10029 = vst [vmem:[#allocation70_spill] sm:$0xff] %v8323_v3 }
 0x168   : > { %v4367_v32 = vpop.f32.mrf.mxu3  ;;  %4322 = vmatmul.bf16.gmra.mxu2 %v8293_v17  ;;  %v1343_v44 = vsel %vm7682_vm14, %v5827_v43, %v1342_v47  ;;  %v1694_v34 = vor.u32 %v1693_v55, %v1690_v40 }
 0x169   : > { %v4368_v26 = vadd.f32 %v4367_v32, %v4279_v37  ;;  %v1946_v37 = vrot.slane %v8253_v57, 5  ;;  %v1704_v57 = vor.u32 %v1703_v35, %v1699_v33  ;;  %v1707_v32 = vshll.u32 %v8313_v63, 16 }
 0x16a   : > { %v4283_v29 = vpop.f32.mrf.mxu2  ;;  %v1695_v40 = vrot.slane %v1694_v34, 4 }
 0x16b   : > { %v4457_v36 = vadd.f32 %v4456_v27, %v4368_v26  ;;  %v4284_v53 = vadd.f32 %v4283_v29, %v7849_v56  ;;  %v1346_v27 = vsel %vm7682_vm14, %v1344_v21, %v1345_v41  ;;  %v1944_v56 = vsel %vm7682_vm14, %v5842_v42, %v1943_v45  ;;  %v1399_v21 = vld [vmem:[#allocation2 + $0x9c] sm:$0xf]  ;;  %v8336_v29 = vld [vmem:[#allocation2 + $0xa0] sm:$0xf]  ;;  %v6783_v42 = vld [vmem:[%s9853_s1 + $0x314] sm:$0xf0] }
 0x16c   : > { %v1947_v47 = vsel %vm7682_vm14, %v1945_v60, %v1946_v37  ;;  %v2758_v26 = vunpack.c.l.b16 %v1343_v44  ;;  %v2759_v38 = vunpack.c.l.b16 %v1346_v27  ;;  %v1705_v4 = vrot.slane %v1704_v57, 4  ;;  %v6873_v60 = vld [vmem:[#allocation2 + $0x94] sm:$0xf] }
 0x16d   : > { %v4545_v14 = vpop.f32.mrf.mxu1  ;;  %v1709_v35 = vrot.slane %v1707_v32, 5  ;;  %v2964_v55 = vunpack.c.l.b16 %v1944_v56  ;;  %v2965_v45 = vunpack.c.l.b16 %v1947_v47  ;;  %v1700_v19 = vsel %vm7198_vm11, %v1695_v40, %v1699_v33 }
 0x16e   : > { %v8316_v16 = vadd.f32 %v4545_v14, %v4457_v36  ;;  %v1349_v44 = vrot.slane %v6873_v60, 5  ;;  %v6451_v27 = vor.u32 %v6783_v42, %v6450_v59  ;;  %v1712_v34 = vshrl.u32 %v1399_v21, 16 }
 0x16f   : > { %v4461_v54 = vpop.f32.mrf.mxu0  ;;  %v1710_v57 = vsel %vm7198_vm11, %v1705_v4, %v1709_v35  ;;  %v1715_v32 = vshll.u32 %v1399_v21, 16  ;;  %v1725_v56 = vshrl.u32 %v8336_v29, 16  ;;  %v8352_v47 = vpack.c.b16 %v2965_v45, %v2964_v55  ;;  %v6874_v21 = vld [vmem:[#allocation2 + $0x98] sm:$0x1] }
 0x170   : > { %4584 = vmatmul.bf16.gmra.mxu1 %v8306_v51  ;;  %v4369_v0 = vpop.f32.mrf.mxu3  ;;  %4626 = vmatpush.bf16.msra.mxu2 %v6451_v27  ;;  %v1950_v40 = vrot.slane %v8280_v48, 5  ;;  %v2903_v4 = vunpack.c.l.b16 %v1710_v57  ;;  %v1351_v35 = vrot.slane %v1349_v44, 4  ;;  %v1714_v59 = vrot.slane %v1712_v34, 4  ;;  %v6514_v48 = vld [vmem:[%s9853_s1 + $0x390] sm:$0xf] }
 0x171   : > { %v4370_v14 = vadd.f32 %v4369_v0, %v4281_v23  ;;  %v1208_v23 = vld [vmem:[#allocation2 + $0x90] sm:$0xe]  ;;  %v1721_v0 = vshll.u32 %v8336_v29, 16  ;;  %10031 = vst [vmem:[#allocation72_spill] sm:$0xff] %v8352_v47  ;;  %v1717_v60 = vrot.slane %v1715_v32, 5 }
 0x172   : > { %4500 = vmatmul.bf16.gmra.mxu0 %v8323_v3  ;;  %v4285_v36 = vpop.f32.mrf.mxu2 }
 0x173   : > { %v4459_v43 = vadd.f32 %v4458_v1, %v4370_v14  ;;  %v8338_v1 = vpack.c.b16 %v2759_v38, %v2758_v26  ;;  %v4197_v14 = vadd.f32 %v7885_v15, %v4108_v13  ;;  %v2902_v38 = vunpack.c.l.b16 %v1700_v19  ;;  %v6799_v19 = vld [vmem:[%s9853_s1 + $0x394] sm:$0xf0] }
 0x174   : > { %v8356_v15 = vrot.slane %v1721_v0, 5  ;;  %v1727_v13 = vrot.slane %v1725_v56, 4  ;;  %v6515_v57 = vor.u32 %v6799_v19, %v6514_v48  ;;  %v1718_v56 = vor.u32 %v1717_v60, %v1714_v59 }
 0x175   : > { %v4547_v41 = vpop.f32.mrf.mxu1  ;;  %4411 = vmatmul.bf16.gmra.mxu3 %v6662_v6  ;;  %10030 = vst [vmem:[#allocation71_spill] sm:$0xff] %v8338_v1  ;;  %v4286_v45 = vadd.f32 %v4285_v36, %v4197_v14  ;;  %v8376_v0 = vpack.c.b16 %v2903_v4, %v2902_v38 }
 0x176   : > { %v8343_v37 = vadd.f32 %v4547_v41, %v4459_v43  ;;  %v5828_v43 = vrot.slane %v1208_v23, 9  ;;  %v1352_v41 = vrot.slane %v6874_v21, 5  ;;  %v1728_v14 = vor.u32 %v1727_v13, %v8356_v15  ;;  %4715 = vmatpush.bf16.msra.mxu3 %v6515_v57 }
 0x177   : > { %v4463_v26 = vpop.f32.mrf.mxu0  ;;  %10032 = vst [vmem:[#allocation73_spill] sm:$0xff] %v8376_v0  ;;  %v1719_v19 = vrot.slane %v1718_v56, 4  ;;  %v6815_v56 = vld [vmem:[%s9853_s1 + $0x414] sm:$0xf0] }
 0x178   : > { %v4372_v6 = vpop.f32.mrf.mxu3  ;;  %4327 = vmatmul.bf16.gmra.mxu2 %v8338_v1  ;;  %v1350_v34 = vsel %vm7682_vm14, %v5828_v43, %v1349_v44  ;;  %v1353_v32 = vsel %vm7682_vm14, %v1351_v35, %v1352_v41  ;;  %v1729_v57 = vrot.slane %v1728_v14, 4 }
 0x179   : > { %v4373_v33 = vadd.f32 %v4372_v6, %v4284_v53  ;;  %v8358_v53 = vld [vmem:[#allocation2 + $0xa4] sm:$0x1]  ;;  %v1401_v6 = vld [vmem:[#allocation2 + $0xa8] sm:$0xf]  ;;  %v2760_v35 = vunpack.c.l.b16 %v1350_v34  ;;  %v2761_v38 = vunpack.c.l.b16 %v1353_v32 }
 0x17a   : > { %v4288_v27 = vpop.f32.mrf.mxu2  ;;  %v1736_v4 = vshrl.u32 %v1401_v6, 16  ;;  %v1739_v59 = vshll.u32 %v1401_v6, 16 }
 0x17b   : > { %v4462_v42 = vadd.f32 %v4461_v54, %v4373_v33  ;;  %v8367_v23 = vadd.f32 %v4288_v27, %v7925_v8  ;;  %v1818_v54 = vld [vmem:[#allocation2 + $0x90] sm:$0xe]  ;;  %v1731_v8 = vshll.u32 %v8358_v53, 16  ;;  %v8380_v33 = vld [vmem:[#allocation2 + $0xac] sm:$0xf]  ;;  %v8401_v14 = vpack.c.b16 %v2761_v38, %v2760_v35 }
 0x17c   : > { %v5843_v21 = vrot.slane %v1818_v54, 9  ;;  %v6663_v27 = vld [vmem:[#allocation2 + $0x90] sm:$0xff]  ;;  %v1745_v60 = vshll.u32 %v8380_v33, 16  ;;  %v1749_v13 = vshrl.u32 %v8380_v33, 16  ;;  %v4113_v54 = vadd.f32 %v7927_v22, %v7665_v49 }
 0x17d   : > { %v4550_v55 = vpop.f32.mrf.mxu1  ;;  %v6686_v22 = vld [vmem:[%s9853_s1 + $0x14] sm:$0xf]  ;;  %10033 = vst [vmem:[#allocation74_spill] sm:$0xff] %v8401_v14  ;;  %v1738_v6 = vrot.slane %v1736_v4, 4  ;;  %v1724_v4 = vsel %vm7198_vm11, %v1719_v19, %v8356_v15 }
 0x17e   : > { %v8371_v36 = vadd.f32 %v4550_v55, %v4462_v42  ;;  %v1952_v42 = vrot.slane %v1950_v40, 4  ;;  %v1953_v55 = vrot.slane %v8313_v63, 5  ;;  %v8406_v51 = vrot.slane %v1745_v60, 5 }
 0x17f   : > { %v4466_v43 = vpop.f32.mrf.mxu0  ;;  %v1957_v60 = vrot.slane %v8336_v29, 5  ;;  %v2904_v29 = vunpack.c.l.b16 %v1724_v4 }
 0x180   : > { %4589 = vmatmul.bf16.gmra.mxu1 %v8352_v47  ;;  %v4374_v44 = vpop.f32.mrf.mxu3  ;;  %v1733_v47 = vrot.slane %v1731_v8, 5  ;;  %v1954_v34 = vsel %vm7682_vm14, %v1952_v42, %v1953_v55  ;;  %v6068_v8 = vld [vmem:[%s9853_s1 + $0x18] sm:$0xf0]  ;;  %v6875_v55 = vld [vmem:[#allocation2 + $0xa0] sm:$0xf] }
 0x181   : > { %v4375_v41 = vadd.f32 %v4374_v44, %v4286_v45  ;;  %v1951_v45 = vsel %vm7682_vm14, %v5843_v21, %v1950_v40  ;;  %v1741_v44 = vrot.slane %v1739_v59, 5  ;;  %v6071_v21 = vor.u32 %v6686_v22, %v6068_v8  ;;  %v1209_v42 = vld [vmem:[#allocation2 + $0x9c] sm:$0xe]  ;;  %v6876_v22 = vld [vmem:[#allocation2 + $0xa4] sm:$0x1] }
 0x182   : > { %4505 = vmatmul.bf16.gmra.mxu0 %v8376_v0  ;;  %v4290_v32 = vpop.f32.mrf.mxu2  ;;  %v1751_v0 = vrot.slane %v1749_v13, 4  ;;  %v2966_v1 = vunpack.c.l.b16 %v1951_v45  ;;  %v2967_v3 = vunpack.c.l.b16 %v1954_v34  ;;  %v1734_v59 = vsel %vm7198_vm11, %v1729_v57, %v1733_v47 }
 0x183   : > { %v4464_v48 = vadd.f32 %v4463_v26, %v4375_v41  ;;  %v6578_v26 = vld [vmem:[%s9853_s1 + $0x410] sm:$0xf]  ;;  %v1356_v41 = vrot.slane %v6875_v55, 5  ;;  %4893 = vmatpush.bf16.msra.mxu1 %v6071_v21  ;;  %v4202_v13 = vadd.f32 %v7959_v7, %v4113_v54  ;;  %v1742_v34 = vor.u32 %v1741_v44, %v1738_v6 }
 0x184   : > { %v6579_v40 = vor.u32 %v6815_v56, %v6578_v26  ;;  %v1752_v15 = vor.u32 %v1751_v0, %v8406_v51  ;;  %v8423_v57 = vpack.c.b16 %v2967_v3, %v2966_v1  ;;  %v2905_v8 = vunpack.c.l.b16 %v1734_v59 }
 0x185   : > { %v4552_v63 = vpop.f32.mrf.mxu1  ;;  %4416 = vmatmul.bf16.gmra.mxu3 %v6663_v27  ;;  %v8408_v27 = vld [vmem:[#allocation2 + $0xb0] sm:$0x1]  ;;  %v1358_v56 = vrot.slane %v1356_v41, 4  ;;  %v4291_v54 = vadd.f32 %v4290_v32, %v4202_v13  ;;  %v1959_v55 = vrot.slane %v1957_v60, 4  ;;  %v1743_v44 = vrot.slane %v1742_v34, 4 }
 0x186   : > { %4804 = vmatpush.bf16.msra.mxu0 %v6579_v40  ;;  %v8410_v35 = vadd.f32 %v4552_v63, %v4464_v48  ;;  %v1819_v48 = vld [vmem:[#allocation2 + $0x9c] sm:$0xe]  ;;  %v5829_v63 = vrot.slane %v1209_v42, 9  ;;  %v1359_v40 = vrot.slane %v6876_v22, 5  ;;  %v1755_v19 = vshll.u32 %v8408_v27, 16  ;;  %10034 = vst [vmem:[#allocation75_spill] sm:$0xff] %v8423_v57 }
 0x187   : > { %v4468_v26 = vpop.f32.mrf.mxu0  ;;  %v5844_v21 = vrot.slane %v1819_v48, 9  ;;  %v1960_v42 = vrot.slane %v8358_v53, 5  ;;  %v1753_v1 = vrot.slane %v1752_v15, 4  ;;  %v8436_v53 = vpack.c.b16 %v2905_v8, %v2904_v29  ;;  %v1403_v13 = vld [vmem:[#allocation2 + $0xb4] sm:$0xf] }
 0x188   : > { %v4377_v38 = vpop.f32.mrf.mxu3  ;;  %4332 = vmatmul.bf16.gmra.mxu2 %v8401_v14  ;;  %v1357_v0 = vsel %vm7682_vm14, %v5829_v63, %v1356_v41  ;;  %v1360_v3 = vsel %vm7682_vm14, %v1358_v56, %v1359_v40  ;;  %v1757_v32 = vrot.slane %v1755_v19, 5  ;;  %v6664_v63 = vld [vmem:[#allocation2 + $0x9c] sm:$0xff]  ;;  %v1748_v40 = vsel %vm7198_vm11, %v1743_v44, %v8406_v51  ;;  %v8448_v19 = vld [vmem:[#allocation2 + $0xb8] sm:$0xf]  ;;  %v8455_v51 = vld [vmem:[#allocation2 + $0xa8] sm:$0xe] }
 0x189   : > { %v4378_v45 = vadd.f32 %v4377_v38, %v8367_v23  ;;  %v262_v38 = vld [vmem:[#allocation2 + $0xc0] sm:$0x1]  ;;  %10035 = vst [vmem:[#allocation76_spill] sm:$0xff] %v8436_v53  ;;  %v1958_v41 = vsel %vm7682_vm14, %v5844_v21, %v1957_v60  ;;  %v1961_v34 = vsel %vm7682_vm14, %v1959_v55, %v1960_v42  ;;  %v2762_v56 = vunpack.c.l.b16 %v1357_v0 }
 0x18a   : > { %v4293_v23 = vpop.f32.mrf.mxu2  ;;  %v263_v4 = vsel %vm7032_vm3, 0, %v262_v38  ;;  %v2763_v22 = vunpack.c.l.b16 %v1360_v3  ;;  %v1758_v15 = vsel %vm7198_vm11, %v1753_v1, %v1757_v32  ;;  %v1760_v29 = vshrl.u32 %v1403_v13, 16  ;;  %v1210_v3 = vld [vmem:[#allocation2 + $0xa8] sm:$0xe]  ;;  %v6877_v32 = vld [vmem:[#allocation2 + $0xac] sm:$0xf] }
 0x18b   : > { %v4467_v47 = vadd.f32 %v4466_v43, %v4378_v45  ;;  %v4294_v6 = vadd.f32 %v4293_v23, %v7984_v39  ;;  %264 = vst [vmem:[#allocation2 + $0xc0] sm:$0x1] %v263_v4  ;;  %v202_v45 = vld [vmem:[%s7065_s15 + $0x78] sm:$0xf]  ;;  %v1763_v8 = vshll.u32 %v1403_v13, 16  ;;  %v2968_v23 = vunpack.c.l.b16 %v1958_v41 }
 0x18c   : > { %v2969_v21 = vunpack.c.l.b16 %v1961_v34  ;;  %v8461_v0 = vpack.c.b16 %v2763_v22, %v2762_v56  ;;  %v2906_v44 = vunpack.c.l.b16 %v1748_v40  ;;  %v2907_v38 = vunpack.c.l.b16 %v1758_v15 }
 0x18d   : > { %v4555_v7 = vpop.f32.mrf.mxu1  ;;  %v1769_v1 = vshll.u32 %v8448_v19, 16  ;;  %v1363_v4 = vrot.slane %v6877_v32, 5  ;;  %v585_v13 = vshll.u32 %v202_v45, 16  ;;  %v1765_v34 = vrot.slane %v1763_v8, 5 }
 0x18e   : > { %v8429_v43 = vadd.f32 %v4555_v7, %v4467_v47  ;;  %v582_v47 = vshrl.u32 %v202_v45, 16  ;;  %v4118_v7 = vadd.f32 %v7986_v2, %v7665_v49  ;;  %10036 = vst [vmem:[#allocation77_spill] sm:$0xff] %v8461_v0  ;;  %v6781_v2 = vld [vmem:[%s9853_s1 + $0x304] sm:$0xf0]  ;;  %v8469_v40 = vpack.c.b16 %v2969_v21, %v2968_v23  ;;  %v6878_v23 = vld [vmem:[#allocation2 + $0xb0] sm:$0x1] }
 0x18f   : > { %v4471_v59 = vpop.f32.mrf.mxu0  ;;  %v5845_v42 = vrot.slane %v8455_v51, 9  ;;  %v10039_v45 = vrot.slane %v8380_v33, 5  ;;  %v1967_v8 = vrot.slane %v8408_v27, 5  ;;  %v1366_v21 = vrot.slane %v6878_v23, 5 }
 0x190   : > { %4594 = vmatmul.bf16.gmra.mxu1 %v8423_v57  ;;  %v4379_v39 = vpop.f32.mrf.mxu3  ;;  %v584_v41 = vrot.slane %v582_v47, 7  ;;  %v4207_v56 = vadd.f32 %v8022_v61, %v4118_v7  ;;  %10037 = vst [vmem:[#allocation78_spill] sm:$0xff] %v8469_v40  ;;  %v5830_v57 = vrot.slane %v1210_v3, 9  ;;  %v8474_v47 = vpack.c.b16 %v2907_v38, %v2906_v44  ;;  %v318_v44 = vld [vmem:[#allocation2 + $0xc8] sm:$0x1] }
 0x191   : > { %v4380_v48 = vadd.f32 %v4379_v39, %v4291_v54  ;;  %v1365_v7 = vrot.slane %v1363_v4, 4 }
 0x192   : > { %4510 = vmatmul.bf16.gmra.mxu0 %v8436_v53  ;;  %v4295_v55 = vpop.f32.mrf.mxu2  ;;  %v203_v53 = vld [vmem:[%s7065_s15 + $0x7c] sm:$0xf]  ;;  %10038 = vst [vmem:[#allocation79_spill] sm:$0xff] %v8474_v47  ;;  %v754_v61 = vld [vmem:[#allocation2 + $0xc0] sm:$0xf]  ;;  %v587_v51 = vor.u32 %v585_v13, %v584_v41  ;;  %v1364_v27 = vsel %vm7682_vm14, %v5830_v57, %v1363_v4  ;;  %v319_v4 = vsel %vm7043_vm4, 0, %v318_v44 }
 0x193   : > { %v8450_v60 = vadd.f32 %v4468_v26, %v4380_v48  ;;  %v6442_v26 = vld [vmem:[%s9853_s1 + $0x300] sm:$0xf]  ;;  %v1762_v48 = vrot.slane %v1760_v29, 4  ;;  %v1966_v29 = vrot.slane %v10039_v45, 4  ;;  %v1367_v57 = vsel %vm7682_vm14, %v1365_v7, %v1366_v21  ;;  %320 = vst [vmem:[#allocation2 + $0xc8] sm:$0x1] %v319_v4 }
 0x194   : > { %v6443_v39 = vor.u32 %v6781_v2, %v6442_v26  ;;  %v8479_v26 = vrot.slane %v1769_v1, 5  ;;  %v8481_v2 = vld [vmem:[#allocation2 + $0xbc] sm:$0x1]  ;;  %v6506_v45 = vld [vmem:[%s9853_s1 + $0x380] sm:$0xf]  ;;  %v755_v1 = vsel %vm7095_vm8, %v587_v51, %v754_v61  ;;  %v6665_v7 = vld [vmem:[#allocation2 + $0xa8] sm:$0xff]  ;;  %v2764_v23 = vunpack.c.l.b16 %v1364_v27 }
 0x195   : > { %v4557_v54 = vpop.f32.mrf.mxu1  ;;  %4421 = vmatmul.bf16.gmra.mxu3 %v6664_v63  ;;  %v1773_v63 = vshrl.u32 %v8448_v19, 16  ;;  %756 = vst [vmem:[#allocation2 + $0xc0] sm:$0xf] %v755_v1  ;;  %v2765_v21 = vunpack.c.l.b16 %v1367_v57 }
 0x196   : > { %4627 = vmatpush.bf16.msra.mxu2 %v6443_v39  ;;  %v590_v39 = vshrl.u32 %v203_v53, 16 }
 0x197   : > { %v4473_v15 = vpop.f32.mrf.mxu0  ;;  %v1775_v32 = vrot.slane %v1773_v63, 4  ;;  %v8499_v63 = vadd.f32 %v4557_v54, %v8450_v60  ;;  %v10040_v54 = vrot.slane %v8380_v33, 5  ;;  %v6570_v33 = vld [vmem:[%s9853_s1 + $0x400] sm:$0xf] }
 0x198   : > { %v4382_v22 = vpop.f32.mrf.mxu3  ;;  %4337 = vmatmul.bf16.gmra.mxu2 %v8461_v0 }
 0x199   : > { %v4383_v14 = vadd.f32 %v4382_v22, %v4294_v6  ;;  %v1766_v6 = vor.u32 %v1765_v34, %v1762_v48  ;;  %v4296_v22 = vadd.f32 %v4295_v55, %v4207_v56  ;;  %v588_v55 = vrot.slane %v584_v41, 4 }
 0x19a   : > { %v4298_v0 = vpop.f32.mrf.mxu2  ;;  %v592_v34 = vrot.slane %v590_v39, 7  ;;  %v1776_v58 = vor.u32 %v1775_v32, %v8479_v26  ;;  %v1965_v51 = vsel %vm7682_vm14, %v5845_v42, %v10040_v54  ;;  %v6813_v42 = vld [vmem:[%s9853_s1 + $0x404] sm:$0xf0] }
 0x19b   : > { %v4472_v3 = vadd.f32 %v4471_v59, %v4383_v14  ;;  %v6797_v14 = vld [vmem:[%s9853_s1 + $0x384] sm:$0xf0]  ;;  %v593_v59 = vshll.u32 %v203_v53, 16  ;;  %v4299_v13 = vadd.f32 %v4298_v0, %v8064_v11  ;;  %v1779_v11 = vshll.u32 %v8481_v2, 16 }
 0x19c   : > { %v6507_v48 = vor.u32 %v6797_v14, %v6506_v45  ;;  %v1767_v32 = vrot.slane %v1766_v6, 4  ;;  %v1777_v44 = vrot.slane %v1776_v58, 4  ;;  %v8526_v6 = vpack.c.b16 %v2765_v21, %v2764_v23  ;;  %v6060_v14 = vld [vmem:[%s9853_s1 + $0x8] sm:$0xf0]  ;;  %v758_v4 = vld [vmem:[#allocation2 + $0xc8] sm:$0x1] }
 0x19d   : > { %v4560_v38 = vpop.f32.mrf.mxu1  ;;  %v595_v53 = vor.u32 %v593_v59, %v592_v34  ;;  %v6571_v9 = vor.u32 %v6813_v42, %v6570_v33  ;;  %v1405_v59 = vld [vmem:[#allocation2 + $0xc0] sm:$0xf] }
 0x19e   : > { %v8501_v56 = vadd.f32 %v4560_v38, %v4472_v3  ;;  %4716 = vmatpush.bf16.msra.mxu3 %v6507_v48  ;;  %v1968_v3 = vsel %vm7682_vm14, %v1966_v29, %v1967_v8  ;;  %v1781_v38 = vrot.slane %v1779_v11, 5  ;;  %v2970_v29 = vunpack.c.l.b16 %v1965_v51  ;;  %10041 = vst [vmem:[#allocation80_spill] sm:$0xff] %v8526_v6 }
 0x19f   : > { %v4476_v41 = vpop.f32.mrf.mxu0  ;;  %v596_v60 = vsel %vm7083_vm7, %v588_v55, %v595_v53  ;;  %v2971_v8 = vunpack.c.l.b16 %v1968_v3  ;;  %v1772_v1 = vsel %vm7198_vm11, %v1767_v32, %v8479_v26  ;;  %v1211_v55 = vld [vmem:[#allocation2 + $0xb4] sm:$0xe]  ;;  %4805 = vmatpush.bf16.msra.mxu0 %v6571_v9  ;;  %v1784_v11 = vshrl.u32 %v1405_v59, 16 }
 0x1a0   : > { %4599 = vmatmul.bf16.gmra.mxu1 %v8469_v40  ;;  %v4384_v0 = vpop.f32.mrf.mxu3  ;;  %757 = vst [vmem:[#allocation2 + $0xc4] sm:$0xf] %v596_v60  ;;  %v1787_v53 = vshll.u32 %v1405_v59, 16  ;;  %v1782_v26 = vsel %vm7198_vm11, %v1777_v44, %v1781_v38  ;;  %v2908_v54 = vunpack.c.l.b16 %v1772_v1  ;;  %v5831_v51 = vrot.slane %v1211_v55, 9 }
 0x1a1   : > { %v4385_v61 = vadd.f32 %v4384_v0, %v4296_v22  ;;  %v597_v22 = vrot.slane %v592_v34, 4  ;;  %v6879_v34 = vld [vmem:[#allocation2 + $0xb8] sm:$0xf]  ;;  %v8541_v60 = vpack.c.b16 %v2971_v8, %v2970_v29  ;;  %v2909_v44 = vunpack.c.l.b16 %v1782_v26 }
 0x1a2   : > { %4515 = vmatmul.bf16.gmra.mxu0 %v8474_v47  ;;  %v4300_v45 = vpop.f32.mrf.mxu2  ;;  %v1370_v57 = vrot.slane %v6879_v34, 5  ;;  %v1786_v38 = vrot.slane %v1784_v11, 4  ;;  %v1789_v33 = vrot.slane %v1787_v53, 5  ;;  %v1971_v29 = vrot.slane %v8448_v19, 5 }
 0x1a3   : > { %v4474_v39 = vadd.f32 %v4473_v15, %v4385_v61  ;;  %v6684_v15 = vld [vmem:[%s9853_s1 + $0x4] sm:$0xf]  ;;  %v759_v58 = vsel %vm7032_vm3, %v597_v22, %v758_v4  ;;  %v4212_v61 = vadd.f32 %v8102_v25, %v4123_v52  ;;  %10042 = vst [vmem:[#allocation81_spill] sm:$0xff] %v8541_v60  ;;  %v8557_v55 = vpack.c.b16 %v2909_v44, %v2908_v54  ;;  %v6714_v44 = vld [vmem:[%s9853_s1 + $0xf4] sm:$0xf] }
 0x1a4   : > { %v6063_v48 = vor.u32 %v6684_v15, %v6060_v14  ;;  %760 = vst [vmem:[#allocation2 + $0xc8] sm:$0x1] %v759_v58  ;;  %v1372_v32 = vrot.slane %v1370_v57, 4  ;;  %v1821_v15 = vld [vmem:[#allocation2 + $0xb4] sm:$0xe]  ;;  %v1790_v19 = vor.u32 %v1789_v33, %v1786_v38  ;;  %v1973_v11 = vrot.slane %v1971_v29, 4 }
 0x1a5   : > { %v4562_v27 = vpop.f32.mrf.mxu1  ;;  %4426 = vmatmul.bf16.gmra.mxu3 %v6665_v7  ;;  %v4301_v14 = vadd.f32 %v4300_v45, %v4212_v61  ;;  %10043 = vst [vmem:[#allocation82_spill] sm:$0xff] %v8557_v55  ;;  %v5846_v34 = vrot.slane %v1821_v15, 9 }
 0x1a6   : > { %v8536_v0 = vadd.f32 %v4562_v27, %v4474_v39  ;;  %4894 = vmatpush.bf16.msra.mxu1 %v6063_v48  ;;  %v6880_v39 = vld [vmem:[#allocation2 + $0xbc] sm:$0x1]  ;;  %v1371_v48 = vsel %vm7682_vm14, %v5831_v51, %v1370_v57  ;;  %v1791_v54 = vrot.slane %v1790_v19, 4 }
 0x1a7   : > { %v4478_v23 = vpop.f32.mrf.mxu0  ;;  %v8544_v3 = vld [vmem:[#allocation2 + $0xc4] sm:$0xf]  ;;  %v1373_v22 = vrot.slane %v6880_v39, 5  ;;  %v2766_v26 = vunpack.c.l.b16 %v1371_v48 }
 0x1a8   : > { %v4387_v7 = vpop.f32.mrf.mxu3  ;;  %4342 = vmatmul.bf16.gmra.mxu2 %v8526_v6  ;;  %v1793_v25 = vshll.u32 %v8544_v3, 16  ;;  %v1797_v52 = vshrl.u32 %v8544_v3, 16 }
 0x1a9   : > { %v4388_v21 = vadd.f32 %v4387_v7, %v4299_v13  ;;  %v6666_v7 = vld [vmem:[#allocation2 + $0xb4] sm:$0xff] }
 0x1aa   : > { %v4303_v42 = vpop.f32.mrf.mxu2  ;;  %v1795_v8 = vrot.slane %v1793_v25, 5  ;;  %v1799_v9 = vrot.slane %v1797_v52, 4 }
 0x1ab   : > { %v4477_v27 = vadd.f32 %v4476_v41, %v4388_v21  ;;  %v4304_v59 = vadd.f32 %v4303_v42, %v8137_v24  ;;  %v1374_v41 = vsel %vm7682_vm14, %v1372_v32, %v1373_v22  ;;  %v8559_v4 = vld [vmem:[#allocation2 + $0xc8] sm:$0x1]  ;;  %v1974_v24 = vrot.slane %v8481_v2, 5  ;;  %v1984_v32 = vld [vmem:[#allocation2 + $0x18] sm:$0xf] }
 0x1ac   : > { %v1800_v53 = vor.u32 %v1799_v9, %v1795_v8  ;;  %v1803_v61 = vshll.u32 %v8559_v4, 16  ;;  %v2767_v21 = vunpack.c.l.b16 %v1374_v41  ;;  %v1972_v22 = vsel %vm7682_vm14, %v5846_v34, %v1971_v29  ;;  %v8577_v42 = vld [vmem:[#allocation2 + $0x1c] sm:$0xf] }
 0x1ad   : > { %v4565_v13 = vpop.f32.mrf.mxu1  ;;  %v1975_v25 = vsel %vm7682_vm14, %v1973_v11, %v1974_v24  ;;  %v2033_v15 = vshrl.u32 %v1984_v32, 16  ;;  %v2036_v29 = vshll.u32 %v1984_v32, 16  ;;  %v2972_v9 = vunpack.c.l.b16 %v1972_v22  ;;  %v1822_v22 = vld [vmem:[#allocation2 + $0xc0] sm:$0xe] }
 0x1ae   : > { %v8550_v1 = vadd.f32 %v4565_v13, %v4477_v27  ;;  %v1801_v52 = vrot.slane %v1800_v53, 4  ;;  %v1805_v27 = vrot.slane %v1803_v61, 5  ;;  %v8575_v33 = vpack.c.b16 %v2767_v21, %v2766_v26 }
 0x1af   : > { %v4481_v45 = vpop.f32.mrf.mxu0  ;;  %v1796_v19 = vsel %vm7198_vm11, %v1791_v54, %v1795_v8  ;;  %v2046_v24 = vshrl.u32 %v8577_v42, 16  ;;  %v2035_v53 = vrot.slane %v2033_v15, 4  ;;  %v2038_v61 = vrot.slane %v2036_v29, 5 }
 0x1b0   : > { %4604 = vmatmul.bf16.gmra.mxu1 %v8541_v60  ;;  %v4389_v58 = vpop.f32.mrf.mxu3  ;;  %10044 = vst [vmem:[#allocation83_spill] sm:$0xff] %v8575_v33  ;;  %v2910_v26 = vunpack.c.l.b16 %v1796_v19  ;;  %v1978_v8 = vrot.slane %v8544_v3, 5  ;;  %v5847_v29 = vrot.slane %v1822_v22, 9  ;;  %v6667_v19 = vld [vmem:[#allocation2 + $0xc0] sm:$0xff]  ;;  %v2018_v60 = vld [vmem:[#allocation2 + $0x38] sm:$0x1] }
 0x1b1   : > { %v4390_v57 = vadd.f32 %v4389_v58, %v4301_v14  ;;  %v2973_v14 = vunpack.c.l.b16 %v1975_v25  ;;  %v2042_v58 = vshll.u32 %v8577_v42, 16  ;;  %v2048_v25 = vrot.slane %v2046_v24, 4 }
 0x1b2   : > { %4520 = vmatmul.bf16.gmra.mxu0 %v8557_v55  ;;  %v4305_v2 = vpop.f32.mrf.mxu2 }
 0x1b3   : > { %v4479_v51 = vadd.f32 %v4478_v23, %v4390_v57  ;;  %v6180_v23 = vld [vmem:[%s9853_s1 + $0xf8] sm:$0xf0]  ;;  %v4306_v38 = vadd.f32 %v4305_v2, %v8162_v5  ;;  %v1806_v5 = vsel %vm7198_vm11, %v1801_v52, %v1805_v27  ;;  %v8591_v54 = vrot.slane %v2042_v58, 5  ;;  %v2016_v27 = vld [vmem:[#allocation2 + $0x20] sm:$0x1] }
 0x1b4   : > { %v6183_v13 = vor.u32 %v6714_v44, %v6180_v23  ;;  %v2911_v21 = vunpack.c.l.b16 %v1806_v5  ;;  %v2039_v44 = vor.u32 %v2038_v61, %v2035_v53  ;;  %v2482_v23 = vrot.slane %v8577_v42, 5  ;;  %v6668_v53 = vld [vmem:[#allocation2 + $0x18] sm:$0xff] }
 0x1b5   : > { %v4567_v39 = vpop.f32.mrf.mxu1  ;;  %4431 = vmatmul.bf16.gmra.mxu3 %v6666_v7  ;;  %v8588_v7 = vpack.c.b16 %v2973_v14, %v2972_v9  ;;  %v1980_v9 = vrot.slane %v1978_v8, 4  ;;  %v2416_v14 = vld [vmem:[#allocation2 + $0x18] sm:$0xe]  ;;  %v2049_v5 = vor.u32 %v2048_v25, %v8591_v54  ;;  %v2052_v58 = vshll.u32 %v2016_v27, 16  ;;  %v6372_v25 = vld [vmem:[%s9853_s1 + $0x278] sm:$0xf0] }
 0x1b6   : > { %4976 = vmatpush.bf16.msrb.mxu2 %v6183_v13  ;;  %v8579_v48 = vadd.f32 %v4567_v39, %v4479_v51  ;;  %v6244_v39 = vld [vmem:[%s9853_s1 + $0x178] sm:$0xf0]  ;;  %v8603_v3 = vpack.c.b16 %v2911_v21, %v2910_v26  ;;  %v5848_v61 = vrot.slane %v2416_v14, 9  ;;  %v2484_v42 = vrot.slane %v2482_v23, 4 }
 0x1b7   : > { %v4483_v34 = vpop.f32.mrf.mxu0  ;;  %10045 = vst [vmem:[#allocation84_spill] sm:$0xff] %v8588_v7  ;;  %v1979_v21 = vsel %vm7682_vm14, %v5847_v29, %v1978_v8  ;;  %v2050_v8 = vrot.slane %v2049_v5, 4 }
 0x1b8   : > { %v4392_v41 = vpop.f32.mrf.mxu3  ;;  %4347 = vmatmul.bf16.gmra.mxu2 %v8575_v33  ;;  %10046 = vst [vmem:[#allocation85_spill] sm:$0xff] %v8603_v3  ;;  %v10067_v33 = vld [vmem:[#allocation45_spill] sm:$0xff] }
 0x1b9   : > { %v4393_v11 = vadd.f32 %v4392_v41, %v4304_v59  ;;  %v6730_v59 = vld [vmem:[%s9853_s1 + $0x174] sm:$0xf] }
 0x1ba   : > { %v6247_v2 = vor.u32 %v6730_v59, %v6244_v39  ;;  %v2054_v39 = vrot.slane %v2052_v58, 5 }
 0x1bb   : > { %v4482_v57 = vadd.f32 %v4481_v45, %v4393_v11  ;;  %v4308_v32 = vpop.f32.mrf.mxu2  ;;  %v2040_v11 = vrot.slane %v2039_v44, 4  ;;  %v8626_v44 = vld [vmem:[#allocation2 + $0x28] sm:$0xf] }
 0x1bc   : > { %v4309_v45 = vadd.f32 %v4308_v32, %v8201_v12  ;;  %5065 = vmatpush.bf16.msrb.mxu3 %v6247_v2  ;;  %v1981_v12 = vrot.slane %v8559_v4, 5  ;;  %v6762_v32 = vld [vmem:[%s9853_s1 + $0x274] sm:$0xf]  ;;  %v1986_v2 = vld [vmem:[#allocation2 + $0x24] sm:$0xf] }
 0x1bd   : > { %v4570_v51 = vpop.f32.mrf.mxu1  ;;  %v2057_v5 = vshrl.u32 %v1986_v2, 16  ;;  %v2060_v58 = vshll.u32 %v1986_v2, 16 }
 0x1be   : > { %v8600_v52 = vadd.f32 %v4570_v51, %v4482_v57  ;;  %v2485_v57 = vrot.slane %v2016_v27, 5  ;;  %v1982_v4 = vsel %vm7682_vm14, %v1980_v9, %v1981_v12  ;;  %v6746_v51 = vld [vmem:[%s9853_s1 + $0x1f4] sm:$0xf]  ;;  %v6375_v27 = vor.u32 %v6762_v32, %v6372_v25 }
 0x1bf   : > { %v4486_v15 = vpop.f32.mrf.mxu0  ;;  %v2975_v29 = vunpack.c.l.b16 %v1982_v4  ;;  %v2045_v9 = vsel %vm7198_vm11, %v2040_v11, %v8591_v54  ;;  %v2055_v4 = vsel %vm7198_vm11, %v2050_v8, %v2054_v39  ;;  %v2066_v54 = vshll.u32 %v8626_v44, 16  ;;  %v2017_v39 = vld [vmem:[#allocation2 + $0x2c] sm:$0x1] }
 0x1c0   : > { %4609 = vmatmul.bf16.gmra.mxu1 %v8588_v7  ;;  %v4394_v13 = vpop.f32.mrf.mxu3  ;;  %v2070_v11 = vshrl.u32 %v8626_v44, 16  ;;  %v2062_v32 = vrot.slane %v2060_v58, 5  ;;  %v1988_v58 = vld [vmem:[#allocation2 + $0x30] sm:$0xf] }
 0x1c1   : > { %v4395_v41 = vadd.f32 %v4394_v13, %v4306_v38  ;;  %v2974_v13 = vunpack.c.l.b16 %v1979_v21  ;;  %5243 = vmatpush.bf16.msrb.mxu1 %v6375_v27 }
 0x1c2   : > { %4525 = vmatmul.bf16.gmra.mxu0 %v8603_v3 }
 0x1c3   : > { %v4484_v24 = vadd.f32 %v4483_v34, %v4395_v41  ;;  %v4310_v38 = vpop.f32.mrf.mxu2  ;;  %v6308_v34 = vld [vmem:[%s9853_s1 + $0x1f8] sm:$0xf0]  ;;  %v2483_v41 = vsel %vm7682_vm14, %v5848_v61, %v2482_v23 }
 0x1c4   : > { %v4311_v59 = vadd.f32 %v4310_v38, %v8231_v10  ;;  %v6311_v22 = vor.u32 %v6746_v51, %v6308_v34  ;;  %v3152_v38 = vunpack.c.l.b16 %v2483_v41  ;;  %v3088_v51 = vunpack.c.l.b16 %v2045_v9 }
 0x1c5   : > { %v4572_v26 = vpop.f32.mrf.mxu1  ;;  %4436 = vmatmul.bf16.gmra.mxu3 %v6667_v19  ;;  %v2486_v19 = vsel %vm7682_vm14, %v2484_v42, %v2485_v57  ;;  %v3089_v42 = vunpack.c.l.b16 %v2055_v4  ;;  %v2059_v34 = vrot.slane %v2057_v5, 4  ;;  %v2076_v41 = vshll.u32 %v2017_v39, 16 }
 0x1c6   : > { %5154 = vmatpush.bf16.msrb.mxu0 %v6311_v22  ;;  %v8631_v12 = vadd.f32 %v4572_v26, %v4484_v24  ;;  %v8641_v26 = vpack.c.b16 %v2975_v29, %v2974_v13  ;;  %v3153_v23 = vunpack.c.l.b16 %v2486_v19  ;;  %v2072_v22 = vrot.slane %v2070_v11, 4 }
 0x1c7   : > { %v4488_v14 = vpop.f32.mrf.mxu0  ;;  %v8649_v27 = vpack.c.b16 %v3089_v42, %v3088_v51  ;;  %v2489_v13 = vrot.slane %v8626_v44, 5  ;;  %v2063_v9 = vor.u32 %v2062_v32, %v2059_v34  ;;  %v2492_v5 = vrot.slane %v2017_v39, 5  ;;  %v6712_v44 = vld [vmem:[%s9853_s1 + $0xe4] sm:$0xf] }
 0x1c8   : > { %v4397_v10 = vpop.f32.mrf.mxu3  ;;  %4628 = vmatmul.bf16.vlgmr.msra.gmra.mxu2 %v6668_v53  ;;  %10047 = vst [vmem:[#allocation86_spill] sm:$0xff] %v8641_v26  ;;  %v2068_v53 = vrot.slane %v2066_v54, 5  ;;  %v2081_v42 = vshrl.u32 %v1988_v58, 16 }
 0x1c9   : > { %v4398_v21 = vadd.f32 %v4397_v10, %v4309_v45  ;;  %10049 = vst [vmem:[#allocation88_spill] sm:$0xff] %v8649_v27 }
 0x1ca   : > { %v2073_v10 = vor.u32 %v2072_v22, %v2068_v53  ;;  %v10050_v22 = vld [vmem:[#allocation17_spill] sm:$0xff] }
 0x1cb   : > { %v4487_v24 = vadd.f32 %v4486_v15, %v4398_v21  ;;  %v4313_v57 = vpop.f32.mrf.mxu2  ;;  %v8647_v15 = vpack.c.b16 %v3153_v23, %v3152_v38  ;;  %v8653_v21 = vld [vmem:[#allocation2 + $0x34] sm:$0xf]  ;;  %v2064_v38 = vrot.slane %v2063_v9, 4  ;;  %v4138_v39 = vadd.f32 %v10050_v22, %v7665_v49  ;;  %v10051_v22 = vld [vmem:[#allocation20_spill] sm:$0xff] }
 0x1cc   : > { %v4314_v45 = vadd.f32 %v4313_v57, %v7728_v30  ;;  %v2417_v30 = vld [vmem:[#allocation2 + $0x24] sm:$0xe]  ;;  %v2074_v23 = vrot.slane %v2073_v10, 4  ;;  %v2084_v57 = vshll.u32 %v1988_v58, 16  ;;  %v2090_v34 = vshll.u32 %v8653_v21, 16 }
 0x1cd   : > { %v4575_v61 = vpop.f32.mrf.mxu1  ;;  %10048 = vst [vmem:[#allocation87_spill] sm:$0xff] %v8647_v15  ;;  %v5849_v11 = vrot.slane %v2417_v30, 9  ;;  %v2094_v32 = vshrl.u32 %v8653_v21, 16  ;;  %v2069_v58 = vsel %vm7198_vm11, %v2064_v38, %v2068_v53  ;;  %v6728_v53 = vld [vmem:[%s9853_s1 + $0x164] sm:$0xf] }
 0x1ce   : > { %v8644_v8 = vadd.f32 %v4575_v61, %v4487_v24  ;;  %v2491_v24 = vrot.slane %v2489_v13, 4  ;;  %v2078_v61 = vrot.slane %v2076_v41, 5  ;;  %v6236_v38 = vld [vmem:[%s9853_s1 + $0x168] sm:$0xf0] }
 0x1cf   : > { %v4491_v2 = vpop.f32.mrf.mxu0  ;;  %v2490_v9 = vsel %vm7682_vm14, %v5849_v11, %v2489_v13 }
 0x1d0   : > { %4614 = vmatmul.bf16.gmra.mxu1 %v8641_v26  ;;  %v4399_v25 = vpop.f32.mrf.mxu3  ;;  %v2493_v10 = vsel %vm7682_vm14, %v2491_v24, %v2492_v5  ;;  %v4227_v26 = vadd.f32 %v10051_v22, %v4138_v39  ;;  %v3154_v13 = vunpack.c.l.b16 %v2490_v9  ;;  %v2100_v39 = vshll.u32 %v2018_v60, 16 }
 0x1d1   : > { %v4400_v29 = vadd.f32 %v4399_v25, %v4311_v59  ;;  %v6172_v59 = vld [vmem:[%s9853_s1 + $0xe8] sm:$0xf0]  ;;  %v3155_v11 = vunpack.c.l.b16 %v2493_v10  ;;  %v2496_v10 = vrot.slane %v8653_v21, 5  ;;  %v6744_v21 = vld [vmem:[%s9853_s1 + $0x1e4] sm:$0xf] }
 0x1d2   : > { %4806 = vmatmul.bf16.vlgmr.msra.gmra.mxu0 %v8647_v15  ;;  %v6175_v51 = vor.u32 %v6712_v44, %v6172_v59  ;;  %v2079_v44 = vsel %vm7198_vm11, %v2074_v23, %v2078_v61  ;;  %v2083_v59 = vrot.slane %v2081_v42, 4  ;;  %v10052_v61 = vld [vmem:[#allocation25_spill] sm:$0xff] }
 0x1d3   : > { %v4489_v19 = vadd.f32 %v4488_v14, %v4400_v29  ;;  %v4315_v54 = vpop.f32.mrf.mxu2  ;;  %v6669_v14 = vld [vmem:[#allocation2 + $0x24] sm:$0xff]  ;;  %v3091_v24 = vunpack.c.l.b16 %v2079_v44  ;;  %v8689_v9 = vpack.c.b16 %v3155_v11, %v3154_v13  ;;  %v2418_v44 = vld [vmem:[#allocation2 + $0x30] sm:$0xe]  ;;  %v2499_v13 = vrot.slane %v2018_v60, 5  ;;  %v6364_v60 = vld [vmem:[%s9853_s1 + $0x268] sm:$0xf0] }
 0x1d4   : > { %4977 = vmatpush.bf16.msrb.mxu2 %v6175_v51  ;;  %v2086_v51 = vrot.slane %v2084_v57, 5  ;;  %v4316_v23 = vadd.f32 %v4315_v54, %v4227_v26  ;;  %v6239_v57 = vor.u32 %v6728_v53, %v6236_v38  ;;  %v1990_v38 = vld [vmem:[#allocation2 + $0x3c] sm:$0xf] }
 0x1d5   : > { %v4577_v4 = vpop.f32.mrf.mxu1  ;;  %4717 = vmatmul.bf16.vlgmr.msra.gmra.mxu3 %v8649_v27  ;;  %10053 = vst [vmem:[#allocation17_spill] sm:$0xff] %v8689_v9 }
 0x1d6   : > { %v8666_v25 = vadd.f32 %v4577_v4, %v4489_v19  ;;  %v8676_v19 = vrot.slane %v2090_v34, 5  ;;  %v2096_v4 = vrot.slane %v2094_v32, 4  ;;  %v2087_v34 = vor.u32 %v2086_v51, %v2083_v59  ;;  %5066 = vmatpush.bf16.msrb.mxu3 %v6239_v57  ;;  %v6670_v51 = vld [vmem:[#allocation2 + $0x30] sm:$0xff] }
 0x1d7   : > { %v4493_v30 = vpop.f32.mrf.mxu0 }
 0x1d8   : > { %v4402_v29 = vpop.f32.mrf.mxu3  ;;  %4633 = vmatmul.bf16.gmra.mxu2 %v6669_v14  ;;  %v2097_v32 = vor.u32 %v2096_v4, %v8676_v19  ;;  %v2088_v22 = vrot.slane %v2087_v34, 4  ;;  %v5850_v4 = vrot.slane %v2418_v44, 9 }
 0x1d9   : > { %v4403_v41 = vadd.f32 %v4402_v29, %v4314_v45  ;;  %v3090_v45 = vunpack.c.l.b16 %v2069_v58  ;;  %v6881_v29 = vld [vmem:[#allocation2] sm:$0xff] }
 0x1db   : > { %v4492_v7 = vadd.f32 %v4491_v2, %v4403_v41  ;;  %v4318_v14 = vpop.f32.mrf.mxu2  ;;  %v8692_v54 = vpack.c.b16 %v3091_v24, %v3090_v45  ;;  %v6300_v45 = vld [vmem:[%s9853_s1 + $0x1e8] sm:$0xf0] }
 0x1dc   : > { %v4319_v42 = vadd.f32 %v4318_v14, %v10052_v61  ;;  %v2498_v14 = vrot.slane %v2496_v10, 4  ;;  %v6303_v24 = vor.u32 %v6744_v21, %v6300_v45  ;;  %v10055_v61 = vld [vmem:[#allocation23_spill] sm:$0xff]  ;;  %v2105_v21 = vshrl.u32 %v1990_v38, 16 }
 0x1dd   : > { %v4580_v5 = vpop.f32.mrf.mxu1  ;;  %10054 = vst [vmem:[#allocation20_spill] sm:$0xff] %v8692_v54  ;;  %v4143_v57 = vadd.f32 %v10055_v61, %v7665_v49  ;;  %v2108_v45 = vshll.u32 %v1990_v38, 16 }
 0x1de   : > { %v8686_v2 = vadd.f32 %v4580_v5, %v4492_v7  ;;  %v2098_v7 = vrot.slane %v2097_v32, 4  ;;  %v2102_v5 = vrot.slane %v2100_v39, 5  ;;  %v2093_v32 = vsel %vm7198_vm11, %v2088_v22, %v8676_v19  ;;  %5155 = vmatpush.bf16.msrb.mxu0 %v6303_v24  ;;  %v10056_v22 = vld [vmem:[#allocation26_spill] sm:$0xff] }
 0x1df   : > { %v4496_v58 = vpop.f32.mrf.mxu0  ;;  %v2497_v39 = vsel %vm7682_vm14, %v5850_v4, %v2496_v10  ;;  %v2110_v38 = vrot.slane %v2108_v45, 5 }
 0x1e0   : > { %4895 = vmatmul.bf16.vlgmr.msra.gmra.mxu1 %v6881_v29  ;;  %v4404_v41 = vpop.f32.mrf.mxu3  ;;  %v2103_v19 = vsel %vm7198_vm11, %v2098_v7, %v2102_v5  ;;  %v3156_v24 = vunpack.c.l.b16 %v2497_v39  ;;  %v2019_v7 = vld [vmem:[#allocation2 + $0x44] sm:$0x1]  ;;  %v6882_v5 = vld [vmem:[#allocation2 + $0xc] sm:$0xff] }
 0x1e1   : > { %v4405_v26 = vadd.f32 %v4404_v41, %v4316_v23  ;;  %v8708_v23 = vld [vmem:[#allocation2 + $0x40] sm:$0xf] }
 0x1e2   : > { %4811 = vmatmul.bf16.gmra.mxu0 %v8689_v9  ;;  %v2118_v10 = vshrl.u32 %v8708_v23, 16 }
 0x1e3   : > { %v4494_v59 = vadd.f32 %v4493_v30, %v4405_v26  ;;  %v4320_v53 = vpop.f32.mrf.mxu2  ;;  %v6760_v30 = vld [vmem:[%s9853_s1 + $0x264] sm:$0xf]  ;;  %v2500_v26 = vsel %vm7682_vm14, %v2498_v14, %v2499_v13  ;;  %v3093_v14 = vunpack.c.l.b16 %v2103_v19 }
 0x1e4   : > { %v6367_v34 = vor.u32 %v6760_v30, %v6364_v60  ;;  %v2114_v30 = vshll.u32 %v8708_v23, 16  ;;  %v3157_v61 = vunpack.c.l.b16 %v2500_v26  ;;  %v2503_v26 = vrot.slane %v8708_v23, 5  ;;  %v6671_v23 = vld [vmem:[#allocation2 + $0x3c] sm:$0xff] }
 0x1e5   : > { %v4582_v11 = vpop.f32.mrf.mxu1  ;;  %4722 = vmatmul.bf16.gmra.mxu3 %v8692_v54 }
 0x1e6   : > { %v8717_v29 = vadd.f32 %v4582_v11, %v4494_v59  ;;  %5244 = vmatpush.bf16.msrb.mxu1 %v6367_v34  ;;  %v4232_v59 = vadd.f32 %v10056_v22, %v4143_v57  ;;  %v3092_v11 = vunpack.c.l.b16 %v2093_v32  ;;  %v2107_v34 = vrot.slane %v2105_v21, 4 }
 0x1e7   : > { %v4498_v44 = vpop.f32.mrf.mxu0  ;;  %v2116_v9 = vrot.slane %v2114_v30, 5  ;;  %v8729_v57 = vpack.c.b16 %v3157_v61, %v3156_v24  ;;  %v2505_v24 = vrot.slane %v2503_v26, 4 }
 0x1e8   : > { %v4407_v41 = vpop.f32.mrf.mxu3  ;;  %4638 = vmatmul.bf16.gmra.mxu2 %v6670_v51  ;;  %v4321_v54 = vadd.f32 %v4320_v53, %v4232_v59  ;;  %v8731_v39 = vpack.c.b16 %v3093_v14, %v3092_v11  ;;  %v2111_v45 = vor.u32 %v2110_v38, %v2107_v34  ;;  %v2124_v53 = vshll.u32 %v2019_v7, 16  ;;  %v6710_v11 = vld [vmem:[%s9853_s1 + $0xd4] sm:$0xf]  ;;  %v8742_v34 = vld [vmem:[#allocation2 + $0x4c] sm:$0xf] }
 0x1e9   : > { %v4408_v60 = vadd.f32 %v4407_v41, %v4319_v42  ;;  %v10057_v42 = vld [vmem:[#allocation29_spill] sm:$0xff]  ;;  %v2120_v41 = vrot.slane %v2118_v10, 4  ;;  %10058 = vst [vmem:[#allocation25_spill] sm:$0xff] %v8729_v57 }
 0x1ea   : > { %10059 = vst [vmem:[#allocation23_spill] sm:$0xff] %v8731_v39  ;;  %v1992_v10 = vld [vmem:[#allocation2 + $0x48] sm:$0xf]  ;;  %v2126_v14 = vrot.slane %v2124_v53, 5  ;;  %v2142_v53 = vshrl.u32 %v8742_v34, 16 }
 0x1eb   : > { %v4497_v4 = vadd.f32 %v4496_v58, %v4408_v60  ;;  %v4323_v13 = vpop.f32.mrf.mxu2  ;;  %v2121_v30 = vor.u32 %v2120_v41, %v2116_v9  ;;  %v2419_v60 = vld [vmem:[#allocation2 + $0x3c] sm:$0xe]  ;;  %v2129_v38 = vshrl.u32 %v1992_v10, 16  ;;  %v10060_v41 = vld [vmem:[#allocation30_spill] sm:$0xff] }
 0x1ec   : > { %v4324_v51 = vadd.f32 %v4323_v13, %v10057_v42  ;;  %v2132_v42 = vshll.u32 %v1992_v10, 16 }
 0x1ed   : > { %v4585_v40 = vpop.f32.mrf.mxu1  ;;  %v2122_v61 = vrot.slane %v2121_v30, 4  ;;  %v2138_v30 = vshll.u32 %v8742_v34, 16 }
 0x1ee   : > { %v8727_v15 = vadd.f32 %v4585_v40, %v4497_v4  ;;  %v2506_v40 = vrot.slane %v2019_v7, 5  ;;  %v5851_v4 = vrot.slane %v2419_v60, 9  ;;  %v4148_v7 = vadd.f32 %v10060_v41, %v7665_v49 }
 0x1ef   : > { %v4501_v32 = vpop.f32.mrf.mxu0  ;;  %v8759_v3 = vrot.slane %v2138_v30, 5 }
 0x1f0   : > { %4900 = vmatmul.bf16.gmra.mxu1 %v6882_v5  ;;  %v4409_v58 = vpop.f32.mrf.mxu3  ;;  %v2504_v60 = vsel %vm7682_vm14, %v5851_v4, %v2503_v26 }
 0x1f1   : > { %v4410_v21 = vadd.f32 %v4409_v58, %v4321_v54  ;;  %v6164_v54 = vld [vmem:[%s9853_s1 + $0xd8] sm:$0xf0]  ;;  %v3158_v4 = vunpack.c.l.b16 %v2504_v60 }
 0x1f2   : > { %4816 = vmatmul.bf16.gmra.mxu0 %v8729_v57  ;;  %v6167_v13 = vor.u32 %v6710_v11, %v6164_v54  ;;  %v2134_v54 = vrot.slane %v2132_v42, 5  ;;  %v2020_v42 = vld [vmem:[#allocation2 + $0x50] sm:$0x1] }
 0x1f3   : > { %v4499_v19 = vadd.f32 %v4498_v44, %v4410_v21  ;;  %v4325_v59 = vpop.f32.mrf.mxu2  ;;  %v2112_v44 = vrot.slane %v2111_v45, 4  ;;  %v2507_v45 = vsel %vm7682_vm14, %v2505_v24, %v2506_v40 }
 0x1f4   : > { %4978 = vmatpush.bf16.msrb.mxu2 %v6167_v13  ;;  %v10061_v13 = vld [vmem:[#allocation33_spill] sm:$0xff]  ;;  %v3159_v57 = vunpack.c.l.b16 %v2507_v45  ;;  %v2510_v45 = vrot.slane %v8742_v34, 5 }
 0x1f5   : > { %v4587_v22 = vpop.f32.mrf.mxu1  ;;  %4727 = vmatmul.bf16.gmra.mxu3 %v8731_v39  ;;  %v2117_v10 = vsel %vm7198_vm11, %v2112_v44, %v2116_v9  ;;  %v4237_v41 = vadd.f32 %v10061_v13, %v4148_v7  ;;  %v6726_v9 = vld [vmem:[%s9853_s1 + $0x154] sm:$0xf] }
 0x1f6   : > { %v8746_v5 = vadd.f32 %v4587_v22, %v4499_v19  ;;  %v2127_v19 = vsel %vm7198_vm11, %v2122_v61, %v2126_v14  ;;  %v2131_v22 = vrot.slane %v2129_v38, 4  ;;  %v3094_v24 = vunpack.c.l.b16 %v2117_v10  ;;  %v10062_v61 = vld [vmem:[#allocation37_spill] sm:$0xff] }
 0x1f7   : > { %v4503_v21 = vpop.f32.mrf.mxu0  ;;  %v3095_v39 = vunpack.c.l.b16 %v2127_v19  ;;  %v4326_v44 = vadd.f32 %v4325_v59, %v4237_v41  ;;  %v8770_v60 = vpack.c.b16 %v3159_v57, %v3158_v4  ;;  %v2148_v59 = vshll.u32 %v2020_v42, 16  ;;  %v1994_v4 = vld [vmem:[#allocation2 + $0x54] sm:$0xf] }
 0x1f8   : > { %v4412_v58 = vpop.f32.mrf.mxu3  ;;  %4643 = vmatmul.bf16.gmra.mxu2 %v6671_v23  ;;  %v6228_v23 = vld [vmem:[%s9853_s1 + $0x158] sm:$0xf0]  ;;  %v2135_v7 = vor.u32 %v2134_v54, %v2131_v22  ;;  %v6672_v22 = vld [vmem:[#allocation2 + $0x48] sm:$0xff]  ;;  %v2512_v57 = vrot.slane %v2510_v45, 4 }
 0x1f9   : > { %v4413_v11 = vadd.f32 %v4412_v58, %v4324_v51  ;;  %v2144_v51 = vrot.slane %v2142_v53, 4  ;;  %v6231_v14 = vor.u32 %v6726_v9, %v6228_v23  ;;  %v6883_v58 = vld [vmem:[#allocation2 + $0x18] sm:$0xff]  ;;  %10063 = vst [vmem:[#allocation26_spill] sm:$0xff] %v8770_v60  ;;  %v8773_v19 = vpack.c.b16 %v3095_v39, %v3094_v24  ;;  %v6742_v9 = vld [vmem:[%s9853_s1 + $0x1d4] sm:$0xf] }
 0x1fa   : > { %v2136_v13 = vrot.slane %v2135_v7, 4  ;;  %v6292_v39 = vld [vmem:[%s9853_s1 + $0x1d8] sm:$0xf0] }
 0x1fb   : > { %v4502_v26 = vadd.f32 %v4501_v32, %v4413_v11  ;;  %v4328_v27 = vpop.f32.mrf.mxu2  ;;  %5067 = vmatpush.bf16.msrb.mxu3 %v6231_v14  ;;  %v2420_v11 = vld [vmem:[#allocation2 + $0x48] sm:$0xe]  ;;  %10064 = vst [vmem:[#allocation29_spill] sm:$0xff] %v8773_v19  ;;  %v6295_v23 = vor.u32 %v6742_v9, %v6292_v39  ;;  %v10065_v14 = vld [vmem:[#allocation36_spill] sm:$0xff] }
 0x1fc   : > { %v4329_v32 = vadd.f32 %v4328_v27, %v10062_v61  ;;  %v2145_v27 = vor.u32 %v2144_v51, %v8759_v3  ;;  %v5852_v54 = vrot.slane %v2420_v11, 9  ;;  %v2150_v51 = vrot.slane %v2148_v59, 5  ;;  %v8790_v61 = vld [vmem:[#allocation2 + $0x58] sm:$0xf] }
 0x1fd   : > { %v4590_v40 = vpop.f32.mrf.mxu1  ;;  %5156 = vmatpush.bf16.msrb.mxu0 %v6295_v23  ;;  %v2156_v11 = vshll.u32 %v1994_v4, 16  ;;  %v2162_v39 = vshll.u32 %v8790_v61, 16 }
 0x1fe   : > { %v8768_v38 = vadd.f32 %v4590_v40, %v4502_v26  ;;  %v2513_v26 = vrot.slane %v2020_v42, 5  ;;  %v2146_v24 = vrot.slane %v2145_v27, 4  ;;  %v4153_v42 = vadd.f32 %v10065_v14, %v7665_v49 }
 0x1ff   : > { %v4506_v53 = vpop.f32.mrf.mxu0 }
 0x200   : > { %4905 = vmatmul.bf16.gmra.mxu1 %v6883_v58  ;;  %v4414_v30 = vpop.f32.mrf.mxu3  ;;  %v2511_v58 = vsel %vm7682_vm14, %v5852_v54, %v2510_v45  ;;  %v2514_v9 = vsel %vm7682_vm14, %v2512_v57, %v2513_v26  ;;  %v2151_v45 = vsel %vm7198_vm11, %v2146_v24, %v2150_v51  ;;  %v10066_v54 = vld [vmem:[#allocation40_spill] sm:$0xff]  ;;  %v2158_v26 = vrot.slane %v2156_v11, 5  ;;  %v2021_v24 = vld [vmem:[#allocation2 + $0x5c] sm:$0x1] }
 0x201   : > { %v4415_v10 = vadd.f32 %v4414_v30, %v4326_v44  ;;  %v6356_v44 = vld [vmem:[%s9853_s1 + $0x258] sm:$0xf0]  ;;  %v2153_v30 = vshrl.u32 %v1994_v4, 16  ;;  %v4242_v4 = vadd.f32 %v10066_v54, %v4153_v42 }
 0x202   : > { %4821 = vmatmul.bf16.gmra.mxu0 %v8770_v60  ;;  %v10068_v51 = vld [vmem:[#allocation43_spill] sm:$0xff] }
 0x203   : > { %v4504_v41 = vadd.f32 %v4503_v21, %v4415_v10  ;;  %v4330_v40 = vpop.f32.mrf.mxu2  ;;  %v6758_v21 = vld [vmem:[%s9853_s1 + $0x254] sm:$0xf]  ;;  %v2155_v57 = vrot.slane %v2153_v30, 4  ;;  %v4158_v42 = vadd.f32 %v10068_v51, %v7665_v49 }
 0x204   : > { %v6359_v7 = vor.u32 %v6758_v21, %v6356_v44  ;;  %v2141_v21 = vsel %vm7198_vm11, %v2136_v13, %v8759_v3  ;;  %v3161_v44 = vunpack.c.l.b16 %v2514_v9  ;;  %v2517_v9 = vrot.slane %v8790_v61, 5 }
 0x205   : > { %v4592_v34 = vpop.f32.mrf.mxu1  ;;  %4732 = vmatmul.bf16.gmra.mxu3 %v8773_v19  ;;  %v4331_v19 = vadd.f32 %v4330_v40, %v4242_v4 }
 0x206   : > { %v8796_v10 = vadd.f32 %v4592_v34, %v4504_v41  ;;  %5245 = vmatpush.bf16.msrb.mxu1 %v6359_v7  ;;  %v2166_v41 = vshrl.u32 %v8790_v61, 16  ;;  %v3160_v34 = vunpack.c.l.b16 %v2511_v58  ;;  %v3096_v7 = vunpack.c.l.b16 %v2141_v21  ;;  %v6884_v58 = vld [vmem:[#allocation2 + $0x24] sm:$0xff]  ;;  %v6156_v61 = vld [vmem:[%s9853_s1 + $0xc8] sm:$0xf0] }
 0x207   : > { %v4508_v59 = vpop.f32.mrf.mxu0  ;;  %v2172_v21 = vshll.u32 %v2021_v24, 16 }
 0x208   : > { %v4417_v27 = vpop.f32.mrf.mxu3  ;;  %4648 = vmatmul.bf16.gmra.mxu2 %v6672_v22  ;;  %v2168_v13 = vrot.slane %v2166_v41, 4  ;;  %v10071_v41 = vld [vmem:[#allocation47_spill] sm:$0xff] }
 0x209   : > { %v4418_v60 = vadd.f32 %v4417_v27, %v4329_v32  ;;  %v3097_v32 = vunpack.c.l.b16 %v2151_v45  ;;  %v2164_v27 = vrot.slane %v2162_v39, 5  ;;  %v2421_v45 = vld [vmem:[#allocation2 + $0x54] sm:$0xe]  ;;  %v4247_v54 = vadd.f32 %v10071_v41, %v4158_v42 }
 0x20b   : > { %v4507_v23 = vadd.f32 %v4506_v53, %v4418_v60  ;;  %v4333_v22 = vpop.f32.mrf.mxu2  ;;  %v8813_v60 = vpack.c.b16 %v3161_v44, %v3160_v34  ;;  %v2159_v53 = vor.u32 %v2158_v26, %v2155_v57  ;;  %v8816_v40 = vpack.c.b16 %v3097_v32, %v3096_v7  ;;  %v1996_v34 = vld [vmem:[#allocation2 + $0x60] sm:$0xf]  ;;  %v6673_v7 = vld [vmem:[#allocation2 + $0x54] sm:$0xff] }
 0x20c   : > { %v4334_v3 = vadd.f32 %v4333_v22, %v10067_v33  ;;  %v2169_v33 = vor.u32 %v2168_v13, %v2164_v27  ;;  %v5853_v26 = vrot.slane %v2421_v45, 9  ;;  %v2174_v22 = vrot.slane %v2172_v21, 5 }
 0x20d   : > { %v4595_v14 = vpop.f32.mrf.mxu1  ;;  %10069 = vst [vmem:[#allocation30_spill] sm:$0xff] %v8813_v60  ;;  %v2160_v49 = vrot.slane %v2159_v53, 4  ;;  %v2177_v51 = vshrl.u32 %v1996_v34, 16  ;;  %v2180_v42 = vshll.u32 %v1996_v34, 16 }
 0x20e   : > { %v8809_v55 = vadd.f32 %v4595_v14, %v4507_v23  ;;  %10070 = vst [vmem:[#allocation33_spill] sm:$0xff] %v8816_v40  ;;  %v2520_v23 = vrot.slane %v2021_v24, 5  ;;  %v2519_v14 = vrot.slane %v2517_v9, 4  ;;  %v2170_v32 = vrot.slane %v2169_v33, 4  ;;  %v8827_v24 = vld [vmem:[#allocation2 + $0x64] sm:$0xf] }
 0x20f   : > { %v4511_v11 = vpop.f32.mrf.mxu0  ;;  %v2186_v41 = vshll.u32 %v8827_v24, 16  ;;  %v2165_v21 = vsel %vm7198_vm11, %v2160_v49, %v2164_v27  ;;  %v2179_v34 = vrot.slane %v2177_v51, 4  ;;  %v6220_v27 = vld [vmem:[%s9853_s1 + $0x148] sm:$0xf0]  ;;  %v10072_v49 = vld [vmem:[#allocation50_spill] sm:$0xff] }
 0x210   : > { %4910 = vmatmul.bf16.gmra.mxu1 %v6884_v58  ;;  %v4419_v30 = vpop.f32.mrf.mxu3  ;;  %v2521_v45 = vsel %vm7682_vm14, %v2519_v14, %v2520_v23  ;;  %v2022_v51 = vld [vmem:[#allocation2 + $0x68] sm:$0x1] }
 0x211   : > { %v4420_v39 = vadd.f32 %v4419_v30, %v4331_v19  ;;  %v6708_v19 = vld [vmem:[%s9853_s1 + $0xc4] sm:$0xf] }
 0x212   : > { %4826 = vmatmul.bf16.gmra.mxu0 %v8813_v60  ;;  %v6159_v13 = vor.u32 %v6708_v19, %v6156_v61  ;;  %v3098_v61 = vunpack.c.l.b16 %v2165_v21  ;;  %v2422_v21 = vld [vmem:[#allocation2 + $0x60] sm:$0xe] }
 0x213   : > { %v4509_v4 = vadd.f32 %v4508_v59, %v4420_v39  ;;  %v4335_v57 = vpop.f32.mrf.mxu2  ;;  %v2518_v39 = vsel %vm7682_vm14, %v5853_v26, %v2517_v9  ;;  %v3163_v9 = vunpack.c.l.b16 %v2521_v45  ;;  %v2524_v45 = vrot.slane %v8827_v24, 5 }
 0x214   : > { %v4336_v59 = vadd.f32 %v4335_v57, %v4247_v54  ;;  %4979 = vmatpush.bf16.msrb.mxu2 %v6159_v13  ;;  %v2175_v54 = vsel %vm7198_vm11, %v2170_v32, %v2174_v22  ;;  %v3162_v19 = vunpack.c.l.b16 %v2518_v39  ;;  %v2188_v13 = vrot.slane %v2186_v41, 5 }
 0x215   : > { %v4597_v44 = vpop.f32.mrf.mxu1  ;;  %4737 = vmatmul.bf16.gmra.mxu3 %v8816_v40  ;;  %v3099_v23 = vunpack.c.l.b16 %v2175_v54 }
 0x216   : > { %v8829_v58 = vadd.f32 %v4597_v44, %v4509_v4  ;;  %v2190_v4 = vshrl.u32 %v8827_v24, 16  ;;  %v2182_v44 = vrot.slane %v2180_v42, 5  ;;  %v8850_v39 = vpack.c.b16 %v3163_v9, %v3162_v19  ;;  %v6740_v24 = vld [vmem:[%s9853_s1 + $0x1c4] sm:$0xf] }
 0x217   : > { %v4513_v30 = vpop.f32.mrf.mxu0  ;;  %v8853_v60 = vpack.c.b16 %v3099_v23, %v3098_v61  ;;  %v6756_v61 = vld [vmem:[%s9853_s1 + $0x244] sm:$0xf] }
 0x218   : > { %v4422_v53 = vpop.f32.mrf.mxu3  ;;  %4653 = vmatmul.bf16.gmra.mxu2 %v6673_v7  ;;  %v2192_v32 = vrot.slane %v2190_v4, 4  ;;  %v2183_v42 = vor.u32 %v2182_v44, %v2179_v34  ;;  %10073 = vst [vmem:[#allocation37_spill] sm:$0xff] %v8850_v39  ;;  %v2196_v4 = vshll.u32 %v2022_v51, 16  ;;  %v5854_v34 = vrot.slane %v2422_v21, 9 }
 0x219   : > { %v4423_v33 = vadd.f32 %v4422_v53, %v4334_v3  ;;  %v6724_v3 = vld [vmem:[%s9853_s1 + $0x144] sm:$0xf]  ;;  %v6885_v53 = vld [vmem:[#allocation2 + $0x30] sm:$0xff]  ;;  %10074 = vst [vmem:[#allocation36_spill] sm:$0xff] %v8853_v60  ;;  %v2526_v44 = vrot.slane %v2524_v45, 4 }
 0x21a   : > { %v6223_v22 = vor.u32 %v6724_v3, %v6220_v27  ;;  %v2184_v3 = vrot.slane %v2183_v42, 4  ;;  %v6674_v27 = vld [vmem:[#allocation2 + $0x60] sm:$0xff] }
 0x21b   : > { %v4512_v57 = vadd.f32 %v4511_v11, %v4423_v33  ;;  %v4338_v14 = vpop.f32.mrf.mxu2 }
 0x21c   : > { %v4339_v7 = vadd.f32 %v4338_v14, %v10072_v49  ;;  %5068 = vmatpush.bf16.msrb.mxu3 %v6223_v22  ;;  %v2193_v14 = vor.u32 %v2192_v32, %v2188_v13  ;;  %v2198_v32 = vrot.slane %v2196_v4, 5 }
 0x21d   : > { %v4600_v26 = vpop.f32.mrf.mxu1 }
 0x21e   : > { %v8848_v11 = vadd.f32 %v4600_v26, %v4512_v57  ;;  %v2527_v26 = vrot.slane %v2022_v51, 5  ;;  %v2194_v49 = vrot.slane %v2193_v14, 4  ;;  %v6348_v51 = vld [vmem:[%s9853_s1 + $0x248] sm:$0xf0] }
 0x21f   : > { %v4516_v33 = vpop.f32.mrf.mxu0  ;;  %v6351_v42 = vor.u32 %v6756_v61, %v6348_v51 }
 0x220   : > { %4915 = vmatmul.bf16.gmra.mxu1 %v6885_v53  ;;  %v4424_v41 = vpop.f32.mrf.mxu3  ;;  %v1998_v53 = vld [vmem:[#allocation2 + $0x6c] sm:$0xf]  ;;  %v2528_v14 = vsel %vm7682_vm14, %v2526_v44, %v2527_v26  ;;  %v10076_v26 = vld [vmem:[#allocation56_spill] sm:$0xff] }
 0x221   : > { %v4425_v54 = vadd.f32 %v4424_v41, %v4336_v59  ;;  %v6284_v59 = vld [vmem:[%s9853_s1 + $0x1c8] sm:$0xf0]  ;;  %v1999_v41 = vld [vmem:[#allocation2 + $0x70] sm:$0xf]  ;;  %5246 = vmatpush.bf16.msrb.mxu1 %v6351_v42  ;;  %v3165_v51 = vunpack.c.l.b16 %v2528_v14 }
 0x222   : > { %4831 = vmatmul.bf16.gmra.mxu0 %v8850_v39  ;;  %v6287_v22 = vor.u32 %v6740_v24, %v6284_v59  ;;  %v2199_v24 = vsel %vm7198_vm11, %v2194_v49, %v2198_v32  ;;  %v2201_v59 = vshrl.u32 %v1998_v53, 16  ;;  %v2214_v61 = vshrl.u32 %v1999_v41, 16  ;;  %v6886_v49 = vld [vmem:[#allocation2 + $0x3c] sm:$0xff] }
 0x223   : > { %v4514_v57 = vadd.f32 %v4513_v30, %v4425_v54  ;;  %v4340_v9 = vpop.f32.mrf.mxu2  ;;  %v10075_v30 = vld [vmem:[#allocation52_spill] sm:$0xff]  ;;  %v3101_v44 = vunpack.c.l.b16 %v2199_v24 }
 0x224   : > { %v4341_v23 = vadd.f32 %v4340_v9, %v10075_v30  ;;  %5157 = vmatpush.bf16.msrb.mxu0 %v6287_v22  ;;  %v2189_v9 = vsel %vm7198_vm11, %v2184_v3, %v2188_v13  ;;  %v2203_v42 = vrot.slane %v2201_v59, 4 }
 0x225   : > { %v4602_v19 = vpop.f32.mrf.mxu1  ;;  %4742 = vmatmul.bf16.gmra.mxu3 %v8853_v60  ;;  %v2525_v60 = vsel %vm7682_vm14, %v5854_v34, %v2524_v45  ;;  %v3100_v40 = vunpack.c.l.b16 %v2189_v9 }
 0x226   : > { %v8870_v21 = vadd.f32 %v4602_v19, %v4514_v57  ;;  %v2204_v57 = vshll.u32 %v1998_v53, 16  ;;  %v2210_v19 = vshll.u32 %v1999_v41, 16  ;;  %v3164_v22 = vunpack.c.l.b16 %v2525_v60  ;;  %v2023_v53 = vld [vmem:[#allocation2 + $0x74] sm:$0x1] }
 0x227   : > { %v4518_v39 = vpop.f32.mrf.mxu0  ;;  %v8885_v9 = vpack.c.b16 %v3101_v44, %v3100_v40  ;;  %v6148_v40 = vld [vmem:[%s9853_s1 + $0xb8] sm:$0xf0] }
 0x228   : > { %v4427_v54 = vpop.f32.mrf.mxu3  ;;  %4658 = vmatmul.bf16.gmra.mxu2 %v6674_v27  ;;  %v2206_v13 = vrot.slane %v2204_v57, 5  ;;  %v2212_v3 = vrot.slane %v2210_v19, 5  ;;  %v8883_v32 = vpack.c.b16 %v3165_v51, %v3164_v22  ;;  %v2534_v19 = vrot.slane %v2023_v53, 5  ;;  %v10079_v51 = vld [vmem:[#allocation58_spill] sm:$0xff] }
 0x229   : > { %v4428_v4 = vadd.f32 %v4427_v54, %v4339_v7  ;;  %v2216_v54 = vrot.slane %v2214_v61, 4  ;;  %10078 = vst [vmem:[#allocation45_spill] sm:$0xff] %v8885_v9 }
 0x22a   : > { %10077 = vst [vmem:[#allocation40_spill] sm:$0xff] %v8883_v32  ;;  %v2207_v24 = vor.u32 %v2206_v13, %v2203_v42 }
 0x22b   : > { %v4517_v30 = vadd.f32 %v4516_v33, %v4428_v4  ;;  %v4343_v34 = vpop.f32.mrf.mxu2  ;;  %v2531_v33 = vrot.slane %v1999_v41, 5  ;;  %v2423_v4 = vld [vmem:[#allocation2 + $0x6c] sm:$0xe]  ;;  %v6706_v41 = vld [vmem:[%s9853_s1 + $0xb4] sm:$0xf] }
 0x22c   : > { %v4344_v7 = vadd.f32 %v4343_v34, %v10076_v26  ;;  %v2217_v34 = vor.u32 %v2216_v54, %v2212_v3  ;;  %v5855_v59 = vrot.slane %v2423_v4, 9  ;;  %v6151_v44 = vor.u32 %v6706_v41, %v6148_v40  ;;  %v8896_v26 = vld [vmem:[#allocation2 + $0x7c] sm:$0xf] }
 0x22d   : > { %v4605_v45 = vpop.f32.mrf.mxu1  ;;  %v2533_v57 = vrot.slane %v2531_v33, 4  ;;  %v2208_v42 = vrot.slane %v2207_v24, 4  ;;  %v2234_v41 = vshll.u32 %v8896_v26, 16  ;;  %v2238_v40 = vshrl.u32 %v8896_v26, 16 }
 0x22e   : > { %v8881_v27 = vadd.f32 %v4605_v45, %v4517_v30  ;;  %v2220_v30 = vshll.u32 %v2023_v53, 16  ;;  %v2218_v13 = vrot.slane %v2217_v34, 4  ;;  %4980 = vmatpush.bf16.msrb.mxu2 %v6151_v44 }
 0x22f   : > { %v4521_v14 = vpop.f32.mrf.mxu0  ;;  %v2213_v34 = vsel %vm7198_vm11, %v2208_v42, %v2212_v3  ;;  %v6722_v3 = vld [vmem:[%s9853_s1 + $0x134] sm:$0xf] }
 0x230   : > { %4920 = vmatmul.bf16.gmra.mxu1 %v6886_v49  ;;  %v4429_v60 = vpop.f32.mrf.mxu3  ;;  %v2222_v54 = vrot.slane %v2220_v30, 5  ;;  %v2532_v49 = vsel %vm7682_vm14, %v5855_v59, %v2531_v33  ;;  %v3102_v17 = vunpack.c.l.b16 %v2213_v34 }
 0x231   : > { %v4430_v6 = vadd.f32 %v4429_v60, %v4341_v23  ;;  %v2000_v23 = vld [vmem:[#allocation2 + $0x78] sm:$0xf]  ;;  %v3166_v30 = vunpack.c.l.b16 %v2532_v49 }
 0x232   : > { %4836 = vmatmul.bf16.gmra.mxu0 %v8883_v32  ;;  %v2225_v53 = vshrl.u32 %v2000_v23, 16  ;;  %v2228_v60 = vshll.u32 %v2000_v23, 16  ;;  %v2223_v33 = vsel %vm7198_vm11, %v2218_v13, %v2222_v54  ;;  %v6887_v13 = vld [vmem:[#allocation2 + $0x48] sm:$0xff] }
 0x233   : > { %v4519_v45 = vadd.f32 %v4518_v39, %v4430_v6  ;;  %v4345_v22 = vpop.f32.mrf.mxu2  ;;  %v6675_v39 = vld [vmem:[#allocation2 + $0x6c] sm:$0xff]  ;;  %v3103_v50 = vunpack.c.l.b16 %v2223_v33  ;;  %v2424_v33 = vld [vmem:[#allocation2 + $0x78] sm:$0xe] }
 0x234   : > { %v4346_v6 = vadd.f32 %v4345_v22, %v10079_v51  ;;  %v2535_v22 = vsel %vm7682_vm14, %v2533_v57, %v2534_v19  ;;  %v2230_v23 = vrot.slane %v2228_v60, 5  ;;  %v2024_v57 = vld [vmem:[#allocation2 + $0x80] sm:$0x1]  ;;  %v2236_v19 = vrot.slane %v2234_v41, 5 }
 0x235   : > { %v4607_v61 = vpop.f32.mrf.mxu1  ;;  %4747 = vmatmul.bf16.gmra.mxu3 %v8885_v9  ;;  %v3167_v59 = vunpack.c.l.b16 %v2535_v22  ;;  %v2240_v9 = vrot.slane %v2238_v40, 4  ;;  %v2538_v40 = vrot.slane %v8896_v26, 5  ;;  %v8922_v34 = vpack.c.b16 %v3103_v50, %v3102_v17  ;;  %v10083_v26 = vld [vmem:[#allocation64_spill] sm:$0xff]  ;;  %v6738_v50 = vld [vmem:[%s9853_s1 + $0x1b4] sm:$0xf] }
 0x236   : > { %v8900_v4 = vadd.f32 %v4607_v61, %v4519_v45  ;;  %v2227_v61 = vrot.slane %v2225_v53, 4  ;;  %v2244_v53 = vshll.u32 %v2024_v57, 16  ;;  %v6276_v17 = vld [vmem:[%s9853_s1 + $0x1b8] sm:$0xf0] }
 0x237   : > { %v4523_v47 = vpop.f32.mrf.mxu0  ;;  %v8919_v54 = vpack.c.b16 %v3167_v59, %v3166_v30  ;;  %v2241_v41 = vor.u32 %v2240_v9, %v2236_v19  ;;  %10082 = vst [vmem:[#allocation47_spill] sm:$0xff] %v8922_v34  ;;  %v2002_v9 = vld [vmem:[#allocation2 + $0x84] sm:$0xf] }
 0x238   : > { %v4432_v32 = vpop.f32.mrf.mxu3  ;;  %4663 = vmatmul.bf16.gmra.mxu2 %v6675_v39  ;;  %v2231_v49 = vor.u32 %v2230_v23, %v2227_v61  ;;  %v5856_v23 = vrot.slane %v2424_v33, 9 }
 0x239   : > { %v4433_v24 = vadd.f32 %v4432_v32, %v4344_v7  ;;  %v10080_v7 = vld [vmem:[#allocation61_spill] sm:$0xff]  ;;  %10081 = vst [vmem:[#allocation43_spill] sm:$0xff] %v8919_v54  ;;  %v2242_v61 = vrot.slane %v2241_v41, 4 }
 0x23a   : > { %v2539_v33 = vsel %vm7682_vm14, %v5856_v23, %v2538_v40 }
 0x23b   : > { %v4522_v45 = vadd.f32 %v4521_v14, %v4433_v24  ;;  %v4348_v44 = vpop.f32.mrf.mxu2  ;;  %v6212_v14 = vld [vmem:[%s9853_s1 + $0x138] sm:$0xf0] }
 0x23c   : > { %v4349_v32 = vadd.f32 %v4348_v44, %v10080_v7  ;;  %v6215_v42 = vor.u32 %v6722_v3, %v6212_v14  ;;  %v2246_v7 = vrot.slane %v2244_v53, 5  ;;  %v2540_v3 = vrot.slane %v2538_v40, 4 }
 0x23d   : > { %v4610_v51 = vpop.f32.mrf.mxu1  ;;  %v2541_v14 = vrot.slane %v2024_v57, 5  ;;  %v6279_v57 = vor.u32 %v6738_v50, %v6276_v17 }
 0x23e   : > { %v8917_v39 = vadd.f32 %v4610_v51, %v4522_v45  ;;  %5069 = vmatpush.bf16.msrb.mxu3 %v6215_v42  ;;  %v6676_v45 = vld [vmem:[#allocation2 + $0x78] sm:$0xff]  ;;  %v2232_v51 = vrot.slane %v2231_v49, 4  ;;  %v8941_v49 = vld [vmem:[#allocation2 + $0x88] sm:$0xf]  ;;  %v2247_v50 = vsel %vm7198_vm11, %v2242_v61, %v2246_v7 }
 0x23f   : > { %v4526_v22 = vpop.f32.mrf.mxu0  ;;  %5158 = vmatpush.bf16.msrb.mxu0 %v6279_v57  ;;  %v2545_v7 = vrot.slane %v8941_v49, 5  ;;  %v6888_v61 = vld [vmem:[#allocation2 + $0x54] sm:$0xff] }
 0x240   : > { %4925 = vmatmul.bf16.gmra.mxu1 %v6887_v13  ;;  %v4434_v60 = vpop.f32.mrf.mxu3  ;;  %v6340_v13 = vld [vmem:[%s9853_s1 + $0x238] sm:$0xf0]  ;;  %v2237_v53 = vsel %vm7198_vm11, %v2232_v51, %v2236_v19  ;;  %v2258_v19 = vshll.u32 %v8941_v49, 16  ;;  %v2262_v51 = vshrl.u32 %v8941_v49, 16 }
 0x241   : > { %v4435_v24 = vadd.f32 %v4434_v60, %v4346_v6  ;;  %v3104_v23 = vunpack.c.l.b16 %v2237_v53  ;;  %v2425_v53 = vld [vmem:[#allocation2 + $0x84] sm:$0xe] }
 0x242   : > { %4841 = vmatmul.bf16.gmra.mxu0 %v8919_v54  ;;  %v3105_v54 = vunpack.c.l.b16 %v2247_v50  ;;  %v5857_v49 = vrot.slane %v2425_v53, 9 }
 0x243   : > { %v4524_v44 = vadd.f32 %v4523_v47, %v4435_v24  ;;  %v4350_v59 = vpop.f32.mrf.mxu2  ;;  %v6754_v47 = vld [vmem:[%s9853_s1 + $0x234] sm:$0xf] }
 0x244   : > { %v4351_v6 = vadd.f32 %v4350_v59, %v10083_v26  ;;  %v6343_v60 = vor.u32 %v6754_v47, %v6340_v13  ;;  %v2252_v59 = vshll.u32 %v2002_v9, 16  ;;  %v3168_v47 = vunpack.c.l.b16 %v2539_v33 }
 0x245   : > { %v4612_v30 = vpop.f32.mrf.mxu1  ;;  %4752 = vmatmul.bf16.gmra.mxu3 %v8922_v34  ;;  %v8959_v50 = vpack.c.b16 %v3105_v54, %v3104_v23 }
 0x246   : > { %v8936_v42 = vadd.f32 %v4612_v30, %v4524_v44  ;;  %v2542_v44 = vsel %vm7682_vm14, %v2540_v3, %v2541_v14  ;;  %v2249_v30 = vshrl.u32 %v2002_v9, 16  ;;  %5247 = vmatpush.bf16.msrb.mxu1 %v6343_v60  ;;  %v2254_v57 = vrot.slane %v2252_v59, 5 }
 0x247   : > { %v4528_v24 = vpop.f32.mrf.mxu0  ;;  %v3169_v13 = vunpack.c.l.b16 %v2542_v44  ;;  %v2264_v9 = vrot.slane %v2262_v51, 4  ;;  %10085 = vst [vmem:[#allocation52_spill] sm:$0xff] %v8959_v50 }
 0x248   : > { %v4437_v41 = vpop.f32.mrf.mxu3  ;;  %4668 = vmatmul.bf16.gmra.mxu2 %v6676_v45  ;;  %v2251_v14 = vrot.slane %v2249_v30, 4  ;;  %v2260_v45 = vrot.slane %v2258_v19, 5  ;;  %v2547_v19 = vrot.slane %v2545_v7, 4 }
 0x249   : > { %v4438_v26 = vadd.f32 %v4437_v41, %v4349_v32  ;;  %v8957_v60 = vpack.c.b16 %v3169_v13, %v3168_v47  ;;  %v6677_v13 = vld [vmem:[#allocation2 + $0x84] sm:$0xff] }
 0x24a   : > { %v2255_v30 = vor.u32 %v2254_v57, %v2251_v14  ;;  %v2265_v59 = vor.u32 %v2264_v9, %v2260_v45  ;;  %v6704_v14 = vld [vmem:[%s9853_s1 + $0xa4] sm:$0xf] }
 0x24b   : > { %v4527_v17 = vadd.f32 %v4526_v22, %v4438_v26  ;;  %v4629_v3 = vpop.f32.mrf.mxu2  ;;  %10084 = vst [vmem:[#allocation50_spill] sm:$0xff] %v8957_v60  ;;  %v2025_v22 = vld [vmem:[#allocation2 + $0x8c] sm:$0x1] }
 0x24c   : > { %v4630_v32 = vadd.f32 %v4629_v3, %v8262_v46  ;;  %v2268_v46 = vshll.u32 %v2025_v22, 16  ;;  %v2548_v51 = vrot.slane %v2025_v22, 5  ;;  %v2266_v23 = vrot.slane %v2265_v59, 4 }
 0x24d   : > { %v4615_v40 = vpop.f32.mrf.mxu1 }
 0x24e   : > { %v8954_v41 = vadd.f32 %v4615_v40, %v4527_v17  ;;  %v2004_v40 = vld [vmem:[#allocation2 + $0x90] sm:$0xf]  ;;  %v2270_v9 = vrot.slane %v2268_v46, 5  ;;  %v2549_v22 = vsel %vm7682_vm14, %v2547_v19, %v2548_v51 }
 0x24f   : > { %v4807_v44 = vpop.f32.mrf.mxu0  ;;  %v2273_v53 = vshrl.u32 %v2004_v40, 16 }
 0x250   : > { %4930 = vmatmul.bf16.gmra.mxu1 %v6888_v61  ;;  %v4439_v33 = vpop.f32.mrf.mxu3  ;;  %v8962_v61 = vld [vmem:[#allocation2 + $0x94] sm:$0xf]  ;;  %v2271_v19 = vsel %vm7198_vm11, %v2266_v23, %v2270_v9  ;;  %v6889_v23 = vld [vmem:[#allocation2 + $0x60] sm:$0xff] }
 0x251   : > { %v4440_v26 = vadd.f32 %v4439_v33, %v4351_v6  ;;  %v2256_v6 = vrot.slane %v2255_v30, 4  ;;  %v2282_v30 = vshll.u32 %v8962_v61, 16  ;;  %v2286_v59 = vshrl.u32 %v8962_v61, 16 }
 0x252   : > { %4846 = vmatmul.bf16.gmra.mxu0 %v8957_v60 }
 0x253   : > { %v4529_v17 = vadd.f32 %v4528_v24, %v4440_v26  ;;  %v4631_v47 = vpop.f32.mrf.mxu2  ;;  %v6140_v24 = vld [vmem:[%s9853_s1 + $0xa8] sm:$0xf0]  ;;  %v2276_v26 = vshll.u32 %v2004_v40, 16  ;;  %v2261_v46 = vsel %vm7198_vm11, %v2256_v6, %v2260_v45  ;;  %v8986_v40 = vrot.slane %v2282_v30, 5  ;;  %v2026_v45 = vld [vmem:[#allocation2 + $0x98] sm:$0x1] }
 0x254   : > { %v4632_v54 = vadd.f32 %v4631_v47, %v8303_v62  ;;  %v6143_v33 = vor.u32 %v6704_v14, %v6140_v24  ;;  %v2546_v62 = vsel %vm7682_vm14, %v5857_v49, %v2545_v7  ;;  %v2288_v14 = vrot.slane %v2286_v59, 4  ;;  %v6720_v6 = vld [vmem:[%s9853_s1 + $0x124] sm:$0xf] }
 0x255   : > { %v4617_v3 = vpop.f32.mrf.mxu1  ;;  %4757 = vmatmul.bf16.gmra.mxu3 %v8959_v50  ;;  %v3170_v51 = vunpack.c.l.b16 %v2546_v62  ;;  %v2278_v49 = vrot.slane %v2276_v26, 5  ;;  %v2552_v30 = vrot.slane %v8962_v61, 5 }
 0x256   : > { %v8972_v57 = vadd.f32 %v4617_v3, %v4529_v17  ;;  %4981 = vmatpush.bf16.msrb.mxu2 %v6143_v33  ;;  %v3171_v17 = vunpack.c.l.b16 %v2549_v22  ;;  %v2275_v3 = vrot.slane %v2273_v53, 4  ;;  %v2289_v53 = vor.u32 %v2288_v14, %v8986_v40 }
 0x257   : > { %v4809_v60 = vpop.f32.mrf.mxu0 }
 0x258   : > { %v4718_v47 = vpop.f32.mrf.mxu3  ;;  %4673 = vmatmul.bf16.gmra.mxu2 %v6677_v13  ;;  %v3107_v13 = vunpack.c.l.b16 %v2271_v19  ;;  %v8997_v9 = vpack.c.b16 %v3171_v17, %v3170_v51  ;;  %v2279_v22 = vor.u32 %v2278_v49, %v2275_v3  ;;  %v2426_v19 = vld [vmem:[#allocation2 + $0x90] sm:$0xe]  ;;  %v2290_v51 = vrot.slane %v2289_v53, 4 }
 0x259   : > { %v4719_v50 = vadd.f32 %v4718_v47, %v4630_v32  ;;  %v3106_v32 = vunpack.c.l.b16 %v2261_v46  ;;  %v6678_v49 = vld [vmem:[#allocation2 + $0x90] sm:$0xff] }
 0x25a   : > { %10087 = vst [vmem:[#allocation58_spill] sm:$0xff] %v8997_v9 }
 0x25b   : > { %v8984_v7 = vadd.f32 %v4807_v44, %v4719_v50  ;;  %v4634_v33 = vpop.f32.mrf.mxu2  ;;  %v6204_v44 = vld [vmem:[%s9853_s1 + $0x128] sm:$0xf0]  ;;  %v9001_v46 = vpack.c.b16 %v3107_v13, %v3106_v32  ;;  %v6752_v32 = vld [vmem:[%s9853_s1 + $0x224] sm:$0xf] }
 0x25c   : > { %v4635_v47 = vadd.f32 %v4634_v33, %v8316_v16  ;;  %v6207_v50 = vor.u32 %v6720_v6, %v6204_v44  ;;  %v2292_v16 = vshll.u32 %v2026_v45, 16  ;;  %v2280_v6 = vrot.slane %v2279_v22, 4  ;;  %v2006_v22 = vld [vmem:[#allocation2 + $0x9c] sm:$0xf] }
 0x25d   : > { %10086 = vst [vmem:[#allocation56_spill] sm:$0xff] %v8984_v7  ;;  %v8988_v24 = vpop.f32.mrf.mxu1  ;;  %v5858_v44 = vrot.slane %v2426_v19, 9  ;;  %v2555_v7 = vrot.slane %v2026_v45, 5  ;;  %v6332_v45 = vld [vmem:[%s9853_s1 + $0x228] sm:$0xf0] }
 0x25e   : > { %5070 = vmatpush.bf16.msrb.mxu3 %v6207_v50  ;;  %10088 = vst [vmem:[#allocation61_spill] sm:$0xff] %v9001_v46  ;;  %v2294_v14 = vrot.slane %v2292_v16, 5  ;;  %v6335_v50 = vor.u32 %v6752_v32, %v6332_v45  ;;  %v2300_v32 = vshll.u32 %v2006_v22, 16 }
 0x25f   : > { %v4812_v26 = vpop.f32.mrf.mxu0  ;;  %v2553_v16 = vsel %vm7682_vm14, %v5858_v44, %v2552_v30 }
 0x260   : > { %4935 = vmatmul.bf16.gmra.mxu1 %v6889_v23  ;;  %v4720_v62 = vpop.f32.mrf.mxu3  ;;  %v2554_v23 = vrot.slane %v2552_v30, 4  ;;  %v3172_v30 = vunpack.c.l.b16 %v2553_v16 }
 0x261   : > { %v4721_v59 = vadd.f32 %v4720_v62, %v4632_v54  ;;  %v6268_v54 = vld [vmem:[%s9853_s1 + $0x1a8] sm:$0xf0]  ;;  %5248 = vmatpush.bf16.msrb.mxu1 %v6335_v50 }
 0x262   : > { %4851 = vmatmul.bf16.gmra.mxu0 %v8997_v9 }
 0x263   : > { %v9003_v33 = vadd.f32 %v4809_v60, %v4721_v59  ;;  %v4636_v3 = vpop.f32.mrf.mxu2  ;;  %v6736_v60 = vld [vmem:[%s9853_s1 + $0x1a4] sm:$0xf]  ;;  %v2556_v59 = vsel %vm7682_vm14, %v2554_v23, %v2555_v7 }
 0x264   : > { %v4637_v61 = vadd.f32 %v4636_v3, %v8343_v37  ;;  %v6271_v13 = vor.u32 %v6736_v60, %v6268_v54  ;;  %v2007_v37 = vld [vmem:[#allocation2 + $0xa0] sm:$0xf]  ;;  %v2285_v3 = vsel %vm7198_vm11, %v2280_v6, %v8986_v40  ;;  %v2295_v60 = vsel %vm7198_vm11, %v2290_v51, %v2294_v14  ;;  %v6890_v14 = vld [vmem:[#allocation2 + $0x6c] sm:$0xff] }
 0x265   : > { %10089 = vst [vmem:[#allocation64_spill] sm:$0xff] %v9003_v33  ;;  %v9006_v17 = vpop.f32.mrf.mxu1  ;;  %4762 = vmatmul.bf16.gmra.mxu3 %v9001_v46  ;;  %v2297_v54 = vshrl.u32 %v2006_v22, 16  ;;  %v2306_v45 = vshll.u32 %v2007_v37, 16  ;;  %v2310_v9 = vshrl.u32 %v2007_v37, 16  ;;  %v3173_v44 = vunpack.c.l.b16 %v2556_v59  ;;  %v2027_v22 = vld [vmem:[#allocation2 + $0xa4] sm:$0x1] }
 0x266   : > { %5159 = vmatpush.bf16.msrb.mxu0 %v6271_v13  ;;  %v3109_v23 = vunpack.c.l.b16 %v2295_v60  ;;  %v2302_v6 = vrot.slane %v2300_v32, 5  ;;  %v2559_v16 = vrot.slane %v2007_v37, 5  ;;  %v2427_v46 = vld [vmem:[#allocation2 + $0x9c] sm:$0xe]  ;;  %v2316_v34 = vshll.u32 %v2027_v22, 16 }
 0x267   : > { %v4814_v62 = vpop.f32.mrf.mxu0  ;;  %v2299_v40 = vrot.slane %v2297_v54, 4  ;;  %v2312_v51 = vrot.slane %v2310_v9, 4  ;;  %v9036_v50 = vpack.c.b16 %v3173_v44, %v3172_v30  ;;  %v6679_v32 = vld [vmem:[#allocation2 + $0x9c] sm:$0xff]  ;;  %v2562_v44 = vrot.slane %v2027_v22, 5  ;;  %v6702_v37 = vld [vmem:[%s9853_s1 + $0x94] sm:$0xf] }
 0x268   : > { %v4723_v53 = vpop.f32.mrf.mxu3  ;;  %4678 = vmatmul.bf16.gmra.mxu2 %v6678_v49  ;;  %v3108_v49 = vunpack.c.l.b16 %v2285_v3  ;;  %v2561_v30 = vrot.slane %v2559_v16, 4 }
 0x269   : > { %v4724_v19 = vadd.f32 %v4723_v53, %v4635_v47  ;;  %v2308_v53 = vrot.slane %v2306_v45, 5  ;;  %10091 = vst [vmem:[#allocation90_spill] sm:$0xff] %v9036_v50  ;;  %v2303_v3 = vor.u32 %v2302_v6, %v2299_v40  ;;  %v5859_v45 = vrot.slane %v2427_v46, 9  ;;  %v9053_v46 = vld [vmem:[#allocation2 + $0xac] sm:$0xf] }
 0x26a   : > { %v2318_v40 = vrot.slane %v2316_v34, 5  ;;  %v2563_v22 = vsel %vm7682_vm14, %v2561_v30, %v2562_v44 }
 0x26b   : > { %v9031_v33 = vadd.f32 %v4812_v26, %v4724_v19  ;;  %v4639_v47 = vpop.f32.mrf.mxu2  ;;  %v2313_v60 = vor.u32 %v2312_v51, %v2308_v53 }
 0x26c   : > { %v4640_v13 = vadd.f32 %v4639_v47, %v8371_v36  ;;  %v2008_v47 = vld [vmem:[#allocation2 + $0xa8] sm:$0xf] }
 0x26d   : > { %10090 = vst [vmem:[#allocation89_spill] sm:$0xff] %v9031_v33  ;;  %v9033_v7 = vpop.f32.mrf.mxu1  ;;  %v9038_v33 = vpack.c.b16 %v3109_v23, %v3108_v49  ;;  %v2304_v49 = vrot.slane %v2303_v3, 4  ;;  %v2314_v23 = vrot.slane %v2313_v60, 4  ;;  %v2330_v60 = vshll.u32 %v9053_v46, 16 }
 0x26f   : > { %v4817_v19 = vpop.f32.mrf.mxu0  ;;  %10092 = vst [vmem:[#allocation91_spill] sm:$0xff] %v9038_v33  ;;  %v2309_v3 = vsel %vm7198_vm11, %v2304_v49, %v2308_v53  ;;  %v2319_v34 = vsel %vm7198_vm11, %v2314_v23, %v2318_v40  ;;  %v6718_v49 = vld [vmem:[%s9853_s1 + $0x114] sm:$0xf]  ;;  %v2332_v23 = vrot.slane %v2330_v60, 5 }
 0x270   : > { %4940 = vmatmul.bf16.gmra.mxu1 %v6890_v14  ;;  %v4725_v26 = vpop.f32.mrf.mxu3 }
 0x271   : > { %v4726_v59 = vadd.f32 %v4725_v26, %v4637_v61  ;;  %v2321_v26 = vshrl.u32 %v2008_v47, 16 }
 0x272   : > { %4856 = vmatmul.bf16.gmra.mxu0 %v9036_v50  ;;  %v2428_v50 = vld [vmem:[#allocation2 + $0xa8] sm:$0xe] }
 0x273   : > { %v9040_v36 = vadd.f32 %v4814_v62, %v4726_v59  ;;  %v4641_v54 = vpop.f32.mrf.mxu2  ;;  %v6132_v62 = vld [vmem:[%s9853_s1 + $0x98] sm:$0xf0]  ;;  %v2324_v59 = vshll.u32 %v2008_v47, 16  ;;  %v2323_v47 = vrot.slane %v2321_v26, 4  ;;  %v2028_v26 = vld [vmem:[#allocation2 + $0xb0] sm:$0x1] }
 0x274   : > { %v4642_v61 = vadd.f32 %v4641_v54, %v8410_v35  ;;  %v6135_v6 = vor.u32 %v6702_v37, %v6132_v62  ;;  %v2560_v35 = vsel %vm7682_vm14, %v5859_v45, %v2559_v16  ;;  %v2334_v37 = vshrl.u32 %v9053_v46, 16 }
 0x275   : > { %10093 = vst [vmem:[#allocation92_spill] sm:$0xff] %v9040_v36  ;;  %v9043_v9 = vpop.f32.mrf.mxu1  ;;  %4767 = vmatmul.bf16.gmra.mxu3 %v9038_v33  ;;  %v3174_v16 = vunpack.c.l.b16 %v2560_v35  ;;  %v3175_v45 = vunpack.c.l.b16 %v2563_v22  ;;  %v6891_v35 = vld [vmem:[#allocation2 + $0x78] sm:$0xff]  ;;  %v2340_v36 = vshll.u32 %v2028_v26, 16 }
 0x276   : > { %4982 = vmatpush.bf16.msrb.mxu2 %v6135_v6  ;;  %v3111_v6 = vunpack.c.l.b16 %v2319_v34  ;;  %v2336_v40 = vrot.slane %v2334_v37, 4  ;;  %v6680_v37 = vld [vmem:[#allocation2 + $0xa8] sm:$0xff] }
 0x277   : > { %v4819_v14 = vpop.f32.mrf.mxu0  ;;  %v9076_v22 = vpack.c.b16 %v3175_v45, %v3174_v16 }
 0x278   : > { %v4728_v51 = vpop.f32.mrf.mxu3  ;;  %4683 = vmatmul.bf16.gmra.mxu2 %v6679_v32  ;;  %v3110_v32 = vunpack.c.l.b16 %v2309_v3 }
 0x279   : > { %v4729_v54 = vadd.f32 %v4728_v51, %v4640_v13  ;;  %v2326_v13 = vrot.slane %v2324_v59, 5  ;;  %10095 = vst [vmem:[#allocation94_spill] sm:$0xff] %v9076_v22 }
 0x27b   : > { %v9065_v62 = vadd.f32 %v4817_v19, %v4729_v54  ;;  %v4644_v44 = vpop.f32.mrf.mxu2  ;;  %v6196_v19 = vld [vmem:[%s9853_s1 + $0x118] sm:$0xf0]  ;;  %v2327_v3 = vor.u32 %v2326_v13, %v2323_v47  ;;  %v2569_v13 = vrot.slane %v2028_v26, 5 }
 0x27c   : > { %v4645_v53 = vadd.f32 %v4644_v44, %v8429_v43  ;;  %v6199_v51 = vor.u32 %v6718_v49, %v6196_v19  ;;  %v2566_v43 = vrot.slane %v9053_v46, 5  ;;  %v9079_v44 = vpack.c.b16 %v3111_v6, %v3110_v32  ;;  %v2010_v46 = vld [vmem:[#allocation2 + $0xb4] sm:$0xf]  ;;  %v6260_v32 = vld [vmem:[%s9853_s1 + $0x198] sm:$0xf0] }
 0x27d   : > { %10094 = vst [vmem:[#allocation93_spill] sm:$0xff] %v9065_v62  ;;  %v9067_v30 = vpop.f32.mrf.mxu1  ;;  %v2337_v62 = vor.u32 %v2336_v40, %v2332_v23  ;;  %v2328_v49 = vrot.slane %v2327_v3, 4  ;;  %v5860_v19 = vrot.slane %v2428_v50, 9  ;;  %v6750_v6 = vld [vmem:[%s9853_s1 + $0x214] sm:$0xf]  ;;  %v2342_v40 = vrot.slane %v2340_v36, 5 }
 0x27e   : > { %5071 = vmatpush.bf16.msrb.mxu3 %v6199_v51  ;;  %10096 = vst [vmem:[#allocation95_spill] sm:$0xff] %v9079_v44  ;;  %v2568_v47 = vrot.slane %v2566_v43, 4 }
 0x27f   : > { %v4822_v54 = vpop.f32.mrf.mxu0  ;;  %v2338_v50 = vrot.slane %v2337_v62, 4  ;;  %v2348_v62 = vshll.u32 %v2010_v46, 16 }
 0x280   : > { %4945 = vmatmul.bf16.gmra.mxu1 %v6891_v35  ;;  %v4730_v59 = vpop.f32.mrf.mxu3  ;;  %v6324_v35 = vld [vmem:[%s9853_s1 + $0x218] sm:$0xf0] }
 0x281   : > { %v4731_v34 = vadd.f32 %v4730_v59, %v4642_v61  ;;  %v6327_v26 = vor.u32 %v6750_v6, %v6324_v35  ;;  %v2343_v35 = vsel %vm7198_vm11, %v2338_v50, %v2342_v40 }
 0x282   : > { %4861 = vmatmul.bf16.gmra.mxu0 %v9076_v22  ;;  %v2345_v22 = vshrl.u32 %v2010_v46, 16 }
 0x283   : > { %v9081_v60 = vadd.f32 %v4819_v14, %v4731_v34  ;;  %v4646_v45 = vpop.f32.mrf.mxu2  ;;  %v6734_v14 = vld [vmem:[%s9853_s1 + $0x194] sm:$0xf]  ;;  %v2567_v34 = vsel %vm7682_vm14, %v5860_v19, %v2566_v43  ;;  %5249 = vmatpush.bf16.msrb.mxu1 %v6327_v26 }
 0x284   : > { %v4647_v61 = vadd.f32 %v4646_v45, %v8499_v63  ;;  %v6263_v51 = vor.u32 %v6734_v14, %v6260_v32  ;;  %v9100_v63 = vld [vmem:[#allocation2 + $0xb8] sm:$0xf]  ;;  %v2570_v45 = vsel %vm7682_vm14, %v2568_v47, %v2569_v13  ;;  %v2333_v14 = vsel %vm7198_vm11, %v2328_v49, %v2332_v23 }
 0x285   : > { %10097 = vst [vmem:[#allocation96_spill] sm:$0xff] %v9081_v60  ;;  %v9084_v16 = vpop.f32.mrf.mxu1  ;;  %4772 = vmatmul.bf16.gmra.mxu3 %v9079_v44  ;;  %v2354_v32 = vshll.u32 %v9100_v63, 16  ;;  %v2358_v6 = vshrl.u32 %v9100_v63, 16  ;;  %v3176_v19 = vunpack.c.l.b16 %v2567_v34  ;;  %v3177_v47 = vunpack.c.l.b16 %v2570_v45  ;;  %v2029_v60 = vld [vmem:[#allocation2 + $0xbc] sm:$0x1]  ;;  %v6892_v44 = vld [vmem:[#allocation2 + $0x84] sm:$0xff] }
 0x286   : > { %5160 = vmatpush.bf16.msrb.mxu0 %v6263_v51  ;;  %v3112_v46 = vunpack.c.l.b16 %v2333_v14  ;;  %v2350_v51 = vrot.slane %v2348_v62, 5  ;;  %v2429_v45 = vld [vmem:[#allocation2 + $0xb4] sm:$0xe]  ;;  %v2364_v62 = vshll.u32 %v2029_v60, 16 }
 0x287   : > { %v4824_v3 = vpop.f32.mrf.mxu0  ;;  %v2356_v49 = vrot.slane %v2354_v32, 5  ;;  %v2360_v26 = vrot.slane %v2358_v6, 4  ;;  %v9117_v33 = vpack.c.b16 %v3177_v47, %v3176_v19  ;;  %v2012_v6 = vld [vmem:[#allocation2 + $0xc0] sm:$0xf]  ;;  %v6681_v47 = vld [vmem:[#allocation2 + $0xb4] sm:$0xff] }
 0x288   : > { %v4733_v59 = vpop.f32.mrf.mxu3  ;;  %4688 = vmatmul.bf16.gmra.mxu2 %v6680_v37  ;;  %v2347_v37 = vrot.slane %v2345_v22, 4 }
 0x289   : > { %v4734_v36 = vadd.f32 %v4733_v59, %v4645_v53  ;;  %v3113_v59 = vunpack.c.l.b16 %v2343_v35  ;;  %10098 = vst [vmem:[#allocation97_spill] sm:$0xff] %v9117_v33  ;;  %v2361_v22 = vor.u32 %v2360_v26, %v2356_v49  ;;  %v2369_v26 = vshrl.u32 %v2012_v6, 16 }
 0x28a   : > { %v2351_v34 = vor.u32 %v2350_v51, %v2347_v37  ;;  %v9127_v37 = vld [vmem:[#allocation2 + $0xc4] sm:$0xf] }
 0x28b   : > { %v9112_v43 = vadd.f32 %v4822_v54, %v4734_v36  ;;  %v4649_v53 = vpop.f32.mrf.mxu2  ;;  %v2573_v54 = vrot.slane %v9100_v63, 5  ;;  %v9120_v14 = vpack.c.b16 %v3113_v59, %v3112_v46  ;;  %v2362_v46 = vrot.slane %v2361_v22, 4  ;;  %v6700_v51 = vld [vmem:[%s9853_s1 + $0x84] sm:$0xf]  ;;  %v265_v22 = vld [vmem:[#allocation2 + $0xcc] sm:$0x1] }
 0x28c   : > { %v4650_v23 = vadd.f32 %v4649_v53, %v8501_v56  ;;  %v5861_v56 = vrot.slane %v2429_v45, 9  ;;  %v2352_v53 = vrot.slane %v2351_v34, 4 }
 0x28d   : > { %v9114_v13 = vpop.f32.mrf.mxu1  ;;  %10099 = vst [vmem:[#allocation98_spill] sm:$0xff] %v9120_v14  ;;  %v2575_v32 = vrot.slane %v2573_v54, 4 }
 0x28e   : > { %v2574_v34 = vsel %vm7682_vm14, %v5861_v56, %v2573_v54 }
 0x28f   : > { %v4827_v40 = vpop.f32.mrf.mxu0  ;;  %v3178_v56 = vunpack.c.l.b16 %v2574_v34 }
 0x290   : > { %4950 = vmatmul.bf16.gmra.mxu1 %v6892_v44  ;;  %v4735_v50 = vpop.f32.mrf.mxu3  ;;  %v2576_v44 = vrot.slane %v2029_v60, 5  ;;  %v6124_v60 = vld [vmem:[%s9853_s1 + $0x88] sm:$0xf0] }
 0x291   : > { %v4736_v36 = vadd.f32 %v4735_v50, %v4647_v61  ;;  %v6127_v59 = vor.u32 %v6700_v51, %v6124_v60  ;;  %v2372_v50 = vshll.u32 %v2012_v6, 16  ;;  %v2357_v6 = vsel %vm7198_vm11, %v2352_v53, %v2356_v49 }
 0x292   : > { %4866 = vmatmul.bf16.gmra.mxu0 %v9117_v33  ;;  %v2577_v45 = vsel %vm7682_vm14, %v2575_v32, %v2576_v44  ;;  %v266_v33 = vsel %vm7032_vm3, 0, %v265_v22  ;;  %v2371_v44 = vrot.slane %v2369_v26, 4  ;;  %v3114_v53 = vunpack.c.l.b16 %v2357_v6  ;;  %v6188_v26 = vld [vmem:[%s9853_s1 + $0x108] sm:$0xf0]  ;;  %v2430_v6 = vld [vmem:[#allocation2 + $0xc0] sm:$0xe] }
 0x293   : > { %v9122_v35 = vadd.f32 %v4824_v3, %v4736_v36  ;;  %v4651_v63 = vpop.f32.mrf.mxu2  ;;  %v2366_v3 = vrot.slane %v2364_v62, 5  ;;  %v2382_v36 = vshrl.u32 %v9127_v37, 16  ;;  %4983 = vmatpush.bf16.msrb.mxu2 %v6127_v59  ;;  %267 = vst [vmem:[#allocation2 + $0xcc] sm:$0x1] %v266_v33  ;;  %v3179_v32 = vunpack.c.l.b16 %v2577_v45 }
 0x294   : > { %v4652_v61 = vadd.f32 %v4651_v63, %v8536_v0  ;;  %v2378_v0 = vshll.u32 %v9127_v37, 16  ;;  %v2374_v60 = vrot.slane %v2372_v50, 5  ;;  %v2580_v22 = vrot.slane %v9127_v37, 5 }
 0x295   : > { %10100 = vst [vmem:[#allocation99_spill] sm:$0xff] %v9122_v35  ;;  %v9125_v19 = vpop.f32.mrf.mxu1  ;;  %4777 = vmatmul.bf16.gmra.mxu3 %v9120_v14  ;;  %v2367_v54 = vsel %vm7198_vm11, %v2362_v46, %v2366_v3  ;;  %v321_v35 = vld [vmem:[#allocation2 + $0xd4] sm:$0x1]  ;;  %v2384_v28 = vrot.slane %v2382_v36, 4  ;;  %v2030_v3 = vld [vmem:[#allocation2 + $0xc8] sm:$0x1] }
 0x296   : > { %v9151_v59 = vrot.slane %v2378_v0, 5  ;;  %v3115_v46 = vunpack.c.l.b16 %v2367_v54  ;;  %v2375_v34 = vor.u32 %v2374_v60, %v2371_v44  ;;  %v6682_v60 = vld [vmem:[#allocation2 + $0xc0] sm:$0xff] }
 0x297   : > { %v4829_v63 = vpop.f32.mrf.mxu0 }
 0x298   : > { %v4738_v62 = vpop.f32.mrf.mxu3  ;;  %4693 = vmatmul.bf16.gmra.mxu2 %v6681_v47  ;;  %v2385_v45 = vor.u32 %v2384_v28, %v9151_v59 }
 0x299   : > { %v4739_v51 = vadd.f32 %v4738_v62, %v4650_v23  ;;  %v322_v23 = vsel %vm7043_vm4, 0, %v321_v35  ;;  %v9164_v35 = vpack.c.b16 %v3179_v32, %v3178_v56 }
 0x29a   : > { %323 = vst [vmem:[#allocation2 + $0xd4] sm:$0x1] %v322_v23  ;;  %v2376_v23 = vrot.slane %v2375_v34, 4  ;;  %v2386_v56 = vrot.slane %v2385_v45, 4 }
 0x29b   : > { %v9149_v14 = vadd.f32 %v4827_v40, %v4739_v51  ;;  %v4654_v49 = vpop.f32.mrf.mxu2  ;;  %v6716_v40 = vld [vmem:[%s9853_s1 + $0x104] sm:$0xf]  ;;  %10101 = vst [vmem:[#allocation100_spill] sm:$0xff] %v9164_v35  ;;  %v9168_v51 = vpack.c.b16 %v3115_v46, %v3114_v53 }
 0x29c   : > { %v4655_v33 = vadd.f32 %v4654_v49, %v8550_v1  ;;  %v6191_v50 = vor.u32 %v6716_v40, %v6188_v26  ;;  %v2388_v1 = vshll.u32 %v2030_v3, 16  ;;  %v5862_v49 = vrot.slane %v2430_v6, 9  ;;  %v6748_v53 = vld [vmem:[%s9853_s1 + $0x204] sm:$0xf] }
 0x29d   : > { %v9155_v47 = vpop.f32.mrf.mxu1  ;;  %10102 = vst [vmem:[#allocation101_spill] sm:$0xff] %v9168_v51  ;;  %v2582_v40 = vrot.slane %v2580_v22, 4  ;;  %v2583_v26 = vrot.slane %v2030_v3, 5  ;;  %v6316_v3 = vld [vmem:[%s9853_s1 + $0x208] sm:$0xf0]  ;;  %v2381_v6 = vsel %vm7198_vm11, %v2376_v23, %v9151_v59 }
 0x29e   : > { %5072 = vmatpush.bf16.msrb.mxu3 %v6191_v50  ;;  %v2390_v28 = vrot.slane %v2388_v1, 5  ;;  %v6319_v50 = vor.u32 %v6748_v53, %v6316_v3 }
 0x29f   : > { %v4832_v36 = vpop.f32.mrf.mxu0  ;;  %v2584_v1 = vsel %vm7682_vm14, %v2582_v40, %v2583_v26 }
 0x2a0   : > { %4955 = vmatmul.bf16.gmra.mxu1 %v6893_v31  ;;  %v4740_v0 = vpop.f32.mrf.mxu3  ;;  %v2014_v31 = vld [vmem:[#allocation2 + $0xcc] sm:$0xf] }
 0x2a1   : > { %v4741_v62 = vadd.f32 %v4740_v0, %v4652_v61  ;;  %v6732_v61 = vld [vmem:[%s9853_s1 + $0x184] sm:$0xf]  ;;  %v2581_v0 = vsel %vm7682_vm14, %v5862_v49, %v2580_v22  ;;  %5250 = vmatpush.bf16.msrb.mxu1 %v6319_v50  ;;  %v3181_v49 = vunpack.c.l.b16 %v2584_v1 }
 0x2a2   : > { %4871 = vmatmul.bf16.gmra.mxu0 %v9164_v35  ;;  %v3180_v22 = vunpack.c.l.b16 %v2581_v0 }
 0x2a3   : > { %v9170_v54 = vadd.f32 %v4829_v63, %v4741_v62  ;;  %v4656_v44 = vpop.f32.mrf.mxu2  ;;  %v6252_v63 = vld [vmem:[%s9853_s1 + $0x188] sm:$0xf0] }
 0x2a4   : > { %v4657_v37 = vadd.f32 %v4656_v44, %v8579_v48  ;;  %v6255_v46 = vor.u32 %v6732_v61, %v6252_v63  ;;  %v2015_v48 = vld [vmem:[#allocation2 + $0xd0] sm:$0xf]  ;;  %v2391_v44 = vsel %vm7198_vm11, %v2386_v56, %v2390_v28  ;;  %v2393_v61 = vshrl.u32 %v2014_v31, 16  ;;  %v6894_v28 = vld [vmem:[#allocation2 + $0x9c] sm:$0xff] }
 0x2a5   : > { %10103 = vst [vmem:[#allocation102_spill] sm:$0xff] %v9170_v54  ;;  %v9173_v32 = vpop.f32.mrf.mxu1  ;;  %4782 = vmatmul.bf16.gmra.mxu3 %v9168_v51  ;;  %v2396_v63 = vshll.u32 %v2014_v31, 16  ;;  %v2402_v53 = vshll.u32 %v2015_v48, 16  ;;  %v2406_v3 = vshrl.u32 %v2015_v48, 16  ;;  %v3117_v26 = vunpack.c.l.b16 %v2391_v44  ;;  %v2031_v31 = vld [vmem:[#allocation2 + $0xd4] sm:$0x1] }
 0x2a6   : > { %5161 = vmatpush.bf16.msrb.mxu0 %v6255_v46  ;;  %v2395_v59 = vrot.slane %v2393_v61, 4  ;;  %v9203_v50 = vpack.c.b16 %v3181_v49, %v3180_v22  ;;  %v2587_v0 = vrot.slane %v2015_v48, 5  ;;  %v2431_v54 = vld [vmem:[#allocation2 + $0xcc] sm:$0xe]  ;;  %v2412_v51 = vshll.u32 %v2031_v31, 16 }
 0x2a7   : > { %v4834_v45 = vpop.f32.mrf.mxu0  ;;  %v2398_v23 = vrot.slane %v2396_v63, 5  ;;  %v2408_v56 = vrot.slane %v2406_v3, 4  ;;  %v2590_v22 = vrot.slane %v2031_v31, 5  ;;  %v6683_v48 = vld [vmem:[#allocation2 + $0xcc] sm:$0xff]  ;;  %v6778_v49 = vld [vmem:[%s9853_s1 + $0x2f4] sm:$0xf] }
 0x2a8   : > { %v4743_v34 = vpop.f32.mrf.mxu3  ;;  %4698 = vmatmul.bf16.gmra.mxu2 %v6682_v60  ;;  %v3116_v60 = vunpack.c.l.b16 %v2381_v6  ;;  %v2589_v3 = vrot.slane %v2587_v0, 4 }
 0x2a9   : > { %v4744_v62 = vadd.f32 %v4743_v34, %v4655_v33  ;;  %v2404_v34 = vrot.slane %v2402_v53, 5  ;;  %v2399_v6 = vor.u32 %v2398_v23, %v2395_v59  ;;  %v5863_v53 = vrot.slane %v2431_v54, 9 }
 0x2ab   : > { %v9198_v35 = vadd.f32 %v4832_v36, %v4744_v62  ;;  %v4659_v33 = vpop.f32.mrf.mxu2  ;;  %v2409_v44 = vor.u32 %v2408_v56, %v2404_v34  ;;  %v2588_v56 = vsel %vm7682_vm14, %v5863_v53, %v2587_v0 }
 0x2ac   : > { %v4660_v46 = vadd.f32 %v4659_v33, %v8600_v52  ;;  %v2400_v33 = vrot.slane %v2399_v6, 4 }
 0x2ad   : > { %10104 = vst [vmem:[#allocation103_spill] sm:$0xff] %v9198_v35  ;;  %v9200_v40 = vpop.f32.mrf.mxu1  ;;  %v9205_v35 = vpack.c.b16 %v3117_v26, %v3116_v60  ;;  %v2410_v60 = vrot.slane %v2409_v44, 4  ;;  %v2414_v26 = vrot.slane %v2412_v51, 5  ;;  %v3182_v51 = vunpack.c.l.b16 %v2588_v56  ;;  %v6628_v56 = vld [vmem:[%s9853_s1 + $0x478] sm:$0xf0] }
 0x2ae   : > { %v2405_v31 = vsel %vm7198_vm11, %v2400_v33, %v2404_v34 }
 0x2af   : > { %v4837_v62 = vpop.f32.mrf.mxu0  ;;  %v3118_v0 = vunpack.c.l.b16 %v2405_v31 }
 0x2b0   : > { %4960 = vmatmul.bf16.gmra.mxu1 %v6894_v28  ;;  %v4745_v36 = vpop.f32.mrf.mxu3 }
 0x2b1   : > { %v4746_v1 = vadd.f32 %v4745_v36, %v4657_v37  ;;  %v2415_v36 = vsel %vm7198_vm11, %v2410_v60, %v2414_v26 }
 0x2b2   : > { %4876 = vmatmul.bf16.gmra.mxu0 %v9203_v50  ;;  %v3119_v53 = vunpack.c.l.b16 %v2415_v36  ;;  %v10105_v36 = vld [vmem:[#allocation4_spill] sm:$0xff] }
 0x2b3   : > { %v9207_v52 = vadd.f32 %v4834_v45, %v4746_v1  ;;  %v4661_v63 = vpop.f32.mrf.mxu2  ;;  %v6436_v45 = vld [vmem:[%s9853_s1 + $0x2f8] sm:$0xf0] }
 0x2b4   : > { %v4662_v37 = vadd.f32 %v4661_v63, %v8631_v12  ;;  %v6439_v59 = vor.u32 %v6778_v49, %v6436_v45  ;;  %v2591_v12 = vsel %vm7682_vm14, %v2589_v3, %v2590_v22  ;;  %v9241_v45 = vpack.c.b16 %v3119_v53, %v3118_v0  ;;  %v6896_v53 = vld [vmem:[#allocation2 + $0xb4] sm:$0xff] }
 0x2b5   : > { %v9210_v61 = vpop.f32.mrf.mxu1  ;;  %4787 = vmatmul.bf16.gmra.mxu3 %v9205_v35  ;;  %v3183_v6 = vunpack.c.l.b16 %v2591_v12 }
 0x2b6   : > { %5332 = vmatpush.bf16.msra.mxu2 %v6439_v59  ;;  %v6810_v59 = vld [vmem:[%s9853_s1 + $0x3f4] sm:$0xf] }
 0x2b7   : > { %v4839_v23 = vpop.f32.mrf.mxu0  ;;  %v9239_v3 = vpack.c.b16 %v3183_v6, %v3182_v51 }
 0x2b8   : > { %v4748_v54 = vpop.f32.mrf.mxu3  ;;  %4703 = vmatmul.bf16.gmra.mxu2 %v6683_v48 }
 0x2b9   : > { %v4749_v28 = vadd.f32 %v4748_v54, %v4660_v46  ;;  %v6794_v46 = vld [vmem:[%s9853_s1 + $0x374] sm:$0xf] }
 0x2ba   : > { %v6503_v34 = vor.u32 %v6794_v46, %v6500_v20  ;;  %v6826_v54 = vld [vmem:[%s9853_s1 + $0x474] sm:$0xf] }
 0x2bb   : > { %v9228_v1 = vadd.f32 %v4837_v62, %v4749_v28  ;;  %v4664_v63 = vpop.f32.mrf.mxu2  ;;  %v6895_v62 = vld [vmem:[#allocation2 + $0xa8] sm:$0xff]  ;;  %v6631_v12 = vor.u32 %v6826_v54, %v6628_v56  ;;  %v10107_v56 = vld [vmem:[#allocation6_spill] sm:$0xff] }
 0x2bc   : > { %v4665_v18 = vadd.f32 %v4664_v63, %v8644_v8  ;;  %5421 = vmatpush.bf16.msra.mxu3 %v6503_v34 }
 0x2bd   : > { %v9230_v44 = vpop.f32.mrf.mxu1  ;;  %5599 = vmatpush.bf16.msra.mxu1 %v6631_v12 }
 0x2bf   : > { %v4842_v48 = vpop.f32.mrf.mxu0 }
 0x2c0   : > { %4965 = vmatmul.bf16.gmra.mxu1 %v6895_v62  ;;  %v4750_v22 = vpop.f32.mrf.mxu3 }
 0x2c1   : > { %v4751_v49 = vadd.f32 %v4750_v22, %v4662_v37  ;;  %v6564_v37 = vld [vmem:[%s9853_s1 + $0x3f8] sm:$0xf0]  ;;  %v6897_v22 = vld [vmem:[#allocation2 + $0xc] sm:$0xff] }
 0x2c2   : > { %4881 = vmatmul.bf16.gmra.mxu0 %v9239_v3 }
 0x2c3   : > { %v9243_v8 = vadd.f32 %v4839_v23, %v4751_v49  ;;  %v4666_v60 = vpop.f32.mrf.mxu2  ;;  %v6567_v23 = vor.u32 %v6810_v59, %v6564_v37  ;;  %v6428_v59 = vld [vmem:[%s9853_s1 + $0x2e8] sm:$0xf0] }
 0x2c4   : > { %v4667_v26 = vadd.f32 %v4666_v60, %v8666_v25  ;;  %v10106_v60 = vld [vmem:[#allocation19_spill] sm:$0xff] }
 0x2c5   : > { %v9246_v33 = vpop.f32.mrf.mxu1  ;;  %4792 = vmatmul.bf16.gmra.mxu3 %v9241_v45  ;;  %5510 = vmatpush.bf16.msra.mxu0 %v6567_v23 }
 0x2c7   : > { %v4844_v25 = vpop.f32.mrf.mxu0 }
 0x2c8   : > { %v4753_v28 = vpop.f32.mrf.mxu3  ;;  %4984 = vmatmul.bf16.vlgmr.msrb.gmra.mxu2 %v10105_v36  ;;  %v6492_v36 = vld [vmem:[%s9853_s1 + $0x368] sm:$0xf0] }
 0x2c9   : > { %v4754_v31 = vadd.f32 %v4753_v28, %v4665_v18 }
 0x2cb   : > { %v9263_v51 = vadd.f32 %v4842_v48, %v4754_v31  ;;  %v4669_v63 = vpop.f32.mrf.mxu2  ;;  %v6792_v31 = vld [vmem:[%s9853_s1 + $0x364] sm:$0xf] }
 0x2cc   : > { %v4670_v0 = vadd.f32 %v4669_v63, %v8686_v2  ;;  %v6776_v2 = vld [vmem:[%s9853_s1 + $0x2e4] sm:$0xf]  ;;  %v6495_v63 = vor.u32 %v6792_v31, %v6492_v36 }
 0x2cd   : > { %v9265_v6 = vpop.f32.mrf.mxu1  ;;  %v10110_v31 = vld [vmem:[#allocation8_spill] sm:$0xff] }
 0x2ce   : > { %5422 = vmatpush.bf16.msra.mxu3 %v6495_v63 }
 0x2cf   : > { %v4847_v20 = vpop.f32.mrf.mxu0 }
 0x2d0   : > { %4970 = vmatmul.bf16.gmra.mxu1 %v6896_v53  ;;  %v4755_v46 = vpop.f32.mrf.mxu3  ;;  %v10108_v53 = vld [vmem:[#allocation22_spill] sm:$0xff] }
 0x2d1   : > { %v4756_v34 = vadd.f32 %v4755_v46, %v4667_v26  ;;  %v6431_v26 = vor.u32 %v6776_v2, %v6428_v59  ;;  %v6808_v59 = vld [vmem:[%s9853_s1 + $0x3e4] sm:$0xf] }
 0x2d2   : > { %5162 = vmatmul.bf16.vlgmr.msrb.gmra.mxu0 %v6897_v22  ;;  %v6898_v22 = vld [vmem:[#allocation2 + $0x18] sm:$0xff] }
 0x2d3   : > { %v9268_v62 = vadd.f32 %v4844_v25, %v4756_v34  ;;  %v4671_v49 = vpop.f32.mrf.mxu2  ;;  %5333 = vmatpush.bf16.msra.mxu2 %v6431_v26  ;;  %v6556_v26 = vld [vmem:[%s9853_s1 + $0x3e8] sm:$0xf0] }
 0x2d4   : > { %v4672_v48 = vadd.f32 %v4671_v49, %v8717_v29 }
 0x2d5   : > { %v9270_v18 = vpop.f32.mrf.mxu1  ;;  %5073 = vmatmul.bf16.vlgmr.msrb.gmra.mxu3 %v10106_v60  ;;  %v10109_v60 = vld [vmem:[#allocation24_spill] sm:$0xff] }
 0x2d7   : > { %v4849_v54 = vpop.f32.mrf.mxu0 }
 0x2d8   : > { %v4758_v37 = vpop.f32.mrf.mxu3  ;;  %4989 = vmatmul.bf16.gmra.mxu2 %v10107_v56 }
 0x2d9   : > { %v4759_v23 = vadd.f32 %v4758_v37, %v4670_v0  ;;  %v6559_v37 = vor.u32 %v6808_v59, %v6556_v26  ;;  %v6899_v26 = vld [vmem:[#allocation2 + $0x24] sm:$0xff] }
 0x2db   : > { %v9281_v12 = vadd.f32 %v4847_v20, %v4759_v23  ;;  %v4674_v29 = vpop.f32.mrf.mxu2  ;;  %5511 = vmatpush.bf16.msra.mxu0 %v6559_v37  ;;  %v10114_v37 = vld [vmem:[#allocation31_spill] sm:$0xff] }
 0x2dc   : > { %v4675_v25 = vadd.f32 %v4674_v29, %v8727_v15 }
 0x2dd   : > { %v9283_v28 = vpop.f32.mrf.mxu1 }
 0x2df   : > { %v4852_v46 = vpop.f32.mrf.mxu0 }
 0x2e0   : > { %5251 = vmatmul.bf16.vlgmr.msrb.gmra.mxu1 %v10108_v53  ;;  %v4760_v0 = vpop.f32.mrf.mxu3 }
 0x2e1   : > { %v4761_v20 = vadd.f32 %v4760_v0, %v4672_v48  ;;  %v6824_v48 = vld [vmem:[%s9853_s1 + $0x464] sm:$0xf] }
 0x2e2   : > { %5167 = vmatmul.bf16.gmra.mxu0 %v6898_v22 }
 0x2e3   : > { %v9293_v34 = vadd.f32 %v4849_v54, %v4761_v20  ;;  %v4676_v49 = vpop.f32.mrf.mxu2  ;;  %v6620_v54 = vld [vmem:[%s9853_s1 + $0x468] sm:$0xf0]  ;;  %v10112_v20 = vld [vmem:[#allocation28_spill] sm:$0xff] }
 0x2e4   : > { %v4677_v2 = vadd.f32 %v4676_v49, %v8746_v5  ;;  %v6623_v23 = vor.u32 %v6824_v48, %v6620_v54  ;;  %v6420_v54 = vld [vmem:[%s9853_s1 + $0x2d8] sm:$0xf0] }
 0x2e5   : > { %v9295_v15 = vpop.f32.mrf.mxu1  ;;  %5078 = vmatmul.bf16.gmra.mxu3 %v10109_v60 }
 0x2e6   : > { %5600 = vmatpush.bf16.msra.mxu1 %v6623_v23 }
 0x2e7   : > { %v4854_v5 = vpop.f32.mrf.mxu0 }
 0x2e8   : > { %v4763_v56 = vpop.f32.mrf.mxu3  ;;  %4994 = vmatmul.bf16.gmra.mxu2 %v10110_v31 }
 0x2e9   : > { %v4764_v29 = vadd.f32 %v4763_v56, %v4675_v25 }
 0x2eb   : > { %v9312_v36 = vadd.f32 %v4852_v46, %v4764_v29  ;;  %v4679_v53 = vpop.f32.mrf.mxu2  ;;  %v10115_v29 = vld [vmem:[#allocation10_spill] sm:$0xff] }
 0x2ec   : > { %v4680_v0 = vadd.f32 %v4679_v53, %v8768_v38  ;;  %v6774_v38 = vld [vmem:[%s9853_s1 + $0x2d4] sm:$0xf] }
 0x2ed   : > { %10111 = vst [vmem:[#allocation4_spill] sm:$0xff] %v9312_v36  ;;  %v9314_v63 = vpop.f32.mrf.mxu1  ;;  %v10149_v36 = vld [vmem:[#allocation67_spill] sm:$0xff] }
 0x2ef   : > { %v4857_v49 = vpop.f32.mrf.mxu0 }
 0x2f0   : > { %5256 = vmatmul.bf16.gmra.mxu1 %v10112_v20  ;;  %v4765_v22 = vpop.f32.mrf.mxu3 }
 0x2f1   : > { %v4766_v60 = vadd.f32 %v4765_v22, %v4677_v2  ;;  %v6423_v2 = vor.u32 %v6774_v38, %v6420_v54  ;;  %v6790_v22 = vld [vmem:[%s9853_s1 + $0x354] sm:$0xf] }
 0x2f2   : > { %5172 = vmatmul.bf16.gmra.mxu0 %v6899_v26  ;;  %v6900_v54 = vld [vmem:[#allocation2 + $0x30] sm:$0xff] }
 0x2f3   : > { %v9318_v59 = vadd.f32 %v4854_v5, %v4766_v60  ;;  %v4681_v48 = vpop.f32.mrf.mxu2  ;;  %5334 = vmatpush.bf16.msra.mxu2 %v6423_v2  ;;  %v6484_v60 = vld [vmem:[%s9853_s1 + $0x358] sm:$0xf0] }
 0x2f4   : > { %v4682_v46 = vadd.f32 %v4681_v48, %v8796_v10  ;;  %v6487_v26 = vor.u32 %v6790_v22, %v6484_v60  ;;  %v10117_v48 = vld [vmem:[#allocation34_spill] sm:$0xff]  ;;  %v6612_v22 = vld [vmem:[%s9853_s1 + $0x458] sm:$0xf0] }
 0x2f5   : > { %10113 = vst [vmem:[#allocation19_spill] sm:$0xff] %v9318_v59  ;;  %v9320_v25 = vpop.f32.mrf.mxu1  ;;  %5083 = vmatmul.bf16.gmra.mxu3 %v10114_v37 }
 0x2f6   : > { %5423 = vmatpush.bf16.msra.mxu3 %v6487_v26 }
 0x2f7   : > { %v4859_v56 = vpop.f32.mrf.mxu0 }
 0x2f8   : > { %v4768_v23 = vpop.f32.mrf.mxu3  ;;  %4999 = vmatmul.bf16.gmra.mxu2 %v10115_v29  ;;  %v6806_v29 = vld [vmem:[%s9853_s1 + $0x3d4] sm:$0xf] }
 0x2f9   : > { %v4769_v5 = vadd.f32 %v4768_v23, %v4680_v0  ;;  %v10119_v23 = vld [vmem:[#allocation35_spill] sm:$0xff] }
 0x2fb   : > { %v9331_v31 = vadd.f32 %v4857_v49, %v4769_v5  ;;  %v4684_v10 = vpop.f32.mrf.mxu2 }
 0x2fc   : > { %v4685_v20 = vadd.f32 %v4684_v10, %v8809_v55  ;;  %v6548_v10 = vld [vmem:[%s9853_s1 + $0x3d8] sm:$0xf0] }
 0x2fd   : > { %10116 = vst [vmem:[#allocation6_spill] sm:$0xff] %v9331_v31  ;;  %v9333_v53 = vpop.f32.mrf.mxu1 }
 0x2ff   : > { %v4862_v37 = vpop.f32.mrf.mxu0 }
 0x300   : > { %5261 = vmatmul.bf16.gmra.mxu1 %v10117_v48  ;;  %v4770_v0 = vpop.f32.mrf.mxu3 }
 0x301   : > { %v4771_v49 = vadd.f32 %v4770_v0, %v4682_v46  ;;  %v6822_v46 = vld [vmem:[%s9853_s1 + $0x454] sm:$0xf]  ;;  %v10120_v0 = vld [vmem:[#allocation12_spill] sm:$0xff] }
 0x302   : > { %5177 = vmatmul.bf16.gmra.mxu0 %v6900_v54  ;;  %v6615_v60 = vor.u32 %v6822_v46, %v6612_v22  ;;  %v6901_v22 = vld [vmem:[#allocation2 + $0x3c] sm:$0xff] }
 0x303   : > { %v9343_v38 = vadd.f32 %v4859_v56, %v4771_v49  ;;  %v4686_v2 = vpop.f32.mrf.mxu2  ;;  %v6551_v56 = vor.u32 %v6806_v29, %v6548_v10  ;;  %v10122_v29 = vld [vmem:[#allocation39_spill] sm:$0xff] }
 0x304   : > { %v4687_v5 = vadd.f32 %v4686_v2, %v8829_v58  ;;  %5601 = vmatpush.bf16.msra.mxu1 %v6615_v60  ;;  %v10124_v60 = vld [vmem:[#allocation41_spill] sm:$0xff] }
 0x305   : > { %10118 = vst [vmem:[#allocation22_spill] sm:$0xff] %v9343_v38  ;;  %v9345_v55 = vpop.f32.mrf.mxu1  ;;  %5088 = vmatmul.bf16.gmra.mxu3 %v10119_v23  ;;  %5512 = vmatpush.bf16.msra.mxu0 %v6551_v56 }
 0x307   : > { %v4864_v58 = vpop.f32.mrf.mxu0 }
 0x308   : > { %v4773_v26 = vpop.f32.mrf.mxu3  ;;  %5004 = vmatmul.bf16.gmra.mxu2 %v10120_v0  ;;  %v10125_v0 = vld [vmem:[#allocation14_spill] sm:$0xff] }
 0x309   : > { %v4774_v48 = vadd.f32 %v4773_v26, %v4685_v20  ;;  %v6412_v26 = vld [vmem:[%s9853_s1 + $0x2c8] sm:$0xf0] }
 0x30b   : > { %v9362_v49 = vadd.f32 %v4862_v37, %v4774_v48  ;;  %v4689_v2 = vpop.f32.mrf.mxu2 }
 0x30c   : > { %v4690_v23 = vadd.f32 %v4689_v2, %v8848_v11  ;;  %v6772_v11 = vld [vmem:[%s9853_s1 + $0x2c4] sm:$0xf] }
 0x30d   : > { %10121 = vst [vmem:[#allocation24_spill] sm:$0xff] %v9362_v49  ;;  %v9364_v54 = vpop.f32.mrf.mxu1 }
 0x30f   : > { %v4867_v38 = vpop.f32.mrf.mxu0 }
 0x310   : > { %5266 = vmatmul.bf16.gmra.mxu1 %v10122_v29  ;;  %v4775_v10 = vpop.f32.mrf.mxu3 }
 0x311   : > { %v4776_v31 = vadd.f32 %v4775_v10, %v4687_v5  ;;  %v6415_v5 = vor.u32 %v6772_v11, %v6412_v26  ;;  %v10127_v11 = vld [vmem:[#allocation44_spill] sm:$0xff] }
 0x312   : > { %5182 = vmatmul.bf16.gmra.mxu0 %v6901_v22  ;;  %v6788_v22 = vld [vmem:[%s9853_s1 + $0x344] sm:$0xf] }
 0x313   : > { %v9368_v46 = vadd.f32 %v4864_v58, %v4776_v31  ;;  %v4691_v56 = vpop.f32.mrf.mxu2  ;;  %5335 = vmatpush.bf16.msra.mxu2 %v6415_v5 }
 0x314   : > { %v4692_v37 = vadd.f32 %v4691_v56, %v8870_v21  ;;  %v6476_v56 = vld [vmem:[%s9853_s1 + $0x348] sm:$0xf0] }
 0x315   : > { %10123 = vst [vmem:[#allocation8_spill] sm:$0xff] %v9368_v46  ;;  %v9370_v20 = vpop.f32.mrf.mxu1  ;;  %5093 = vmatmul.bf16.gmra.mxu3 %v10124_v60  ;;  %v6479_v60 = vor.u32 %v6788_v22, %v6476_v56  ;;  %v6804_v22 = vld [vmem:[%s9853_s1 + $0x3c4] sm:$0xf]  ;;  %v6540_v56 = vld [vmem:[%s9853_s1 + $0x3c8] sm:$0xf0] }
 0x317   : > { %v4869_v58 = vpop.f32.mrf.mxu0  ;;  %5424 = vmatpush.bf16.msra.mxu3 %v6479_v60  ;;  %v6604_v60 = vld [vmem:[%s9853_s1 + $0x448] sm:$0xf0] }
 0x318   : > { %v4778_v31 = vpop.f32.mrf.mxu3  ;;  %5009 = vmatmul.bf16.gmra.mxu2 %v10125_v0  ;;  %v10129_v0 = vld [vmem:[#allocation46_spill] sm:$0xff] }
 0x319   : > { %v4779_v48 = vadd.f32 %v4778_v31, %v4690_v23  ;;  %v6902_v31 = vld [vmem:[#allocation2 + $0x48] sm:$0xff] }
 0x31b   : > { %v9381_v2 = vadd.f32 %v4867_v38, %v4779_v48  ;;  %v4694_v21 = vpop.f32.mrf.mxu2 }
 0x31c   : > { %v4695_v10 = vadd.f32 %v4694_v21, %v8881_v27 }
 0x31d   : > { %10126 = vst [vmem:[#allocation28_spill] sm:$0xff] %v9381_v2  ;;  %v9383_v29 = vpop.f32.mrf.mxu1 }
 0x31f   : > { %v4872_v26 = vpop.f32.mrf.mxu0 }
 0x320   : > { %5271 = vmatmul.bf16.gmra.mxu1 %v10127_v11  ;;  %v4780_v23 = vpop.f32.mrf.mxu3 }
 0x321   : > { %v4781_v38 = vadd.f32 %v4780_v23, %v4692_v37  ;;  %v6820_v37 = vld [vmem:[%s9853_s1 + $0x444] sm:$0xf] }
 0x322   : > { %5187 = vmatmul.bf16.gmra.mxu0 %v6902_v31  ;;  %v6607_v11 = vor.u32 %v6820_v37, %v6604_v60  ;;  %v10130_v31 = vld [vmem:[#allocation16_spill] sm:$0xff]  ;;  %v6903_v60 = vld [vmem:[#allocation2 + $0x54] sm:$0xff] }
 0x323   : > { %v9393_v5 = vadd.f32 %v4869_v58, %v4781_v38  ;;  %v4696_v48 = vpop.f32.mrf.mxu2  ;;  %v6543_v58 = vor.u32 %v6804_v22, %v6540_v56  ;;  %v10132_v22 = vld [vmem:[#allocation49_spill] sm:$0xff] }
 0x324   : > { %v4697_v21 = vadd.f32 %v4696_v48, %v8900_v4  ;;  %5602 = vmatpush.bf16.msra.mxu1 %v6607_v11  ;;  %v10134_v11 = vld [vmem:[#allocation51_spill] sm:$0xff] }
 0x325   : > { %10128 = vst [vmem:[#allocation31_spill] sm:$0xff] %v9393_v5  ;;  %v9395_v27 = vpop.f32.mrf.mxu1  ;;  %5098 = vmatmul.bf16.gmra.mxu3 %v10129_v0  ;;  %5513 = vmatpush.bf16.msra.mxu0 %v6543_v58 }
 0x327   : > { %v4874_v4 = vpop.f32.mrf.mxu0 }
 0x328   : > { %v4783_v23 = vpop.f32.mrf.mxu3  ;;  %5014 = vmatmul.bf16.gmra.mxu2 %v10130_v31 }
 0x329   : > { %v4784_v38 = vadd.f32 %v4783_v23, %v4695_v10 }
 0x32b   : > { %v9412_v48 = vadd.f32 %v4872_v26, %v4784_v38  ;;  %v4699_v5 = vpop.f32.mrf.mxu2  ;;  %v10135_v38 = vld [vmem:[#allocation21_spill] sm:$0xff] }
 0x32c   : > { %v4700_v2 = vadd.f32 %v4699_v5, %v8917_v39  ;;  %v6770_v39 = vld [vmem:[%s9853_s1 + $0x2b4] sm:$0xf]  ;;  %v6404_v5 = vld [vmem:[%s9853_s1 + $0x2b8] sm:$0xf0] }
 0x32d   : > { %10131 = vst [vmem:[#allocation10_spill] sm:$0xff] %v9412_v48  ;;  %v9414_v0 = vpop.f32.mrf.mxu1  ;;  %v6784_v48 = vld [vmem:[%s9853_s1 + $0x324] sm:$0xf] }
 0x32f   : > { %v4877_v46 = vpop.f32.mrf.mxu0 }
 0x330   : > { %5276 = vmatmul.bf16.gmra.mxu1 %v10132_v22  ;;  %v4785_v56 = vpop.f32.mrf.mxu3 }
 0x331   : > { %v4786_v49 = vadd.f32 %v4785_v56, %v4697_v21  ;;  %v6407_v21 = vor.u32 %v6770_v39, %v6404_v5  ;;  %v6786_v56 = vld [vmem:[%s9853_s1 + $0x334] sm:$0xf] }
 0x332   : > { %5192 = vmatmul.bf16.gmra.mxu0 %v6903_v60  ;;  %v6468_v60 = vld [vmem:[%s9853_s1 + $0x338] sm:$0xf0]  ;;  %v10137_v39 = vld [vmem:[#allocation54_spill] sm:$0xff] }
 0x333   : > { %v9418_v37 = vadd.f32 %v4874_v4, %v4786_v49  ;;  %v4701_v58 = vpop.f32.mrf.mxu2  ;;  %5336 = vmatpush.bf16.msra.mxu2 %v6407_v21 }
 0x334   : > { %v4702_v26 = vadd.f32 %v4701_v58, %v8936_v42 }
 0x335   : > { %10133 = vst [vmem:[#allocation34_spill] sm:$0xff] %v9418_v37  ;;  %v9420_v10 = vpop.f32.mrf.mxu1  ;;  %5103 = vmatmul.bf16.gmra.mxu3 %v10134_v11  ;;  %v6471_v11 = vor.u32 %v6786_v56, %v6468_v60  ;;  %v6596_v60 = vld [vmem:[%s9853_s1 + $0x438] sm:$0xf0] }
 0x337   : > { %v4879_v23 = vpop.f32.mrf.mxu0  ;;  %5425 = vmatpush.bf16.msra.mxu3 %v6471_v11 }
 0x338   : > { %v4788_v49 = vpop.f32.mrf.mxu3  ;;  %5019 = vmatmul.bf16.gmra.mxu2 %v10135_v38 }
 0x339   : > { %v4789_v4 = vadd.f32 %v4788_v49, %v4700_v2  ;;  %v6904_v49 = vld [vmem:[#allocation2 + $0x60] sm:$0xff] }
 0x33b   : > { %v9431_v31 = vadd.f32 %v4877_v46, %v4789_v4  ;;  %v4704_v42 = vpop.f32.mrf.mxu2 }
 0x33c   : > { %v4705_v58 = vadd.f32 %v4704_v42, %v8954_v41  ;;  %v6532_v41 = vld [vmem:[%s9853_s1 + $0x3b8] sm:$0xf0]  ;;  %v6818_v42 = vld [vmem:[%s9853_s1 + $0x434] sm:$0xf] }
 0x33d   : > { %10136 = vst [vmem:[#allocation35_spill] sm:$0xff] %v9431_v31  ;;  %v9433_v22 = vpop.f32.mrf.mxu1  ;;  %v6802_v31 = vld [vmem:[%s9853_s1 + $0x3b4] sm:$0xf]  ;;  %v6599_v11 = vor.u32 %v6818_v42, %v6596_v60  ;;  %v10142_v60 = vld [vmem:[#allocation59_spill] sm:$0xff] }
 0x33e   : > { %v6535_v56 = vor.u32 %v6802_v31, %v6532_v41 }
 0x33f   : > { %v4882_v46 = vpop.f32.mrf.mxu0  ;;  %5603 = vmatpush.bf16.msra.mxu1 %v6599_v11 }
 0x340   : > { %5281 = vmatmul.bf16.gmra.mxu1 %v10137_v39  ;;  %v4790_v2 = vpop.f32.mrf.mxu3  ;;  %v6905_v39 = vld [vmem:[%s9854_s2] sm:$0x3]  ;;  %5514 = vmatpush.bf16.msra.mxu0 %v6535_v56 }
 0x341   : > { %v4791_v5 = vadd.f32 %v4790_v2, %v4702_v26  ;;  %v10139_v26 = vld [vmem:[#allocation55_spill] sm:$0xff]  ;;  %v9464_v2 = vperm.slane %v6905_v39, 1 }
 0x342   : > { %5197 = vmatmul.bf16.gmra.mxu0 %v6904_v49 }
 0x343   : > { %v9443_v21 = vadd.f32 %v4879_v23, %v4791_v5  ;;  %v4706_v38 = vpop.f32.mrf.mxu2  ;;  %v4899_v11 = vadd.f32 %v9006_v17, %v9464_v2 }
 0x344   : > { %v4707_v23 = vadd.f32 %v4706_v38, %v8972_v57  ;;  %v4897_v57 = vadd.f32 %v8988_v24, %v9464_v2 }
 0x345   : > { %10138 = vst [vmem:[#allocation12_spill] sm:$0xff] %v9443_v21  ;;  %v9445_v4 = vpop.f32.mrf.mxu1  ;;  %5108 = vmatmul.bf16.gmra.mxu3 %v10139_v26  ;;  %v10140_v26 = vld [vmem:[#allocation3_spill] sm:$0xff] }
 0x347   : > { %v4884_v49 = vpop.f32.mrf.mxu0 }
 0x348   : > { %v4793_v5 = vpop.f32.mrf.mxu3  ;;  %5024 = vmatmul.bf16.gmra.mxu2 %v10140_v26 }
 0x349   : > { %v4794_v21 = vadd.f32 %v4793_v5, %v4705_v58  ;;  %v6906_v5 = vld [vmem:[#allocation2 + $0x6c] sm:$0xff] }
 0x34b   : > { %v9469_v31 = vadd.f32 %v4882_v46, %v4794_v21  ;;  %v4985_v41 = vpop.f32.mrf.mxu2  ;;  %v6768_v46 = vld [vmem:[%s9853_s1 + $0x2a4] sm:$0xf]  ;;  %v6396_v21 = vld [vmem:[%s9853_s1 + $0x2a8] sm:$0xf0] }
 0x34c   : > { %v4986_v42 = vadd.f32 %v4985_v41, %v4897_v57  ;;  %v10144_v57 = vld [vmem:[#allocation60_spill] sm:$0xff]  ;;  %v6399_v41 = vor.u32 %v6768_v46, %v6396_v21 }
 0x34d   : > { %10141 = vst [vmem:[#allocation39_spill] sm:$0xff] %v9469_v31  ;;  %v9471_v38 = vpop.f32.mrf.mxu1 }
 0x34e   : > { %5337 = vmatpush.bf16.msra.mxu2 %v6399_v41  ;;  %v4904_v41 = vadd.f32 %v9043_v9, %v9464_v2 }
 0x34f   : > { %v5163_v37 = vpop.f32.mrf.mxu0 }
 0x350   : > { %5286 = vmatmul.bf16.gmra.mxu1 %v10142_v60  ;;  %v4795_v39 = vpop.f32.mrf.mxu3 }
 0x351   : > { %v4796_v56 = vadd.f32 %v4795_v39, %v4707_v23  ;;  %v10145_v39 = vld [vmem:[#allocation5_spill] sm:$0xff] }
 0x352   : > { %5202 = vmatmul.bf16.gmra.mxu0 %v6906_v5 }
 0x353   : > { %v9476_v58 = vadd.f32 %v4884_v49, %v4796_v56  ;;  %v4987_v24 = vpop.f32.mrf.mxu2  ;;  %v4902_v56 = vadd.f32 %v9033_v7, %v9464_v2 }
 0x354   : > { %v4988_v23 = vadd.f32 %v4987_v24, %v4899_v11  ;;  %v6460_v11 = vld [vmem:[%s9853_s1 + $0x328] sm:$0xf0] }
 0x355   : > { %10143 = vst [vmem:[#allocation41_spill] sm:$0xff] %v9476_v58  ;;  %v9478_v26 = vpop.f32.mrf.mxu1  ;;  %5113 = vmatmul.bf16.gmra.mxu3 %v10144_v57  ;;  %v6463_v46 = vor.u32 %v6784_v48, %v6460_v11  ;;  %v6800_v48 = vld [vmem:[%s9853_s1 + $0x3a4] sm:$0xf] }
 0x357   : > { %v5165_v49 = vpop.f32.mrf.mxu0  ;;  %5426 = vmatpush.bf16.msra.mxu3 %v6463_v46 }
 0x358   : > { %v5074_v17 = vpop.f32.mrf.mxu3  ;;  %5029 = vmatmul.bf16.gmra.mxu2 %v10145_v39 }
 0x359   : > { %v5075_v60 = vadd.f32 %v5074_v17, %v4986_v42  ;;  %v10146_v42 = vld [vmem:[#allocation63_spill] sm:$0xff] }
 0x35b   : > { %v5164_v5 = vadd.f32 %v5163_v37, %v5075_v60  ;;  %v4990_v31 = vpop.f32.mrf.mxu2  ;;  %v6907_v60 = vld [vmem:[#allocation2 + $0x78] sm:$0xff] }
 0x35c   : > { %v4991_v24 = vadd.f32 %v4990_v31, %v4902_v56  ;;  %v6524_v31 = vld [vmem:[%s9853_s1 + $0x3a8] sm:$0xf0] }
 0x35d   : > { %v5252_v58 = vpop.f32.mrf.mxu1  ;;  %v6588_v56 = vld [vmem:[%s9853_s1 + $0x428] sm:$0xf0] }
 0x35e   : > { %v9496_v21 = vadd.f32 %v5252_v58, %v5164_v5  ;;  %v6816_v58 = vld [vmem:[%s9853_s1 + $0x424] sm:$0xf] }
 0x35f   : > { %v5168_v7 = vpop.f32.mrf.mxu0  ;;  %v6591_v11 = vor.u32 %v6816_v58, %v6588_v56  ;;  %v6908_v56 = vld [vmem:[#allocation2 + $0x84] sm:$0xff] }
 0x360   : > { %5291 = vmatmul.bf16.gmra.mxu1 %v10146_v42  ;;  %v5076_v57 = vpop.f32.mrf.mxu3 }
 0x361   : > { %v5077_v37 = vadd.f32 %v5076_v57, %v4988_v23  ;;  %v10147_v23 = vld [vmem:[#allocation65_spill] sm:$0xff]  ;;  %5604 = vmatpush.bf16.msra.mxu1 %v6591_v11 }
 0x362   : > { %5207 = vmatmul.bf16.gmra.mxu0 %v6907_v60  ;;  %v4907_v60 = vadd.f32 %v9067_v30, %v9464_v2  ;;  %v6766_v30 = vld [vmem:[%s9853_s1 + $0x294] sm:$0xf] }
 0x363   : > { %v5166_v17 = vadd.f32 %v5165_v49, %v5077_v37  ;;  %v4992_v59 = vpop.f32.mrf.mxu2  ;;  %v6527_v49 = vor.u32 %v6800_v48, %v6524_v31  ;;  %v10148_v37 = vld [vmem:[#allocation7_spill] sm:$0xff] }
 0x364   : > { %v4993_v9 = vadd.f32 %v4992_v59, %v4904_v41 }
 0x365   : > { %v5254_v39 = vpop.f32.mrf.mxu1  ;;  %5118 = vmatmul.bf16.gmra.mxu3 %v10147_v23  ;;  %5515 = vmatpush.bf16.msra.mxu0 %v6527_v49  ;;  %v4909_v49 = vadd.f32 %v9084_v16, %v9464_v2 }
 0x366   : > { %v9514_v5 = vadd.f32 %v5254_v39, %v5166_v17 }
 0x367   : > { %v5170_v42 = vpop.f32.mrf.mxu0 }
 0x368   : > { %v5079_v46 = vpop.f32.mrf.mxu3  ;;  %5034 = vmatmul.bf16.gmra.mxu2 %v10148_v37 }
 0x369   : > { %v5080_v57 = vadd.f32 %v5079_v46, %v4991_v24 }
 0x36b   : > { %v5169_v23 = vadd.f32 %v5168_v7, %v5080_v57  ;;  %v4995_v41 = vpop.f32.mrf.mxu2  ;;  %v6388_v7 = vld [vmem:[%s9853_s1 + $0x298] sm:$0xf0] }
 0x36c   : > { %v4996_v48 = vadd.f32 %v4995_v41, %v4907_v60 }
 0x36d   : > { %v5257_v59 = vpop.f32.mrf.mxu1 }
 0x36e   : > { %v9519_v31 = vadd.f32 %v5257_v59, %v5169_v23  ;;  %v10151_v23 = vld [vmem:[#allocation9_spill] sm:$0xff]  ;;  %v4912_v59 = vadd.f32 %v9114_v13, %v9464_v2 }
 0x36f   : > { %v5173_v39 = vpop.f32.mrf.mxu0 }
 0x370   : > { %5296 = vmatmul.bf16.gmra.mxu1 %v10149_v36  ;;  %v5081_v17 = vpop.f32.mrf.mxu3  ;;  %v10150_v36 = vld [vmem:[#allocation68_spill] sm:$0xff] }
 0x371   : > { %v5082_v58 = vadd.f32 %v5081_v17, %v4993_v9  ;;  %v6391_v9 = vor.u32 %v6766_v30, %v6388_v7  ;;  %v4914_v7 = vadd.f32 %v9125_v19, %v9464_v2 }
 0x372   : > { %5212 = vmatmul.bf16.gmra.mxu0 %v6908_v56  ;;  %v6782_v56 = vld [vmem:[%s9853_s1 + $0x314] sm:$0xf] }
 0x373   : > { %v5171_v24 = vadd.f32 %v5170_v42, %v5082_v58  ;;  %v4997_v46 = vpop.f32.mrf.mxu2  ;;  %5338 = vmatpush.bf16.msra.mxu2 %v6391_v9  ;;  %v6909_v9 = vld [vmem:[#allocation2 + $0x90] sm:$0xff] }
 0x374   : > { %v4998_v57 = vadd.f32 %v4997_v46, %v4909_v49  ;;  %v6452_v49 = vld [vmem:[%s9853_s1 + $0x318] sm:$0xf0] }
 0x375   : > { %v5259_v11 = vpop.f32.mrf.mxu1  ;;  %5123 = vmatmul.bf16.gmra.mxu3 %v10150_v36 }
 0x376   : > { %v9531_v37 = vadd.f32 %v5259_v11, %v5171_v24  ;;  %v6455_v11 = vor.u32 %v6782_v56, %v6452_v49 }
 0x377   : > { %v5175_v42 = vpop.f32.mrf.mxu0 }
 0x378   : > { %v5084_v16 = vpop.f32.mrf.mxu3  ;;  %5039 = vmatmul.bf16.gmra.mxu2 %v10151_v23  ;;  %5427 = vmatpush.bf16.msra.mxu3 %v6455_v11  ;;  %v6798_v23 = vld [vmem:[%s9853_s1 + $0x394] sm:$0xf] }
 0x379   : > { %v5085_v60 = vadd.f32 %v5084_v16, %v4996_v48  ;;  %v10152_v48 = vld [vmem:[#allocation70_spill] sm:$0xff] }
 0x37b   : > { %v5174_v41 = vadd.f32 %v5173_v39, %v5085_v60  ;;  %v5000_v58 = vpop.f32.mrf.mxu2 }
 0x37c   : > { %v5001_v24 = vadd.f32 %v5000_v58, %v4912_v59  ;;  %v6516_v59 = vld [vmem:[%s9853_s1 + $0x398] sm:$0xf0] }
 0x37d   : > { %v5262_v17 = vpop.f32.mrf.mxu1 }
 0x37e   : > { %v9542_v46 = vadd.f32 %v5262_v17, %v5174_v41  ;;  %v10153_v41 = vld [vmem:[#allocation71_spill] sm:$0xff] }
 0x37f   : > { %v5178_v13 = vpop.f32.mrf.mxu0  ;;  %v6580_v17 = vld [vmem:[%s9853_s1 + $0x418] sm:$0xf0] }
 0x380   : > { %5301 = vmatmul.bf16.gmra.mxu1 %v10152_v48  ;;  %v5086_v30 = vpop.f32.mrf.mxu3 }
 0x381   : > { %v5087_v39 = vadd.f32 %v5086_v30, %v4998_v57  ;;  %v6814_v57 = vld [vmem:[%s9853_s1 + $0x414] sm:$0xf]  ;;  %v10154_v30 = vld [vmem:[#allocation11_spill] sm:$0xff] }
 0x382   : > { %5217 = vmatmul.bf16.gmra.mxu0 %v6909_v9  ;;  %v6583_v56 = vor.u32 %v6814_v57, %v6580_v17  ;;  %v6910_v17 = vld [vmem:[#allocation2 + $0x9c] sm:$0xff] }
 0x383   : > { %v5176_v36 = vadd.f32 %v5175_v42, %v5087_v39  ;;  %v5002_v60 = vpop.f32.mrf.mxu2  ;;  %v6519_v42 = vor.u32 %v6798_v23, %v6516_v59  ;;  %v4917_v39 = vadd.f32 %v9155_v47, %v9464_v2  ;;  %v6764_v47 = vld [vmem:[%s9853_s1 + $0x284] sm:$0xf] }
 0x384   : > { %v5003_v19 = vadd.f32 %v5002_v60, %v4914_v7  ;;  %5605 = vmatpush.bf16.msra.mxu1 %v6583_v56 }
 0x385   : > { %v5264_v16 = vpop.f32.mrf.mxu1  ;;  %5128 = vmatmul.bf16.gmra.mxu3 %v10153_v41  ;;  %5516 = vmatpush.bf16.msra.mxu0 %v6519_v42  ;;  %v10155_v41 = vld [vmem:[#allocation73_spill] sm:$0xff]  ;;  %v4919_v42 = vadd.f32 %v9173_v32, %v9464_v2 }
 0x386   : > { %v9560_v58 = vadd.f32 %v5264_v16, %v5176_v36 }
 0x387   : > { %v5180_v11 = vpop.f32.mrf.mxu0 }
 0x388   : > { %v5089_v49 = vpop.f32.mrf.mxu3  ;;  %5044 = vmatmul.bf16.gmra.mxu2 %v10154_v30 }
 0x389   : > { %v5090_v48 = vadd.f32 %v5089_v49, %v5001_v24 }
 0x38b   : > { %v5179_v9 = vadd.f32 %v5178_v13, %v5090_v48  ;;  %v5005_v60 = vpop.f32.mrf.mxu2  ;;  %v6380_v13 = vld [vmem:[%s9853_s1 + $0x288] sm:$0xf0]  ;;  %v10156_v48 = vld [vmem:[#allocation74_spill] sm:$0xff] }
 0x38c   : > { %v5006_v23 = vadd.f32 %v5005_v60, %v4917_v39  ;;  %v4922_v60 = vadd.f32 %v9200_v40, %v9464_v2 }
 0x38d   : > { %v5267_v7 = vpop.f32.mrf.mxu1 }
 0x38e   : > { %v9565_v59 = vadd.f32 %v5267_v7, %v5179_v9  ;;  %v10157_v7 = vld [vmem:[#allocation13_spill] sm:$0xff] }
 0x38f   : > { %v5183_v16 = vpop.f32.mrf.mxu0 }
 0x390   : > { %5306 = vmatmul.bf16.gmra.mxu1 %v10155_v41  ;;  %v5091_v36 = vpop.f32.mrf.mxu3 }
 0x391   : > { %v5092_v57 = vadd.f32 %v5091_v36, %v5003_v19  ;;  %v6383_v19 = vor.u32 %v6764_v47, %v6380_v13  ;;  %v4924_v13 = vadd.f32 %v9210_v61, %v9464_v2 }
 0x392   : > { %5222 = vmatmul.bf16.gmra.mxu0 %v6910_v17  ;;  %v6780_v17 = vld [vmem:[%s9853_s1 + $0x304] sm:$0xf] }
 0x393   : > { %v5181_v24 = vadd.f32 %v5180_v11, %v5092_v57  ;;  %v5007_v49 = vpop.f32.mrf.mxu2  ;;  %5339 = vmatpush.bf16.msra.mxu2 %v6383_v19  ;;  %v6911_v19 = vld [vmem:[#allocation2 + $0xa8] sm:$0xff] }
 0x394   : > { %v5008_v30 = vadd.f32 %v5007_v49, %v4919_v42  ;;  %v6444_v42 = vld [vmem:[%s9853_s1 + $0x308] sm:$0xf0] }
 0x395   : > { %v5269_v56 = vpop.f32.mrf.mxu1  ;;  %5133 = vmatmul.bf16.gmra.mxu3 %v10156_v48 }
 0x396   : > { %v9577_v39 = vadd.f32 %v5269_v56, %v5181_v24  ;;  %v6447_v56 = vor.u32 %v6780_v17, %v6444_v42 }
 0x397   : > { %v5185_v11 = vpop.f32.mrf.mxu0 }
 0x398   : > { %v5094_v32 = vpop.f32.mrf.mxu3  ;;  %5049 = vmatmul.bf16.gmra.mxu2 %v10157_v7  ;;  %5428 = vmatpush.bf16.msra.mxu3 %v6447_v56  ;;  %v6796_v7 = vld [vmem:[%s9853_s1 + $0x384] sm:$0xf] }
 0x399   : > { %v5095_v9 = vadd.f32 %v5094_v32, %v5006_v23  ;;  %v10158_v23 = vld [vmem:[#allocation76_spill] sm:$0xff] }
 0x39b   : > { %v5184_v41 = vadd.f32 %v5183_v16, %v5095_v9  ;;  %v5010_v57 = vpop.f32.mrf.mxu2 }
 0x39c   : > { %v5011_v24 = vadd.f32 %v5010_v57, %v4922_v60  ;;  %v6508_v60 = vld [vmem:[%s9853_s1 + $0x388] sm:$0xf0] }
 0x39d   : > { %v5272_v36 = vpop.f32.mrf.mxu1 }
 0x39e   : > { %v9588_v49 = vadd.f32 %v5272_v36, %v5184_v41  ;;  %v10159_v41 = vld [vmem:[#allocation77_spill] sm:$0xff] }
 0x39f   : > { %v5188_v40 = vpop.f32.mrf.mxu0  ;;  %v6572_v36 = vld [vmem:[%s9853_s1 + $0x408] sm:$0xf0] }
 0x3a0   : > { %5311 = vmatmul.bf16.gmra.mxu1 %v10158_v23  ;;  %v5096_v47 = vpop.f32.mrf.mxu3 }
 0x3a1   : > { %v5097_v16 = vadd.f32 %v5096_v47, %v5008_v30  ;;  %v6812_v30 = vld [vmem:[%s9853_s1 + $0x404] sm:$0xf]  ;;  %v10160_v47 = vld [vmem:[#allocation15_spill] sm:$0xff] }
 0x3a2   : > { %5227 = vmatmul.bf16.gmra.mxu0 %v6911_v19  ;;  %v6575_v17 = vor.u32 %v6812_v30, %v6572_v36  ;;  %v6912_v36 = vld [vmem:[#allocation2 + $0xb4] sm:$0xff] }
 0x3a3   : > { %v5186_v48 = vadd.f32 %v5185_v11, %v5097_v16  ;;  %v5012_v9 = vpop.f32.mrf.mxu2  ;;  %v6511_v11 = vor.u32 %v6796_v7, %v6508_v60  ;;  %v4927_v16 = vadd.f32 %v9230_v44, %v9464_v2  ;;  %v10162_v44 = vld [vmem:[#allocation80_spill] sm:$0xff] }
 0x3a4   : > { %v5013_v61 = vadd.f32 %v5012_v9, %v4924_v13  ;;  %5606 = vmatpush.bf16.msra.mxu1 %v6575_v17 }
 0x3a5   : > { %v5274_v32 = vpop.f32.mrf.mxu1  ;;  %5138 = vmatmul.bf16.gmra.mxu3 %v10159_v41  ;;  %5517 = vmatpush.bf16.msra.mxu0 %v6511_v11  ;;  %v10161_v41 = vld [vmem:[#allocation79_spill] sm:$0xff]  ;;  %v4929_v11 = vadd.f32 %v9246_v33, %v9464_v2 }
 0x3a6   : > { %v9606_v57 = vadd.f32 %v5274_v32, %v5186_v48 }
 0x3a7   : > { %v5190_v56 = vpop.f32.mrf.mxu0 }
 0x3a8   : > { %v5099_v42 = vpop.f32.mrf.mxu3  ;;  %5054 = vmatmul.bf16.gmra.mxu2 %v10160_v47 }
 0x3a9   : > { %v5100_v23 = vadd.f32 %v5099_v42, %v5011_v24 }
 0x3ab   : > { %v5189_v19 = vadd.f32 %v5188_v40, %v5100_v23  ;;  %v5015_v9 = vpop.f32.mrf.mxu2 }
 0x3ac   : > { %v5016_v7 = vadd.f32 %v5015_v9, %v4927_v16 }
 0x3ad   : > { %v5277_v13 = vpop.f32.mrf.mxu1 }
 0x3ae   : > { %v9611_v60 = vadd.f32 %v5277_v13, %v5189_v19  ;;  %v10163_v13 = vld [vmem:[#allocation18_spill] sm:$0xff] }
 0x3af   : > { %v5193_v32 = vpop.f32.mrf.mxu0 }
 0x3b0   : > { %5316 = vmatmul.bf16.gmra.mxu1 %v10161_v41  ;;  %v5101_v48 = vpop.f32.mrf.mxu3 }
 0x3b1   : > { %v5102_v30 = vadd.f32 %v5101_v48, %v5013_v61  ;;  %v4932_v61 = vadd.f32 %v9265_v6, %v9464_v2  ;;  %v10165_v6 = vld [vmem:[#allocation83_spill] sm:$0xff] }
 0x3b2   : > { %5232 = vmatmul.bf16.gmra.mxu0 %v6912_v36 }
 0x3b3   : > { %v5191_v24 = vadd.f32 %v5190_v56, %v5102_v30  ;;  %v5017_v42 = vpop.f32.mrf.mxu2  ;;  %v10164_v30 = vld [vmem:[#allocation82_spill] sm:$0xff] }
 0x3b4   : > { %v5018_v40 = vadd.f32 %v5017_v42, %v4929_v11  ;;  %v6913_v42 = vld [vmem:[#allocation2 + $0xc0] sm:$0xff] }
 0x3b5   : > { %v5279_v17 = vpop.f32.mrf.mxu1  ;;  %5143 = vmatmul.bf16.gmra.mxu3 %v10162_v44 }
 0x3b6   : > { %v9617_v23 = vadd.f32 %v5279_v17, %v5191_v24  ;;  %v4934_v17 = vadd.f32 %v9270_v18, %v9464_v2 }
 0x3b7   : > { %v5195_v16 = vpop.f32.mrf.mxu0 }
 0x3b8   : > { %v5104_v47 = vpop.f32.mrf.mxu3  ;;  %5059 = vmatmul.bf16.gmra.mxu2 %v10163_v13 }
 0x3b9   : > { %v5105_v19 = vadd.f32 %v5104_v47, %v5016_v7 }
 0x3bb   : > { %v5194_v9 = vadd.f32 %v5193_v32, %v5105_v19  ;;  %v5020_v56 = vpop.f32.mrf.mxu2 }
 0x3bc   : > { %v5021_v41 = vadd.f32 %v5020_v56, %v4932_v61 }
 0x3bd   : > { %v5282_v33 = vpop.f32.mrf.mxu1 }
 0x3be   : > { %v9622_v48 = vadd.f32 %v5282_v33, %v5194_v9  ;;  %v10166_v33 = vld [vmem:[#allocation27_spill] sm:$0xff] }
 0x3bf   : > { %v5198_v11 = vpop.f32.mrf.mxu0 }
 0x3c0   : > { %5321 = vmatmul.bf16.gmra.mxu1 %v10164_v30  ;;  %v5106_v36 = vpop.f32.mrf.mxu3 }
 0x3c1   : > { %v5107_v24 = vadd.f32 %v5106_v36, %v5018_v40  ;;  %v4937_v40 = vadd.f32 %v9283_v28, %v9464_v2  ;;  %v6914_v28 = vld [vmem:[#allocation2 + $0x18] sm:$0xff] }
 0x3c2   : > { %5237 = vmatmul.bf16.gmra.mxu0 %v6913_v42 }
 0x3c3   : > { %v5196_v7 = vadd.f32 %v5195_v16, %v5107_v24  ;;  %v5022_v47 = vpop.f32.mrf.mxu2  ;;  %v10167_v24 = vld [vmem:[#allocation85_spill] sm:$0xff] }
 0x3c4   : > { %v5023_v32 = vadd.f32 %v5022_v47, %v4934_v17  ;;  %v10168_v47 = vld [vmem:[#allocation88_spill] sm:$0xff] }
 0x3c5   : > { %v5284_v44 = vpop.f32.mrf.mxu1  ;;  %5148 = vmatmul.bf16.gmra.mxu3 %v10165_v6 }
 0x3c6   : > { %v9628_v19 = vadd.f32 %v5284_v44, %v5196_v7  ;;  %v4939_v44 = vadd.f32 %v9295_v15, %v9464_v2 }
 0x3c7   : > { %v5200_v61 = vpop.f32.mrf.mxu0 }
 0x3c8   : > { %v5109_v13 = vpop.f32.mrf.mxu3  ;;  %5340 = vmatmul.bf16.vlgmr.msra.gmra.mxu2 %v10166_v33 }
 0x3c9   : > { %v5110_v9 = vadd.f32 %v5109_v13, %v5021_v41 }
 0x3cb   : > { %v5199_v56 = vadd.f32 %v5198_v11, %v5110_v9  ;;  %v5025_v16 = vpop.f32.mrf.mxu2 }
 0x3cc   : > { %v5026_v30 = vadd.f32 %v5025_v16, %v4937_v40 }
 0x3cd   : > { %v5287_v18 = vpop.f32.mrf.mxu1 }
 0x3ce   : > { %v9633_v36 = vadd.f32 %v5287_v18, %v5199_v56  ;;  %v10169_v18 = vld [vmem:[#allocation32_spill] sm:$0xff] }
 0x3cf   : > { %v5203_v17 = vpop.f32.mrf.mxu0 }
 0x3d0   : > { %5326 = vmatmul.bf16.gmra.mxu1 %v10167_v24  ;;  %v5111_v42 = vpop.f32.mrf.mxu3 }
 0x3d1   : > { %v5112_v7 = vadd.f32 %v5111_v42, %v5023_v32  ;;  %v4942_v32 = vadd.f32 %v9314_v63, %v9464_v2  ;;  %v6915_v63 = vld [vmem:[#allocation2 + $0x24] sm:$0xff] }
 0x3d2   : > { %5518 = vmatmul.bf16.vlgmr.msra.gmra.mxu0 %v10168_v47 }
 0x3d3   : > { %v5201_v41 = vadd.f32 %v5200_v61, %v5112_v7  ;;  %v5027_v13 = vpop.f32.mrf.mxu2  ;;  %v10170_v7 = vld [vmem:[#allocation87_spill] sm:$0xff] }
 0x3d4   : > { %v5028_v11 = vadd.f32 %v5027_v13, %v4939_v44  ;;  %v10171_v13 = vld [vmem:[#allocation20_spill] sm:$0xff] }
 0x3d5   : > { %v5289_v6 = vpop.f32.mrf.mxu1  ;;  %5429 = vmatmul.bf16.vlgmr.msra.gmra.mxu3 %v6914_v28 }
 0x3d6   : > { %v9639_v9 = vadd.f32 %v5289_v6, %v5201_v41  ;;  %v4944_v6 = vadd.f32 %v9320_v25, %v9464_v2 }
 0x3d7   : > { %v5205_v40 = vpop.f32.mrf.mxu0 }
 0x3d8   : > { %v5114_v33 = vpop.f32.mrf.mxu3  ;;  %5345 = vmatmul.bf16.gmra.mxu2 %v10169_v18 }
 0x3d9   : > { %v5115_v56 = vadd.f32 %v5114_v33, %v5026_v30 }
 0x3db   : > { %v5204_v16 = vadd.f32 %v5203_v17, %v5115_v56  ;;  %v5030_v61 = vpop.f32.mrf.mxu2 }
 0x3dc   : > { %v5031_v24 = vadd.f32 %v5030_v61, %v4942_v32 }
 0x3dd   : > { %v5292_v15 = vpop.f32.mrf.mxu1 }
 0x3de   : > { %v9644_v42 = vadd.f32 %v5292_v15, %v5204_v16  ;;  %v10172_v15 = vld [vmem:[#allocation38_spill] sm:$0xff] }
 0x3df   : > { %v5208_v44 = vpop.f32.mrf.mxu0 }
 0x3e0   : > { %5607 = vmatmul.bf16.vlgmr.msra.gmra.mxu1 %v10170_v7  ;;  %v5116_v47 = vpop.f32.mrf.mxu3 }
 0x3e1   : > { %v5117_v41 = vadd.f32 %v5116_v47, %v5028_v11  ;;  %v4947_v11 = vadd.f32 %v9333_v53, %v9464_v2  ;;  %v6916_v53 = vld [vmem:[#allocation2 + $0x30] sm:$0xff] }
 0x3e2   : > { %5523 = vmatmul.bf16.gmra.mxu0 %v10171_v13 }
 0x3e3   : > { %v5206_v30 = vadd.f32 %v5205_v40, %v5117_v41  ;;  %v5032_v33 = vpop.f32.mrf.mxu2  ;;  %v10173_v41 = vld [vmem:[#allocation17_spill] sm:$0xff] }
 0x3e4   : > { %v5033_v17 = vadd.f32 %v5032_v33, %v4944_v6  ;;  %v10174_v33 = vld [vmem:[#allocation23_spill] sm:$0xff] }
 0x3e5   : > { %v5294_v28 = vpop.f32.mrf.mxu1  ;;  %5434 = vmatmul.bf16.gmra.mxu3 %v6915_v63 }
 0x3e6   : > { %v9650_v56 = vadd.f32 %v5294_v28, %v5206_v30  ;;  %v4949_v28 = vadd.f32 %v9345_v55, %v9464_v2 }
 0x3e7   : > { %v5210_v32 = vpop.f32.mrf.mxu0 }
 0x3e8   : > { %v5119_v18 = vpop.f32.mrf.mxu3  ;;  %5350 = vmatmul.bf16.gmra.mxu2 %v10172_v15 }
 0x3e9   : > { %v5120_v16 = vadd.f32 %v5119_v18, %v5031_v24 }
 0x3eb   : > { %v5209_v61 = vadd.f32 %v5208_v44, %v5120_v16  ;;  %v5035_v40 = vpop.f32.mrf.mxu2 }
 0x3ec   : > { %v5036_v7 = vadd.f32 %v5035_v40, %v4947_v11 }
 0x3ed   : > { %v5297_v25 = vpop.f32.mrf.mxu1 }
 0x3ee   : > { %v9655_v47 = vadd.f32 %v5297_v25, %v5209_v61  ;;  %v10175_v25 = vld [vmem:[#allocation42_spill] sm:$0xff] }
 0x3ef   : > { %v5213_v6 = vpop.f32.mrf.mxu0 }
 0x3f0   : > { %5612 = vmatmul.bf16.gmra.mxu1 %v10173_v41  ;;  %v5121_v13 = vpop.f32.mrf.mxu3 }
 0x3f1   : > { %v5122_v30 = vadd.f32 %v5121_v13, %v5033_v17  ;;  %v4952_v17 = vadd.f32 %v9364_v54, %v9464_v2  ;;  %v6917_v54 = vld [vmem:[#allocation2 + $0x3c] sm:$0xff] }
 0x3f2   : > { %5528 = vmatmul.bf16.gmra.mxu0 %v10174_v33 }
 0x3f3   : > { %v5211_v24 = vadd.f32 %v5210_v32, %v5122_v30  ;;  %v5037_v18 = vpop.f32.mrf.mxu2  ;;  %v10176_v30 = vld [vmem:[#allocation25_spill] sm:$0xff] }
 0x3f4   : > { %v5038_v44 = vadd.f32 %v5037_v18, %v4949_v28  ;;  %v10177_v18 = vld [vmem:[#allocation29_spill] sm:$0xff] }
 0x3f5   : > { %v5299_v63 = vpop.f32.mrf.mxu1  ;;  %5439 = vmatmul.bf16.gmra.mxu3 %v6916_v53 }
 0x3f6   : > { %v9661_v16 = vadd.f32 %v5299_v63, %v5211_v24  ;;  %v4954_v63 = vadd.f32 %v9370_v20, %v9464_v2 }
 0x3f7   : > { %v5215_v11 = vpop.f32.mrf.mxu0 }
 0x3f8   : > { %v5124_v15 = vpop.f32.mrf.mxu3  ;;  %5355 = vmatmul.bf16.gmra.mxu2 %v10175_v25 }
 0x3f9   : > { %v5125_v61 = vadd.f32 %v5124_v15, %v5036_v7 }
 0x3fb   : > { %v5214_v40 = vadd.f32 %v5213_v6, %v5125_v61  ;;  %v5040_v32 = vpop.f32.mrf.mxu2 }
 0x3fc   : > { %v5041_v41 = vadd.f32 %v5040_v32, %v4952_v17 }
 0x3fd   : > { %v5302_v55 = vpop.f32.mrf.mxu1 }
 0x3fe   : > { %v9666_v13 = vadd.f32 %v5302_v55, %v5214_v40  ;;  %v10178_v55 = vld [vmem:[#allocation48_spill] sm:$0xff] }
 0x3ff   : > { %v5218_v28 = vpop.f32.mrf.mxu0 }
 0x400   : > { %5617 = vmatmul.bf16.gmra.mxu1 %v10176_v30  ;;  %v5126_v33 = vpop.f32.mrf.mxu3 }
 0x401   : > { %v5127_v24 = vadd.f32 %v5126_v33, %v5038_v44  ;;  %v4957_v44 = vadd.f32 %v9383_v29, %v9464_v2  ;;  %v6918_v29 = vld [vmem:[#allocation2 + $0x48] sm:$0xff] }
 0x402   : > { %5533 = vmatmul.bf16.gmra.mxu0 %v10177_v18 }
 0x403   : > { %v5216_v7 = vadd.f32 %v5215_v11, %v5127_v24  ;;  %v5042_v15 = vpop.f32.mrf.mxu2  ;;  %v10179_v24 = vld [vmem:[#allocation26_spill] sm:$0xff] }
 0x404   : > { %v5043_v6 = vadd.f32 %v5042_v15, %v4954_v63  ;;  %v10180_v15 = vld [vmem:[#allocation33_spill] sm:$0xff] }
 0x405   : > { %v5304_v53 = vpop.f32.mrf.mxu1  ;;  %5444 = vmatmul.bf16.gmra.mxu3 %v6917_v54 }
 0x406   : > { %v9672_v61 = vadd.f32 %v5304_v53, %v5216_v7  ;;  %v4959_v53 = vadd.f32 %v9395_v27, %v9464_v2 }
 0x407   : > { %v5220_v17 = vpop.f32.mrf.mxu0 }
 0x408   : > { %v5129_v25 = vpop.f32.mrf.mxu3  ;;  %5360 = vmatmul.bf16.gmra.mxu2 %v10178_v55 }
 0x409   : > { %v5130_v40 = vadd.f32 %v5129_v25, %v5041_v41 }
 0x40b   : > { %v5219_v32 = vadd.f32 %v5218_v28, %v5130_v40  ;;  %v5045_v11 = vpop.f32.mrf.mxu2 }
 0x40c   : > { %v5046_v30 = vadd.f32 %v5045_v11, %v4957_v44 }
 0x40d   : > { %v5307_v20 = vpop.f32.mrf.mxu1 }
 0x40e   : > { %v9677_v33 = vadd.f32 %v5307_v20, %v5219_v32  ;;  %v10181_v20 = vld [vmem:[#allocation53_spill] sm:$0xff] }
 0x40f   : > { %v5223_v63 = vpop.f32.mrf.mxu0 }
 0x410   : > { %5622 = vmatmul.bf16.gmra.mxu1 %v10179_v24  ;;  %v5131_v18 = vpop.f32.mrf.mxu3 }
 0x411   : > { %v5132_v7 = vadd.f32 %v5131_v18, %v5043_v6  ;;  %v4962_v6 = vadd.f32 %v9414_v0, %v9464_v2  ;;  %v6919_v0 = vld [vmem:[#allocation2 + $0x54] sm:$0xff] }
 0x412   : > { %5538 = vmatmul.bf16.gmra.mxu0 %v10180_v15 }
 0x413   : > { %v5221_v41 = vadd.f32 %v5220_v17, %v5132_v7  ;;  %v5047_v25 = vpop.f32.mrf.mxu2  ;;  %v10182_v7 = vld [vmem:[#allocation30_spill] sm:$0xff] }
 0x414   : > { %v5048_v28 = vadd.f32 %v5047_v25, %v4959_v53  ;;  %v10183_v25 = vld [vmem:[#allocation36_spill] sm:$0xff] }
 0x415   : > { %v5309_v54 = vpop.f32.mrf.mxu1  ;;  %5449 = vmatmul.bf16.gmra.mxu3 %v6918_v29 }
 0x416   : > { %v9683_v40 = vadd.f32 %v5309_v54, %v5221_v41  ;;  %v4964_v54 = vadd.f32 %v9420_v10, %v9464_v2 }
 0x417   : > { %v5225_v44 = vpop.f32.mrf.mxu0 }
 0x418   : > { %v5134_v55 = vpop.f32.mrf.mxu3  ;;  %5365 = vmatmul.bf16.gmra.mxu2 %v10181_v20 }
 0x419   : > { %v5135_v32 = vadd.f32 %v5134_v55, %v5046_v30 }
 0x41b   : > { %v5224_v11 = vadd.f32 %v5223_v63, %v5135_v32  ;;  %v5050_v17 = vpop.f32.mrf.mxu2 }
 0x41c   : > { %v5051_v24 = vadd.f32 %v5050_v17, %v4962_v6 }
 0x41d   : > { %v5312_v27 = vpop.f32.mrf.mxu1 }
 0x41e   : > { %v9688_v18 = vadd.f32 %v5312_v27, %v5224_v11  ;;  %v10184_v27 = vld [vmem:[#allocation57_spill] sm:$0xff] }
 0x41f   : > { %v5228_v53 = vpop.f32.mrf.mxu0 }
 0x420   : > { %5627 = vmatmul.bf16.gmra.mxu1 %v10182_v7  ;;  %v5136_v15 = vpop.f32.mrf.mxu3 }
 0x421   : > { %v5137_v41 = vadd.f32 %v5136_v15, %v5048_v28  ;;  %v4967_v28 = vadd.f32 %v9433_v22, %v9464_v2  ;;  %v6920_v22 = vld [vmem:[#allocation2 + $0x60] sm:$0xff] }
 0x422   : > { %5543 = vmatmul.bf16.gmra.mxu0 %v10183_v25 }
 0x423   : > { %v5226_v30 = vadd.f32 %v5225_v44, %v5137_v41  ;;  %v5052_v55 = vpop.f32.mrf.mxu2  ;;  %v10185_v41 = vld [vmem:[#allocation37_spill] sm:$0xff] }
 0x424   : > { %v5053_v63 = vadd.f32 %v5052_v55, %v4964_v54  ;;  %v10186_v55 = vld [vmem:[#allocation45_spill] sm:$0xff] }
 0x425   : > { %v5314_v29 = vpop.f32.mrf.mxu1  ;;  %5454 = vmatmul.bf16.gmra.mxu3 %v6919_v0 }
 0x426   : > { %v9694_v32 = vadd.f32 %v5314_v29, %v5226_v30  ;;  %v4969_v29 = vadd.f32 %v9445_v4, %v9464_v2 }
 0x427   : > { %v5230_v6 = vpop.f32.mrf.mxu0 }
 0x428   : > { %v5139_v20 = vpop.f32.mrf.mxu3  ;;  %5370 = vmatmul.bf16.gmra.mxu2 %v10184_v27 }
 0x429   : > { %v5140_v11 = vadd.f32 %v5139_v20, %v5051_v24 }
 0x42b   : > { %v5229_v17 = vadd.f32 %v5228_v53, %v5140_v11  ;;  %v5055_v44 = vpop.f32.mrf.mxu2 }
 0x42c   : > { %v5056_v7 = vadd.f32 %v5055_v44, %v4967_v28 }
 0x42d   : > { %v5317_v10 = vpop.f32.mrf.mxu1 }
 0x42e   : > { %v9699_v15 = vadd.f32 %v5317_v10, %v5229_v17  ;;  %v10187_v10 = vld [vmem:[#allocation62_spill] sm:$0xff] }
 0x42f   : > { %v5233_v54 = vpop.f32.mrf.mxu0 }
 0x430   : > { %5632 = vmatmul.bf16.gmra.mxu1 %v10185_v41  ;;  %v5141_v25 = vpop.f32.mrf.mxu3 }
 0x431   : > { %v5142_v30 = vadd.f32 %v5141_v25, %v5053_v63  ;;  %v4972_v63 = vadd.f32 %v9471_v38, %v9464_v2  ;;  %v6921_v38 = vld [vmem:[#allocation2 + $0x6c] sm:$0xff] }
 0x432   : > { %5548 = vmatmul.bf16.gmra.mxu0 %v10186_v55 }
 0x433   : > { %v5231_v24 = vadd.f32 %v5230_v6, %v5142_v30  ;;  %v5057_v20 = vpop.f32.mrf.mxu2  ;;  %v10188_v30 = vld [vmem:[#allocation40_spill] sm:$0xff] }
 0x434   : > { %v5058_v53 = vadd.f32 %v5057_v20, %v4969_v29  ;;  %v10189_v20 = vld [vmem:[#allocation47_spill] sm:$0xff] }
 0x435   : > { %v5319_v0 = vpop.f32.mrf.mxu1  ;;  %5459 = vmatmul.bf16.gmra.mxu3 %v6920_v22 }
 0x436   : > { %v9705_v11 = vadd.f32 %v5319_v0, %v5231_v24  ;;  %v4974_v0 = vadd.f32 %v9478_v26, %v9464_v2  ;;  %v10191_v2 = vld [vmem:[#allocation43_spill] sm:$0xff] }
 0x437   : > { %v5235_v28 = vpop.f32.mrf.mxu0 }
 0x438   : > { %v5144_v27 = vpop.f32.mrf.mxu3  ;;  %5375 = vmatmul.bf16.gmra.mxu2 %v10187_v10 }
 0x439   : > { %v5145_v17 = vadd.f32 %v5144_v27, %v5056_v7 }
 0x43b   : > { %v5234_v44 = vadd.f32 %v5233_v54, %v5145_v17  ;;  %v5060_v6 = vpop.f32.mrf.mxu2 }
 0x43c   : > { %v5061_v41 = vadd.f32 %v5060_v6, %v4972_v63 }
 0x43d   : > { %v5322_v4 = vpop.f32.mrf.mxu1 }
 0x43e   : > { %v9710_v25 = vadd.f32 %v5322_v4, %v5234_v44  ;;  %v10190_v4 = vld [vmem:[#allocation66_spill] sm:$0xff] }
 0x43f   : > { %v5238_v29 = vpop.f32.mrf.mxu0 }
 0x440   : > { %5637 = vmatmul.bf16.gmra.mxu1 %v10188_v30  ;;  %v5146_v55 = vpop.f32.mrf.mxu3 }
 0x441   : > { %v5147_v24 = vadd.f32 %v5146_v55, %v5058_v53 }
 0x442   : > { %5553 = vmatmul.bf16.gmra.mxu0 %v10189_v20 }
 0x443   : > { %v5236_v7 = vadd.f32 %v5235_v28, %v5147_v24  ;;  %v5062_v27 = vpop.f32.mrf.mxu2 }
 0x444   : > { %v5063_v54 = vadd.f32 %v5062_v27, %v4974_v0  ;;  %v10192_v0 = vld [vmem:[#allocation52_spill] sm:$0xff]  ;;  %v6922_v27 = vld [vmem:[#allocation2 + $0x78] sm:$0xff] }
 0x445   : > { %v5324_v22 = vpop.f32.mrf.mxu1  ;;  %5464 = vmatmul.bf16.gmra.mxu3 %v6921_v38 }
 0x446   : > { %v9716_v17 = vadd.f32 %v5324_v22, %v5236_v7 }
 0x447   : > { %v5240_v63 = vpop.f32.mrf.mxu0 }
 0x448   : > { %v5149_v10 = vpop.f32.mrf.mxu3  ;;  %5380 = vmatmul.bf16.gmra.mxu2 %v10190_v4  ;;  %v10193_v4 = vld [vmem:[#allocation69_spill] sm:$0xff] }
 0x449   : > { %v5150_v44 = vadd.f32 %v5149_v10, %v5061_v41 }
 0x44b   : > { %v5239_v6 = vadd.f32 %v5238_v29, %v5150_v44  ;;  %v5341_v30 = vpop.f32.mrf.mxu2 }
 0x44c   : > { %v5342_v41 = vadd.f32 %v5341_v30, %v9496_v21  ;;  %v10194_v21 = vld [vmem:[#allocation56_spill] sm:$0xff] }
 0x44d   : > { %v5327_v53 = vpop.f32.mrf.mxu1 }
 0x44e   : > { %v9719_v55 = vadd.f32 %v5327_v53, %v5239_v6 }
 0x44f   : > { %v5519_v28 = vpop.f32.mrf.mxu0 }
 0x450   : > { %5642 = vmatmul.bf16.gmra.mxu1 %v10191_v2  ;;  %v5151_v26 = vpop.f32.mrf.mxu3 }
 0x451   : > { %v5152_v24 = vadd.f32 %v5151_v26, %v5063_v54  ;;  %v10195_v26 = vld [vmem:[#allocation50_spill] sm:$0xff] }
 0x452   : > { %5558 = vmatmul.bf16.gmra.mxu0 %v10192_v0 }
 0x453   : > { %v5241_v20 = vadd.f32 %v5240_v63, %v5152_v24  ;;  %v5343_v22 = vpop.f32.mrf.mxu2 }
 0x454   : > { %v5344_v2 = vadd.f32 %v5343_v22, %v9514_v5 }
 0x455   : > { %v5329_v7 = vpop.f32.mrf.mxu1  ;;  %5469 = vmatmul.bf16.gmra.mxu3 %v6922_v27 }
 0x456   : > { %v9724_v29 = vadd.f32 %v5329_v7, %v5241_v20  ;;  %v10196_v7 = vld [vmem:[#allocation61_spill] sm:$0xff] }
 0x457   : > { %v5521_v10 = vpop.f32.mrf.mxu0 }
 0x458   : > { %v5430_v38 = vpop.f32.mrf.mxu3  ;;  %5385 = vmatmul.bf16.gmra.mxu2 %v10193_v4 }
 0x459   : > { %v5431_v44 = vadd.f32 %v5430_v38, %v5342_v41  ;;  %v6923_v41 = vld [vmem:[#allocation2 + $0x84] sm:$0xff] }
 0x45b   : > { %v5520_v6 = vadd.f32 %v5519_v28, %v5431_v44  ;;  %v5346_v54 = vpop.f32.mrf.mxu2  ;;  %v10197_v44 = vld [vmem:[#allocation64_spill] sm:$0xff] }
 0x45c   : > { %v5347_v38 = vadd.f32 %v5346_v54, %v9519_v31 }
 0x45d   : > { %v5608_v53 = vpop.f32.mrf.mxu1 }
 0x45e   : > { %v5609_v63 = vadd.f32 %v5608_v53, %v5520_v6 }
 0x45f   : > { %v5524_v20 = vpop.f32.mrf.mxu0 }
 0x460   : > { %v5688_v30 = vpack.c.bf16 %v5609_v63, %v10194_v21  ;;  %5647 = vmatmul.bf16.gmra.mxu1 %v10195_v26  ;;  %v5432_v24 = vpop.f32.mrf.mxu3  ;;  %v10198_v21 = vld [vmem:[#allocation72_spill] sm:$0xff] }
 0x461   : > { %v5433_v28 = vadd.f32 %v5432_v24, %v5344_v2 }
 0x462   : > { %5720 = vst [vmem:[%s9732_s9] sm:$0xff] %v5688_v30  ;;  %5563 = vmatmul.bf16.gmra.mxu0 %v10196_v7  ;;  %v10200_v7 = vld [vmem:[#allocation58_spill] sm:$0xff] }
 0x463   : > { %v5522_v0 = vadd.f32 %v5521_v10, %v5433_v28  ;;  %v5348_v5 = vpop.f32.mrf.mxu2  ;;  %v10199_v28 = vld [vmem:[#allocation89_spill] sm:$0xff] }
 0x464   : > { %v5349_v24 = vadd.f32 %v5348_v5, %v9531_v37  ;;  %v10202_v37 = vld [vmem:[#allocation92_spill] sm:$0xff] }
 0x465   : > { %v5610_v27 = vpop.f32.mrf.mxu1  ;;  %5474 = vmatmul.bf16.gmra.mxu3 %v6923_v41  ;;  %v10201_v41 = vld [vmem:[#allocation91_spill] sm:$0xff] }
 0x466   : > { %v5611_v22 = vadd.f32 %v5610_v27, %v5522_v0 }
 0x467   : > { %v5526_v53 = vpop.f32.mrf.mxu0 }
 0x468   : > { %v5689_v4 = vpack.c.bf16 %v5611_v22, %v10197_v44  ;;  %v5435_v6 = vpop.f32.mrf.mxu3  ;;  %5390 = vmatmul.bf16.gmra.mxu2 %v10198_v21 }
 0x469   : > { %v5436_v63 = vadd.f32 %v5435_v6, %v5347_v38 }
 0x46a   : > { %5721 = vst [vmem:[%s9732_s9 + $0x8] sm:$0xff] %v5689_v4  ;;  %v6924_v4 = vld [vmem:[#allocation2 + $0x90] sm:$0xff] }
 0x46b   : > { %v5525_v2 = vadd.f32 %v5524_v20, %v5436_v63  ;;  %v5351_v30 = vpop.f32.mrf.mxu2 }
 0x46c   : > { %v5352_v6 = vadd.f32 %v5351_v30, %v9542_v46 }
 0x46d   : > { %v5613_v10 = vpop.f32.mrf.mxu1 }
 0x46e   : > { %v5614_v26 = vadd.f32 %v5613_v10, %v5525_v2  ;;  %v10203_v10 = vld [vmem:[#allocation75_spill] sm:$0xff] }
 0x46f   : > { %v5529_v54 = vpop.f32.mrf.mxu0 }
 0x470   : > { %v5690_v0 = vpack.c.bf16 %v5614_v26, %v10199_v28  ;;  %5652 = vmatmul.bf16.gmra.mxu1 %v10200_v7  ;;  %v5437_v31 = vpop.f32.mrf.mxu3  ;;  %v10204_v7 = vld [vmem:[#allocation93_spill] sm:$0xff] }
 0x471   : > { %v5438_v27 = vadd.f32 %v5437_v31, %v5349_v24 }
 0x472   : > { %5722 = vst [vmem:[%s9732_s9 + $0x10] sm:$0xff] %v5690_v0  ;;  %5568 = vmatmul.bf16.gmra.mxu0 %v10201_v41 }
 0x473   : > { %v5527_v22 = vadd.f32 %v5526_v53, %v5438_v27  ;;  %v5353_v44 = vpop.f32.mrf.mxu2  ;;  %v10205_v27 = vld [vmem:[#allocation90_spill] sm:$0xff] }
 0x474   : > { %v5354_v0 = vadd.f32 %v5353_v44, %v9560_v58  ;;  %v10207_v58 = vld [vmem:[#allocation96_spill] sm:$0xff] }
 0x475   : > { %v5615_v38 = vpop.f32.mrf.mxu1  ;;  %5479 = vmatmul.bf16.gmra.mxu3 %v6924_v4 }
 0x476   : > { %v5616_v20 = vadd.f32 %v5615_v38, %v5527_v22  ;;  %v10206_v38 = vld [vmem:[#allocation95_spill] sm:$0xff] }
 0x477   : > { %v5531_v21 = vpop.f32.mrf.mxu0 }
 0x478   : > { %v5691_v5 = vpack.c.bf16 %v5616_v20, %v10202_v37  ;;  %v5440_v63 = vpop.f32.mrf.mxu3  ;;  %5395 = vmatmul.bf16.gmra.mxu2 %v10203_v10  ;;  %v10208_v10 = vld [vmem:[#allocation78_spill] sm:$0xff] }
 0x479   : > { %v5441_v2 = vadd.f32 %v5440_v63, %v5352_v6  ;;  %v6925_v6 = vld [vmem:[#allocation2 + $0x9c] sm:$0xff] }
 0x47a   : > { %5723 = vst [vmem:[%s9732_s9 + $0x18] sm:$0xff] %v5691_v5 }
 0x47b   : > { %v5530_v26 = vadd.f32 %v5529_v54, %v5441_v2  ;;  %v5356_v24 = vpop.f32.mrf.mxu2 }
 0x47c   : > { %v5357_v37 = vadd.f32 %v5356_v24, %v9565_v59 }
 0x47d   : > { %v5618_v53 = vpop.f32.mrf.mxu1 }
 0x47e   : > { %v5619_v28 = vadd.f32 %v5618_v53, %v5530_v26 }
 0x47f   : > { %v5534_v30 = vpop.f32.mrf.mxu0 }
 0x480   : > { %v5692_v31 = vpack.c.bf16 %v5619_v28, %v10204_v7  ;;  %5657 = vmatmul.bf16.gmra.mxu1 %v10205_v27  ;;  %v5442_v46 = vpop.f32.mrf.mxu3 }
 0x481   : > { %v5443_v22 = vadd.f32 %v5442_v46, %v5354_v0 }
 0x482   : > { %5724 = vst [vmem:[%s9732_s9 + $0x20] sm:$0xff] %v5692_v31  ;;  %5573 = vmatmul.bf16.gmra.mxu0 %v10206_v38  ;;  %v10209_v31 = vld [vmem:[#allocation94_spill] sm:$0xff] }
 0x483   : > { %v5532_v41 = vadd.f32 %v5531_v21, %v5443_v22  ;;  %v5358_v4 = vpop.f32.mrf.mxu2  ;;  %v10210_v22 = vld [vmem:[#allocation98_spill] sm:$0xff] }
 0x484   : > { %v5359_v0 = vadd.f32 %v5358_v4, %v9577_v39  ;;  %v10211_v39 = vld [vmem:[#allocation99_spill] sm:$0xff] }
 0x485   : > { %v5620_v20 = vpop.f32.mrf.mxu1  ;;  %5484 = vmatmul.bf16.gmra.mxu3 %v6925_v6 }
 0x486   : > { %v5621_v54 = vadd.f32 %v5620_v20, %v5532_v41  ;;  %v6926_v20 = vld [vmem:[#allocation2 + $0xa8] sm:$0xff] }
 0x487   : > { %v5536_v63 = vpop.f32.mrf.mxu0 }
 0x488   : > { %v5693_v44 = vpack.c.bf16 %v5621_v54, %v10207_v58  ;;  %v5445_v5 = vpop.f32.mrf.mxu3  ;;  %5400 = vmatmul.bf16.gmra.mxu2 %v10208_v10  ;;  %v10212_v58 = vld [vmem:[#allocation81_spill] sm:$0xff] }
 0x489   : > { %v5446_v2 = vadd.f32 %v5445_v5, %v5357_v37 }
 0x48a   : > { %5725 = vst [vmem:[%s9732_s9 + $0x28] sm:$0xff] %v5693_v44 }
 0x48b   : > { %v5535_v26 = vadd.f32 %v5534_v30, %v5446_v2  ;;  %v5361_v53 = vpop.f32.mrf.mxu2 }
 0x48c   : > { %v5362_v54 = vadd.f32 %v5361_v53, %v9588_v49 }
 0x48d   : > { %v5623_v21 = vpop.f32.mrf.mxu1 }
 0x48e   : > { %v5624_v28 = vadd.f32 %v5623_v21, %v5535_v26  ;;  %v10213_v21 = vld [vmem:[#allocation97_spill] sm:$0xff] }
 0x48f   : > { %v5539_v24 = vpop.f32.mrf.mxu0 }
 0x490   : > { %v5694_v7 = vpack.c.bf16 %v5624_v28, %v9112_v43  ;;  %5662 = vmatmul.bf16.gmra.mxu1 %v10209_v31  ;;  %v5447_v59 = vpop.f32.mrf.mxu3 }
 0x491   : > { %v5448_v27 = vadd.f32 %v5447_v59, %v5359_v0 }
 0x492   : > { %5726 = vst [vmem:[%s9732_s9 + $0x30] sm:$0xff] %v5694_v7  ;;  %5578 = vmatmul.bf16.gmra.mxu0 %v10210_v22  ;;  %v10214_v7 = vld [vmem:[#allocation101_spill] sm:$0xff] }
 0x493   : > { %v5537_v46 = vadd.f32 %v5536_v63, %v5448_v27  ;;  %v5363_v38 = vpop.f32.mrf.mxu2  ;;  %v6927_v27 = vld [vmem:[#allocation2 + $0xb4] sm:$0xff] }
 0x494   : > { %v5364_v10 = vadd.f32 %v5363_v38, %v9606_v57  ;;  %v10215_v57 = vld [vmem:[#allocation102_spill] sm:$0xff] }
 0x495   : > { %v5625_v41 = vpop.f32.mrf.mxu1  ;;  %5489 = vmatmul.bf16.gmra.mxu3 %v6926_v20 }
 0x496   : > { %v5626_v30 = vadd.f32 %v5625_v41, %v5537_v46 }
 0x497   : > { %v5541_v6 = vpop.f32.mrf.mxu0 }
 0x498   : > { %v5695_v43 = vpack.c.bf16 %v5626_v30, %v10211_v39  ;;  %v5450_v4 = vpop.f32.mrf.mxu3  ;;  %5405 = vmatmul.bf16.gmra.mxu2 %v10212_v58  ;;  %v10216_v30 = vld [vmem:[#allocation84_spill] sm:$0xff] }
 0x499   : > { %v5451_v37 = vadd.f32 %v5450_v4, %v5362_v54  ;;  %v10218_v58 = vld [vmem:[#allocation100_spill] sm:$0xff] }
 0x49a   : > { %5727 = vst [vmem:[%s9732_s9 + $0x38] sm:$0xff] %v5695_v43 }
 0x49b   : > { %v5540_v44 = vadd.f32 %v5539_v24, %v5451_v37  ;;  %v5366_v63 = vpop.f32.mrf.mxu2 }
 0x49c   : > { %v5367_v46 = vadd.f32 %v5366_v63, %v9611_v60 }
 0x49d   : > { %v5628_v5 = vpop.f32.mrf.mxu1 }
 0x49e   : > { %v5629_v2 = vadd.f32 %v5628_v5, %v5540_v44 }
 0x49f   : > { %v5544_v53 = vpop.f32.mrf.mxu0 }
 0x4a0   : > { %v5696_v26 = vpack.c.bf16 %v5629_v2, %v9149_v14  ;;  %5667 = vmatmul.bf16.gmra.mxu1 %v10213_v21  ;;  %v5452_v49 = vpop.f32.mrf.mxu3  ;;  %v6928_v21 = vld [vmem:[#allocation2 + $0xc0] sm:$0xff] }
 0x4a1   : > { %v5453_v28 = vadd.f32 %v5452_v49, %v5364_v10 }
 0x4a2   : > { %5728 = vst [vmem:[%s9732_s9 + $0x40] sm:$0xff] %v5696_v26  ;;  %5583 = vmatmul.bf16.gmra.mxu0 %v10214_v7  ;;  %v10219_v7 = vld [vmem:[#allocation86_spill] sm:$0xff] }
 0x4a3   : > { %v5542_v0 = vadd.f32 %v5541_v6, %v5453_v28  ;;  %v5368_v59 = vpop.f32.mrf.mxu2  ;;  %v10217_v6 = vld [vmem:[#allocation103_spill] sm:$0xff] }
 0x4a4   : > { %v5369_v4 = vadd.f32 %v5368_v59, %v9617_v23 }
 0x4a5   : > { %v5630_v31 = vpop.f32.mrf.mxu1  ;;  %5494 = vmatmul.bf16.gmra.mxu3 %v6927_v27 }
 0x4a6   : > { %v5631_v24 = vadd.f32 %v5630_v31, %v5542_v0 }
 0x4a7   : > { %v5546_v41 = vpop.f32.mrf.mxu0 }
 0x4a8   : > { %v5697_v14 = vpack.c.bf16 %v5631_v24, %v10215_v57  ;;  %v5455_v22 = vpop.f32.mrf.mxu3  ;;  %5410 = vmatmul.bf16.gmra.mxu2 %v10216_v30  ;;  %v6929_v30 = vld [vmem:[#allocation2 + $0xcc] sm:$0xff] }
 0x4a9   : > { %v5456_v38 = vadd.f32 %v5455_v22, %v5367_v46 }
 0x4aa   : > { %5729 = vst [vmem:[%s9732_s9 + $0x48] sm:$0xff] %v5697_v14 }
 0x4ab   : > { %v5545_v20 = vadd.f32 %v5544_v53, %v5456_v38  ;;  %v5371_v39 = vpop.f32.mrf.mxu2 }
 0x4ac   : > { %v5372_v49 = vadd.f32 %v5371_v39, %v9622_v48 }
 0x4ad   : > { %v5633_v54 = vpop.f32.mrf.mxu1 }
 0x4ae   : > { %v5634_v43 = vadd.f32 %v5633_v54, %v5545_v20 }
 0x4af   : > { %v5549_v44 = vpop.f32.mrf.mxu0 }
 0x4b0   : > { %v5698_v37 = vpack.c.bf16 %v5634_v43, %v10217_v6  ;;  %5672 = vmatmul.bf16.gmra.mxu1 %v10218_v58  ;;  %v5457_v60 = vpop.f32.mrf.mxu3 }
 0x4b1   : > { %v5458_v5 = vadd.f32 %v5457_v60, %v5369_v4 }
 0x4b2   : > { %5730 = vst [vmem:[%s9732_s9 + $0x50] sm:$0xff] %v5698_v37  ;;  %5588 = vmatmul.bf16.gmra.mxu0 %v9205_v35 }
 0x4b3   : > { %v5547_v63 = vadd.f32 %v5546_v41, %v5458_v5  ;;  %v5373_v10 = vpop.f32.mrf.mxu2 }
 0x4b4   : > { %v5374_v27 = vadd.f32 %v5373_v10, %v9628_v19 }
 0x4b5   : > { %v5635_v2 = vpop.f32.mrf.mxu1  ;;  %5499 = vmatmul.bf16.gmra.mxu3 %v6928_v21 }
 0x4b6   : > { %v5636_v26 = vadd.f32 %v5635_v2, %v5547_v63 }
 0x4b7   : > { %v5551_v28 = vpop.f32.mrf.mxu0 }
 0x4b8   : > { %v5699_v23 = vpack.c.bf16 %v5636_v26, %v9207_v52  ;;  %v5460_v53 = vpop.f32.mrf.mxu3  ;;  %5415 = vmatmul.bf16.gmra.mxu2 %v10219_v7 }
 0x4b9   : > { %v5461_v0 = vadd.f32 %v5460_v53, %v5372_v49 }
 0x4ba   : > { %5731 = vst [vmem:[%s9732_s9 + $0x58] sm:$0xff] %v5699_v23 }
 0x4bb   : > { %v5550_v31 = vadd.f32 %v5549_v44, %v5461_v0  ;;  %v5376_v24 = vpop.f32.mrf.mxu2 }
 0x4bc   : > { %v5377_v19 = vadd.f32 %v5376_v24, %v9633_v36 }
 0x4bd   : > { %v5638_v59 = vpop.f32.mrf.mxu1 }
 0x4be   : > { %v5639_v35 = vadd.f32 %v5638_v59, %v5550_v31 }
 0x4bf   : > { %v5554_v57 = vpop.f32.mrf.mxu0 }
 0x4c0   : > { %v5700_v46 = vpack.c.bf16 %v5639_v35, %v9228_v1  ;;  %5677 = vmatmul.bf16.gmra.mxu1 %v9203_v50  ;;  %v5462_v48 = vpop.f32.mrf.mxu3 }
 0x4c1   : > { %v5463_v52 = vadd.f32 %v5462_v48, %v5374_v27 }
 0x4c2   : > { %5732 = vst [vmem:[%s9732_s9 + $0x60] sm:$0xff] %v5700_v46  ;;  %5593 = vmatmul.bf16.gmra.mxu0 %v9241_v45 }
 0x4c3   : > { %v5552_v14 = vadd.f32 %v5551_v28, %v5463_v52  ;;  %v5378_v41 = vpop.f32.mrf.mxu2 }
 0x4c4   : > { %v5379_v45 = vadd.f32 %v5378_v41, %v9639_v9  ;;  %v10220_v41 = vld [vmem:[#allocation4_spill] sm:$0xff] }
 0x4c5   : > { %v5640_v22 = vpop.f32.mrf.mxu1  ;;  %5504 = vmatmul.bf16.gmra.mxu3 %v6929_v30 }
 0x4c6   : > { %v5641_v38 = vadd.f32 %v5640_v22, %v5552_v14 }
 0x4c7   : > { %v5556_v50 = vpop.f32.mrf.mxu0 }
 0x4c8   : > { %v5701_v1 = vpack.c.bf16 %v5641_v38, %v9243_v8  ;;  %v5465_v20 = vpop.f32.mrf.mxu3 }
 0x4c9   : > { %v5466_v54 = vadd.f32 %v5465_v20, %v5377_v19 }
 0x4ca   : > { %5733 = vst [vmem:[%s9732_s9 + $0x68] sm:$0xff] %v5701_v1 }
 0x4cb   : > { %v5555_v39 = vadd.f32 %v5554_v57, %v5466_v54  ;;  %v5381_v4 = vpop.f32.mrf.mxu2 }
 0x4cc   : > { %v5382_v2 = vadd.f32 %v5381_v4, %v9644_v42 }
 0x4cd   : > { %v5643_v43 = vpop.f32.mrf.mxu1 }
 0x4ce   : > { %v5644_v6 = vadd.f32 %v5643_v43, %v5555_v39  ;;  %v10221_v39 = vld [vmem:[#allocation19_spill] sm:$0xff] }
 0x4cf   : > { %v5559_v60 = vpop.f32.mrf.mxu0 }
 0x4d0   : > { %v5702_v37 = vpack.c.bf16 %v5644_v6, %v9263_v51  ;;  %5682 = vmatmul.bf16.gmra.mxu1 %v9239_v3  ;;  %v5467_v58 = vpop.f32.mrf.mxu3 }
 0x4d1   : > { %v5468_v36 = vadd.f32 %v5467_v58, %v5379_v45 }
 0x4d2   : > { %5734 = vst [vmem:[%s9732_s9 + $0x70] sm:$0xff] %v5702_v37 }
 0x4d3   : > { %v5557_v8 = vadd.f32 %v5556_v50, %v5468_v36  ;;  %v5383_v5 = vpop.f32.mrf.mxu2 }
 0x4d4   : > { %v5384_v53 = vadd.f32 %v5383_v5, %v9650_v56 }
 0x4d5   : > { %v5645_v44 = vpop.f32.mrf.mxu1 }
 0x4d6   : > { %v5646_v63 = vadd.f32 %v5645_v44, %v5557_v8  ;;  %v10222_v8 = vld [vmem:[#allocation6_spill] sm:$0xff] }
 0x4d7   : > { %v5561_v21 = vpop.f32.mrf.mxu0 }
 0x4d8   : > { %v5703_v10 = vpack.c.bf16 %v5646_v63, %v9268_v62  ;;  %v5470_v26 = vpop.f32.mrf.mxu3 }
 0x4d9   : > { %v5471_v9 = vadd.f32 %v5470_v26, %v5382_v2 }
 0x4da   : > { %5735 = vst [vmem:[%s9732_s9 + $0x78] sm:$0xff] %v5703_v10 }
 0x4db   : > { %v5560_v51 = vadd.f32 %v5559_v60, %v5471_v9  ;;  %v5386_v3 = vpop.f32.mrf.mxu2 }
 0x4dc   : > { %v5387_v35 = vadd.f32 %v5386_v3, %v9655_v47 }
 0x4dd   : > { %v5648_v49 = vpop.f32.mrf.mxu1 }
 0x4de   : > { %v5649_v23 = vadd.f32 %v5648_v49, %v5560_v51  ;;  %v10223_v51 = vld [vmem:[#allocation22_spill] sm:$0xff] }
 0x4df   : > { %v5564_v7 = vpop.f32.mrf.mxu0 }
 0x4e0   : > { %v5704_v28 = vpack.c.bf16 %v5649_v23, %v9281_v12  ;;  %v5472_v0 = vpop.f32.mrf.mxu3 }
 0x4e1   : > { %v5473_v31 = vadd.f32 %v5472_v0, %v5384_v53 }
 0x4e2   : > { %5736 = vst [vmem:[%s9732_s9 + $0x80] sm:$0xff] %v5704_v28 }
 0x4e3   : > { %v5562_v42 = vadd.f32 %v5561_v21, %v5473_v31  ;;  %v5388_v62 = vpop.f32.mrf.mxu2 }
 0x4e4   : > { %v5389_v22 = vadd.f32 %v5388_v62, %v9661_v16 }
 0x4e5   : > { %v5650_v59 = vpop.f32.mrf.mxu1 }
 0x4e6   : > { %v5651_v24 = vadd.f32 %v5650_v59, %v5562_v42  ;;  %v10224_v42 = vld [vmem:[#allocation24_spill] sm:$0xff] }
 0x4e7   : > { %v5566_v48 = vpop.f32.mrf.mxu0 }
 0x4e8   : > { %v5705_v27 = vpack.c.bf16 %v5651_v24, %v9293_v34  ;;  %v5475_v46 = vpop.f32.mrf.mxu3 }
 0x4e9   : > { %v5476_v57 = vadd.f32 %v5475_v46, %v5387_v35 }
 0x4ea   : > { %5737 = vst [vmem:[%s9732_s9 + $0x88] sm:$0xff] %v5705_v27 }
 0x4eb   : > { %v5565_v56 = vadd.f32 %v5564_v7, %v5476_v57  ;;  %v5391_v12 = vpop.f32.mrf.mxu2 }
 0x4ec   : > { %v5392_v54 = vadd.f32 %v5391_v12, %v9666_v13 }
 0x4ed   : > { %v5653_v52 = vpop.f32.mrf.mxu1 }
 0x4ee   : > { %v5654_v14 = vadd.f32 %v5653_v52, %v5565_v56  ;;  %v10225_v56 = vld [vmem:[#allocation8_spill] sm:$0xff] }
 0x4ef   : > { %v5569_v19 = vpop.f32.mrf.mxu0 }
 0x4f0   : > { %v5706_v38 = vpack.c.bf16 %v5654_v14, %v10220_v41  ;;  %v5477_v30 = vpop.f32.mrf.mxu3 }
 0x4f1   : > { %v5478_v1 = vadd.f32 %v5477_v30, %v5389_v22 }
 0x4f2   : > { %5738 = vst [vmem:[%s9732_s9 + $0x90] sm:$0xff] %v5706_v38 }
 0x4f3   : > { %v5567_v47 = vadd.f32 %v5566_v48, %v5478_v1  ;;  %v5393_v34 = vpop.f32.mrf.mxu2  ;;  %v10226_v1 = vld [vmem:[#allocation28_spill] sm:$0xff] }
 0x4f4   : > { %v5394_v36 = vadd.f32 %v5393_v34, %v9672_v61 }
 0x4f5   : > { %v5655_v20 = vpop.f32.mrf.mxu1 }
 0x4f6   : > { %v5656_v50 = vadd.f32 %v5655_v20, %v5567_v47 }
 0x4f7   : > { %v5571_v6 = vpop.f32.mrf.mxu0 }
 0x4f8   : > { %v5707_v43 = vpack.c.bf16 %v5656_v50, %v10221_v39  ;;  %v5480_v4 = vpop.f32.mrf.mxu3 }
 0x4f9   : > { %v5481_v45 = vadd.f32 %v5480_v4, %v5392_v54 }
 0x4fa   : > { %5739 = vst [vmem:[%s9732_s9 + $0x98] sm:$0xff] %v5707_v43 }
 0x4fb   : > { %v5570_v16 = vadd.f32 %v5569_v19, %v5481_v45  ;;  %v5396_v58 = vpop.f32.mrf.mxu2 }
 0x4fc   : > { %v5397_v9 = vadd.f32 %v5396_v58, %v9677_v33 }
 0x4fd   : > { %v5658_v37 = vpop.f32.mrf.mxu1 }
 0x4fe   : > { %v5659_v60 = vadd.f32 %v5658_v37, %v5570_v16 }
 0x4ff   : > { %v5574_v63 = vpop.f32.mrf.mxu0 }
 0x500   : > { %v5708_v44 = vpack.c.bf16 %v5659_v60, %v10222_v8  ;;  %v5482_v5 = vpop.f32.mrf.mxu3 }
 0x501   : > { %v5483_v2 = vadd.f32 %v5482_v5, %v5394_v36  ;;  %v10228_v5 = vld [vmem:[#allocation10_spill] sm:$0xff] }
 0x502   : > { %5740 = vst [vmem:[%s9732_s9 + $0xa0] sm:$0xff] %v5708_v44 }
 0x503   : > { %v5572_v13 = vadd.f32 %v5571_v6, %v5483_v2  ;;  %v5398_v26 = vpop.f32.mrf.mxu2  ;;  %v10227_v6 = vld [vmem:[#allocation31_spill] sm:$0xff] }
 0x504   : > { %v5399_v31 = vadd.f32 %v5398_v26, %v9683_v40 }
 0x505   : > { %v5660_v10 = vpop.f32.mrf.mxu1 }
 0x506   : > { %v5661_v21 = vadd.f32 %v5660_v10, %v5572_v13 }
 0x507   : > { %v5576_v23 = vpop.f32.mrf.mxu0 }
 0x508   : > { %v5709_v49 = vpack.c.bf16 %v5661_v21, %v10223_v51  ;;  %v5485_v3 = vpop.f32.mrf.mxu3 }
 0x509   : > { %v5486_v53 = vadd.f32 %v5485_v3, %v5397_v9 }
 0x50a   : > { %5741 = vst [vmem:[%s9732_s9 + $0xa8] sm:$0xff] %v5709_v49  ;;  %v10229_v49 = vld [vmem:[#allocation34_spill] sm:$0xff] }
 0x50b   : > { %v5575_v61 = vadd.f32 %v5574_v63, %v5486_v53  ;;  %v5401_v0 = vpop.f32.mrf.mxu2 }
 0x50c   : > { %v5402_v57 = vadd.f32 %v5401_v0, %v9688_v18 }
 0x50d   : > { %v5663_v28 = vpop.f32.mrf.mxu1 }
 0x50e   : > { %v5664_v7 = vadd.f32 %v5663_v28, %v5575_v61 }
 0x50f   : > { %v5579_v24 = vpop.f32.mrf.mxu0 }
 0x510   : > { %v5710_v59 = vpack.c.bf16 %v5664_v7, %v10224_v42  ;;  %v5487_v62 = vpop.f32.mrf.mxu3 }
 0x511   : > { %v5488_v35 = vadd.f32 %v5487_v62, %v5399_v31  ;;  %v10230_v31 = vld [vmem:[#allocation35_spill] sm:$0xff] }
 0x512   : > { %5742 = vst [vmem:[%s9732_s9 + $0xb0] sm:$0xff] %v5710_v59 }
 0x513   : > { %v5577_v33 = vadd.f32 %v5576_v23, %v5488_v35  ;;  %v5403_v46 = vpop.f32.mrf.mxu2 }
 0x514   : > { %v5404_v19 = vadd.f32 %v5403_v46, %v9694_v32  ;;  %v10231_v46 = vld [vmem:[#allocation12_spill] sm:$0xff] }
 0x515   : > { %v5665_v27 = vpop.f32.mrf.mxu1 }
 0x516   : > { %v5666_v48 = vadd.f32 %v5665_v27, %v5577_v33 }
 0x517   : > { %v5581_v14 = vpop.f32.mrf.mxu0 }
 0x518   : > { %v5711_v52 = vpack.c.bf16 %v5666_v48, %v10225_v56  ;;  %v5490_v12 = vpop.f32.mrf.mxu3 }
 0x519   : > { %v5491_v22 = vadd.f32 %v5490_v12, %v5402_v57 }
 0x51a   : > { %5743 = vst [vmem:[%s9732_s9 + $0xb8] sm:$0xff] %v5711_v52 }
 0x51b   : > { %v5580_v40 = vadd.f32 %v5579_v24, %v5491_v22  ;;  %v5406_v38 = vpop.f32.mrf.mxu2 }
 0x51c   : > { %v5407_v4 = vadd.f32 %v5406_v38, %v9699_v15 }
 0x51d   : > { %v5668_v41 = vpop.f32.mrf.mxu1 }
 0x51e   : > { %v5669_v30 = vadd.f32 %v5668_v41, %v5580_v40  ;;  %v10232_v41 = vld [vmem:[#allocation39_spill] sm:$0xff] }
 0x51f   : > { %v5584_v34 = vpop.f32.mrf.mxu0 }
 0x520   : > { %v5712_v47 = vpack.c.bf16 %v5669_v30, %v10226_v1  ;;  %v5492_v20 = vpop.f32.mrf.mxu3 }
 0x521   : > { %v5493_v50 = vadd.f32 %v5492_v20, %v5404_v19 }
 0x522   : > { %5744 = vst [vmem:[%s9732_s9 + $0xc0] sm:$0xff] %v5712_v47 }
 0x523   : > { %v5582_v18 = vadd.f32 %v5581_v14, %v5493_v50  ;;  %v5408_v39 = vpop.f32.mrf.mxu2 }
 0x524   : > { %v5409_v44 = vadd.f32 %v5408_v39, %v9705_v11 }
 0x525   : > { %v5670_v54 = vpop.f32.mrf.mxu1 }
 0x526   : > { %v5671_v43 = vadd.f32 %v5670_v54, %v5582_v18 }
 0x527   : > { %v5586_v58 = vpop.f32.mrf.mxu0 }
 0x528   : > { %v5713_v45 = vpack.c.bf16 %v5671_v43, %v10227_v6  ;;  %v5495_v16 = vpop.f32.mrf.mxu3 }
 0x529   : > { %v5496_v37 = vadd.f32 %v5495_v16, %v5407_v4 }
 0x52a   : > { %5745 = vst [vmem:[%s9732_s9 + $0xc8] sm:$0xff] %v5713_v45 }
 0x52b   : > { %v5585_v32 = vadd.f32 %v5584_v34, %v5496_v37  ;;  %v5411_v36 = vpop.f32.mrf.mxu2  ;;  %v10233_v34 = vld [vmem:[#allocation41_spill] sm:$0xff] }
 0x52c   : > { %v5412_v9 = vadd.f32 %v5411_v36, %v9710_v25 }
 0x52d   : > { %v5673_v60 = vpop.f32.mrf.mxu1 }
 0x52e   : > { %v5674_v8 = vadd.f32 %v5673_v60, %v5585_v32 }
 0x52f   : > { %v5589_v26 = vpop.f32.mrf.mxu0 }
 0x530   : > { %v5714_v63 = vpack.c.bf16 %v5674_v8, %v10228_v5  ;;  %v5497_v2 = vpop.f32.mrf.mxu3 }
 0x531   : > { %v5498_v13 = vadd.f32 %v5497_v2, %v5409_v44 }
 0x532   : > { %5746 = vst [vmem:[%s9732_s9 + $0xd0] sm:$0xff] %v5714_v63 }
 0x533   : > { %v5587_v10 = vadd.f32 %v5586_v58, %v5498_v13  ;;  %v5413_v51 = vpop.f32.mrf.mxu2 }
 0x534   : > { %v5414_v0 = vadd.f32 %v5413_v51, %v9716_v17 }
 0x535   : > { %v5675_v15 = vpop.f32.mrf.mxu1 }
 0x536   : > { %v5676_v21 = vadd.f32 %v5675_v15, %v5587_v10 }
 0x537   : > { %v5591_v7 = vpop.f32.mrf.mxu0 }
 0x538   : > { %v5715_v3 = vpack.c.bf16 %v5676_v21, %v10229_v49  ;;  %v5500_v23 = vpop.f32.mrf.mxu3 }
 0x539   : > { %v5501_v53 = vadd.f32 %v5500_v23, %v5412_v9 }
 0x53a   : > { %5747 = vst [vmem:[%s9732_s9 + $0xd8] sm:$0xff] %v5715_v3 }
 0x53b   : > { %v5590_v61 = vadd.f32 %v5589_v26, %v5501_v53  ;;  %v5416_v62 = vpop.f32.mrf.mxu2 }
 0x53c   : > { %v5417_v27 = vadd.f32 %v5416_v62, %v9719_v55 }
 0x53d   : > { %v5678_v11 = vpop.f32.mrf.mxu1 }
 0x53e   : > { %v5679_v28 = vadd.f32 %v5678_v11, %v5590_v61 }
 0x53f   : > { %v5594_v57 = vpop.f32.mrf.mxu0 }
 0x540   : > { %v5716_v42 = vpack.c.bf16 %v5679_v28, %v10230_v31  ;;  %v5502_v59 = vpop.f32.mrf.mxu3 }
 0x541   : > { %v5503_v24 = vadd.f32 %v5502_v59, %v5414_v0 }
 0x542   : > { %5748 = vst [vmem:[%s9732_s9 + $0xe0] sm:$0xff] %v5716_v42 }
 0x543   : > { %v5592_v25 = vadd.f32 %v5591_v7, %v5503_v24  ;;  %v5418_v52 = vpop.f32.mrf.mxu2 }
 0x544   : > { %v5419_v40 = vadd.f32 %v5418_v52, %v9724_v29 }
 0x545   : > { %v5680_v35 = vpop.f32.mrf.mxu1 }
 0x546   : > { %v5681_v33 = vadd.f32 %v5680_v35, %v5592_v25 }
 0x547   : > { %v5596_v1 = vpop.f32.mrf.mxu0 }
 0x548   : > { %v5717_v48 = vpack.c.bf16 %v5681_v33, %v10231_v46  ;;  %v5505_v56 = vpop.f32.mrf.mxu3 }
 0x549   : > { %v5506_v17 = vadd.f32 %v5505_v56, %v5417_v27 }
 0x54a   : > { %5749 = vst [vmem:[%s9732_s9 + $0xe8] sm:$0xff] %v5717_v48 }
 0x54b   : > { %v5595_v12 = vadd.f32 %v5594_v57, %v5506_v17 }
 0x54d   : > { %v5683_v14 = vpop.f32.mrf.mxu1 }
 0x54e   : > { %v5684_v22 = vadd.f32 %v5683_v14, %v5595_v12 }
 0x550   : > { %v5718_v38 = vpack.c.bf16 %v5684_v22, %v10232_v41  ;;  %v5507_v30 = vpop.f32.mrf.mxu3 }
 0x551   : > { %v5508_v19 = vadd.f32 %v5507_v30, %v5419_v40 }
 0x552   : > { %5750 = vst [vmem:[%s9732_s9 + $0xf0] sm:$0xff] %v5718_v38 }
 0x553   : > { %v5597_v55 = vadd.f32 %v5596_v1, %v5508_v19 }
 0x555   : > { %v5685_v47 = vpop.f32.mrf.mxu1 }
 0x556   : > { %v5686_v20 = vadd.f32 %v5685_v47, %v5597_v55 }
 0x558   : > { %v5719_v50 = vpack.c.bf16 %v5686_v20, %v10233_v34 }
 0x55a   : > { %5751 = vst [vmem:[%s9732_s9 + $0xf8] sm:$0xff] %v5719_v50 }
 0x55b PF: > { %s13_s12 = sadd.s32 1, %s6936_s12  }
 0x55c   : > { %p10_p4 = scmp.ge.s32.totalorder %s13_s12, 4  }
 0x55e   :  { %12 = sbr.rel (!%p10_p4) target bundleno = 1 (0x1), region = 65 }

</bundles_post_ra>
